<compile_context>
chip_gen: v6e
topology: v6e:2x2x1
jax: 0.10.0
libtpu: 0.0.40
codegen_flags: <defaults>
</compile_context>

<pallas_src>
import functools

import jax
import jax.numpy as jnp
from jax import lax
from jax.experimental import pallas as pl
from jax.experimental.pallas import tpu as pltpu


# ---------------------------------------------------------------------------
# Kernel
# ---------------------------------------------------------------------------
def _layer_norm(y, g, b, eps=1e-5):
    mu = jnp.mean(y, axis=-1, keepdims=True)
    var = jnp.mean((y - mu) ** 2, axis=-1, keepdims=True)
    return (y - mu) * lax.rsqrt(var + eps) * g + b


def _transformer_kernel(num_heads, num_blocks,
                        x_ref, pos_ref, mask_ref,
                        wqkv_ref, bqkv_ref, wo_ref, bo_ref,
                        g1_ref, be1_ref, w1_ref, b1_ref,
                        w2_ref, b2_ref, g2_ref, be2_ref,
                        wout_ref, bout_ref,
                        out_ref,
                        qkv_scr, ctx_scr):
    """Whole decoder-only transformer (minus embedding gather) in one kernel."""
    B, S, E = x_ref.shape
    H = num_heads
    Dh = E // H
    HD = H * Dh
    BS = B * S
    L = num_blocks

    # Fused positional add; collapse (B, S) -> one (B*S, E) row slab.  f32.
    x = (x_ref[...] + pos_ref[...]).reshape(BS, E)
    # Host-precomputed block-diagonal causal mask: 0.0 allowed, -inf elsewhere.
    mask = mask_ref[...]

    # Fully unrolled layer loop: static weight slices, cross-layer scheduling.
    for l in range(L):
        # --- fused QKV projection: one (BS,E)@(E,3*H*Dh) MXU op -------------
        # 1/sqrt(Dh) is already folded into the Q columns of wqkv/bqkv.
        qkv_scr[...] = (jnp.dot(x.astype(jnp.bfloat16), wqkv_ref[l],
                                preferred_element_type=jnp.float32)
                        + bqkv_ref[l])

        # --- per-head attention (score matmuls are inherently per-head) -----
        for h in range(H):
            qh = qkv_scr[:, h * Dh:(h + 1) * Dh].astype(jnp.bfloat16)
            kh = qkv_scr[:, HD + h * Dh:HD + (h + 1) * Dh].astype(jnp.bfloat16)
            vh = qkv_scr[:, 2 * HD + h * Dh:2 * HD + (h + 1) * Dh].astype(jnp.bfloat16)

            s = lax.dot_general(qh, kh, (((1,), (1,)), ((), ())),
                                preferred_element_type=jnp.float32) + mask
            m = jnp.max(s, axis=-1, keepdims=True)
            e = jnp.exp(s - m)                                    # f32 softmax
            p = e * pl.reciprocal(jnp.sum(e, axis=-1, keepdims=True), approx=True)
            ctx_scr[:, h * Dh:(h + 1) * Dh] = jnp.dot(
                p.astype(jnp.bfloat16), vh, preferred_element_type=jnp.float32)

        # --- output projection: concat(heads) @ Wo as ONE matmul ------------
        attn = (jnp.dot(ctx_scr[...].astype(jnp.bfloat16), wo_ref[l],
                        preferred_element_type=jnp.float32) + bo_ref[l])
        x1 = _layer_norm(attn + x, g1_ref[l], be1_ref[l])

        # --- MLP --------------------------------------------------------------
        h1 = jnp.maximum(
            jnp.dot(x1.astype(jnp.bfloat16), w1_ref[l],
                    preferred_element_type=jnp.float32) + b1_ref[l], 0.0)
        x2 = (jnp.dot(h1.astype(jnp.bfloat16), w2_ref[l],
                      preferred_element_type=jnp.float32) + b2_ref[l])
        x = _layer_norm(x2 + x1, g2_ref[l], be2_ref[l])

    # --- output head: lane-dense padded-V (128-lane) store ---------------------
    out_ref[...] = (jnp.dot(x.astype(jnp.bfloat16), wout_ref[...],
                            preferred_element_type=jnp.float32) + bout_ref[...])


# ---------------------------------------------------------------------------
# Parameters (deterministic synthetic init) and forward pass
# ---------------------------------------------------------------------------
def init_params(key, vocab_size, embedding_size, seq_len, num_blocks=6, num_heads=4):
    E = embedding_size
    H = num_heads
    Dh = E // H
    HD = H * Dh
    H4 = 4 * E
    L = num_blocks
    V = vocab_size
    V_pad = max(128, ((V + 127) // 128) * 128)
    keys = iter(jax.random.split(key, 32))

    def w(shape, scale=0.02):
        return (scale * jax.random.normal(next(keys), shape)).astype(jnp.float32)

    # Per-head Q/K/V weights, fused into one (E, 3*H*Dh) matrix; 1/sqrt(Dh)
    # folded into the Q columns at init (host side, not a wrapper-time op).
    q_scale = 1.0 / (Dh ** 0.5)
    wq = w((L, H, E, Dh)) * q_scale
    bq = w((L, H, 1, Dh), 0.01) * q_scale
    wk, bk = w((L, H, E, Dh)), w((L, H, 1, Dh), 0.01)
    wv, bv = w((L, H, E, Dh)), w((L, H, 1, Dh), 0.01)

    def fuse_w(a):   # (L,H,E,Dh) -> (L,E,H*Dh), head-major columns
        return a.transpose(0, 2, 1, 3).reshape(L, E, HD)

    def fuse_b(a):   # (L,H,1,Dh) -> (L,1,H*Dh)
        return a.transpose(0, 2, 1, 3).reshape(L, 1, HD)

    w_qkv = jnp.concatenate([fuse_w(wq), fuse_w(wk), fuse_w(wv)],
                            axis=-1).astype(jnp.bfloat16)                 # (L,E,3HD)
    b_qkv = jnp.concatenate([fuse_b(bq), fuse_b(bk), fuse_b(bv)], axis=-1)  # f32

    w_o = w((L, H, Dh, E)).reshape(L, HD, E).astype(jnp.bfloat16)  # concat(heads)@Wo
    b_o = w((L, 1, E), 0.01)

    g1 = jnp.ones((L, 1, E), jnp.float32)
    be1 = jnp.zeros((L, 1, E), jnp.float32)
    w1 = w((L, E, H4)).astype(jnp.bfloat16)
    b1 = w((L, 1, H4), 0.01)
    w2 = w((L, H4, E)).astype(jnp.bfloat16)
    b2 = w((L, 1, E), 0.01)
    g2 = jnp.ones((L, 1, E), jnp.float32)
    be2 = jnp.zeros((L, 1, E), jnp.float32)

    blocks = (w_qkv, b_qkv, w_o, b_o, g1, be1, w1, b1, w2, b2, g2, be2)

    # Output head padded to a 128-lane multiple (zero columns) for a
    # lane-dense (unmasked) logits store; wrapper slices [:, :V].
    w_out = jnp.pad(w((E, V)), ((0, 0), (0, V_pad - V))).astype(jnp.bfloat16)
    b_out = jnp.pad(w((1, V), 0.01), ((0, 0), (0, V_pad - V)))

    # Positional encoding — reproduces the original torch code exactly (same
    # vector at every sequence position).
    half = E // 2
    idx = jnp.arange(half, dtype=jnp.float32)
    denom = jnp.power(10000.0, 2.0 * idx / E)
    pos = jnp.broadcast_to(idx / denom, (seq_len, half))
    pos_enc = jnp.concatenate([jnp.sin(pos), jnp.cos(pos)], axis=-1).astype(jnp.float32)

    return {
        "embedding": w((V, E)),
        "blocks": blocks,
        "w_out": w_out,
        "b_out": b_out,
        "pos_enc": pos_enc,
        "vocab_size": V,
    }


def _block_causal_mask(batch, seq):
    """(B*S, B*S) mask over flattened rows: 0.0 allowed, -inf elsewhere."""
    bs = batch * seq
    row = jnp.arange(bs)[:, None]
    col = jnp.arange(bs)[None, :]
    allowed = (row // seq == col // seq) & (col <= row)
    return jnp.where(allowed, 0.0, -jnp.inf).astype(jnp.float32)


def transformer_forward(token_ids, params, num_heads=4, num_blocks=6):
    B, S = token_ids.shape
    V = params["vocab_size"]
    E = params["embedding"].shape[1]
    V_pad = params["w_out"].shape[1]
    HD = E  # num_heads * head_dim == E

    # Embedding lookup (gather) stays in XLA; everything downstream runs in
    # one fused Pallas kernel.
    x = jnp.take(params["embedding"], token_ids, axis=0)          # (B, S, E) f32
    mask = _block_causal_mask(B, S)                                # (BS, BS) f32

    kernel = functools.partial(_transformer_kernel, num_heads, num_blocks)
    logits = pl.pallas_call(
        kernel,
        out_shape=jax.ShapeDtypeStruct((B * S, V_pad), jnp.float32),
        scratch_shapes=[
            pltpu.VMEM((B * S, 3 * HD), jnp.float32),   # fused qkv slab
            pltpu.VMEM((B * S, HD), jnp.float32),       # concat(heads) context
        ],
    )(x, params["pos_enc"], mask, *params["blocks"],
      params["w_out"], params["b_out"])

    # Drop the lane padding, (B*S,V) -> (B,S,V) -> (B,V,S) (torch transpose(1,2)).
    return logits[:, :V].reshape(B, S, V).transpose(0, 2, 1)


# ---------------------------------------------------------------------------
if __name__ == "__main__":
    B, S, E, V, HEADS, BLOCKS = 2, 8, 32, 64, 4, 6

    key = jax.random.PRNGKey(0)
    pkey, dkey = jax.random.split(key)
    params = init_params(pkey, vocab_size=V, embedding_size=E, seq_len=S,
                         num_blocks=BLOCKS, num_heads=HEADS)

    token_ids = jax.random.randint(dkey, (B, S), minval=0, maxval=V, dtype=jnp.int32)

    out = transformer_forward(token_ids, params, num_heads=HEADS, num_blocks=BLOCKS)
    out = jax.block_until_ready(out)

    assert out.shape == (B, V, S), out.shape
    assert bool(jnp.all(jnp.isfinite(out)))
    print("KERNEL_OK")
</pallas_src>

<mosaic_0001>
module attributes {stable_mosaic.version = 11 : i64} {
  func.func @_transformer_kernel(%arg0: memref<2x8x32xf32, #tpu.memory_space<vmem>>, %arg1: memref<8x32xf32, #tpu.memory_space<vmem>>, %arg2: memref<16x16xf32, #tpu.memory_space<vmem>>, %arg3: memref<6x32x96xbf16, #tpu.memory_space<vmem>>, %arg4: memref<6x1x96xf32, #tpu.memory_space<vmem>>, %arg5: memref<6x32x32xbf16, #tpu.memory_space<vmem>>, %arg6: memref<6x1x32xf32, #tpu.memory_space<vmem>>, %arg7: memref<6x1x32xf32, #tpu.memory_space<vmem>>, %arg8: memref<6x1x32xf32, #tpu.memory_space<vmem>>, %arg9: memref<6x32x128xbf16, #tpu.memory_space<vmem>>, %arg10: memref<6x1x128xf32, #tpu.memory_space<vmem>>, %arg11: memref<6x128x32xbf16, #tpu.memory_space<vmem>>, %arg12: memref<6x1x32xf32, #tpu.memory_space<vmem>>, %arg13: memref<6x1x32xf32, #tpu.memory_space<vmem>>, %arg14: memref<6x1x32xf32, #tpu.memory_space<vmem>>, %arg15: memref<32x128xbf16, #tpu.memory_space<vmem>>, %arg16: memref<1x128xf32, #tpu.memory_space<vmem>>, %arg17: memref<16x128xf32, #tpu.memory_space<vmem>>, %arg18: memref<16x96xf32, #tpu.memory_space<vmem>>, %arg19: memref<16x32xf32, #tpu.memory_space<vmem>>) attributes {dimension_semantics = [], scalar_prefetch = 0 : i64, scratch_operands = 2 : i64, tpu.core_type = #tpu.core_type<tc>} {
    %c0 = arith.constant 0 : index
    %c0_0 = arith.constant 0 : index
    %c0_1 = arith.constant 0 : index
    %0 = vector.load %arg0[%c0, %c0_0, %c0_1] : memref<2x8x32xf32, #tpu.memory_space<vmem>>, vector<2x8x32xf32>
    %c0_2 = arith.constant 0 : index
    %c0_3 = arith.constant 0 : index
    %1 = vector.load %arg1[%c0_2, %c0_3] : memref<8x32xf32, #tpu.memory_space<vmem>>, vector<8x32xf32>
    %2 = vector.shape_cast %1 : vector<8x32xf32> to vector<1x8x32xf32>
    %3 = vector.broadcast %2 : vector<1x8x32xf32> to vector<2x8x32xf32>
    %4 = arith.addf %0, %3 : vector<2x8x32xf32>
    %5 = vector.shape_cast %4 : vector<2x8x32xf32> to vector<16x32xf32>
    %c0_4 = arith.constant 0 : index
    %c0_5 = arith.constant 0 : index
    %6 = vector.load %arg2[%c0_4, %c0_5] : memref<16x16xf32, #tpu.memory_space<vmem>>, vector<16x16xf32>
    %7 = arith.truncf %5 : vector<16x32xf32> to vector<16x32xbf16>
    %c0_6 = arith.constant 0 : index
    %c0_7 = arith.constant 0 : index
    %c0_8 = arith.constant 0 : index
    %8 = vector.load %arg3[%c0_6, %c0_7, %c0_8] : memref<6x32x96xbf16, #tpu.memory_space<vmem>>, vector<1x32x96xbf16>
    %9 = vector.shape_cast %8 : vector<1x32x96xbf16> to vector<32x96xbf16>
    %cst = arith.constant dense<0.000000e+00> : vector<16x96xf32>
    %10 = tpu.matmul %7, %9, %cst {dimension_numbers = #tpu.dot_dimension_numbers<[1], [0], [0], [1], [0, 0, 1, 1], [], []>} : vector<16x32xbf16>, vector<32x96xbf16>, vector<16x96xf32> -> vector<16x96xf32>
    %c0_9 = arith.constant 0 : index
    %c0_10 = arith.constant 0 : index
    %c0_11 = arith.constant 0 : index
    %11 = vector.load %arg4[%c0_9, %c0_10, %c0_11] : memref<6x1x96xf32, #tpu.memory_space<vmem>>, vector<1x1x96xf32>
    %12 = vector.shape_cast %11 : vector<1x1x96xf32> to vector<1x96xf32>
    %13 = vector.broadcast %12 : vector<1x96xf32> to vector<16x96xf32>
    %14 = arith.addf %10, %13 : vector<16x96xf32>
    %c0_12 = arith.constant 0 : index
    %c0_13 = arith.constant 0 : index
    %15 = vector.load %arg18[%c0_12, %c0_13] : memref<16x96xf32, #tpu.memory_space<vmem>>, vector<16x96xf32>
    tpu.vector_store %arg18[%c0_12, %c0_13], %14 {strides = array<i32>} : memref<16x96xf32, #tpu.memory_space<vmem>>, vector<16x96xf32>,
    %c0_14 = arith.constant 0 : index
    %c0_15 = arith.constant 0 : index
    %16 = vector.load %arg18[%c0_14, %c0_15] : memref<16x96xf32, #tpu.memory_space<vmem>>, vector<16x8xf32>
    %17 = arith.truncf %16 : vector<16x8xf32> to vector<16x8xbf16>
    %c0_16 = arith.constant 0 : index
    %c32 = arith.constant 32 : index
    %18 = vector.load %arg18[%c0_16, %c32] : memref<16x96xf32, #tpu.memory_space<vmem>>, vector<16x8xf32>
    %19 = arith.truncf %18 : vector<16x8xf32> to vector<16x8xbf16>
    %c0_17 = arith.constant 0 : index
    %c64 = arith.constant 64 : index
    %20 = vector.load %arg18[%c0_17, %c64] : memref<16x96xf32, #tpu.memory_space<vmem>>, vector<16x8xf32>
    %21 = arith.truncf %20 : vector<16x8xf32> to vector<16x8xbf16>
    %cst_18 = arith.constant dense<0.000000e+00> : vector<16x16xf32>
    %22 = tpu.matmul %17, %19, %cst_18 {dimension_numbers = #tpu.dot_dimension_numbers<[1], [1], [0], [0], [0, 0, 1, 0], [], []>} : vector<16x8xbf16>, vector<16x8xbf16>, vector<16x16xf32> -> vector<16x16xf32>
    %23 = arith.addf %22, %6 : vector<16x16xf32>
    %cst_19 = arith.constant dense<0xFF800000> : vector<16xf32>
    %24 = vector.multi_reduction <maximumf>, %23, %cst_19 [1] : vector<16x16xf32> to vector<16xf32>
    %25 = vector.shape_cast %24 : vector<16xf32> to vector<16x1xf32>
    %26 = vector.broadcast %25 : vector<16x1xf32> to vector<16x16xf32>
    %27 = arith.subf %23, %26 : vector<16x16xf32>
    %28 = math.exp %27 : vector<16x16xf32>
    %cst_20 = arith.constant dense<0.000000e+00> : vector<16xf32>
    %29 = vector.multi_reduction <add>, %28, %cst_20 [1] : vector<16x16xf32> to vector<16xf32>
    %30 = vector.shape_cast %29 : vector<16xf32> to vector<16x1xf32>
    %31 = tpu.reciprocal %30 {approx = true} : vector<16x1xf32> -> vector<16x1xf32>
    %32 = vector.broadcast %31 : vector<16x1xf32> to vector<16x16xf32>
    %33 = arith.mulf %28, %32 : vector<16x16xf32>
    %34 = arith.truncf %33 : vector<16x16xf32> to vector<16x16xbf16>
    %cst_21 = arith.constant dense<0.000000e+00> : vector<16x8xf32>
    %35 = tpu.matmul %34, %21, %cst_21 {dimension_numbers = #tpu.dot_dimension_numbers<[1], [0], [0], [1], [0, 0, 1, 1], [], []>} : vector<16x16xbf16>, vector<16x8xbf16>, vector<16x8xf32> -> vector<16x8xf32>
    %c0_22 = arith.constant 0 : index
    %c0_23 = arith.constant 0 : index
    %36 = vector.load %arg19[%c0_22, %c0_23] : memref<16x32xf32, #tpu.memory_space<vmem>>, vector<16x8xf32>
    tpu.vector_store %arg19[%c0_22, %c0_23], %35 {strides = array<i32>} : memref<16x32xf32, #tpu.memory_space<vmem>>, vector<16x8xf32>,
    %c0_24 = arith.constant 0 : index
    %c8 = arith.constant 8 : index
    %37 = vector.load %arg18[%c0_24, %c8] : memref<16x96xf32, #tpu.memory_space<vmem>>, vector<16x8xf32>
    %38 = arith.truncf %37 : vector<16x8xf32> to vector<16x8xbf16>
    %c0_25 = arith.constant 0 : index
    %c40 = arith.constant 40 : index
    %39 = vector.load %arg18[%c0_25, %c40] : memref<16x96xf32, #tpu.memory_space<vmem>>, vector<16x8xf32>
    %40 = arith.truncf %39 : vector<16x8xf32> to vector<16x8xbf16>
    %c0_26 = arith.constant 0 : index
    %c72 = arith.constant 72 : index
    %41 = vector.load %arg18[%c0_26, %c72] : memref<16x96xf32, #tpu.memory_space<vmem>>, vector<16x8xf32>
    %42 = arith.truncf %41 : vector<16x8xf32> to vector<16x8xbf16>
    %cst_27 = arith.constant dense<0.000000e+00> : vector<16x16xf32>
    %43 = tpu.matmul %38, %40, %cst_27 {dimension_numbers = #tpu.dot_dimension_numbers<[1], [1], [0], [0], [0, 0, 1, 0], [], []>} : vector<16x8xbf16>, vector<16x8xbf16>, vector<16x16xf32> -> vector<16x16xf32>
    %44 = arith.addf %43, %6 : vector<16x16xf32>
    %cst_28 = arith.constant dense<0xFF800000> : vector<16xf32>
    %45 = vector.multi_reduction <maximumf>, %44, %cst_28 [1] : vector<16x16xf32> to vector<16xf32>
    %46 = vector.shape_cast %45 : vector<16xf32> to vector<16x1xf32>
    %47 = vector.broadcast %46 : vector<16x1xf32> to vector<16x16xf32>
    %48 = arith.subf %44, %47 : vector<16x16xf32>
    %49 = math.exp %48 : vector<16x16xf32>
    %cst_29 = arith.constant dense<0.000000e+00> : vector<16xf32>
    %50 = vector.multi_reduction <add>, %49, %cst_29 [1] : vector<16x16xf32> to vector<16xf32>
    %51 = vector.shape_cast %50 : vector<16xf32> to vector<16x1xf32>
    %52 = tpu.reciprocal %51 {approx = true} : vector<16x1xf32> -> vector<16x1xf32>
    %53 = vector.broadcast %52 : vector<16x1xf32> to vector<16x16xf32>
    %54 = arith.mulf %49, %53 : vector<16x16xf32>
    %55 = arith.truncf %54 : vector<16x16xf32> to vector<16x16xbf16>
    %cst_30 = arith.constant dense<0.000000e+00> : vector<16x8xf32>
    %56 = tpu.matmul %55, %42, %cst_30 {dimension_numbers = #tpu.dot_dimension_numbers<[1], [0], [0], [1], [0, 0, 1, 1], [], []>} : vector<16x16xbf16>, vector<16x8xbf16>, vector<16x8xf32> -> vector<16x8xf32>
    %c0_31 = arith.constant 0 : index
    %c8_32 = arith.constant 8 : index
    %57 = vector.load %arg19[%c0_31, %c8_32] : memref<16x32xf32, #tpu.memory_space<vmem>>, vector<16x8xf32>
    tpu.vector_store %arg19[%c0_31, %c8_32], %56 {strides = array<i32>} : memref<16x32xf32, #tpu.memory_space<vmem>>, vector<16x8xf32>,
    %c0_33 = arith.constant 0 : index
    %c16 = arith.constant 16 : index
    %58 = vector.load %arg18[%c0_33, %c16] : memref<16x96xf32, #tpu.memory_space<vmem>>, vector<16x8xf32>
    %59 = arith.truncf %58 : vector<16x8xf32> to vector<16x8xbf16>
    %c0_34 = arith.constant 0 : index
    %c48 = arith.constant 48 : index
    %60 = vector.load %arg18[%c0_34, %c48] : memref<16x96xf32, #tpu.memory_space<vmem>>, vector<16x8xf32>
    %61 = arith.truncf %60 : vector<16x8xf32> to vector<16x8xbf16>
    %c0_35 = arith.constant 0 : index
    %c80 = arith.constant 80 : index
    %62 = vector.load %arg18[%c0_35, %c80] : memref<16x96xf32, #tpu.memory_space<vmem>>, vector<16x8xf32>
    %63 = arith.truncf %62 : vector<16x8xf32> to vector<16x8xbf16>
    %cst_36 = arith.constant dense<0.000000e+00> : vector<16x16xf32>
    %64 = tpu.matmul %59, %61, %cst_36 {dimension_numbers = #tpu.dot_dimension_numbers<[1], [1], [0], [0], [0, 0, 1, 0], [], []>} : vector<16x8xbf16>, vector<16x8xbf16>, vector<16x16xf32> -> vector<16x16xf32>
    %65 = arith.addf %64, %6 : vector<16x16xf32>
    %cst_37 = arith.constant dense<0xFF800000> : vector<16xf32>
    %66 = vector.multi_reduction <maximumf>, %65, %cst_37 [1] : vector<16x16xf32> to vector<16xf32>
    %67 = vector.shape_cast %66 : vector<16xf32> to vector<16x1xf32>
    %68 = vector.broadcast %67 : vector<16x1xf32> to vector<16x16xf32>
    %69 = arith.subf %65, %68 : vector<16x16xf32>
    %70 = math.exp %69 : vector<16x16xf32>
    %cst_38 = arith.constant dense<0.000000e+00> : vector<16xf32>
    %71 = vector.multi_reduction <add>, %70, %cst_38 [1] : vector<16x16xf32> to vector<16xf32>
    %72 = vector.shape_cast %71 : vector<16xf32> to vector<16x1xf32>
    %73 = tpu.reciprocal %72 {approx = true} : vector<16x1xf32> -> vector<16x1xf32>
    %74 = vector.broadcast %73 : vector<16x1xf32> to vector<16x16xf32>
    %75 = arith.mulf %70, %74 : vector<16x16xf32>
    %76 = arith.truncf %75 : vector<16x16xf32> to vector<16x16xbf16>
    %cst_39 = arith.constant dense<0.000000e+00> : vector<16x8xf32>
    %77 = tpu.matmul %76, %63, %cst_39 {dimension_numbers = #tpu.dot_dimension_numbers<[1], [0], [0], [1], [0, 0, 1, 1], [], []>} : vector<16x16xbf16>, vector<16x8xbf16>, vector<16x8xf32> -> vector<16x8xf32>
    %c0_40 = arith.constant 0 : index
    %c16_41 = arith.constant 16 : index
    %78 = vector.load %arg19[%c0_40, %c16_41] : memref<16x32xf32, #tpu.memory_space<vmem>>, vector<16x8xf32>
    tpu.vector_store %arg19[%c0_40, %c16_41], %77 {strides = array<i32>} : memref<16x32xf32, #tpu.memory_space<vmem>>, vector<16x8xf32>,
    %c0_42 = arith.constant 0 : index
    %c24 = arith.constant 24 : index
    %79 = vector.load %arg18[%c0_42, %c24] : memref<16x96xf32, #tpu.memory_space<vmem>>, vector<16x8xf32>
    %80 = arith.truncf %79 : vector<16x8xf32> to vector<16x8xbf16>
    %c0_43 = arith.constant 0 : index
    %c56 = arith.constant 56 : index
    %81 = vector.load %arg18[%c0_43, %c56] : memref<16x96xf32, #tpu.memory_space<vmem>>, vector<16x8xf32>
    %82 = arith.truncf %81 : vector<16x8xf32> to vector<16x8xbf16>
    %c0_44 = arith.constant 0 : index
    %c88 = arith.constant 88 : index
    %83 = vector.load %arg18[%c0_44, %c88] : memref<16x96xf32, #tpu.memory_space<vmem>>, vector<16x8xf32>
    %84 = arith.truncf %83 : vector<16x8xf32> to vector<16x8xbf16>
    %cst_45 = arith.constant dense<0.000000e+00> : vector<16x16xf32>
    %85 = tpu.matmul %80, %82, %cst_45 {dimension_numbers = #tpu.dot_dimension_numbers<[1], [1], [0], [0], [0, 0, 1, 0], [], []>} : vector<16x8xbf16>, vector<16x8xbf16>, vector<16x16xf32> -> vector<16x16xf32>
    %86 = arith.addf %85, %6 : vector<16x16xf32>
    %cst_46 = arith.constant dense<0xFF800000> : vector<16xf32>
    %87 = vector.multi_reduction <maximumf>, %86, %cst_46 [1] : vector<16x16xf32> to vector<16xf32>
    %88 = vector.shape_cast %87 : vector<16xf32> to vector<16x1xf32>
    %89 = vector.broadcast %88 : vector<16x1xf32> to vector<16x16xf32>
    %90 = arith.subf %86, %89 : vector<16x16xf32>
    %91 = math.exp %90 : vector<16x16xf32>
    %cst_47 = arith.constant dense<0.000000e+00> : vector<16xf32>
    %92 = vector.multi_reduction <add>, %91, %cst_47 [1] : vector<16x16xf32> to vector<16xf32>
    %93 = vector.shape_cast %92 : vector<16xf32> to vector<16x1xf32>
    %94 = tpu.reciprocal %93 {approx = true} : vector<16x1xf32> -> vector<16x1xf32>
    %95 = vector.broadcast %94 : vector<16x1xf32> to vector<16x16xf32>
    %96 = arith.mulf %91, %95 : vector<16x16xf32>
    %97 = arith.truncf %96 : vector<16x16xf32> to vector<16x16xbf16>
    %cst_48 = arith.constant dense<0.000000e+00> : vector<16x8xf32>
    %98 = tpu.matmul %97, %84, %cst_48 {dimension_numbers = #tpu.dot_dimension_numbers<[1], [0], [0], [1], [0, 0, 1, 1], [], []>} : vector<16x16xbf16>, vector<16x8xbf16>, vector<16x8xf32> -> vector<16x8xf32>
    %c0_49 = arith.constant 0 : index
    %c24_50 = arith.constant 24 : index
    %99 = vector.load %arg19[%c0_49, %c24_50] : memref<16x32xf32, #tpu.memory_space<vmem>>, vector<16x8xf32>
    tpu.vector_store %arg19[%c0_49, %c24_50], %98 {strides = array<i32>} : memref<16x32xf32, #tpu.memory_space<vmem>>, vector<16x8xf32>,
    %c0_51 = arith.constant 0 : index
    %c0_52 = arith.constant 0 : index
    %100 = vector.load %arg19[%c0_51, %c0_52] : memref<16x32xf32, #tpu.memory_space<vmem>>, vector<16x32xf32>
    %101 = arith.truncf %100 : vector<16x32xf32> to vector<16x32xbf16>
    %c0_53 = arith.constant 0 : index
    %c0_54 = arith.constant 0 : index
    %c0_55 = arith.constant 0 : index
    %102 = vector.load %arg5[%c0_53, %c0_54, %c0_55] : memref<6x32x32xbf16, #tpu.memory_space<vmem>>, vector<1x32x32xbf16>
    %103 = vector.shape_cast %102 : vector<1x32x32xbf16> to vector<32x32xbf16>
    %cst_56 = arith.constant dense<0.000000e+00> : vector<16x32xf32>
    %104 = tpu.matmul %101, %103, %cst_56 {dimension_numbers = #tpu.dot_dimension_numbers<[1], [0], [0], [1], [0, 0, 1, 1], [], []>} : vector<16x32xbf16>, vector<32x32xbf16>, vector<16x32xf32> -> vector<16x32xf32>
    %c0_57 = arith.constant 0 : index
    %c0_58 = arith.constant 0 : index
    %c0_59 = arith.constant 0 : index
    %105 = vector.load %arg6[%c0_57, %c0_58, %c0_59] : memref<6x1x32xf32, #tpu.memory_space<vmem>>, vector<1x1x32xf32>
    %106 = vector.shape_cast %105 : vector<1x1x32xf32> to vector<1x32xf32>
    %107 = vector.broadcast %106 : vector<1x32xf32> to vector<16x32xf32>
    %108 = arith.addf %104, %107 : vector<16x32xf32>
    %109 = arith.addf %108, %5 : vector<16x32xf32>
    %c0_60 = arith.constant 0 : index
    %c0_61 = arith.constant 0 : index
    %c0_62 = arith.constant 0 : index
    %110 = vector.load %arg7[%c0_60, %c0_61, %c0_62] : memref<6x1x32xf32, #tpu.memory_space<vmem>>, vector<1x1x32xf32>
    %111 = vector.shape_cast %110 : vector<1x1x32xf32> to vector<1x32xf32>
    %c0_63 = arith.constant 0 : index
    %c0_64 = arith.constant 0 : index
    %c0_65 = arith.constant 0 : index
    %112 = vector.load %arg8[%c0_63, %c0_64, %c0_65] : memref<6x1x32xf32, #tpu.memory_space<vmem>>, vector<1x1x32xf32>
    %113 = vector.shape_cast %112 : vector<1x1x32xf32> to vector<1x32xf32>
    %cst_66 = arith.constant dense<0.000000e+00> : vector<16xf32>
    %114 = vector.multi_reduction <add>, %109, %cst_66 [1] : vector<16x32xf32> to vector<16xf32>
    %115 = vector.shape_cast %114 : vector<16xf32> to vector<16x1xf32>
    %cst_67 = arith.constant 3.200000e+01 : f32
    %116 = vector.broadcast %cst_67 : f32 to vector<16x1xf32>
    %117 = arith.divf %115, %116 : vector<16x1xf32>
    %118 = vector.broadcast %117 : vector<16x1xf32> to vector<16x32xf32>
    %119 = arith.subf %109, %118 : vector<16x32xf32>
    %120 = arith.mulf %119, %119 : vector<16x32xf32>
    %cst_68 = arith.constant dense<0.000000e+00> : vector<16xf32>
    %121 = vector.multi_reduction <add>, %120, %cst_68 [1] : vector<16x32xf32> to vector<16xf32>
    %122 = vector.shape_cast %121 : vector<16xf32> to vector<16x1xf32>
    %cst_69 = arith.constant 3.200000e+01 : f32
    %123 = vector.broadcast %cst_69 : f32 to vector<16x1xf32>
    %124 = arith.divf %122, %123 : vector<16x1xf32>
    %125 = vector.broadcast %117 : vector<16x1xf32> to vector<16x32xf32>
    %126 = arith.subf %109, %125 : vector<16x32xf32>
    %cst_70 = arith.constant 9.99999974E-6 : f32
    %127 = vector.broadcast %cst_70 : f32 to vector<16x1xf32>
    %128 = arith.addf %124, %127 : vector<16x1xf32>
    %129 = math.rsqrt %128 : vector<16x1xf32>
    %130 = vector.broadcast %129 : vector<16x1xf32> to vector<16x32xf32>
    %131 = arith.mulf %126, %130 : vector<16x32xf32>
    %132 = vector.broadcast %111 : vector<1x32xf32> to vector<16x32xf32>
    %133 = arith.mulf %131, %132 : vector<16x32xf32>
    %134 = vector.broadcast %113 : vector<1x32xf32> to vector<16x32xf32>
    %135 = arith.addf %133, %134 : vector<16x32xf32>
    %136 = arith.truncf %135 : vector<16x32xf32> to vector<16x32xbf16>
    %c0_71 = arith.constant 0 : index
    %c0_72 = arith.constant 0 : index
    %c0_73 = arith.constant 0 : index
    %137 = vector.load %arg9[%c0_71, %c0_72, %c0_73] : memref<6x32x128xbf16, #tpu.memory_space<vmem>>, vector<1x32x128xbf16>
    %138 = vector.shape_cast %137 : vector<1x32x128xbf16> to vector<32x128xbf16>
    %cst_74 = arith.constant dense<0.000000e+00> : vector<16x128xf32>
    %139 = tpu.matmul %136, %138, %cst_74 {dimension_numbers = #tpu.dot_dimension_numbers<[1], [0], [0], [1], [0, 0, 1, 1], [], []>} : vector<16x32xbf16>, vector<32x128xbf16>, vector<16x128xf32> -> vector<16x128xf32>
    %c0_75 = arith.constant 0 : index
    %c0_76 = arith.constant 0 : index
    %c0_77 = arith.constant 0 : index
    %140 = vector.load %arg10[%c0_75, %c0_76, %c0_77] : memref<6x1x128xf32, #tpu.memory_space<vmem>>, vector<1x1x128xf32>
    %141 = vector.shape_cast %140 : vector<1x1x128xf32> to vector<1x128xf32>
    %142 = vector.broadcast %141 : vector<1x128xf32> to vector<16x128xf32>
    %143 = arith.addf %139, %142 : vector<16x128xf32>
    %cst_78 = arith.constant 0.000000e+00 : f32
    %144 = vector.broadcast %cst_78 : f32 to vector<16x128xf32>
    %145 = arith.maximumf %143, %144 : vector<16x128xf32>
    %146 = arith.truncf %145 : vector<16x128xf32> to vector<16x128xbf16>
    %c0_79 = arith.constant 0 : index
    %c0_80 = arith.constant 0 : index
    %c0_81 = arith.constant 0 : index
    %147 = vector.load %arg11[%c0_79, %c0_80, %c0_81] : memref<6x128x32xbf16, #tpu.memory_space<vmem>>, vector<1x128x32xbf16>
    %148 = vector.shape_cast %147 : vector<1x128x32xbf16> to vector<128x32xbf16>
    %cst_82 = arith.constant dense<0.000000e+00> : vector<16x32xf32>
    %149 = tpu.matmul %146, %148, %cst_82 {dimension_numbers = #tpu.dot_dimension_numbers<[1], [0], [0], [1], [0, 0, 1, 1], [], []>} : vector<16x128xbf16>, vector<128x32xbf16>, vector<16x32xf32> -> vector<16x32xf32>
    %c0_83 = arith.constant 0 : index
    %c0_84 = arith.constant 0 : index
    %c0_85 = arith.constant 0 : index
    %150 = vector.load %arg12[%c0_83, %c0_84, %c0_85] : memref<6x1x32xf32, #tpu.memory_space<vmem>>, vector<1x1x32xf32>
    %151 = vector.shape_cast %150 : vector<1x1x32xf32> to vector<1x32xf32>
    %152 = vector.broadcast %151 : vector<1x32xf32> to vector<16x32xf32>
    %153 = arith.addf %149, %152 : vector<16x32xf32>
    %154 = arith.addf %153, %135 : vector<16x32xf32>
    %c0_86 = arith.constant 0 : index
    %c0_87 = arith.constant 0 : index
    %c0_88 = arith.constant 0 : index
    %155 = vector.load %arg13[%c0_86, %c0_87, %c0_88] : memref<6x1x32xf32, #tpu.memory_space<vmem>>, vector<1x1x32xf32>
    %156 = vector.shape_cast %155 : vector<1x1x32xf32> to vector<1x32xf32>
    %c0_89 = arith.constant 0 : index
    %c0_90 = arith.constant 0 : index
    %c0_91 = arith.constant 0 : index
    %157 = vector.load %arg14[%c0_89, %c0_90, %c0_91] : memref<6x1x32xf32, #tpu.memory_space<vmem>>, vector<1x1x32xf32>
    %158 = vector.shape_cast %157 : vector<1x1x32xf32> to vector<1x32xf32>
    %cst_92 = arith.constant dense<0.000000e+00> : vector<16xf32>
    %159 = vector.multi_reduction <add>, %154, %cst_92 [1] : vector<16x32xf32> to vector<16xf32>
    %160 = vector.shape_cast %159 : vector<16xf32> to vector<16x1xf32>
    %cst_93 = arith.constant 3.200000e+01 : f32
    %161 = vector.broadcast %cst_93 : f32 to vector<16x1xf32>
    %162 = arith.divf %160, %161 : vector<16x1xf32>
    %163 = vector.broadcast %162 : vector<16x1xf32> to vector<16x32xf32>
    %164 = arith.subf %154, %163 : vector<16x32xf32>
    %165 = arith.mulf %164, %164 : vector<16x32xf32>
    %cst_94 = arith.constant dense<0.000000e+00> : vector<16xf32>
    %166 = vector.multi_reduction <add>, %165, %cst_94 [1] : vector<16x32xf32> to vector<16xf32>
    %167 = vector.shape_cast %166 : vector<16xf32> to vector<16x1xf32>
    %cst_95 = arith.constant 3.200000e+01 : f32
    %168 = vector.broadcast %cst_95 : f32 to vector<16x1xf32>
    %169 = arith.divf %167, %168 : vector<16x1xf32>
    %170 = vector.broadcast %162 : vector<16x1xf32> to vector<16x32xf32>
    %171 = arith.subf %154, %170 : vector<16x32xf32>
    %cst_96 = arith.constant 9.99999974E-6 : f32
    %172 = vector.broadcast %cst_96 : f32 to vector<16x1xf32>
    %173 = arith.addf %169, %172 : vector<16x1xf32>
    %174 = math.rsqrt %173 : vector<16x1xf32>
    %175 = vector.broadcast %174 : vector<16x1xf32> to vector<16x32xf32>
    %176 = arith.mulf %171, %175 : vector<16x32xf32>
    %177 = vector.broadcast %156 : vector<1x32xf32> to vector<16x32xf32>
    %178 = arith.mulf %176, %177 : vector<16x32xf32>
    %179 = vector.broadcast %158 : vector<1x32xf32> to vector<16x32xf32>
    %180 = arith.addf %178, %179 : vector<16x32xf32>
    %181 = arith.truncf %180 : vector<16x32xf32> to vector<16x32xbf16>
    %c1 = arith.constant 1 : index
    %c0_97 = arith.constant 0 : index
    %c0_98 = arith.constant 0 : index
    %182 = vector.load %arg3[%c1, %c0_97, %c0_98] : memref<6x32x96xbf16, #tpu.memory_space<vmem>>, vector<1x32x96xbf16>
    %183 = vector.shape_cast %182 : vector<1x32x96xbf16> to vector<32x96xbf16>
    %cst_99 = arith.constant dense<0.000000e+00> : vector<16x96xf32>
    %184 = tpu.matmul %181, %183, %cst_99 {dimension_numbers = #tpu.dot_dimension_numbers<[1], [0], [0], [1], [0, 0, 1, 1], [], []>} : vector<16x32xbf16>, vector<32x96xbf16>, vector<16x96xf32> -> vector<16x96xf32>
    %c1_100 = arith.constant 1 : index
    %c0_101 = arith.constant 0 : index
    %c0_102 = arith.constant 0 : index
    %185 = vector.load %arg4[%c1_100, %c0_101, %c0_102] : memref<6x1x96xf32, #tpu.memory_space<vmem>>, vector<1x1x96xf32>
    %186 = vector.shape_cast %185 : vector<1x1x96xf32> to vector<1x96xf32>
    %187 = vector.broadcast %186 : vector<1x96xf32> to vector<16x96xf32>
    %188 = arith.addf %184, %187 : vector<16x96xf32>
    %c0_103 = arith.constant 0 : index
    %c0_104 = arith.constant 0 : index
    %189 = vector.load %arg18[%c0_103, %c0_104] : memref<16x96xf32, #tpu.memory_space<vmem>>, vector<16x96xf32>
    tpu.vector_store %arg18[%c0_103, %c0_104], %188 {strides = array<i32>} : memref<16x96xf32, #tpu.memory_space<vmem>>, vector<16x96xf32>,
    %c0_105 = arith.constant 0 : index
    %c0_106 = arith.constant 0 : index
    %190 = vector.load %arg18[%c0_105, %c0_106] : memref<16x96xf32, #tpu.memory_space<vmem>>, vector<16x8xf32>
    %191 = arith.truncf %190 : vector<16x8xf32> to vector<16x8xbf16>
    %c0_107 = arith.constant 0 : index
    %c32_108 = arith.constant 32 : index
    %192 = vector.load %arg18[%c0_107, %c32_108] : memref<16x96xf32, #tpu.memory_space<vmem>>, vector<16x8xf32>
    %193 = arith.truncf %192 : vector<16x8xf32> to vector<16x8xbf16>
    %c0_109 = arith.constant 0 : index
    %c64_110 = arith.constant 64 : index
    %194 = vector.load %arg18[%c0_109, %c64_110] : memref<16x96xf32, #tpu.memory_space<vmem>>, vector<16x8xf32>
    %195 = arith.truncf %194 : vector<16x8xf32> to vector<16x8xbf16>
    %cst_111 = arith.constant dense<0.000000e+00> : vector<16x16xf32>
    %196 = tpu.matmul %191, %193, %cst_111 {dimension_numbers = #tpu.dot_dimension_numbers<[1], [1], [0], [0], [0, 0, 1, 0], [], []>} : vector<16x8xbf16>, vector<16x8xbf16>, vector<16x16xf32> -> vector<16x16xf32>
    %197 = arith.addf %196, %6 : vector<16x16xf32>
    %cst_112 = arith.constant dense<0xFF800000> : vector<16xf32>
    %198 = vector.multi_reduction <maximumf>, %197, %cst_112 [1] : vector<16x16xf32> to vector<16xf32>
    %199 = vector.shape_cast %198 : vector<16xf32> to vector<16x1xf32>
    %200 = vector.broadcast %199 : vector<16x1xf32> to vector<16x16xf32>
    %201 = arith.subf %197, %200 : vector<16x16xf32>
    %202 = math.exp %201 : vector<16x16xf32>
    %cst_113 = arith.constant dense<0.000000e+00> : vector<16xf32>
    %203 = vector.multi_reduction <add>, %202, %cst_113 [1] : vector<16x16xf32> to vector<16xf32>
    %204 = vector.shape_cast %203 : vector<16xf32> to vector<16x1xf32>
    %205 = tpu.reciprocal %204 {approx = true} : vector<16x1xf32> -> vector<16x1xf32>
    %206 = vector.broadcast %205 : vector<16x1xf32> to vector<16x16xf32>
    %207 = arith.mulf %202, %206 : vector<16x16xf32>
    %208 = arith.truncf %207 : vector<16x16xf32> to vector<16x16xbf16>
    %cst_114 = arith.constant dense<0.000000e+00> : vector<16x8xf32>
    %209 = tpu.matmul %208, %195, %cst_114 {dimension_numbers = #tpu.dot_dimension_numbers<[1], [0], [0], [1], [0, 0, 1, 1], [], []>} : vector<16x16xbf16>, vector<16x8xbf16>, vector<16x8xf32> -> vector<16x8xf32>
    %c0_115 = arith.constant 0 : index
    %c0_116 = arith.constant 0 : index
    %210 = vector.load %arg19[%c0_115, %c0_116] : memref<16x32xf32, #tpu.memory_space<vmem>>, vector<16x8xf32>
    tpu.vector_store %arg19[%c0_115, %c0_116], %209 {strides = array<i32>} : memref<16x32xf32, #tpu.memory_space<vmem>>, vector<16x8xf32>,
    %c0_117 = arith.constant 0 : index
    %c8_118 = arith.constant 8 : index
    %211 = vector.load %arg18[%c0_117, %c8_118] : memref<16x96xf32, #tpu.memory_space<vmem>>, vector<16x8xf32>
    %212 = arith.truncf %211 : vector<16x8xf32> to vector<16x8xbf16>
    %c0_119 = arith.constant 0 : index
    %c40_120 = arith.constant 40 : index
    %213 = vector.load %arg18[%c0_119, %c40_120] : memref<16x96xf32, #tpu.memory_space<vmem>>, vector<16x8xf32>
    %214 = arith.truncf %213 : vector<16x8xf32> to vector<16x8xbf16>
    %c0_121 = arith.constant 0 : index
    %c72_122 = arith.constant 72 : index
    %215 = vector.load %arg18[%c0_121, %c72_122] : memref<16x96xf32, #tpu.memory_space<vmem>>, vector<16x8xf32>
    %216 = arith.truncf %215 : vector<16x8xf32> to vector<16x8xbf16>
    %cst_123 = arith.constant dense<0.000000e+00> : vector<16x16xf32>
    %217 = tpu.matmul %212, %214, %cst_123 {dimension_numbers = #tpu.dot_dimension_numbers<[1], [1], [0], [0], [0, 0, 1, 0], [], []>} : vector<16x8xbf16>, vector<16x8xbf16>, vector<16x16xf32> -> vector<16x16xf32>
    %218 = arith.addf %217, %6 : vector<16x16xf32>
    %cst_124 = arith.constant dense<0xFF800000> : vector<16xf32>
    %219 = vector.multi_reduction <maximumf>, %218, %cst_124 [1] : vector<16x16xf32> to vector<16xf32>
    %220 = vector.shape_cast %219 : vector<16xf32> to vector<16x1xf32>
    %221 = vector.broadcast %220 : vector<16x1xf32> to vector<16x16xf32>
    %222 = arith.subf %218, %221 : vector<16x16xf32>
    %223 = math.exp %222 : vector<16x16xf32>
    %cst_125 = arith.constant dense<0.000000e+00> : vector<16xf32>
    %224 = vector.multi_reduction <add>, %223, %cst_125 [1] : vector<16x16xf32> to vector<16xf32>
    %225 = vector.shape_cast %224 : vector<16xf32> to vector<16x1xf32>
    %226 = tpu.reciprocal %225 {approx = true} : vector<16x1xf32> -> vector<16x1xf32>
    %227 = vector.broadcast %226 : vector<16x1xf32> to vector<16x16xf32>
    %228 = arith.mulf %223, %227 : vector<16x16xf32>
    %229 = arith.truncf %228 : vector<16x16xf32> to vector<16x16xbf16>
    %cst_126 = arith.constant dense<0.000000e+00> : vector<16x8xf32>
    %230 = tpu.matmul %229, %216, %cst_126 {dimension_numbers = #tpu.dot_dimension_numbers<[1], [0], [0], [1], [0, 0, 1, 1], [], []>} : vector<16x16xbf16>, vector<16x8xbf16>, vector<16x8xf32> -> vector<16x8xf32>
    %c0_127 = arith.constant 0 : index
    %c8_128 = arith.constant 8 : index
    %231 = vector.load %arg19[%c0_127, %c8_128] : memref<16x32xf32, #tpu.memory_space<vmem>>, vector<16x8xf32>
    tpu.vector_store %arg19[%c0_127, %c8_128], %230 {strides = array<i32>} : memref<16x32xf32, #tpu.memory_space<vmem>>, vector<16x8xf32>,
    %c0_129 = arith.constant 0 : index
    %c16_130 = arith.constant 16 : index
    %232 = vector.load %arg18[%c0_129, %c16_130] : memref<16x96xf32, #tpu.memory_space<vmem>>, vector<16x8xf32>
    %233 = arith.truncf %232 : vector<16x8xf32> to vector<16x8xbf16>
    %c0_131 = arith.constant 0 : index
    %c48_132 = arith.constant 48 : index
    %234 = vector.load %arg18[%c0_131, %c48_132] : memref<16x96xf32, #tpu.memory_space<vmem>>, vector<16x8xf32>
    %235 = arith.truncf %234 : vector<16x8xf32> to vector<16x8xbf16>
    %c0_133 = arith.constant 0 : index
    %c80_134 = arith.constant 80 : index
    %236 = vector.load %arg18[%c0_133, %c80_134] : memref<16x96xf32, #tpu.memory_space<vmem>>, vector<16x8xf32>
    %237 = arith.truncf %236 : vector<16x8xf32> to vector<16x8xbf16>
    %cst_135 = arith.constant dense<0.000000e+00> : vector<16x16xf32>
    %238 = tpu.matmul %233, %235, %cst_135 {dimension_numbers = #tpu.dot_dimension_numbers<[1], [1], [0], [0], [0, 0, 1, 0], [], []>} : vector<16x8xbf16>, vector<16x8xbf16>, vector<16x16xf32> -> vector<16x16xf32>
    %239 = arith.addf %238, %6 : vector<16x16xf32>
    %cst_136 = arith.constant dense<0xFF800000> : vector<16xf32>
    %240 = vector.multi_reduction <maximumf>, %239, %cst_136 [1] : vector<16x16xf32> to vector<16xf32>
    %241 = vector.shape_cast %240 : vector<16xf32> to vector<16x1xf32>
    %242 = vector.broadcast %241 : vector<16x1xf32> to vector<16x16xf32>
    %243 = arith.subf %239, %242 : vector<16x16xf32>
    %244 = math.exp %243 : vector<16x16xf32>
    %cst_137 = arith.constant dense<0.000000e+00> : vector<16xf32>
    %245 = vector.multi_reduction <add>, %244, %cst_137 [1] : vector<16x16xf32> to vector<16xf32>
    %246 = vector.shape_cast %245 : vector<16xf32> to vector<16x1xf32>
    %247 = tpu.reciprocal %246 {approx = true} : vector<16x1xf32> -> vector<16x1xf32>
    %248 = vector.broadcast %247 : vector<16x1xf32> to vector<16x16xf32>
    %249 = arith.mulf %244, %248 : vector<16x16xf32>
    %250 = arith.truncf %249 : vector<16x16xf32> to vector<16x16xbf16>
    %cst_138 = arith.constant dense<0.000000e+00> : vector<16x8xf32>
    %251 = tpu.matmul %250, %237, %cst_138 {dimension_numbers = #tpu.dot_dimension_numbers<[1], [0], [0], [1], [0, 0, 1, 1], [], []>} : vector<16x16xbf16>, vector<16x8xbf16>, vector<16x8xf32> -> vector<16x8xf32>
    %c0_139 = arith.constant 0 : index
    %c16_140 = arith.constant 16 : index
    %252 = vector.load %arg19[%c0_139, %c16_140] : memref<16x32xf32, #tpu.memory_space<vmem>>, vector<16x8xf32>
    tpu.vector_store %arg19[%c0_139, %c16_140], %251 {strides = array<i32>} : memref<16x32xf32, #tpu.memory_space<vmem>>, vector<16x8xf32>,
    %c0_141 = arith.constant 0 : index
    %c24_142 = arith.constant 24 : index
    %253 = vector.load %arg18[%c0_141, %c24_142] : memref<16x96xf32, #tpu.memory_space<vmem>>, vector<16x8xf32>
    %254 = arith.truncf %253 : vector<16x8xf32> to vector<16x8xbf16>
    %c0_143 = arith.constant 0 : index
    %c56_144 = arith.constant 56 : index
    %255 = vector.load %arg18[%c0_143, %c56_144] : memref<16x96xf32, #tpu.memory_space<vmem>>, vector<16x8xf32>
    %256 = arith.truncf %255 : vector<16x8xf32> to vector<16x8xbf16>
    %c0_145 = arith.constant 0 : index
    %c88_146 = arith.constant 88 : index
    %257 = vector.load %arg18[%c0_145, %c88_146] : memref<16x96xf32, #tpu.memory_space<vmem>>, vector<16x8xf32>
    %258 = arith.truncf %257 : vector<16x8xf32> to vector<16x8xbf16>
    %cst_147 = arith.constant dense<0.000000e+00> : vector<16x16xf32>
    %259 = tpu.matmul %254, %256, %cst_147 {dimension_numbers = #tpu.dot_dimension_numbers<[1], [1], [0], [0], [0, 0, 1, 0], [], []>} : vector<16x8xbf16>, vector<16x8xbf16>, vector<16x16xf32> -> vector<16x16xf32>
    %260 = arith.addf %259, %6 : vector<16x16xf32>
    %cst_148 = arith.constant dense<0xFF800000> : vector<16xf32>
    %261 = vector.multi_reduction <maximumf>, %260, %cst_148 [1] : vector<16x16xf32> to vector<16xf32>
    %262 = vector.shape_cast %261 : vector<16xf32> to vector<16x1xf32>
    %263 = vector.broadcast %262 : vector<16x1xf32> to vector<16x16xf32>
    %264 = arith.subf %260, %263 : vector<16x16xf32>
    %265 = math.exp %264 : vector<16x16xf32>
    %cst_149 = arith.constant dense<0.000000e+00> : vector<16xf32>
    %266 = vector.multi_reduction <add>, %265, %cst_149 [1] : vector<16x16xf32> to vector<16xf32>
    %267 = vector.shape_cast %266 : vector<16xf32> to vector<16x1xf32>
    %268 = tpu.reciprocal %267 {approx = true} : vector<16x1xf32> -> vector<16x1xf32>
    %269 = vector.broadcast %268 : vector<16x1xf32> to vector<16x16xf32>
    %270 = arith.mulf %265, %269 : vector<16x16xf32>
    %271 = arith.truncf %270 : vector<16x16xf32> to vector<16x16xbf16>
    %cst_150 = arith.constant dense<0.000000e+00> : vector<16x8xf32>
    %272 = tpu.matmul %271, %258, %cst_150 {dimension_numbers = #tpu.dot_dimension_numbers<[1], [0], [0], [1], [0, 0, 1, 1], [], []>} : vector<16x16xbf16>, vector<16x8xbf16>, vector<16x8xf32> -> vector<16x8xf32>
    %c0_151 = arith.constant 0 : index
    %c24_152 = arith.constant 24 : index
    %273 = vector.load %arg19[%c0_151, %c24_152] : memref<16x32xf32, #tpu.memory_space<vmem>>, vector<16x8xf32>
    tpu.vector_store %arg19[%c0_151, %c24_152], %272 {strides = array<i32>} : memref<16x32xf32, #tpu.memory_space<vmem>>, vector<16x8xf32>,
    %c0_153 = arith.constant 0 : index
    %c0_154 = arith.constant 0 : index
    %274 = vector.load %arg19[%c0_153, %c0_154] : memref<16x32xf32, #tpu.memory_space<vmem>>, vector<16x32xf32>
    %275 = arith.truncf %274 : vector<16x32xf32> to vector<16x32xbf16>
    %c1_155 = arith.constant 1 : index
    %c0_156 = arith.constant 0 : index
    %c0_157 = arith.constant 0 : index
    %276 = vector.load %arg5[%c1_155, %c0_156, %c0_157] : memref<6x32x32xbf16, #tpu.memory_space<vmem>>, vector<1x32x32xbf16>
    %277 = vector.shape_cast %276 : vector<1x32x32xbf16> to vector<32x32xbf16>
    %cst_158 = arith.constant dense<0.000000e+00> : vector<16x32xf32>
    %278 = tpu.matmul %275, %277, %cst_158 {dimension_numbers = #tpu.dot_dimension_numbers<[1], [0], [0], [1], [0, 0, 1, 1], [], []>} : vector<16x32xbf16>, vector<32x32xbf16>, vector<16x32xf32> -> vector<16x32xf32>
    %c1_159 = arith.constant 1 : index
    %c0_160 = arith.constant 0 : index
    %c0_161 = arith.constant 0 : index
    %279 = vector.load %arg6[%c1_159, %c0_160, %c0_161] : memref<6x1x32xf32, #tpu.memory_space<vmem>>, vector<1x1x32xf32>
    %280 = vector.shape_cast %279 : vector<1x1x32xf32> to vector<1x32xf32>
    %281 = vector.broadcast %280 : vector<1x32xf32> to vector<16x32xf32>
    %282 = arith.addf %278, %281 : vector<16x32xf32>
    %283 = arith.addf %282, %180 : vector<16x32xf32>
    %c1_162 = arith.constant 1 : index
    %c0_163 = arith.constant 0 : index
    %c0_164 = arith.constant 0 : index
    %284 = vector.load %arg7[%c1_162, %c0_163, %c0_164] : memref<6x1x32xf32, #tpu.memory_space<vmem>>, vector<1x1x32xf32>
    %285 = vector.shape_cast %284 : vector<1x1x32xf32> to vector<1x32xf32>
    %c1_165 = arith.constant 1 : index
    %c0_166 = arith.constant 0 : index
    %c0_167 = arith.constant 0 : index
    %286 = vector.load %arg8[%c1_165, %c0_166, %c0_167] : memref<6x1x32xf32, #tpu.memory_space<vmem>>, vector<1x1x32xf32>
    %287 = vector.shape_cast %286 : vector<1x1x32xf32> to vector<1x32xf32>
    %cst_168 = arith.constant dense<0.000000e+00> : vector<16xf32>
    %288 = vector.multi_reduction <add>, %283, %cst_168 [1] : vector<16x32xf32> to vector<16xf32>
    %289 = vector.shape_cast %288 : vector<16xf32> to vector<16x1xf32>
    %cst_169 = arith.constant 3.200000e+01 : f32
    %290 = vector.broadcast %cst_169 : f32 to vector<16x1xf32>
    %291 = arith.divf %289, %290 : vector<16x1xf32>
    %292 = vector.broadcast %291 : vector<16x1xf32> to vector<16x32xf32>
    %293 = arith.subf %283, %292 : vector<16x32xf32>
    %294 = arith.mulf %293, %293 : vector<16x32xf32>
    %cst_170 = arith.constant dense<0.000000e+00> : vector<16xf32>
    %295 = vector.multi_reduction <add>, %294, %cst_170 [1] : vector<16x32xf32> to vector<16xf32>
    %296 = vector.shape_cast %295 : vector<16xf32> to vector<16x1xf32>
    %cst_171 = arith.constant 3.200000e+01 : f32
    %297 = vector.broadcast %cst_171 : f32 to vector<16x1xf32>
    %298 = arith.divf %296, %297 : vector<16x1xf32>
    %299 = vector.broadcast %291 : vector<16x1xf32> to vector<16x32xf32>
    %300 = arith.subf %283, %299 : vector<16x32xf32>
    %cst_172 = arith.constant 9.99999974E-6 : f32
    %301 = vector.broadcast %cst_172 : f32 to vector<16x1xf32>
    %302 = arith.addf %298, %301 : vector<16x1xf32>
    %303 = math.rsqrt %302 : vector<16x1xf32>
    %304 = vector.broadcast %303 : vector<16x1xf32> to vector<16x32xf32>
    %305 = arith.mulf %300, %304 : vector<16x32xf32>
    %306 = vector.broadcast %285 : vector<1x32xf32> to vector<16x32xf32>
    %307 = arith.mulf %305, %306 : vector<16x32xf32>
    %308 = vector.broadcast %287 : vector<1x32xf32> to vector<16x32xf32>
    %309 = arith.addf %307, %308 : vector<16x32xf32>
    %310 = arith.truncf %309 : vector<16x32xf32> to vector<16x32xbf16>
    %c1_173 = arith.constant 1 : index
    %c0_174 = arith.constant 0 : index
    %c0_175 = arith.constant 0 : index
    %311 = vector.load %arg9[%c1_173, %c0_174, %c0_175] : memref<6x32x128xbf16, #tpu.memory_space<vmem>>, vector<1x32x128xbf16>
    %312 = vector.shape_cast %311 : vector<1x32x128xbf16> to vector<32x128xbf16>
    %cst_176 = arith.constant dense<0.000000e+00> : vector<16x128xf32>
    %313 = tpu.matmul %310, %312, %cst_176 {dimension_numbers = #tpu.dot_dimension_numbers<[1], [0], [0], [1], [0, 0, 1, 1], [], []>} : vector<16x32xbf16>, vector<32x128xbf16>, vector<16x128xf32> -> vector<16x128xf32>
    %c1_177 = arith.constant 1 : index
    %c0_178 = arith.constant 0 : index
    %c0_179 = arith.constant 0 : index
    %314 = vector.load %arg10[%c1_177, %c0_178, %c0_179] : memref<6x1x128xf32, #tpu.memory_space<vmem>>, vector<1x1x128xf32>
    %315 = vector.shape_cast %314 : vector<1x1x128xf32> to vector<1x128xf32>
    %316 = vector.broadcast %315 : vector<1x128xf32> to vector<16x128xf32>
    %317 = arith.addf %313, %316 : vector<16x128xf32>
    %cst_180 = arith.constant 0.000000e+00 : f32
    %318 = vector.broadcast %cst_180 : f32 to vector<16x128xf32>
    %319 = arith.maximumf %317, %318 : vector<16x128xf32>
    %320 = arith.truncf %319 : vector<16x128xf32> to vector<16x128xbf16>
    %c1_181 = arith.constant 1 : index
    %c0_182 = arith.constant 0 : index
    %c0_183 = arith.constant 0 : index
    %321 = vector.load %arg11[%c1_181, %c0_182, %c0_183] : memref<6x128x32xbf16, #tpu.memory_space<vmem>>, vector<1x128x32xbf16>
    %322 = vector.shape_cast %321 : vector<1x128x32xbf16> to vector<128x32xbf16>
    %cst_184 = arith.constant dense<0.000000e+00> : vector<16x32xf32>
    %323 = tpu.matmul %320, %322, %cst_184 {dimension_numbers = #tpu.dot_dimension_numbers<[1], [0], [0], [1], [0, 0, 1, 1], [], []>} : vector<16x128xbf16>, vector<128x32xbf16>, vector<16x32xf32> -> vector<16x32xf32>
    %c1_185 = arith.constant 1 : index
    %c0_186 = arith.constant 0 : index
    %c0_187 = arith.constant 0 : index
    %324 = vector.load %arg12[%c1_185, %c0_186, %c0_187] : memref<6x1x32xf32, #tpu.memory_space<vmem>>, vector<1x1x32xf32>
    %325 = vector.shape_cast %324 : vector<1x1x32xf32> to vector<1x32xf32>
    %326 = vector.broadcast %325 : vector<1x32xf32> to vector<16x32xf32>
    %327 = arith.addf %323, %326 : vector<16x32xf32>
    %328 = arith.addf %327, %309 : vector<16x32xf32>
    %c1_188 = arith.constant 1 : index
    %c0_189 = arith.constant 0 : index
    %c0_190 = arith.constant 0 : index
    %329 = vector.load %arg13[%c1_188, %c0_189, %c0_190] : memref<6x1x32xf32, #tpu.memory_space<vmem>>, vector<1x1x32xf32>
    %330 = vector.shape_cast %329 : vector<1x1x32xf32> to vector<1x32xf32>
    %c1_191 = arith.constant 1 : index
    %c0_192 = arith.constant 0 : index
    %c0_193 = arith.constant 0 : index
    %331 = vector.load %arg14[%c1_191, %c0_192, %c0_193] : memref<6x1x32xf32, #tpu.memory_space<vmem>>, vector<1x1x32xf32>
    %332 = vector.shape_cast %331 : vector<1x1x32xf32> to vector<1x32xf32>
    %cst_194 = arith.constant dense<0.000000e+00> : vector<16xf32>
    %333 = vector.multi_reduction <add>, %328, %cst_194 [1] : vector<16x32xf32> to vector<16xf32>
    %334 = vector.shape_cast %333 : vector<16xf32> to vector<16x1xf32>
    %cst_195 = arith.constant 3.200000e+01 : f32
    %335 = vector.broadcast %cst_195 : f32 to vector<16x1xf32>
    %336 = arith.divf %334, %335 : vector<16x1xf32>
    %337 = vector.broadcast %336 : vector<16x1xf32> to vector<16x32xf32>
    %338 = arith.subf %328, %337 : vector<16x32xf32>
    %339 = arith.mulf %338, %338 : vector<16x32xf32>
    %cst_196 = arith.constant dense<0.000000e+00> : vector<16xf32>
    %340 = vector.multi_reduction <add>, %339, %cst_196 [1] : vector<16x32xf32> to vector<16xf32>
    %341 = vector.shape_cast %340 : vector<16xf32> to vector<16x1xf32>
    %cst_197 = arith.constant 3.200000e+01 : f32
    %342 = vector.broadcast %cst_197 : f32 to vector<16x1xf32>
    %343 = arith.divf %341, %342 : vector<16x1xf32>
    %344 = vector.broadcast %336 : vector<16x1xf32> to vector<16x32xf32>
    %345 = arith.subf %328, %344 : vector<16x32xf32>
    %cst_198 = arith.constant 9.99999974E-6 : f32
    %346 = vector.broadcast %cst_198 : f32 to vector<16x1xf32>
    %347 = arith.addf %343, %346 : vector<16x1xf32>
    %348 = math.rsqrt %347 : vector<16x1xf32>
    %349 = vector.broadcast %348 : vector<16x1xf32> to vector<16x32xf32>
    %350 = arith.mulf %345, %349 : vector<16x32xf32>
    %351 = vector.broadcast %330 : vector<1x32xf32> to vector<16x32xf32>
    %352 = arith.mulf %350, %351 : vector<16x32xf32>
    %353 = vector.broadcast %332 : vector<1x32xf32> to vector<16x32xf32>
    %354 = arith.addf %352, %353 : vector<16x32xf32>
    %355 = arith.truncf %354 : vector<16x32xf32> to vector<16x32xbf16>
    %c2 = arith.constant 2 : index
    %c0_199 = arith.constant 0 : index
    %c0_200 = arith.constant 0 : index
    %356 = vector.load %arg3[%c2, %c0_199, %c0_200] : memref<6x32x96xbf16, #tpu.memory_space<vmem>>, vector<1x32x96xbf16>
    %357 = vector.shape_cast %356 : vector<1x32x96xbf16> to vector<32x96xbf16>
    %cst_201 = arith.constant dense<0.000000e+00> : vector<16x96xf32>
    %358 = tpu.matmul %355, %357, %cst_201 {dimension_numbers = #tpu.dot_dimension_numbers<[1], [0], [0], [1], [0, 0, 1, 1], [], []>} : vector<16x32xbf16>, vector<32x96xbf16>, vector<16x96xf32> -> vector<16x96xf32>
    %c2_202 = arith.constant 2 : index
    %c0_203 = arith.constant 0 : index
    %c0_204 = arith.constant 0 : index
    %359 = vector.load %arg4[%c2_202, %c0_203, %c0_204] : memref<6x1x96xf32, #tpu.memory_space<vmem>>, vector<1x1x96xf32>
    %360 = vector.shape_cast %359 : vector<1x1x96xf32> to vector<1x96xf32>
    %361 = vector.broadcast %360 : vector<1x96xf32> to vector<16x96xf32>
    %362 = arith.addf %358, %361 : vector<16x96xf32>
    %c0_205 = arith.constant 0 : index
    %c0_206 = arith.constant 0 : index
    %363 = vector.load %arg18[%c0_205, %c0_206] : memref<16x96xf32, #tpu.memory_space<vmem>>, vector<16x96xf32>
    tpu.vector_store %arg18[%c0_205, %c0_206], %362 {strides = array<i32>} : memref<16x96xf32, #tpu.memory_space<vmem>>, vector<16x96xf32>,
    %c0_207 = arith.constant 0 : index
    %c0_208 = arith.constant 0 : index
    %364 = vector.load %arg18[%c0_207, %c0_208] : memref<16x96xf32, #tpu.memory_space<vmem>>, vector<16x8xf32>
    %365 = arith.truncf %364 : vector<16x8xf32> to vector<16x8xbf16>
    %c0_209 = arith.constant 0 : index
    %c32_210 = arith.constant 32 : index
    %366 = vector.load %arg18[%c0_209, %c32_210] : memref<16x96xf32, #tpu.memory_space<vmem>>, vector<16x8xf32>
    %367 = arith.truncf %366 : vector<16x8xf32> to vector<16x8xbf16>
    %c0_211 = arith.constant 0 : index
    %c64_212 = arith.constant 64 : index
    %368 = vector.load %arg18[%c0_211, %c64_212] : memref<16x96xf32, #tpu.memory_space<vmem>>, vector<16x8xf32>
    %369 = arith.truncf %368 : vector<16x8xf32> to vector<16x8xbf16>
    %cst_213 = arith.constant dense<0.000000e+00> : vector<16x16xf32>
    %370 = tpu.matmul %365, %367, %cst_213 {dimension_numbers = #tpu.dot_dimension_numbers<[1], [1], [0], [0], [0, 0, 1, 0], [], []>} : vector<16x8xbf16>, vector<16x8xbf16>, vector<16x16xf32> -> vector<16x16xf32>
    %371 = arith.addf %370, %6 : vector<16x16xf32>
    %cst_214 = arith.constant dense<0xFF800000> : vector<16xf32>
    %372 = vector.multi_reduction <maximumf>, %371, %cst_214 [1] : vector<16x16xf32> to vector<16xf32>
    %373 = vector.shape_cast %372 : vector<16xf32> to vector<16x1xf32>
    %374 = vector.broadcast %373 : vector<16x1xf32> to vector<16x16xf32>
    %375 = arith.subf %371, %374 : vector<16x16xf32>
    %376 = math.exp %375 : vector<16x16xf32>
    %cst_215 = arith.constant dense<0.000000e+00> : vector<16xf32>
    %377 = vector.multi_reduction <add>, %376, %cst_215 [1] : vector<16x16xf32> to vector<16xf32>
    %378 = vector.shape_cast %377 : vector<16xf32> to vector<16x1xf32>
    %379 = tpu.reciprocal %378 {approx = true} : vector<16x1xf32> -> vector<16x1xf32>
    %380 = vector.broadcast %379 : vector<16x1xf32> to vector<16x16xf32>
    %381 = arith.mulf %376, %380 : vector<16x16xf32>
    %382 = arith.truncf %381 : vector<16x16xf32> to vector<16x16xbf16>
    %cst_216 = arith.constant dense<0.000000e+00> : vector<16x8xf32>
    %383 = tpu.matmul %382, %369, %cst_216 {dimension_numbers = #tpu.dot_dimension_numbers<[1], [0], [0], [1], [0, 0, 1, 1], [], []>} : vector<16x16xbf16>, vector<16x8xbf16>, vector<16x8xf32> -> vector<16x8xf32>
    %c0_217 = arith.constant 0 : index
    %c0_218 = arith.constant 0 : index
    %384 = vector.load %arg19[%c0_217, %c0_218] : memref<16x32xf32, #tpu.memory_space<vmem>>, vector<16x8xf32>
    tpu.vector_store %arg19[%c0_217, %c0_218], %383 {strides = array<i32>} : memref<16x32xf32, #tpu.memory_space<vmem>>, vector<16x8xf32>,
    %c0_219 = arith.constant 0 : index
    %c8_220 = arith.constant 8 : index
    %385 = vector.load %arg18[%c0_219, %c8_220] : memref<16x96xf32, #tpu.memory_space<vmem>>, vector<16x8xf32>
    %386 = arith.truncf %385 : vector<16x8xf32> to vector<16x8xbf16>
    %c0_221 = arith.constant 0 : index
    %c40_222 = arith.constant 40 : index
    %387 = vector.load %arg18[%c0_221, %c40_222] : memref<16x96xf32, #tpu.memory_space<vmem>>, vector<16x8xf32>
    %388 = arith.truncf %387 : vector<16x8xf32> to vector<16x8xbf16>
    %c0_223 = arith.constant 0 : index
    %c72_224 = arith.constant 72 : index
    %389 = vector.load %arg18[%c0_223, %c72_224] : memref<16x96xf32, #tpu.memory_space<vmem>>, vector<16x8xf32>
    %390 = arith.truncf %389 : vector<16x8xf32> to vector<16x8xbf16>
    %cst_225 = arith.constant dense<0.000000e+00> : vector<16x16xf32>
    %391 = tpu.matmul %386, %388, %cst_225 {dimension_numbers = #tpu.dot_dimension_numbers<[1], [1], [0], [0], [0, 0, 1, 0], [], []>} : vector<16x8xbf16>, vector<16x8xbf16>, vector<16x16xf32> -> vector<16x16xf32>
    %392 = arith.addf %391, %6 : vector<16x16xf32>
    %cst_226 = arith.constant dense<0xFF800000> : vector<16xf32>
    %393 = vector.multi_reduction <maximumf>, %392, %cst_226 [1] : vector<16x16xf32> to vector<16xf32>
    %394 = vector.shape_cast %393 : vector<16xf32> to vector<16x1xf32>
    %395 = vector.broadcast %394 : vector<16x1xf32> to vector<16x16xf32>
    %396 = arith.subf %392, %395 : vector<16x16xf32>
    %397 = math.exp %396 : vector<16x16xf32>
    %cst_227 = arith.constant dense<0.000000e+00> : vector<16xf32>
    %398 = vector.multi_reduction <add>, %397, %cst_227 [1] : vector<16x16xf32> to vector<16xf32>
    %399 = vector.shape_cast %398 : vector<16xf32> to vector<16x1xf32>
    %400 = tpu.reciprocal %399 {approx = true} : vector<16x1xf32> -> vector<16x1xf32>
    %401 = vector.broadcast %400 : vector<16x1xf32> to vector<16x16xf32>
    %402 = arith.mulf %397, %401 : vector<16x16xf32>
    %403 = arith.truncf %402 : vector<16x16xf32> to vector<16x16xbf16>
    %cst_228 = arith.constant dense<0.000000e+00> : vector<16x8xf32>
    %404 = tpu.matmul %403, %390, %cst_228 {dimension_numbers = #tpu.dot_dimension_numbers<[1], [0], [0], [1], [0, 0, 1, 1], [], []>} : vector<16x16xbf16>, vector<16x8xbf16>, vector<16x8xf32> -> vector<16x8xf32>
    %c0_229 = arith.constant 0 : index
    %c8_230 = arith.constant 8 : index
    %405 = vector.load %arg19[%c0_229, %c8_230] : memref<16x32xf32, #tpu.memory_space<vmem>>, vector<16x8xf32>
    tpu.vector_store %arg19[%c0_229, %c8_230], %404 {strides = array<i32>} : memref<16x32xf32, #tpu.memory_space<vmem>>, vector<16x8xf32>,
    %c0_231 = arith.constant 0 : index
    %c16_232 = arith.constant 16 : index
    %406 = vector.load %arg18[%c0_231, %c16_232] : memref<16x96xf32, #tpu.memory_space<vmem>>, vector<16x8xf32>
    %407 = arith.truncf %406 : vector<16x8xf32> to vector<16x8xbf16>
    %c0_233 = arith.constant 0 : index
    %c48_234 = arith.constant 48 : index
    %408 = vector.load %arg18[%c0_233, %c48_234] : memref<16x96xf32, #tpu.memory_space<vmem>>, vector<16x8xf32>
    %409 = arith.truncf %408 : vector<16x8xf32> to vector<16x8xbf16>
    %c0_235 = arith.constant 0 : index
    %c80_236 = arith.constant 80 : index
    %410 = vector.load %arg18[%c0_235, %c80_236] : memref<16x96xf32, #tpu.memory_space<vmem>>, vector<16x8xf32>
    %411 = arith.truncf %410 : vector<16x8xf32> to vector<16x8xbf16>
    %cst_237 = arith.constant dense<0.000000e+00> : vector<16x16xf32>
    %412 = tpu.matmul %407, %409, %cst_237 {dimension_numbers = #tpu.dot_dimension_numbers<[1], [1], [0], [0], [0, 0, 1, 0], [], []>} : vector<16x8xbf16>, vector<16x8xbf16>, vector<16x16xf32> -> vector<16x16xf32>
    %413 = arith.addf %412, %6 : vector<16x16xf32>
    %cst_238 = arith.constant dense<0xFF800000> : vector<16xf32>
    %414 = vector.multi_reduction <maximumf>, %413, %cst_238 [1] : vector<16x16xf32> to vector<16xf32>
    %415 = vector.shape_cast %414 : vector<16xf32> to vector<16x1xf32>
    %416 = vector.broadcast %415 : vector<16x1xf32> to vector<16x16xf32>
    %417 = arith.subf %413, %416 : vector<16x16xf32>
    %418 = math.exp %417 : vector<16x16xf32>
    %cst_239 = arith.constant dense<0.000000e+00> : vector<16xf32>
    %419 = vector.multi_reduction <add>, %418, %cst_239 [1] : vector<16x16xf32> to vector<16xf32>
    %420 = vector.shape_cast %419 : vector<16xf32> to vector<16x1xf32>
    %421 = tpu.reciprocal %420 {approx = true} : vector<16x1xf32> -> vector<16x1xf32>
    %422 = vector.broadcast %421 : vector<16x1xf32> to vector<16x16xf32>
    %423 = arith.mulf %418, %422 : vector<16x16xf32>
    %424 = arith.truncf %423 : vector<16x16xf32> to vector<16x16xbf16>
    %cst_240 = arith.constant dense<0.000000e+00> : vector<16x8xf32>
    %425 = tpu.matmul %424, %411, %cst_240 {dimension_numbers = #tpu.dot_dimension_numbers<[1], [0], [0], [1], [0, 0, 1, 1], [], []>} : vector<16x16xbf16>, vector<16x8xbf16>, vector<16x8xf32> -> vector<16x8xf32>
    %c0_241 = arith.constant 0 : index
    %c16_242 = arith.constant 16 : index
    %426 = vector.load %arg19[%c0_241, %c16_242] : memref<16x32xf32, #tpu.memory_space<vmem>>, vector<16x8xf32>
    tpu.vector_store %arg19[%c0_241, %c16_242], %425 {strides = array<i32>} : memref<16x32xf32, #tpu.memory_space<vmem>>, vector<16x8xf32>,
    %c0_243 = arith.constant 0 : index
    %c24_244 = arith.constant 24 : index
    %427 = vector.load %arg18[%c0_243, %c24_244] : memref<16x96xf32, #tpu.memory_space<vmem>>, vector<16x8xf32>
    %428 = arith.truncf %427 : vector<16x8xf32> to vector<16x8xbf16>
    %c0_245 = arith.constant 0 : index
    %c56_246 = arith.constant 56 : index
    %429 = vector.load %arg18[%c0_245, %c56_246] : memref<16x96xf32, #tpu.memory_space<vmem>>, vector<16x8xf32>
    %430 = arith.truncf %429 : vector<16x8xf32> to vector<16x8xbf16>
    %c0_247 = arith.constant 0 : index
    %c88_248 = arith.constant 88 : index
    %431 = vector.load %arg18[%c0_247, %c88_248] : memref<16x96xf32, #tpu.memory_space<vmem>>, vector<16x8xf32>
    %432 = arith.truncf %431 : vector<16x8xf32> to vector<16x8xbf16>
    %cst_249 = arith.constant dense<0.000000e+00> : vector<16x16xf32>
    %433 = tpu.matmul %428, %430, %cst_249 {dimension_numbers = #tpu.dot_dimension_numbers<[1], [1], [0], [0], [0, 0, 1, 0], [], []>} : vector<16x8xbf16>, vector<16x8xbf16>, vector<16x16xf32> -> vector<16x16xf32>
    %434 = arith.addf %433, %6 : vector<16x16xf32>
    %cst_250 = arith.constant dense<0xFF800000> : vector<16xf32>
    %435 = vector.multi_reduction <maximumf>, %434, %cst_250 [1] : vector<16x16xf32> to vector<16xf32>
    %436 = vector.shape_cast %435 : vector<16xf32> to vector<16x1xf32>
    %437 = vector.broadcast %436 : vector<16x1xf32> to vector<16x16xf32>
    %438 = arith.subf %434, %437 : vector<16x16xf32>
    %439 = math.exp %438 : vector<16x16xf32>
    %cst_251 = arith.constant dense<0.000000e+00> : vector<16xf32>
    %440 = vector.multi_reduction <add>, %439, %cst_251 [1] : vector<16x16xf32> to vector<16xf32>
    %441 = vector.shape_cast %440 : vector<16xf32> to vector<16x1xf32>
    %442 = tpu.reciprocal %441 {approx = true} : vector<16x1xf32> -> vector<16x1xf32>
    %443 = vector.broadcast %442 : vector<16x1xf32> to vector<16x16xf32>
    %444 = arith.mulf %439, %443 : vector<16x16xf32>
    %445 = arith.truncf %444 : vector<16x16xf32> to vector<16x16xbf16>
    %cst_252 = arith.constant dense<0.000000e+00> : vector<16x8xf32>
    %446 = tpu.matmul %445, %432, %cst_252 {dimension_numbers = #tpu.dot_dimension_numbers<[1], [0], [0], [1], [0, 0, 1, 1], [], []>} : vector<16x16xbf16>, vector<16x8xbf16>, vector<16x8xf32> -> vector<16x8xf32>
    %c0_253 = arith.constant 0 : index
    %c24_254 = arith.constant 24 : index
    %447 = vector.load %arg19[%c0_253, %c24_254] : memref<16x32xf32, #tpu.memory_space<vmem>>, vector<16x8xf32>
    tpu.vector_store %arg19[%c0_253, %c24_254], %446 {strides = array<i32>} : memref<16x32xf32, #tpu.memory_space<vmem>>, vector<16x8xf32>,
    %c0_255 = arith.constant 0 : index
    %c0_256 = arith.constant 0 : index
    %448 = vector.load %arg19[%c0_255, %c0_256] : memref<16x32xf32, #tpu.memory_space<vmem>>, vector<16x32xf32>
    %449 = arith.truncf %448 : vector<16x32xf32> to vector<16x32xbf16>
    %c2_257 = arith.constant 2 : index
    %c0_258 = arith.constant 0 : index
    %c0_259 = arith.constant 0 : index
    %450 = vector.load %arg5[%c2_257, %c0_258, %c0_259] : memref<6x32x32xbf16, #tpu.memory_space<vmem>>, vector<1x32x32xbf16>
    %451 = vector.shape_cast %450 : vector<1x32x32xbf16> to vector<32x32xbf16>
    %cst_260 = arith.constant dense<0.000000e+00> : vector<16x32xf32>
    %452 = tpu.matmul %449, %451, %cst_260 {dimension_numbers = #tpu.dot_dimension_numbers<[1], [0], [0], [1], [0, 0, 1, 1], [], []>} : vector<16x32xbf16>, vector<32x32xbf16>, vector<16x32xf32> -> vector<16x32xf32>
    %c2_261 = arith.constant 2 : index
    %c0_262 = arith.constant 0 : index
    %c0_263 = arith.constant 0 : index
    %453 = vector.load %arg6[%c2_261, %c0_262, %c0_263] : memref<6x1x32xf32, #tpu.memory_space<vmem>>, vector<1x1x32xf32>
    %454 = vector.shape_cast %453 : vector<1x1x32xf32> to vector<1x32xf32>
    %455 = vector.broadcast %454 : vector<1x32xf32> to vector<16x32xf32>
    %456 = arith.addf %452, %455 : vector<16x32xf32>
    %457 = arith.addf %456, %354 : vector<16x32xf32>
    %c2_264 = arith.constant 2 : index
    %c0_265 = arith.constant 0 : index
    %c0_266 = arith.constant 0 : index
    %458 = vector.load %arg7[%c2_264, %c0_265, %c0_266] : memref<6x1x32xf32, #tpu.memory_space<vmem>>, vector<1x1x32xf32>
    %459 = vector.shape_cast %458 : vector<1x1x32xf32> to vector<1x32xf32>
    %c2_267 = arith.constant 2 : index
    %c0_268 = arith.constant 0 : index
    %c0_269 = arith.constant 0 : index
    %460 = vector.load %arg8[%c2_267, %c0_268, %c0_269] : memref<6x1x32xf32, #tpu.memory_space<vmem>>, vector<1x1x32xf32>
    %461 = vector.shape_cast %460 : vector<1x1x32xf32> to vector<1x32xf32>
    %cst_270 = arith.constant dense<0.000000e+00> : vector<16xf32>
    %462 = vector.multi_reduction <add>, %457, %cst_270 [1] : vector<16x32xf32> to vector<16xf32>
    %463 = vector.shape_cast %462 : vector<16xf32> to vector<16x1xf32>
    %cst_271 = arith.constant 3.200000e+01 : f32
    %464 = vector.broadcast %cst_271 : f32 to vector<16x1xf32>
    %465 = arith.divf %463, %464 : vector<16x1xf32>
    %466 = vector.broadcast %465 : vector<16x1xf32> to vector<16x32xf32>
    %467 = arith.subf %457, %466 : vector<16x32xf32>
    %468 = arith.mulf %467, %467 : vector<16x32xf32>
    %cst_272 = arith.constant dense<0.000000e+00> : vector<16xf32>
    %469 = vector.multi_reduction <add>, %468, %cst_272 [1] : vector<16x32xf32> to vector<16xf32>
    %470 = vector.shape_cast %469 : vector<16xf32> to vector<16x1xf32>
    %cst_273 = arith.constant 3.200000e+01 : f32
    %471 = vector.broadcast %cst_273 : f32 to vector<16x1xf32>
    %472 = arith.divf %470, %471 : vector<16x1xf32>
    %473 = vector.broadcast %465 : vector<16x1xf32> to vector<16x32xf32>
    %474 = arith.subf %457, %473 : vector<16x32xf32>
    %cst_274 = arith.constant 9.99999974E-6 : f32
    %475 = vector.broadcast %cst_274 : f32 to vector<16x1xf32>
    %476 = arith.addf %472, %475 : vector<16x1xf32>
    %477 = math.rsqrt %476 : vector<16x1xf32>
    %478 = vector.broadcast %477 : vector<16x1xf32> to vector<16x32xf32>
    %479 = arith.mulf %474, %478 : vector<16x32xf32>
    %480 = vector.broadcast %459 : vector<1x32xf32> to vector<16x32xf32>
    %481 = arith.mulf %479, %480 : vector<16x32xf32>
    %482 = vector.broadcast %461 : vector<1x32xf32> to vector<16x32xf32>
    %483 = arith.addf %481, %482 : vector<16x32xf32>
    %484 = arith.truncf %483 : vector<16x32xf32> to vector<16x32xbf16>
    %c2_275 = arith.constant 2 : index
    %c0_276 = arith.constant 0 : index
    %c0_277 = arith.constant 0 : index
    %485 = vector.load %arg9[%c2_275, %c0_276, %c0_277] : memref<6x32x128xbf16, #tpu.memory_space<vmem>>, vector<1x32x128xbf16>
    %486 = vector.shape_cast %485 : vector<1x32x128xbf16> to vector<32x128xbf16>
    %cst_278 = arith.constant dense<0.000000e+00> : vector<16x128xf32>
    %487 = tpu.matmul %484, %486, %cst_278 {dimension_numbers = #tpu.dot_dimension_numbers<[1], [0], [0], [1], [0, 0, 1, 1], [], []>} : vector<16x32xbf16>, vector<32x128xbf16>, vector<16x128xf32> -> vector<16x128xf32>
    %c2_279 = arith.constant 2 : index
    %c0_280 = arith.constant 0 : index
    %c0_281 = arith.constant 0 : index
    %488 = vector.load %arg10[%c2_279, %c0_280, %c0_281] : memref<6x1x128xf32, #tpu.memory_space<vmem>>, vector<1x1x128xf32>
    %489 = vector.shape_cast %488 : vector<1x1x128xf32> to vector<1x128xf32>
    %490 = vector.broadcast %489 : vector<1x128xf32> to vector<16x128xf32>
    %491 = arith.addf %487, %490 : vector<16x128xf32>
    %cst_282 = arith.constant 0.000000e+00 : f32
    %492 = vector.broadcast %cst_282 : f32 to vector<16x128xf32>
    %493 = arith.maximumf %491, %492 : vector<16x128xf32>
    %494 = arith.truncf %493 : vector<16x128xf32> to vector<16x128xbf16>
    %c2_283 = arith.constant 2 : index
    %c0_284 = arith.constant 0 : index
    %c0_285 = arith.constant 0 : index
    %495 = vector.load %arg11[%c2_283, %c0_284, %c0_285] : memref<6x128x32xbf16, #tpu.memory_space<vmem>>, vector<1x128x32xbf16>
    %496 = vector.shape_cast %495 : vector<1x128x32xbf16> to vector<128x32xbf16>
    %cst_286 = arith.constant dense<0.000000e+00> : vector<16x32xf32>
    %497 = tpu.matmul %494, %496, %cst_286 {dimension_numbers = #tpu.dot_dimension_numbers<[1], [0], [0], [1], [0, 0, 1, 1], [], []>} : vector<16x128xbf16>, vector<128x32xbf16>, vector<16x32xf32> -> vector<16x32xf32>
    %c2_287 = arith.constant 2 : index
    %c0_288 = arith.constant 0 : index
    %c0_289 = arith.constant 0 : index
    %498 = vector.load %arg12[%c2_287, %c0_288, %c0_289] : memref<6x1x32xf32, #tpu.memory_space<vmem>>, vector<1x1x32xf32>
    %499 = vector.shape_cast %498 : vector<1x1x32xf32> to vector<1x32xf32>
    %500 = vector.broadcast %499 : vector<1x32xf32> to vector<16x32xf32>
    %501 = arith.addf %497, %500 : vector<16x32xf32>
    %502 = arith.addf %501, %483 : vector<16x32xf32>
    %c2_290 = arith.constant 2 : index
    %c0_291 = arith.constant 0 : index
    %c0_292 = arith.constant 0 : index
    %503 = vector.load %arg13[%c2_290, %c0_291, %c0_292] : memref<6x1x32xf32, #tpu.memory_space<vmem>>, vector<1x1x32xf32>
    %504 = vector.shape_cast %503 : vector<1x1x32xf32> to vector<1x32xf32>
    %c2_293 = arith.constant 2 : index
    %c0_294 = arith.constant 0 : index
    %c0_295 = arith.constant 0 : index
    %505 = vector.load %arg14[%c2_293, %c0_294, %c0_295] : memref<6x1x32xf32, #tpu.memory_space<vmem>>, vector<1x1x32xf32>
    %506 = vector.shape_cast %505 : vector<1x1x32xf32> to vector<1x32xf32>
    %cst_296 = arith.constant dense<0.000000e+00> : vector<16xf32>
    %507 = vector.multi_reduction <add>, %502, %cst_296 [1] : vector<16x32xf32> to vector<16xf32>
    %508 = vector.shape_cast %507 : vector<16xf32> to vector<16x1xf32>
    %cst_297 = arith.constant 3.200000e+01 : f32
    %509 = vector.broadcast %cst_297 : f32 to vector<16x1xf32>
    %510 = arith.divf %508, %509 : vector<16x1xf32>
    %511 = vector.broadcast %510 : vector<16x1xf32> to vector<16x32xf32>
    %512 = arith.subf %502, %511 : vector<16x32xf32>
    %513 = arith.mulf %512, %512 : vector<16x32xf32>
    %cst_298 = arith.constant dense<0.000000e+00> : vector<16xf32>
    %514 = vector.multi_reduction <add>, %513, %cst_298 [1] : vector<16x32xf32> to vector<16xf32>
    %515 = vector.shape_cast %514 : vector<16xf32> to vector<16x1xf32>
    %cst_299 = arith.constant 3.200000e+01 : f32
    %516 = vector.broadcast %cst_299 : f32 to vector<16x1xf32>
    %517 = arith.divf %515, %516 : vector<16x1xf32>
    %518 = vector.broadcast %510 : vector<16x1xf32> to vector<16x32xf32>
    %519 = arith.subf %502, %518 : vector<16x32xf32>
    %cst_300 = arith.constant 9.99999974E-6 : f32
    %520 = vector.broadcast %cst_300 : f32 to vector<16x1xf32>
    %521 = arith.addf %517, %520 : vector<16x1xf32>
    %522 = math.rsqrt %521 : vector<16x1xf32>
    %523 = vector.broadcast %522 : vector<16x1xf32> to vector<16x32xf32>
    %524 = arith.mulf %519, %523 : vector<16x32xf32>
    %525 = vector.broadcast %504 : vector<1x32xf32> to vector<16x32xf32>
    %526 = arith.mulf %524, %525 : vector<16x32xf32>
    %527 = vector.broadcast %506 : vector<1x32xf32> to vector<16x32xf32>
    %528 = arith.addf %526, %527 : vector<16x32xf32>
    %529 = arith.truncf %528 : vector<16x32xf32> to vector<16x32xbf16>
    %c3 = arith.constant 3 : index
    %c0_301 = arith.constant 0 : index
    %c0_302 = arith.constant 0 : index
    %530 = vector.load %arg3[%c3, %c0_301, %c0_302] : memref<6x32x96xbf16, #tpu.memory_space<vmem>>, vector<1x32x96xbf16>
    %531 = vector.shape_cast %530 : vector<1x32x96xbf16> to vector<32x96xbf16>
    %cst_303 = arith.constant dense<0.000000e+00> : vector<16x96xf32>
    %532 = tpu.matmul %529, %531, %cst_303 {dimension_numbers = #tpu.dot_dimension_numbers<[1], [0], [0], [1], [0, 0, 1, 1], [], []>} : vector<16x32xbf16>, vector<32x96xbf16>, vector<16x96xf32> -> vector<16x96xf32>
    %c3_304 = arith.constant 3 : index
    %c0_305 = arith.constant 0 : index
    %c0_306 = arith.constant 0 : index
    %533 = vector.load %arg4[%c3_304, %c0_305, %c0_306] : memref<6x1x96xf32, #tpu.memory_space<vmem>>, vector<1x1x96xf32>
    %534 = vector.shape_cast %533 : vector<1x1x96xf32> to vector<1x96xf32>
    %535 = vector.broadcast %534 : vector<1x96xf32> to vector<16x96xf32>
    %536 = arith.addf %532, %535 : vector<16x96xf32>
    %c0_307 = arith.constant 0 : index
    %c0_308 = arith.constant 0 : index
    %537 = vector.load %arg18[%c0_307, %c0_308] : memref<16x96xf32, #tpu.memory_space<vmem>>, vector<16x96xf32>
    tpu.vector_store %arg18[%c0_307, %c0_308], %536 {strides = array<i32>} : memref<16x96xf32, #tpu.memory_space<vmem>>, vector<16x96xf32>,
    %c0_309 = arith.constant 0 : index
    %c0_310 = arith.constant 0 : index
    %538 = vector.load %arg18[%c0_309, %c0_310] : memref<16x96xf32, #tpu.memory_space<vmem>>, vector<16x8xf32>
    %539 = arith.truncf %538 : vector<16x8xf32> to vector<16x8xbf16>
    %c0_311 = arith.constant 0 : index
    %c32_312 = arith.constant 32 : index
    %540 = vector.load %arg18[%c0_311, %c32_312] : memref<16x96xf32, #tpu.memory_space<vmem>>, vector<16x8xf32>
    %541 = arith.truncf %540 : vector<16x8xf32> to vector<16x8xbf16>
    %c0_313 = arith.constant 0 : index
    %c64_314 = arith.constant 64 : index
    %542 = vector.load %arg18[%c0_313, %c64_314] : memref<16x96xf32, #tpu.memory_space<vmem>>, vector<16x8xf32>
    %543 = arith.truncf %542 : vector<16x8xf32> to vector<16x8xbf16>
    %cst_315 = arith.constant dense<0.000000e+00> : vector<16x16xf32>
    %544 = tpu.matmul %539, %541, %cst_315 {dimension_numbers = #tpu.dot_dimension_numbers<[1], [1], [0], [0], [0, 0, 1, 0], [], []>} : vector<16x8xbf16>, vector<16x8xbf16>, vector<16x16xf32> -> vector<16x16xf32>
    %545 = arith.addf %544, %6 : vector<16x16xf32>
    %cst_316 = arith.constant dense<0xFF800000> : vector<16xf32>
    %546 = vector.multi_reduction <maximumf>, %545, %cst_316 [1] : vector<16x16xf32> to vector<16xf32>
    %547 = vector.shape_cast %546 : vector<16xf32> to vector<16x1xf32>
    %548 = vector.broadcast %547 : vector<16x1xf32> to vector<16x16xf32>
    %549 = arith.subf %545, %548 : vector<16x16xf32>
    %550 = math.exp %549 : vector<16x16xf32>
    %cst_317 = arith.constant dense<0.000000e+00> : vector<16xf32>
    %551 = vector.multi_reduction <add>, %550, %cst_317 [1] : vector<16x16xf32> to vector<16xf32>
    %552 = vector.shape_cast %551 : vector<16xf32> to vector<16x1xf32>
    %553 = tpu.reciprocal %552 {approx = true} : vector<16x1xf32> -> vector<16x1xf32>
    %554 = vector.broadcast %553 : vector<16x1xf32> to vector<16x16xf32>
    %555 = arith.mulf %550, %554 : vector<16x16xf32>
    %556 = arith.truncf %555 : vector<16x16xf32> to vector<16x16xbf16>
    %cst_318 = arith.constant dense<0.000000e+00> : vector<16x8xf32>
    %557 = tpu.matmul %556, %543, %cst_318 {dimension_numbers = #tpu.dot_dimension_numbers<[1], [0], [0], [1], [0, 0, 1, 1], [], []>} : vector<16x16xbf16>, vector<16x8xbf16>, vector<16x8xf32> -> vector<16x8xf32>
    %c0_319 = arith.constant 0 : index
    %c0_320 = arith.constant 0 : index
    %558 = vector.load %arg19[%c0_319, %c0_320] : memref<16x32xf32, #tpu.memory_space<vmem>>, vector<16x8xf32>
    tpu.vector_store %arg19[%c0_319, %c0_320], %557 {strides = array<i32>} : memref<16x32xf32, #tpu.memory_space<vmem>>, vector<16x8xf32>,
    %c0_321 = arith.constant 0 : index
    %c8_322 = arith.constant 8 : index
    %559 = vector.load %arg18[%c0_321, %c8_322] : memref<16x96xf32, #tpu.memory_space<vmem>>, vector<16x8xf32>
    %560 = arith.truncf %559 : vector<16x8xf32> to vector<16x8xbf16>
    %c0_323 = arith.constant 0 : index
    %c40_324 = arith.constant 40 : index
    %561 = vector.load %arg18[%c0_323, %c40_324] : memref<16x96xf32, #tpu.memory_space<vmem>>, vector<16x8xf32>
    %562 = arith.truncf %561 : vector<16x8xf32> to vector<16x8xbf16>
    %c0_325 = arith.constant 0 : index
    %c72_326 = arith.constant 72 : index
    %563 = vector.load %arg18[%c0_325, %c72_326] : memref<16x96xf32, #tpu.memory_space<vmem>>, vector<16x8xf32>
    %564 = arith.truncf %563 : vector<16x8xf32> to vector<16x8xbf16>
    %cst_327 = arith.constant dense<0.000000e+00> : vector<16x16xf32>
    %565 = tpu.matmul %560, %562, %cst_327 {dimension_numbers = #tpu.dot_dimension_numbers<[1], [1], [0], [0], [0, 0, 1, 0], [], []>} : vector<16x8xbf16>, vector<16x8xbf16>, vector<16x16xf32> -> vector<16x16xf32>
    %566 = arith.addf %565, %6 : vector<16x16xf32>
    %cst_328 = arith.constant dense<0xFF800000> : vector<16xf32>
    %567 = vector.multi_reduction <maximumf>, %566, %cst_328 [1] : vector<16x16xf32> to vector<16xf32>
    %568 = vector.shape_cast %567 : vector<16xf32> to vector<16x1xf32>
    %569 = vector.broadcast %568 : vector<16x1xf32> to vector<16x16xf32>
    %570 = arith.subf %566, %569 : vector<16x16xf32>
    %571 = math.exp %570 : vector<16x16xf32>
    %cst_329 = arith.constant dense<0.000000e+00> : vector<16xf32>
    %572 = vector.multi_reduction <add>, %571, %cst_329 [1] : vector<16x16xf32> to vector<16xf32>
    %573 = vector.shape_cast %572 : vector<16xf32> to vector<16x1xf32>
    %574 = tpu.reciprocal %573 {approx = true} : vector<16x1xf32> -> vector<16x1xf32>
    %575 = vector.broadcast %574 : vector<16x1xf32> to vector<16x16xf32>
    %576 = arith.mulf %571, %575 : vector<16x16xf32>
    %577 = arith.truncf %576 : vector<16x16xf32> to vector<16x16xbf16>
    %cst_330 = arith.constant dense<0.000000e+00> : vector<16x8xf32>
    %578 = tpu.matmul %577, %564, %cst_330 {dimension_numbers = #tpu.dot_dimension_numbers<[1], [0], [0], [1], [0, 0, 1, 1], [], []>} : vector<16x16xbf16>, vector<16x8xbf16>, vector<16x8xf32> -> vector<16x8xf32>
    %c0_331 = arith.constant 0 : index
    %c8_332 = arith.constant 8 : index
    %579 = vector.load %arg19[%c0_331, %c8_332] : memref<16x32xf32, #tpu.memory_space<vmem>>, vector<16x8xf32>
    tpu.vector_store %arg19[%c0_331, %c8_332], %578 {strides = array<i32>} : memref<16x32xf32, #tpu.memory_space<vmem>>, vector<16x8xf32>,
    %c0_333 = arith.constant 0 : index
    %c16_334 = arith.constant 16 : index
    %580 = vector.load %arg18[%c0_333, %c16_334] : memref<16x96xf32, #tpu.memory_space<vmem>>, vector<16x8xf32>
    %581 = arith.truncf %580 : vector<16x8xf32> to vector<16x8xbf16>
    %c0_335 = arith.constant 0 : index
    %c48_336 = arith.constant 48 : index
    %582 = vector.load %arg18[%c0_335, %c48_336] : memref<16x96xf32, #tpu.memory_space<vmem>>, vector<16x8xf32>
    %583 = arith.truncf %582 : vector<16x8xf32> to vector<16x8xbf16>
    %c0_337 = arith.constant 0 : index
    %c80_338 = arith.constant 80 : index
    %584 = vector.load %arg18[%c0_337, %c80_338] : memref<16x96xf32, #tpu.memory_space<vmem>>, vector<16x8xf32>
    %585 = arith.truncf %584 : vector<16x8xf32> to vector<16x8xbf16>
    %cst_339 = arith.constant dense<0.000000e+00> : vector<16x16xf32>
    %586 = tpu.matmul %581, %583, %cst_339 {dimension_numbers = #tpu.dot_dimension_numbers<[1], [1], [0], [0], [0, 0, 1, 0], [], []>} : vector<16x8xbf16>, vector<16x8xbf16>, vector<16x16xf32> -> vector<16x16xf32>
    %587 = arith.addf %586, %6 : vector<16x16xf32>
    %cst_340 = arith.constant dense<0xFF800000> : vector<16xf32>
    %588 = vector.multi_reduction <maximumf>, %587, %cst_340 [1] : vector<16x16xf32> to vector<16xf32>
    %589 = vector.shape_cast %588 : vector<16xf32> to vector<16x1xf32>
    %590 = vector.broadcast %589 : vector<16x1xf32> to vector<16x16xf32>
    %591 = arith.subf %587, %590 : vector<16x16xf32>
    %592 = math.exp %591 : vector<16x16xf32>
    %cst_341 = arith.constant dense<0.000000e+00> : vector<16xf32>
    %593 = vector.multi_reduction <add>, %592, %cst_341 [1] : vector<16x16xf32> to vector<16xf32>
    %594 = vector.shape_cast %593 : vector<16xf32> to vector<16x1xf32>
    %595 = tpu.reciprocal %594 {approx = true} : vector<16x1xf32> -> vector<16x1xf32>
    %596 = vector.broadcast %595 : vector<16x1xf32> to vector<16x16xf32>
    %597 = arith.mulf %592, %596 : vector<16x16xf32>
    %598 = arith.truncf %597 : vector<16x16xf32> to vector<16x16xbf16>
    %cst_342 = arith.constant dense<0.000000e+00> : vector<16x8xf32>
    %599 = tpu.matmul %598, %585, %cst_342 {dimension_numbers = #tpu.dot_dimension_numbers<[1], [0], [0], [1], [0, 0, 1, 1], [], []>} : vector<16x16xbf16>, vector<16x8xbf16>, vector<16x8xf32> -> vector<16x8xf32>
    %c0_343 = arith.constant 0 : index
    %c16_344 = arith.constant 16 : index
    %600 = vector.load %arg19[%c0_343, %c16_344] : memref<16x32xf32, #tpu.memory_space<vmem>>, vector<16x8xf32>
    tpu.vector_store %arg19[%c0_343, %c16_344], %599 {strides = array<i32>} : memref<16x32xf32, #tpu.memory_space<vmem>>, vector<16x8xf32>,
    %c0_345 = arith.constant 0 : index
    %c24_346 = arith.constant 24 : index
    %601 = vector.load %arg18[%c0_345, %c24_346] : memref<16x96xf32, #tpu.memory_space<vmem>>, vector<16x8xf32>
    %602 = arith.truncf %601 : vector<16x8xf32> to vector<16x8xbf16>
    %c0_347 = arith.constant 0 : index
    %c56_348 = arith.constant 56 : index
    %603 = vector.load %arg18[%c0_347, %c56_348] : memref<16x96xf32, #tpu.memory_space<vmem>>, vector<16x8xf32>
    %604 = arith.truncf %603 : vector<16x8xf32> to vector<16x8xbf16>
    %c0_349 = arith.constant 0 : index
    %c88_350 = arith.constant 88 : index
    %605 = vector.load %arg18[%c0_349, %c88_350] : memref<16x96xf32, #tpu.memory_space<vmem>>, vector<16x8xf32>
    %606 = arith.truncf %605 : vector<16x8xf32> to vector<16x8xbf16>
    %cst_351 = arith.constant dense<0.000000e+00> : vector<16x16xf32>
    %607 = tpu.matmul %602, %604, %cst_351 {dimension_numbers = #tpu.dot_dimension_numbers<[1], [1], [0], [0], [0, 0, 1, 0], [], []>} : vector<16x8xbf16>, vector<16x8xbf16>, vector<16x16xf32> -> vector<16x16xf32>
    %608 = arith.addf %607, %6 : vector<16x16xf32>
    %cst_352 = arith.constant dense<0xFF800000> : vector<16xf32>
    %609 = vector.multi_reduction <maximumf>, %608, %cst_352 [1] : vector<16x16xf32> to vector<16xf32>
    %610 = vector.shape_cast %609 : vector<16xf32> to vector<16x1xf32>
    %611 = vector.broadcast %610 : vector<16x1xf32> to vector<16x16xf32>
    %612 = arith.subf %608, %611 : vector<16x16xf32>
    %613 = math.exp %612 : vector<16x16xf32>
    %cst_353 = arith.constant dense<0.000000e+00> : vector<16xf32>
    %614 = vector.multi_reduction <add>, %613, %cst_353 [1] : vector<16x16xf32> to vector<16xf32>
    %615 = vector.shape_cast %614 : vector<16xf32> to vector<16x1xf32>
    %616 = tpu.reciprocal %615 {approx = true} : vector<16x1xf32> -> vector<16x1xf32>
    %617 = vector.broadcast %616 : vector<16x1xf32> to vector<16x16xf32>
    %618 = arith.mulf %613, %617 : vector<16x16xf32>
    %619 = arith.truncf %618 : vector<16x16xf32> to vector<16x16xbf16>
    %cst_354 = arith.constant dense<0.000000e+00> : vector<16x8xf32>
    %620 = tpu.matmul %619, %606, %cst_354 {dimension_numbers = #tpu.dot_dimension_numbers<[1], [0], [0], [1], [0, 0, 1, 1], [], []>} : vector<16x16xbf16>, vector<16x8xbf16>, vector<16x8xf32> -> vector<16x8xf32>
    %c0_355 = arith.constant 0 : index
    %c24_356 = arith.constant 24 : index
    %621 = vector.load %arg19[%c0_355, %c24_356] : memref<16x32xf32, #tpu.memory_space<vmem>>, vector<16x8xf32>
    tpu.vector_store %arg19[%c0_355, %c24_356], %620 {strides = array<i32>} : memref<16x32xf32, #tpu.memory_space<vmem>>, vector<16x8xf32>,
    %c0_357 = arith.constant 0 : index
    %c0_358 = arith.constant 0 : index
    %622 = vector.load %arg19[%c0_357, %c0_358] : memref<16x32xf32, #tpu.memory_space<vmem>>, vector<16x32xf32>
    %623 = arith.truncf %622 : vector<16x32xf32> to vector<16x32xbf16>
    %c3_359 = arith.constant 3 : index
    %c0_360 = arith.constant 0 : index
    %c0_361 = arith.constant 0 : index
    %624 = vector.load %arg5[%c3_359, %c0_360, %c0_361] : memref<6x32x32xbf16, #tpu.memory_space<vmem>>, vector<1x32x32xbf16>
    %625 = vector.shape_cast %624 : vector<1x32x32xbf16> to vector<32x32xbf16>
    %cst_362 = arith.constant dense<0.000000e+00> : vector<16x32xf32>
    %626 = tpu.matmul %623, %625, %cst_362 {dimension_numbers = #tpu.dot_dimension_numbers<[1], [0], [0], [1], [0, 0, 1, 1], [], []>} : vector<16x32xbf16>, vector<32x32xbf16>, vector<16x32xf32> -> vector<16x32xf32>
    %c3_363 = arith.constant 3 : index
    %c0_364 = arith.constant 0 : index
    %c0_365 = arith.constant 0 : index
    %627 = vector.load %arg6[%c3_363, %c0_364, %c0_365] : memref<6x1x32xf32, #tpu.memory_space<vmem>>, vector<1x1x32xf32>
    %628 = vector.shape_cast %627 : vector<1x1x32xf32> to vector<1x32xf32>
    %629 = vector.broadcast %628 : vector<1x32xf32> to vector<16x32xf32>
    %630 = arith.addf %626, %629 : vector<16x32xf32>
    %631 = arith.addf %630, %528 : vector<16x32xf32>
    %c3_366 = arith.constant 3 : index
    %c0_367 = arith.constant 0 : index
    %c0_368 = arith.constant 0 : index
    %632 = vector.load %arg7[%c3_366, %c0_367, %c0_368] : memref<6x1x32xf32, #tpu.memory_space<vmem>>, vector<1x1x32xf32>
    %633 = vector.shape_cast %632 : vector<1x1x32xf32> to vector<1x32xf32>
    %c3_369 = arith.constant 3 : index
    %c0_370 = arith.constant 0 : index
    %c0_371 = arith.constant 0 : index
    %634 = vector.load %arg8[%c3_369, %c0_370, %c0_371] : memref<6x1x32xf32, #tpu.memory_space<vmem>>, vector<1x1x32xf32>
    %635 = vector.shape_cast %634 : vector<1x1x32xf32> to vector<1x32xf32>
    %cst_372 = arith.constant dense<0.000000e+00> : vector<16xf32>
    %636 = vector.multi_reduction <add>, %631, %cst_372 [1] : vector<16x32xf32> to vector<16xf32>
    %637 = vector.shape_cast %636 : vector<16xf32> to vector<16x1xf32>
    %cst_373 = arith.constant 3.200000e+01 : f32
    %638 = vector.broadcast %cst_373 : f32 to vector<16x1xf32>
    %639 = arith.divf %637, %638 : vector<16x1xf32>
    %640 = vector.broadcast %639 : vector<16x1xf32> to vector<16x32xf32>
    %641 = arith.subf %631, %640 : vector<16x32xf32>
    %642 = arith.mulf %641, %641 : vector<16x32xf32>
    %cst_374 = arith.constant dense<0.000000e+00> : vector<16xf32>
    %643 = vector.multi_reduction <add>, %642, %cst_374 [1] : vector<16x32xf32> to vector<16xf32>
    %644 = vector.shape_cast %643 : vector<16xf32> to vector<16x1xf32>
    %cst_375 = arith.constant 3.200000e+01 : f32
    %645 = vector.broadcast %cst_375 : f32 to vector<16x1xf32>
    %646 = arith.divf %644, %645 : vector<16x1xf32>
    %647 = vector.broadcast %639 : vector<16x1xf32> to vector<16x32xf32>
    %648 = arith.subf %631, %647 : vector<16x32xf32>
    %cst_376 = arith.constant 9.99999974E-6 : f32
    %649 = vector.broadcast %cst_376 : f32 to vector<16x1xf32>
    %650 = arith.addf %646, %649 : vector<16x1xf32>
    %651 = math.rsqrt %650 : vector<16x1xf32>
    %652 = vector.broadcast %651 : vector<16x1xf32> to vector<16x32xf32>
    %653 = arith.mulf %648, %652 : vector<16x32xf32>
    %654 = vector.broadcast %633 : vector<1x32xf32> to vector<16x32xf32>
    %655 = arith.mulf %653, %654 : vector<16x32xf32>
    %656 = vector.broadcast %635 : vector<1x32xf32> to vector<16x32xf32>
    %657 = arith.addf %655, %656 : vector<16x32xf32>
    %658 = arith.truncf %657 : vector<16x32xf32> to vector<16x32xbf16>
    %c3_377 = arith.constant 3 : index
    %c0_378 = arith.constant 0 : index
    %c0_379 = arith.constant 0 : index
    %659 = vector.load %arg9[%c3_377, %c0_378, %c0_379] : memref<6x32x128xbf16, #tpu.memory_space<vmem>>, vector<1x32x128xbf16>
    %660 = vector.shape_cast %659 : vector<1x32x128xbf16> to vector<32x128xbf16>
    %cst_380 = arith.constant dense<0.000000e+00> : vector<16x128xf32>
    %661 = tpu.matmul %658, %660, %cst_380 {dimension_numbers = #tpu.dot_dimension_numbers<[1], [0], [0], [1], [0, 0, 1, 1], [], []>} : vector<16x32xbf16>, vector<32x128xbf16>, vector<16x128xf32> -> vector<16x128xf32>
    %c3_381 = arith.constant 3 : index
    %c0_382 = arith.constant 0 : index
    %c0_383 = arith.constant 0 : index
    %662 = vector.load %arg10[%c3_381, %c0_382, %c0_383] : memref<6x1x128xf32, #tpu.memory_space<vmem>>, vector<1x1x128xf32>
    %663 = vector.shape_cast %662 : vector<1x1x128xf32> to vector<1x128xf32>
    %664 = vector.broadcast %663 : vector<1x128xf32> to vector<16x128xf32>
    %665 = arith.addf %661, %664 : vector<16x128xf32>
    %cst_384 = arith.constant 0.000000e+00 : f32
    %666 = vector.broadcast %cst_384 : f32 to vector<16x128xf32>
    %667 = arith.maximumf %665, %666 : vector<16x128xf32>
    %668 = arith.truncf %667 : vector<16x128xf32> to vector<16x128xbf16>
    %c3_385 = arith.constant 3 : index
    %c0_386 = arith.constant 0 : index
    %c0_387 = arith.constant 0 : index
    %669 = vector.load %arg11[%c3_385, %c0_386, %c0_387] : memref<6x128x32xbf16, #tpu.memory_space<vmem>>, vector<1x128x32xbf16>
    %670 = vector.shape_cast %669 : vector<1x128x32xbf16> to vector<128x32xbf16>
    %cst_388 = arith.constant dense<0.000000e+00> : vector<16x32xf32>
    %671 = tpu.matmul %668, %670, %cst_388 {dimension_numbers = #tpu.dot_dimension_numbers<[1], [0], [0], [1], [0, 0, 1, 1], [], []>} : vector<16x128xbf16>, vector<128x32xbf16>, vector<16x32xf32> -> vector<16x32xf32>
    %c3_389 = arith.constant 3 : index
    %c0_390 = arith.constant 0 : index
    %c0_391 = arith.constant 0 : index
    %672 = vector.load %arg12[%c3_389, %c0_390, %c0_391] : memref<6x1x32xf32, #tpu.memory_space<vmem>>, vector<1x1x32xf32>
    %673 = vector.shape_cast %672 : vector<1x1x32xf32> to vector<1x32xf32>
    %674 = vector.broadcast %673 : vector<1x32xf32> to vector<16x32xf32>
    %675 = arith.addf %671, %674 : vector<16x32xf32>
    %676 = arith.addf %675, %657 : vector<16x32xf32>
    %c3_392 = arith.constant 3 : index
    %c0_393 = arith.constant 0 : index
    %c0_394 = arith.constant 0 : index
    %677 = vector.load %arg13[%c3_392, %c0_393, %c0_394] : memref<6x1x32xf32, #tpu.memory_space<vmem>>, vector<1x1x32xf32>
    %678 = vector.shape_cast %677 : vector<1x1x32xf32> to vector<1x32xf32>
    %c3_395 = arith.constant 3 : index
    %c0_396 = arith.constant 0 : index
    %c0_397 = arith.constant 0 : index
    %679 = vector.load %arg14[%c3_395, %c0_396, %c0_397] : memref<6x1x32xf32, #tpu.memory_space<vmem>>, vector<1x1x32xf32>
    %680 = vector.shape_cast %679 : vector<1x1x32xf32> to vector<1x32xf32>
    %cst_398 = arith.constant dense<0.000000e+00> : vector<16xf32>
    %681 = vector.multi_reduction <add>, %676, %cst_398 [1] : vector<16x32xf32> to vector<16xf32>
    %682 = vector.shape_cast %681 : vector<16xf32> to vector<16x1xf32>
    %cst_399 = arith.constant 3.200000e+01 : f32
    %683 = vector.broadcast %cst_399 : f32 to vector<16x1xf32>
    %684 = arith.divf %682, %683 : vector<16x1xf32>
    %685 = vector.broadcast %684 : vector<16x1xf32> to vector<16x32xf32>
    %686 = arith.subf %676, %685 : vector<16x32xf32>
    %687 = arith.mulf %686, %686 : vector<16x32xf32>
    %cst_400 = arith.constant dense<0.000000e+00> : vector<16xf32>
    %688 = vector.multi_reduction <add>, %687, %cst_400 [1] : vector<16x32xf32> to vector<16xf32>
    %689 = vector.shape_cast %688 : vector<16xf32> to vector<16x1xf32>
    %cst_401 = arith.constant 3.200000e+01 : f32
    %690 = vector.broadcast %cst_401 : f32 to vector<16x1xf32>
    %691 = arith.divf %689, %690 : vector<16x1xf32>
    %692 = vector.broadcast %684 : vector<16x1xf32> to vector<16x32xf32>
    %693 = arith.subf %676, %692 : vector<16x32xf32>
    %cst_402 = arith.constant 9.99999974E-6 : f32
    %694 = vector.broadcast %cst_402 : f32 to vector<16x1xf32>
    %695 = arith.addf %691, %694 : vector<16x1xf32>
    %696 = math.rsqrt %695 : vector<16x1xf32>
    %697 = vector.broadcast %696 : vector<16x1xf32> to vector<16x32xf32>
    %698 = arith.mulf %693, %697 : vector<16x32xf32>
    %699 = vector.broadcast %678 : vector<1x32xf32> to vector<16x32xf32>
    %700 = arith.mulf %698, %699 : vector<16x32xf32>
    %701 = vector.broadcast %680 : vector<1x32xf32> to vector<16x32xf32>
    %702 = arith.addf %700, %701 : vector<16x32xf32>
    %703 = arith.truncf %702 : vector<16x32xf32> to vector<16x32xbf16>
    %c4 = arith.constant 4 : index
    %c0_403 = arith.constant 0 : index
    %c0_404 = arith.constant 0 : index
    %704 = vector.load %arg3[%c4, %c0_403, %c0_404] : memref<6x32x96xbf16, #tpu.memory_space<vmem>>, vector<1x32x96xbf16>
    %705 = vector.shape_cast %704 : vector<1x32x96xbf16> to vector<32x96xbf16>
    %cst_405 = arith.constant dense<0.000000e+00> : vector<16x96xf32>
    %706 = tpu.matmul %703, %705, %cst_405 {dimension_numbers = #tpu.dot_dimension_numbers<[1], [0], [0], [1], [0, 0, 1, 1], [], []>} : vector<16x32xbf16>, vector<32x96xbf16>, vector<16x96xf32> -> vector<16x96xf32>
    %c4_406 = arith.constant 4 : index
    %c0_407 = arith.constant 0 : index
    %c0_408 = arith.constant 0 : index
    %707 = vector.load %arg4[%c4_406, %c0_407, %c0_408] : memref<6x1x96xf32, #tpu.memory_space<vmem>>, vector<1x1x96xf32>
    %708 = vector.shape_cast %707 : vector<1x1x96xf32> to vector<1x96xf32>
    %709 = vector.broadcast %708 : vector<1x96xf32> to vector<16x96xf32>
    %710 = arith.addf %706, %709 : vector<16x96xf32>
    %c0_409 = arith.constant 0 : index
    %c0_410 = arith.constant 0 : index
    %711 = vector.load %arg18[%c0_409, %c0_410] : memref<16x96xf32, #tpu.memory_space<vmem>>, vector<16x96xf32>
    tpu.vector_store %arg18[%c0_409, %c0_410], %710 {strides = array<i32>} : memref<16x96xf32, #tpu.memory_space<vmem>>, vector<16x96xf32>,
    %c0_411 = arith.constant 0 : index
    %c0_412 = arith.constant 0 : index
    %712 = vector.load %arg18[%c0_411, %c0_412] : memref<16x96xf32, #tpu.memory_space<vmem>>, vector<16x8xf32>
    %713 = arith.truncf %712 : vector<16x8xf32> to vector<16x8xbf16>
    %c0_413 = arith.constant 0 : index
    %c32_414 = arith.constant 32 : index
    %714 = vector.load %arg18[%c0_413, %c32_414] : memref<16x96xf32, #tpu.memory_space<vmem>>, vector<16x8xf32>
    %715 = arith.truncf %714 : vector<16x8xf32> to vector<16x8xbf16>
    %c0_415 = arith.constant 0 : index
    %c64_416 = arith.constant 64 : index
    %716 = vector.load %arg18[%c0_415, %c64_416] : memref<16x96xf32, #tpu.memory_space<vmem>>, vector<16x8xf32>
    %717 = arith.truncf %716 : vector<16x8xf32> to vector<16x8xbf16>
    %cst_417 = arith.constant dense<0.000000e+00> : vector<16x16xf32>
    %718 = tpu.matmul %713, %715, %cst_417 {dimension_numbers = #tpu.dot_dimension_numbers<[1], [1], [0], [0], [0, 0, 1, 0], [], []>} : vector<16x8xbf16>, vector<16x8xbf16>, vector<16x16xf32> -> vector<16x16xf32>
    %719 = arith.addf %718, %6 : vector<16x16xf32>
    %cst_418 = arith.constant dense<0xFF800000> : vector<16xf32>
    %720 = vector.multi_reduction <maximumf>, %719, %cst_418 [1] : vector<16x16xf32> to vector<16xf32>
    %721 = vector.shape_cast %720 : vector<16xf32> to vector<16x1xf32>
    %722 = vector.broadcast %721 : vector<16x1xf32> to vector<16x16xf32>
    %723 = arith.subf %719, %722 : vector<16x16xf32>
    %724 = math.exp %723 : vector<16x16xf32>
    %cst_419 = arith.constant dense<0.000000e+00> : vector<16xf32>
    %725 = vector.multi_reduction <add>, %724, %cst_419 [1] : vector<16x16xf32> to vector<16xf32>
    %726 = vector.shape_cast %725 : vector<16xf32> to vector<16x1xf32>
    %727 = tpu.reciprocal %726 {approx = true} : vector<16x1xf32> -> vector<16x1xf32>
    %728 = vector.broadcast %727 : vector<16x1xf32> to vector<16x16xf32>
    %729 = arith.mulf %724, %728 : vector<16x16xf32>
    %730 = arith.truncf %729 : vector<16x16xf32> to vector<16x16xbf16>
    %cst_420 = arith.constant dense<0.000000e+00> : vector<16x8xf32>
    %731 = tpu.matmul %730, %717, %cst_420 {dimension_numbers = #tpu.dot_dimension_numbers<[1], [0], [0], [1], [0, 0, 1, 1], [], []>} : vector<16x16xbf16>, vector<16x8xbf16>, vector<16x8xf32> -> vector<16x8xf32>
    %c0_421 = arith.constant 0 : index
    %c0_422 = arith.constant 0 : index
    %732 = vector.load %arg19[%c0_421, %c0_422] : memref<16x32xf32, #tpu.memory_space<vmem>>, vector<16x8xf32>
    tpu.vector_store %arg19[%c0_421, %c0_422], %731 {strides = array<i32>} : memref<16x32xf32, #tpu.memory_space<vmem>>, vector<16x8xf32>,
    %c0_423 = arith.constant 0 : index
    %c8_424 = arith.constant 8 : index
    %733 = vector.load %arg18[%c0_423, %c8_424] : memref<16x96xf32, #tpu.memory_space<vmem>>, vector<16x8xf32>
    %734 = arith.truncf %733 : vector<16x8xf32> to vector<16x8xbf16>
    %c0_425 = arith.constant 0 : index
    %c40_426 = arith.constant 40 : index
    %735 = vector.load %arg18[%c0_425, %c40_426] : memref<16x96xf32, #tpu.memory_space<vmem>>, vector<16x8xf32>
    %736 = arith.truncf %735 : vector<16x8xf32> to vector<16x8xbf16>
    %c0_427 = arith.constant 0 : index
    %c72_428 = arith.constant 72 : index
    %737 = vector.load %arg18[%c0_427, %c72_428] : memref<16x96xf32, #tpu.memory_space<vmem>>, vector<16x8xf32>
    %738 = arith.truncf %737 : vector<16x8xf32> to vector<16x8xbf16>
    %cst_429 = arith.constant dense<0.000000e+00> : vector<16x16xf32>
    %739 = tpu.matmul %734, %736, %cst_429 {dimension_numbers = #tpu.dot_dimension_numbers<[1], [1], [0], [0], [0, 0, 1, 0], [], []>} : vector<16x8xbf16>, vector<16x8xbf16>, vector<16x16xf32> -> vector<16x16xf32>
    %740 = arith.addf %739, %6 : vector<16x16xf32>
    %cst_430 = arith.constant dense<0xFF800000> : vector<16xf32>
    %741 = vector.multi_reduction <maximumf>, %740, %cst_430 [1] : vector<16x16xf32> to vector<16xf32>
    %742 = vector.shape_cast %741 : vector<16xf32> to vector<16x1xf32>
    %743 = vector.broadcast %742 : vector<16x1xf32> to vector<16x16xf32>
    %744 = arith.subf %740, %743 : vector<16x16xf32>
    %745 = math.exp %744 : vector<16x16xf32>
    %cst_431 = arith.constant dense<0.000000e+00> : vector<16xf32>
    %746 = vector.multi_reduction <add>, %745, %cst_431 [1] : vector<16x16xf32> to vector<16xf32>
    %747 = vector.shape_cast %746 : vector<16xf32> to vector<16x1xf32>
    %748 = tpu.reciprocal %747 {approx = true} : vector<16x1xf32> -> vector<16x1xf32>
    %749 = vector.broadcast %748 : vector<16x1xf32> to vector<16x16xf32>
    %750 = arith.mulf %745, %749 : vector<16x16xf32>
    %751 = arith.truncf %750 : vector<16x16xf32> to vector<16x16xbf16>
    %cst_432 = arith.constant dense<0.000000e+00> : vector<16x8xf32>
    %752 = tpu.matmul %751, %738, %cst_432 {dimension_numbers = #tpu.dot_dimension_numbers<[1], [0], [0], [1], [0, 0, 1, 1], [], []>} : vector<16x16xbf16>, vector<16x8xbf16>, vector<16x8xf32> -> vector<16x8xf32>
    %c0_433 = arith.constant 0 : index
    %c8_434 = arith.constant 8 : index
    %753 = vector.load %arg19[%c0_433, %c8_434] : memref<16x32xf32, #tpu.memory_space<vmem>>, vector<16x8xf32>
    tpu.vector_store %arg19[%c0_433, %c8_434], %752 {strides = array<i32>} : memref<16x32xf32, #tpu.memory_space<vmem>>, vector<16x8xf32>,
    %c0_435 = arith.constant 0 : index
    %c16_436 = arith.constant 16 : index
    %754 = vector.load %arg18[%c0_435, %c16_436] : memref<16x96xf32, #tpu.memory_space<vmem>>, vector<16x8xf32>
    %755 = arith.truncf %754 : vector<16x8xf32> to vector<16x8xbf16>
    %c0_437 = arith.constant 0 : index
    %c48_438 = arith.constant 48 : index
    %756 = vector.load %arg18[%c0_437, %c48_438] : memref<16x96xf32, #tpu.memory_space<vmem>>, vector<16x8xf32>
    %757 = arith.truncf %756 : vector<16x8xf32> to vector<16x8xbf16>
    %c0_439 = arith.constant 0 : index
    %c80_440 = arith.constant 80 : index
    %758 = vector.load %arg18[%c0_439, %c80_440] : memref<16x96xf32, #tpu.memory_space<vmem>>, vector<16x8xf32>
    %759 = arith.truncf %758 : vector<16x8xf32> to vector<16x8xbf16>
    %cst_441 = arith.constant dense<0.000000e+00> : vector<16x16xf32>
    %760 = tpu.matmul %755, %757, %cst_441 {dimension_numbers = #tpu.dot_dimension_numbers<[1], [1], [0], [0], [0, 0, 1, 0], [], []>} : vector<16x8xbf16>, vector<16x8xbf16>, vector<16x16xf32> -> vector<16x16xf32>
    %761 = arith.addf %760, %6 : vector<16x16xf32>
    %cst_442 = arith.constant dense<0xFF800000> : vector<16xf32>
    %762 = vector.multi_reduction <maximumf>, %761, %cst_442 [1] : vector<16x16xf32> to vector<16xf32>
    %763 = vector.shape_cast %762 : vector<16xf32> to vector<16x1xf32>
    %764 = vector.broadcast %763 : vector<16x1xf32> to vector<16x16xf32>
    %765 = arith.subf %761, %764 : vector<16x16xf32>
    %766 = math.exp %765 : vector<16x16xf32>
    %cst_443 = arith.constant dense<0.000000e+00> : vector<16xf32>
    %767 = vector.multi_reduction <add>, %766, %cst_443 [1] : vector<16x16xf32> to vector<16xf32>
    %768 = vector.shape_cast %767 : vector<16xf32> to vector<16x1xf32>
    %769 = tpu.reciprocal %768 {approx = true} : vector<16x1xf32> -> vector<16x1xf32>
    %770 = vector.broadcast %769 : vector<16x1xf32> to vector<16x16xf32>
    %771 = arith.mulf %766, %770 : vector<16x16xf32>
    %772 = arith.truncf %771 : vector<16x16xf32> to vector<16x16xbf16>
    %cst_444 = arith.constant dense<0.000000e+00> : vector<16x8xf32>
    %773 = tpu.matmul %772, %759, %cst_444 {dimension_numbers = #tpu.dot_dimension_numbers<[1], [0], [0], [1], [0, 0, 1, 1], [], []>} : vector<16x16xbf16>, vector<16x8xbf16>, vector<16x8xf32> -> vector<16x8xf32>
    %c0_445 = arith.constant 0 : index
    %c16_446 = arith.constant 16 : index
    %774 = vector.load %arg19[%c0_445, %c16_446] : memref<16x32xf32, #tpu.memory_space<vmem>>, vector<16x8xf32>
    tpu.vector_store %arg19[%c0_445, %c16_446], %773 {strides = array<i32>} : memref<16x32xf32, #tpu.memory_space<vmem>>, vector<16x8xf32>,
    %c0_447 = arith.constant 0 : index
    %c24_448 = arith.constant 24 : index
    %775 = vector.load %arg18[%c0_447, %c24_448] : memref<16x96xf32, #tpu.memory_space<vmem>>, vector<16x8xf32>
    %776 = arith.truncf %775 : vector<16x8xf32> to vector<16x8xbf16>
    %c0_449 = arith.constant 0 : index
    %c56_450 = arith.constant 56 : index
    %777 = vector.load %arg18[%c0_449, %c56_450] : memref<16x96xf32, #tpu.memory_space<vmem>>, vector<16x8xf32>
    %778 = arith.truncf %777 : vector<16x8xf32> to vector<16x8xbf16>
    %c0_451 = arith.constant 0 : index
    %c88_452 = arith.constant 88 : index
    %779 = vector.load %arg18[%c0_451, %c88_452] : memref<16x96xf32, #tpu.memory_space<vmem>>, vector<16x8xf32>
    %780 = arith.truncf %779 : vector<16x8xf32> to vector<16x8xbf16>
    %cst_453 = arith.constant dense<0.000000e+00> : vector<16x16xf32>
    %781 = tpu.matmul %776, %778, %cst_453 {dimension_numbers = #tpu.dot_dimension_numbers<[1], [1], [0], [0], [0, 0, 1, 0], [], []>} : vector<16x8xbf16>, vector<16x8xbf16>, vector<16x16xf32> -> vector<16x16xf32>
    %782 = arith.addf %781, %6 : vector<16x16xf32>
    %cst_454 = arith.constant dense<0xFF800000> : vector<16xf32>
    %783 = vector.multi_reduction <maximumf>, %782, %cst_454 [1] : vector<16x16xf32> to vector<16xf32>
    %784 = vector.shape_cast %783 : vector<16xf32> to vector<16x1xf32>
    %785 = vector.broadcast %784 : vector<16x1xf32> to vector<16x16xf32>
    %786 = arith.subf %782, %785 : vector<16x16xf32>
    %787 = math.exp %786 : vector<16x16xf32>
    %cst_455 = arith.constant dense<0.000000e+00> : vector<16xf32>
    %788 = vector.multi_reduction <add>, %787, %cst_455 [1] : vector<16x16xf32> to vector<16xf32>
    %789 = vector.shape_cast %788 : vector<16xf32> to vector<16x1xf32>
    %790 = tpu.reciprocal %789 {approx = true} : vector<16x1xf32> -> vector<16x1xf32>
    %791 = vector.broadcast %790 : vector<16x1xf32> to vector<16x16xf32>
    %792 = arith.mulf %787, %791 : vector<16x16xf32>
    %793 = arith.truncf %792 : vector<16x16xf32> to vector<16x16xbf16>
    %cst_456 = arith.constant dense<0.000000e+00> : vector<16x8xf32>
    %794 = tpu.matmul %793, %780, %cst_456 {dimension_numbers = #tpu.dot_dimension_numbers<[1], [0], [0], [1], [0, 0, 1, 1], [], []>} : vector<16x16xbf16>, vector<16x8xbf16>, vector<16x8xf32> -> vector<16x8xf32>
    %c0_457 = arith.constant 0 : index
    %c24_458 = arith.constant 24 : index
    %795 = vector.load %arg19[%c0_457, %c24_458] : memref<16x32xf32, #tpu.memory_space<vmem>>, vector<16x8xf32>
    tpu.vector_store %arg19[%c0_457, %c24_458], %794 {strides = array<i32>} : memref<16x32xf32, #tpu.memory_space<vmem>>, vector<16x8xf32>,
    %c0_459 = arith.constant 0 : index
    %c0_460 = arith.constant 0 : index
    %796 = vector.load %arg19[%c0_459, %c0_460] : memref<16x32xf32, #tpu.memory_space<vmem>>, vector<16x32xf32>
    %797 = arith.truncf %796 : vector<16x32xf32> to vector<16x32xbf16>
    %c4_461 = arith.constant 4 : index
    %c0_462 = arith.constant 0 : index
    %c0_463 = arith.constant 0 : index
    %798 = vector.load %arg5[%c4_461, %c0_462, %c0_463] : memref<6x32x32xbf16, #tpu.memory_space<vmem>>, vector<1x32x32xbf16>
    %799 = vector.shape_cast %798 : vector<1x32x32xbf16> to vector<32x32xbf16>
    %cst_464 = arith.constant dense<0.000000e+00> : vector<16x32xf32>
    %800 = tpu.matmul %797, %799, %cst_464 {dimension_numbers = #tpu.dot_dimension_numbers<[1], [0], [0], [1], [0, 0, 1, 1], [], []>} : vector<16x32xbf16>, vector<32x32xbf16>, vector<16x32xf32> -> vector<16x32xf32>
    %c4_465 = arith.constant 4 : index
    %c0_466 = arith.constant 0 : index
    %c0_467 = arith.constant 0 : index
    %801 = vector.load %arg6[%c4_465, %c0_466, %c0_467] : memref<6x1x32xf32, #tpu.memory_space<vmem>>, vector<1x1x32xf32>
    %802 = vector.shape_cast %801 : vector<1x1x32xf32> to vector<1x32xf32>
    %803 = vector.broadcast %802 : vector<1x32xf32> to vector<16x32xf32>
    %804 = arith.addf %800, %803 : vector<16x32xf32>
    %805 = arith.addf %804, %702 : vector<16x32xf32>
    %c4_468 = arith.constant 4 : index
    %c0_469 = arith.constant 0 : index
    %c0_470 = arith.constant 0 : index
    %806 = vector.load %arg7[%c4_468, %c0_469, %c0_470] : memref<6x1x32xf32, #tpu.memory_space<vmem>>, vector<1x1x32xf32>
    %807 = vector.shape_cast %806 : vector<1x1x32xf32> to vector<1x32xf32>
    %c4_471 = arith.constant 4 : index
    %c0_472 = arith.constant 0 : index
    %c0_473 = arith.constant 0 : index
    %808 = vector.load %arg8[%c4_471, %c0_472, %c0_473] : memref<6x1x32xf32, #tpu.memory_space<vmem>>, vector<1x1x32xf32>
    %809 = vector.shape_cast %808 : vector<1x1x32xf32> to vector<1x32xf32>
    %cst_474 = arith.constant dense<0.000000e+00> : vector<16xf32>
    %810 = vector.multi_reduction <add>, %805, %cst_474 [1] : vector<16x32xf32> to vector<16xf32>
    %811 = vector.shape_cast %810 : vector<16xf32> to vector<16x1xf32>
    %cst_475 = arith.constant 3.200000e+01 : f32
    %812 = vector.broadcast %cst_475 : f32 to vector<16x1xf32>
    %813 = arith.divf %811, %812 : vector<16x1xf32>
    %814 = vector.broadcast %813 : vector<16x1xf32> to vector<16x32xf32>
    %815 = arith.subf %805, %814 : vector<16x32xf32>
    %816 = arith.mulf %815, %815 : vector<16x32xf32>
    %cst_476 = arith.constant dense<0.000000e+00> : vector<16xf32>
    %817 = vector.multi_reduction <add>, %816, %cst_476 [1] : vector<16x32xf32> to vector<16xf32>
    %818 = vector.shape_cast %817 : vector<16xf32> to vector<16x1xf32>
    %cst_477 = arith.constant 3.200000e+01 : f32
    %819 = vector.broadcast %cst_477 : f32 to vector<16x1xf32>
    %820 = arith.divf %818, %819 : vector<16x1xf32>
    %821 = vector.broadcast %813 : vector<16x1xf32> to vector<16x32xf32>
    %822 = arith.subf %805, %821 : vector<16x32xf32>
    %cst_478 = arith.constant 9.99999974E-6 : f32
    %823 = vector.broadcast %cst_478 : f32 to vector<16x1xf32>
    %824 = arith.addf %820, %823 : vector<16x1xf32>
    %825 = math.rsqrt %824 : vector<16x1xf32>
    %826 = vector.broadcast %825 : vector<16x1xf32> to vector<16x32xf32>
    %827 = arith.mulf %822, %826 : vector<16x32xf32>
    %828 = vector.broadcast %807 : vector<1x32xf32> to vector<16x32xf32>
    %829 = arith.mulf %827, %828 : vector<16x32xf32>
    %830 = vector.broadcast %809 : vector<1x32xf32> to vector<16x32xf32>
    %831 = arith.addf %829, %830 : vector<16x32xf32>
    %832 = arith.truncf %831 : vector<16x32xf32> to vector<16x32xbf16>
    %c4_479 = arith.constant 4 : index
    %c0_480 = arith.constant 0 : index
    %c0_481 = arith.constant 0 : index
    %833 = vector.load %arg9[%c4_479, %c0_480, %c0_481] : memref<6x32x128xbf16, #tpu.memory_space<vmem>>, vector<1x32x128xbf16>
    %834 = vector.shape_cast %833 : vector<1x32x128xbf16> to vector<32x128xbf16>
    %cst_482 = arith.constant dense<0.000000e+00> : vector<16x128xf32>
    %835 = tpu.matmul %832, %834, %cst_482 {dimension_numbers = #tpu.dot_dimension_numbers<[1], [0], [0], [1], [0, 0, 1, 1], [], []>} : vector<16x32xbf16>, vector<32x128xbf16>, vector<16x128xf32> -> vector<16x128xf32>
    %c4_483 = arith.constant 4 : index
    %c0_484 = arith.constant 0 : index
    %c0_485 = arith.constant 0 : index
    %836 = vector.load %arg10[%c4_483, %c0_484, %c0_485] : memref<6x1x128xf32, #tpu.memory_space<vmem>>, vector<1x1x128xf32>
    %837 = vector.shape_cast %836 : vector<1x1x128xf32> to vector<1x128xf32>
    %838 = vector.broadcast %837 : vector<1x128xf32> to vector<16x128xf32>
    %839 = arith.addf %835, %838 : vector<16x128xf32>
    %cst_486 = arith.constant 0.000000e+00 : f32
    %840 = vector.broadcast %cst_486 : f32 to vector<16x128xf32>
    %841 = arith.maximumf %839, %840 : vector<16x128xf32>
    %842 = arith.truncf %841 : vector<16x128xf32> to vector<16x128xbf16>
    %c4_487 = arith.constant 4 : index
    %c0_488 = arith.constant 0 : index
    %c0_489 = arith.constant 0 : index
    %843 = vector.load %arg11[%c4_487, %c0_488, %c0_489] : memref<6x128x32xbf16, #tpu.memory_space<vmem>>, vector<1x128x32xbf16>
    %844 = vector.shape_cast %843 : vector<1x128x32xbf16> to vector<128x32xbf16>
    %cst_490 = arith.constant dense<0.000000e+00> : vector<16x32xf32>
    %845 = tpu.matmul %842, %844, %cst_490 {dimension_numbers = #tpu.dot_dimension_numbers<[1], [0], [0], [1], [0, 0, 1, 1], [], []>} : vector<16x128xbf16>, vector<128x32xbf16>, vector<16x32xf32> -> vector<16x32xf32>
    %c4_491 = arith.constant 4 : index
    %c0_492 = arith.constant 0 : index
    %c0_493 = arith.constant 0 : index
    %846 = vector.load %arg12[%c4_491, %c0_492, %c0_493] : memref<6x1x32xf32, #tpu.memory_space<vmem>>, vector<1x1x32xf32>
    %847 = vector.shape_cast %846 : vector<1x1x32xf32> to vector<1x32xf32>
    %848 = vector.broadcast %847 : vector<1x32xf32> to vector<16x32xf32>
    %849 = arith.addf %845, %848 : vector<16x32xf32>
    %850 = arith.addf %849, %831 : vector<16x32xf32>
    %c4_494 = arith.constant 4 : index
    %c0_495 = arith.constant 0 : index
    %c0_496 = arith.constant 0 : index
    %851 = vector.load %arg13[%c4_494, %c0_495, %c0_496] : memref<6x1x32xf32, #tpu.memory_space<vmem>>, vector<1x1x32xf32>
    %852 = vector.shape_cast %851 : vector<1x1x32xf32> to vector<1x32xf32>
    %c4_497 = arith.constant 4 : index
    %c0_498 = arith.constant 0 : index
    %c0_499 = arith.constant 0 : index
    %853 = vector.load %arg14[%c4_497, %c0_498, %c0_499] : memref<6x1x32xf32, #tpu.memory_space<vmem>>, vector<1x1x32xf32>
    %854 = vector.shape_cast %853 : vector<1x1x32xf32> to vector<1x32xf32>
    %cst_500 = arith.constant dense<0.000000e+00> : vector<16xf32>
    %855 = vector.multi_reduction <add>, %850, %cst_500 [1] : vector<16x32xf32> to vector<16xf32>
    %856 = vector.shape_cast %855 : vector<16xf32> to vector<16x1xf32>
    %cst_501 = arith.constant 3.200000e+01 : f32
    %857 = vector.broadcast %cst_501 : f32 to vector<16x1xf32>
    %858 = arith.divf %856, %857 : vector<16x1xf32>
    %859 = vector.broadcast %858 : vector<16x1xf32> to vector<16x32xf32>
    %860 = arith.subf %850, %859 : vector<16x32xf32>
    %861 = arith.mulf %860, %860 : vector<16x32xf32>
    %cst_502 = arith.constant dense<0.000000e+00> : vector<16xf32>
    %862 = vector.multi_reduction <add>, %861, %cst_502 [1] : vector<16x32xf32> to vector<16xf32>
    %863 = vector.shape_cast %862 : vector<16xf32> to vector<16x1xf32>
    %cst_503 = arith.constant 3.200000e+01 : f32
    %864 = vector.broadcast %cst_503 : f32 to vector<16x1xf32>
    %865 = arith.divf %863, %864 : vector<16x1xf32>
    %866 = vector.broadcast %858 : vector<16x1xf32> to vector<16x32xf32>
    %867 = arith.subf %850, %866 : vector<16x32xf32>
    %cst_504 = arith.constant 9.99999974E-6 : f32
    %868 = vector.broadcast %cst_504 : f32 to vector<16x1xf32>
    %869 = arith.addf %865, %868 : vector<16x1xf32>
    %870 = math.rsqrt %869 : vector<16x1xf32>
    %871 = vector.broadcast %870 : vector<16x1xf32> to vector<16x32xf32>
    %872 = arith.mulf %867, %871 : vector<16x32xf32>
    %873 = vector.broadcast %852 : vector<1x32xf32> to vector<16x32xf32>
    %874 = arith.mulf %872, %873 : vector<16x32xf32>
    %875 = vector.broadcast %854 : vector<1x32xf32> to vector<16x32xf32>
    %876 = arith.addf %874, %875 : vector<16x32xf32>
    %877 = arith.truncf %876 : vector<16x32xf32> to vector<16x32xbf16>
    %c5 = arith.constant 5 : index
    %c0_505 = arith.constant 0 : index
    %c0_506 = arith.constant 0 : index
    %878 = vector.load %arg3[%c5, %c0_505, %c0_506] : memref<6x32x96xbf16, #tpu.memory_space<vmem>>, vector<1x32x96xbf16>
    %879 = vector.shape_cast %878 : vector<1x32x96xbf16> to vector<32x96xbf16>
    %cst_507 = arith.constant dense<0.000000e+00> : vector<16x96xf32>
    %880 = tpu.matmul %877, %879, %cst_507 {dimension_numbers = #tpu.dot_dimension_numbers<[1], [0], [0], [1], [0, 0, 1, 1], [], []>} : vector<16x32xbf16>, vector<32x96xbf16>, vector<16x96xf32> -> vector<16x96xf32>
    %c5_508 = arith.constant 5 : index
    %c0_509 = arith.constant 0 : index
    %c0_510 = arith.constant 0 : index
    %881 = vector.load %arg4[%c5_508, %c0_509, %c0_510] : memref<6x1x96xf32, #tpu.memory_space<vmem>>, vector<1x1x96xf32>
    %882 = vector.shape_cast %881 : vector<1x1x96xf32> to vector<1x96xf32>
    %883 = vector.broadcast %882 : vector<1x96xf32> to vector<16x96xf32>
    %884 = arith.addf %880, %883 : vector<16x96xf32>
    %c0_511 = arith.constant 0 : index
    %c0_512 = arith.constant 0 : index
    %885 = vector.load %arg18[%c0_511, %c0_512] : memref<16x96xf32, #tpu.memory_space<vmem>>, vector<16x96xf32>
    tpu.vector_store %arg18[%c0_511, %c0_512], %884 {strides = array<i32>} : memref<16x96xf32, #tpu.memory_space<vmem>>, vector<16x96xf32>,
    %c0_513 = arith.constant 0 : index
    %c0_514 = arith.constant 0 : index
    %886 = vector.load %arg18[%c0_513, %c0_514] : memref<16x96xf32, #tpu.memory_space<vmem>>, vector<16x8xf32>
    %887 = arith.truncf %886 : vector<16x8xf32> to vector<16x8xbf16>
    %c0_515 = arith.constant 0 : index
    %c32_516 = arith.constant 32 : index
    %888 = vector.load %arg18[%c0_515, %c32_516] : memref<16x96xf32, #tpu.memory_space<vmem>>, vector<16x8xf32>
    %889 = arith.truncf %888 : vector<16x8xf32> to vector<16x8xbf16>
    %c0_517 = arith.constant 0 : index
    %c64_518 = arith.constant 64 : index
    %890 = vector.load %arg18[%c0_517, %c64_518] : memref<16x96xf32, #tpu.memory_space<vmem>>, vector<16x8xf32>
    %891 = arith.truncf %890 : vector<16x8xf32> to vector<16x8xbf16>
    %cst_519 = arith.constant dense<0.000000e+00> : vector<16x16xf32>
    %892 = tpu.matmul %887, %889, %cst_519 {dimension_numbers = #tpu.dot_dimension_numbers<[1], [1], [0], [0], [0, 0, 1, 0], [], []>} : vector<16x8xbf16>, vector<16x8xbf16>, vector<16x16xf32> -> vector<16x16xf32>
    %893 = arith.addf %892, %6 : vector<16x16xf32>
    %cst_520 = arith.constant dense<0xFF800000> : vector<16xf32>
    %894 = vector.multi_reduction <maximumf>, %893, %cst_520 [1] : vector<16x16xf32> to vector<16xf32>
    %895 = vector.shape_cast %894 : vector<16xf32> to vector<16x1xf32>
    %896 = vector.broadcast %895 : vector<16x1xf32> to vector<16x16xf32>
    %897 = arith.subf %893, %896 : vector<16x16xf32>
    %898 = math.exp %897 : vector<16x16xf32>
    %cst_521 = arith.constant dense<0.000000e+00> : vector<16xf32>
    %899 = vector.multi_reduction <add>, %898, %cst_521 [1] : vector<16x16xf32> to vector<16xf32>
    %900 = vector.shape_cast %899 : vector<16xf32> to vector<16x1xf32>
    %901 = tpu.reciprocal %900 {approx = true} : vector<16x1xf32> -> vector<16x1xf32>
    %902 = vector.broadcast %901 : vector<16x1xf32> to vector<16x16xf32>
    %903 = arith.mulf %898, %902 : vector<16x16xf32>
    %904 = arith.truncf %903 : vector<16x16xf32> to vector<16x16xbf16>
    %cst_522 = arith.constant dense<0.000000e+00> : vector<16x8xf32>
    %905 = tpu.matmul %904, %891, %cst_522 {dimension_numbers = #tpu.dot_dimension_numbers<[1], [0], [0], [1], [0, 0, 1, 1], [], []>} : vector<16x16xbf16>, vector<16x8xbf16>, vector<16x8xf32> -> vector<16x8xf32>
    %c0_523 = arith.constant 0 : index
    %c0_524 = arith.constant 0 : index
    %906 = vector.load %arg19[%c0_523, %c0_524] : memref<16x32xf32, #tpu.memory_space<vmem>>, vector<16x8xf32>
    tpu.vector_store %arg19[%c0_523, %c0_524], %905 {strides = array<i32>} : memref<16x32xf32, #tpu.memory_space<vmem>>, vector<16x8xf32>,
    %c0_525 = arith.constant 0 : index
    %c8_526 = arith.constant 8 : index
    %907 = vector.load %arg18[%c0_525, %c8_526] : memref<16x96xf32, #tpu.memory_space<vmem>>, vector<16x8xf32>
    %908 = arith.truncf %907 : vector<16x8xf32> to vector<16x8xbf16>
    %c0_527 = arith.constant 0 : index
    %c40_528 = arith.constant 40 : index
    %909 = vector.load %arg18[%c0_527, %c40_528] : memref<16x96xf32, #tpu.memory_space<vmem>>, vector<16x8xf32>
    %910 = arith.truncf %909 : vector<16x8xf32> to vector<16x8xbf16>
    %c0_529 = arith.constant 0 : index
    %c72_530 = arith.constant 72 : index
    %911 = vector.load %arg18[%c0_529, %c72_530] : memref<16x96xf32, #tpu.memory_space<vmem>>, vector<16x8xf32>
    %912 = arith.truncf %911 : vector<16x8xf32> to vector<16x8xbf16>
    %cst_531 = arith.constant dense<0.000000e+00> : vector<16x16xf32>
    %913 = tpu.matmul %908, %910, %cst_531 {dimension_numbers = #tpu.dot_dimension_numbers<[1], [1], [0], [0], [0, 0, 1, 0], [], []>} : vector<16x8xbf16>, vector<16x8xbf16>, vector<16x16xf32> -> vector<16x16xf32>
    %914 = arith.addf %913, %6 : vector<16x16xf32>
    %cst_532 = arith.constant dense<0xFF800000> : vector<16xf32>
    %915 = vector.multi_reduction <maximumf>, %914, %cst_532 [1] : vector<16x16xf32> to vector<16xf32>
    %916 = vector.shape_cast %915 : vector<16xf32> to vector<16x1xf32>
    %917 = vector.broadcast %916 : vector<16x1xf32> to vector<16x16xf32>
    %918 = arith.subf %914, %917 : vector<16x16xf32>
    %919 = math.exp %918 : vector<16x16xf32>
    %cst_533 = arith.constant dense<0.000000e+00> : vector<16xf32>
    %920 = vector.multi_reduction <add>, %919, %cst_533 [1] : vector<16x16xf32> to vector<16xf32>
    %921 = vector.shape_cast %920 : vector<16xf32> to vector<16x1xf32>
    %922 = tpu.reciprocal %921 {approx = true} : vector<16x1xf32> -> vector<16x1xf32>
    %923 = vector.broadcast %922 : vector<16x1xf32> to vector<16x16xf32>
    %924 = arith.mulf %919, %923 : vector<16x16xf32>
    %925 = arith.truncf %924 : vector<16x16xf32> to vector<16x16xbf16>
    %cst_534 = arith.constant dense<0.000000e+00> : vector<16x8xf32>
    %926 = tpu.matmul %925, %912, %cst_534 {dimension_numbers = #tpu.dot_dimension_numbers<[1], [0], [0], [1], [0, 0, 1, 1], [], []>} : vector<16x16xbf16>, vector<16x8xbf16>, vector<16x8xf32> -> vector<16x8xf32>
    %c0_535 = arith.constant 0 : index
    %c8_536 = arith.constant 8 : index
    %927 = vector.load %arg19[%c0_535, %c8_536] : memref<16x32xf32, #tpu.memory_space<vmem>>, vector<16x8xf32>
    tpu.vector_store %arg19[%c0_535, %c8_536], %926 {strides = array<i32>} : memref<16x32xf32, #tpu.memory_space<vmem>>, vector<16x8xf32>,
    %c0_537 = arith.constant 0 : index
    %c16_538 = arith.constant 16 : index
    %928 = vector.load %arg18[%c0_537, %c16_538] : memref<16x96xf32, #tpu.memory_space<vmem>>, vector<16x8xf32>
    %929 = arith.truncf %928 : vector<16x8xf32> to vector<16x8xbf16>
    %c0_539 = arith.constant 0 : index
    %c48_540 = arith.constant 48 : index
    %930 = vector.load %arg18[%c0_539, %c48_540] : memref<16x96xf32, #tpu.memory_space<vmem>>, vector<16x8xf32>
    %931 = arith.truncf %930 : vector<16x8xf32> to vector<16x8xbf16>
    %c0_541 = arith.constant 0 : index
    %c80_542 = arith.constant 80 : index
    %932 = vector.load %arg18[%c0_541, %c80_542] : memref<16x96xf32, #tpu.memory_space<vmem>>, vector<16x8xf32>
    %933 = arith.truncf %932 : vector<16x8xf32> to vector<16x8xbf16>
    %cst_543 = arith.constant dense<0.000000e+00> : vector<16x16xf32>
    %934 = tpu.matmul %929, %931, %cst_543 {dimension_numbers = #tpu.dot_dimension_numbers<[1], [1], [0], [0], [0, 0, 1, 0], [], []>} : vector<16x8xbf16>, vector<16x8xbf16>, vector<16x16xf32> -> vector<16x16xf32>
    %935 = arith.addf %934, %6 : vector<16x16xf32>
    %cst_544 = arith.constant dense<0xFF800000> : vector<16xf32>
    %936 = vector.multi_reduction <maximumf>, %935, %cst_544 [1] : vector<16x16xf32> to vector<16xf32>
    %937 = vector.shape_cast %936 : vector<16xf32> to vector<16x1xf32>
    %938 = vector.broadcast %937 : vector<16x1xf32> to vector<16x16xf32>
    %939 = arith.subf %935, %938 : vector<16x16xf32>
    %940 = math.exp %939 : vector<16x16xf32>
    %cst_545 = arith.constant dense<0.000000e+00> : vector<16xf32>
    %941 = vector.multi_reduction <add>, %940, %cst_545 [1] : vector<16x16xf32> to vector<16xf32>
    %942 = vector.shape_cast %941 : vector<16xf32> to vector<16x1xf32>
    %943 = tpu.reciprocal %942 {approx = true} : vector<16x1xf32> -> vector<16x1xf32>
    %944 = vector.broadcast %943 : vector<16x1xf32> to vector<16x16xf32>
    %945 = arith.mulf %940, %944 : vector<16x16xf32>
    %946 = arith.truncf %945 : vector<16x16xf32> to vector<16x16xbf16>
    %cst_546 = arith.constant dense<0.000000e+00> : vector<16x8xf32>
    %947 = tpu.matmul %946, %933, %cst_546 {dimension_numbers = #tpu.dot_dimension_numbers<[1], [0], [0], [1], [0, 0, 1, 1], [], []>} : vector<16x16xbf16>, vector<16x8xbf16>, vector<16x8xf32> -> vector<16x8xf32>
    %c0_547 = arith.constant 0 : index
    %c16_548 = arith.constant 16 : index
    %948 = vector.load %arg19[%c0_547, %c16_548] : memref<16x32xf32, #tpu.memory_space<vmem>>, vector<16x8xf32>
    tpu.vector_store %arg19[%c0_547, %c16_548], %947 {strides = array<i32>} : memref<16x32xf32, #tpu.memory_space<vmem>>, vector<16x8xf32>,
    %c0_549 = arith.constant 0 : index
    %c24_550 = arith.constant 24 : index
    %949 = vector.load %arg18[%c0_549, %c24_550] : memref<16x96xf32, #tpu.memory_space<vmem>>, vector<16x8xf32>
    %950 = arith.truncf %949 : vector<16x8xf32> to vector<16x8xbf16>
    %c0_551 = arith.constant 0 : index
    %c56_552 = arith.constant 56 : index
    %951 = vector.load %arg18[%c0_551, %c56_552] : memref<16x96xf32, #tpu.memory_space<vmem>>, vector<16x8xf32>
    %952 = arith.truncf %951 : vector<16x8xf32> to vector<16x8xbf16>
    %c0_553 = arith.constant 0 : index
    %c88_554 = arith.constant 88 : index
    %953 = vector.load %arg18[%c0_553, %c88_554] : memref<16x96xf32, #tpu.memory_space<vmem>>, vector<16x8xf32>
    %954 = arith.truncf %953 : vector<16x8xf32> to vector<16x8xbf16>
    %cst_555 = arith.constant dense<0.000000e+00> : vector<16x16xf32>
    %955 = tpu.matmul %950, %952, %cst_555 {dimension_numbers = #tpu.dot_dimension_numbers<[1], [1], [0], [0], [0, 0, 1, 0], [], []>} : vector<16x8xbf16>, vector<16x8xbf16>, vector<16x16xf32> -> vector<16x16xf32>
    %956 = arith.addf %955, %6 : vector<16x16xf32>
    %cst_556 = arith.constant dense<0xFF800000> : vector<16xf32>
    %957 = vector.multi_reduction <maximumf>, %956, %cst_556 [1] : vector<16x16xf32> to vector<16xf32>
    %958 = vector.shape_cast %957 : vector<16xf32> to vector<16x1xf32>
    %959 = vector.broadcast %958 : vector<16x1xf32> to vector<16x16xf32>
    %960 = arith.subf %956, %959 : vector<16x16xf32>
    %961 = math.exp %960 : vector<16x16xf32>
    %cst_557 = arith.constant dense<0.000000e+00> : vector<16xf32>
    %962 = vector.multi_reduction <add>, %961, %cst_557 [1] : vector<16x16xf32> to vector<16xf32>
    %963 = vector.shape_cast %962 : vector<16xf32> to vector<16x1xf32>
    %964 = tpu.reciprocal %963 {approx = true} : vector<16x1xf32> -> vector<16x1xf32>
    %965 = vector.broadcast %964 : vector<16x1xf32> to vector<16x16xf32>
    %966 = arith.mulf %961, %965 : vector<16x16xf32>
    %967 = arith.truncf %966 : vector<16x16xf32> to vector<16x16xbf16>
    %cst_558 = arith.constant dense<0.000000e+00> : vector<16x8xf32>
    %968 = tpu.matmul %967, %954, %cst_558 {dimension_numbers = #tpu.dot_dimension_numbers<[1], [0], [0], [1], [0, 0, 1, 1], [], []>} : vector<16x16xbf16>, vector<16x8xbf16>, vector<16x8xf32> -> vector<16x8xf32>
    %c0_559 = arith.constant 0 : index
    %c24_560 = arith.constant 24 : index
    %969 = vector.load %arg19[%c0_559, %c24_560] : memref<16x32xf32, #tpu.memory_space<vmem>>, vector<16x8xf32>
    tpu.vector_store %arg19[%c0_559, %c24_560], %968 {strides = array<i32>} : memref<16x32xf32, #tpu.memory_space<vmem>>, vector<16x8xf32>,
    %c0_561 = arith.constant 0 : index
    %c0_562 = arith.constant 0 : index
    %970 = vector.load %arg19[%c0_561, %c0_562] : memref<16x32xf32, #tpu.memory_space<vmem>>, vector<16x32xf32>
    %971 = arith.truncf %970 : vector<16x32xf32> to vector<16x32xbf16>
    %c5_563 = arith.constant 5 : index
    %c0_564 = arith.constant 0 : index
    %c0_565 = arith.constant 0 : index
    %972 = vector.load %arg5[%c5_563, %c0_564, %c0_565] : memref<6x32x32xbf16, #tpu.memory_space<vmem>>, vector<1x32x32xbf16>
    %973 = vector.shape_cast %972 : vector<1x32x32xbf16> to vector<32x32xbf16>
    %cst_566 = arith.constant dense<0.000000e+00> : vector<16x32xf32>
    %974 = tpu.matmul %971, %973, %cst_566 {dimension_numbers = #tpu.dot_dimension_numbers<[1], [0], [0], [1], [0, 0, 1, 1], [], []>} : vector<16x32xbf16>, vector<32x32xbf16>, vector<16x32xf32> -> vector<16x32xf32>
    %c5_567 = arith.constant 5 : index
    %c0_568 = arith.constant 0 : index
    %c0_569 = arith.constant 0 : index
    %975 = vector.load %arg6[%c5_567, %c0_568, %c0_569] : memref<6x1x32xf32, #tpu.memory_space<vmem>>, vector<1x1x32xf32>
    %976 = vector.shape_cast %975 : vector<1x1x32xf32> to vector<1x32xf32>
    %977 = vector.broadcast %976 : vector<1x32xf32> to vector<16x32xf32>
    %978 = arith.addf %974, %977 : vector<16x32xf32>
    %979 = arith.addf %978, %876 : vector<16x32xf32>
    %c5_570 = arith.constant 5 : index
    %c0_571 = arith.constant 0 : index
    %c0_572 = arith.constant 0 : index
    %980 = vector.load %arg7[%c5_570, %c0_571, %c0_572] : memref<6x1x32xf32, #tpu.memory_space<vmem>>, vector<1x1x32xf32>
    %981 = vector.shape_cast %980 : vector<1x1x32xf32> to vector<1x32xf32>
    %c5_573 = arith.constant 5 : index
    %c0_574 = arith.constant 0 : index
    %c0_575 = arith.constant 0 : index
    %982 = vector.load %arg8[%c5_573, %c0_574, %c0_575] : memref<6x1x32xf32, #tpu.memory_space<vmem>>, vector<1x1x32xf32>
    %983 = vector.shape_cast %982 : vector<1x1x32xf32> to vector<1x32xf32>
    %cst_576 = arith.constant dense<0.000000e+00> : vector<16xf32>
    %984 = vector.multi_reduction <add>, %979, %cst_576 [1] : vector<16x32xf32> to vector<16xf32>
    %985 = vector.shape_cast %984 : vector<16xf32> to vector<16x1xf32>
    %cst_577 = arith.constant 3.200000e+01 : f32
    %986 = vector.broadcast %cst_577 : f32 to vector<16x1xf32>
    %987 = arith.divf %985, %986 : vector<16x1xf32>
    %988 = vector.broadcast %987 : vector<16x1xf32> to vector<16x32xf32>
    %989 = arith.subf %979, %988 : vector<16x32xf32>
    %990 = arith.mulf %989, %989 : vector<16x32xf32>
    %cst_578 = arith.constant dense<0.000000e+00> : vector<16xf32>
    %991 = vector.multi_reduction <add>, %990, %cst_578 [1] : vector<16x32xf32> to vector<16xf32>
    %992 = vector.shape_cast %991 : vector<16xf32> to vector<16x1xf32>
    %cst_579 = arith.constant 3.200000e+01 : f32
    %993 = vector.broadcast %cst_579 : f32 to vector<16x1xf32>
    %994 = arith.divf %992, %993 : vector<16x1xf32>
    %995 = vector.broadcast %987 : vector<16x1xf32> to vector<16x32xf32>
    %996 = arith.subf %979, %995 : vector<16x32xf32>
    %cst_580 = arith.constant 9.99999974E-6 : f32
    %997 = vector.broadcast %cst_580 : f32 to vector<16x1xf32>
    %998 = arith.addf %994, %997 : vector<16x1xf32>
    %999 = math.rsqrt %998 : vector<16x1xf32>
    %1000 = vector.broadcast %999 : vector<16x1xf32> to vector<16x32xf32>
    %1001 = arith.mulf %996, %1000 : vector<16x32xf32>
    %1002 = vector.broadcast %981 : vector<1x32xf32> to vector<16x32xf32>
    %1003 = arith.mulf %1001, %1002 : vector<16x32xf32>
    %1004 = vector.broadcast %983 : vector<1x32xf32> to vector<16x32xf32>
    %1005 = arith.addf %1003, %1004 : vector<16x32xf32>
    %1006 = arith.truncf %1005 : vector<16x32xf32> to vector<16x32xbf16>
    %c5_581 = arith.constant 5 : index
    %c0_582 = arith.constant 0 : index
    %c0_583 = arith.constant 0 : index
    %1007 = vector.load %arg9[%c5_581, %c0_582, %c0_583] : memref<6x32x128xbf16, #tpu.memory_space<vmem>>, vector<1x32x128xbf16>
    %1008 = vector.shape_cast %1007 : vector<1x32x128xbf16> to vector<32x128xbf16>
    %cst_584 = arith.constant dense<0.000000e+00> : vector<16x128xf32>
    %1009 = tpu.matmul %1006, %1008, %cst_584 {dimension_numbers = #tpu.dot_dimension_numbers<[1], [0], [0], [1], [0, 0, 1, 1], [], []>} : vector<16x32xbf16>, vector<32x128xbf16>, vector<16x128xf32> -> vector<16x128xf32>
    %c5_585 = arith.constant 5 : index
    %c0_586 = arith.constant 0 : index
    %c0_587 = arith.constant 0 : index
    %1010 = vector.load %arg10[%c5_585, %c0_586, %c0_587] : memref<6x1x128xf32, #tpu.memory_space<vmem>>, vector<1x1x128xf32>
    %1011 = vector.shape_cast %1010 : vector<1x1x128xf32> to vector<1x128xf32>
    %1012 = vector.broadcast %1011 : vector<1x128xf32> to vector<16x128xf32>
    %1013 = arith.addf %1009, %1012 : vector<16x128xf32>
    %cst_588 = arith.constant 0.000000e+00 : f32
    %1014 = vector.broadcast %cst_588 : f32 to vector<16x128xf32>
    %1015 = arith.maximumf %1013, %1014 : vector<16x128xf32>
    %1016 = arith.truncf %1015 : vector<16x128xf32> to vector<16x128xbf16>
    %c5_589 = arith.constant 5 : index
    %c0_590 = arith.constant 0 : index
    %c0_591 = arith.constant 0 : index
    %1017 = vector.load %arg11[%c5_589, %c0_590, %c0_591] : memref<6x128x32xbf16, #tpu.memory_space<vmem>>, vector<1x128x32xbf16>
    %1018 = vector.shape_cast %1017 : vector<1x128x32xbf16> to vector<128x32xbf16>
    %cst_592 = arith.constant dense<0.000000e+00> : vector<16x32xf32>
    %1019 = tpu.matmul %1016, %1018, %cst_592 {dimension_numbers = #tpu.dot_dimension_numbers<[1], [0], [0], [1], [0, 0, 1, 1], [], []>} : vector<16x128xbf16>, vector<128x32xbf16>, vector<16x32xf32> -> vector<16x32xf32>
    %c5_593 = arith.constant 5 : index
    %c0_594 = arith.constant 0 : index
    %c0_595 = arith.constant 0 : index
    %1020 = vector.load %arg12[%c5_593, %c0_594, %c0_595] : memref<6x1x32xf32, #tpu.memory_space<vmem>>, vector<1x1x32xf32>
    %1021 = vector.shape_cast %1020 : vector<1x1x32xf32> to vector<1x32xf32>
    %1022 = vector.broadcast %1021 : vector<1x32xf32> to vector<16x32xf32>
    %1023 = arith.addf %1019, %1022 : vector<16x32xf32>
    %1024 = arith.addf %1023, %1005 : vector<16x32xf32>
    %c5_596 = arith.constant 5 : index
    %c0_597 = arith.constant 0 : index
    %c0_598 = arith.constant 0 : index
    %1025 = vector.load %arg13[%c5_596, %c0_597, %c0_598] : memref<6x1x32xf32, #tpu.memory_space<vmem>>, vector<1x1x32xf32>
    %1026 = vector.shape_cast %1025 : vector<1x1x32xf32> to vector<1x32xf32>
    %c5_599 = arith.constant 5 : index
    %c0_600 = arith.constant 0 : index
    %c0_601 = arith.constant 0 : index
    %1027 = vector.load %arg14[%c5_599, %c0_600, %c0_601] : memref<6x1x32xf32, #tpu.memory_space<vmem>>, vector<1x1x32xf32>
    %1028 = vector.shape_cast %1027 : vector<1x1x32xf32> to vector<1x32xf32>
    %cst_602 = arith.constant dense<0.000000e+00> : vector<16xf32>
    %1029 = vector.multi_reduction <add>, %1024, %cst_602 [1] : vector<16x32xf32> to vector<16xf32>
    %1030 = vector.shape_cast %1029 : vector<16xf32> to vector<16x1xf32>
    %cst_603 = arith.constant 3.200000e+01 : f32
    %1031 = vector.broadcast %cst_603 : f32 to vector<16x1xf32>
    %1032 = arith.divf %1030, %1031 : vector<16x1xf32>
    %1033 = vector.broadcast %1032 : vector<16x1xf32> to vector<16x32xf32>
    %1034 = arith.subf %1024, %1033 : vector<16x32xf32>
    %1035 = arith.mulf %1034, %1034 : vector<16x32xf32>
    %cst_604 = arith.constant dense<0.000000e+00> : vector<16xf32>
    %1036 = vector.multi_reduction <add>, %1035, %cst_604 [1] : vector<16x32xf32> to vector<16xf32>
    %1037 = vector.shape_cast %1036 : vector<16xf32> to vector<16x1xf32>
    %cst_605 = arith.constant 3.200000e+01 : f32
    %1038 = vector.broadcast %cst_605 : f32 to vector<16x1xf32>
    %1039 = arith.divf %1037, %1038 : vector<16x1xf32>
    %1040 = vector.broadcast %1032 : vector<16x1xf32> to vector<16x32xf32>
    %1041 = arith.subf %1024, %1040 : vector<16x32xf32>
    %cst_606 = arith.constant 9.99999974E-6 : f32
    %1042 = vector.broadcast %cst_606 : f32 to vector<16x1xf32>
    %1043 = arith.addf %1039, %1042 : vector<16x1xf32>
    %1044 = math.rsqrt %1043 : vector<16x1xf32>
    %1045 = vector.broadcast %1044 : vector<16x1xf32> to vector<16x32xf32>
    %1046 = arith.mulf %1041, %1045 : vector<16x32xf32>
    %1047 = vector.broadcast %1026 : vector<1x32xf32> to vector<16x32xf32>
    %1048 = arith.mulf %1046, %1047 : vector<16x32xf32>
    %1049 = vector.broadcast %1028 : vector<1x32xf32> to vector<16x32xf32>
    %1050 = arith.addf %1048, %1049 : vector<16x32xf32>
    %1051 = arith.truncf %1050 : vector<16x32xf32> to vector<16x32xbf16>
    %c0_607 = arith.constant 0 : index
    %c0_608 = arith.constant 0 : index
    %1052 = vector.load %arg15[%c0_607, %c0_608] : memref<32x128xbf16, #tpu.memory_space<vmem>>, vector<32x128xbf16>
    %cst_609 = arith.constant dense<0.000000e+00> : vector<16x128xf32>
    %1053 = tpu.matmul %1051, %1052, %cst_609 {dimension_numbers = #tpu.dot_dimension_numbers<[1], [0], [0], [1], [0, 0, 1, 1], [], []>} : vector<16x32xbf16>, vector<32x128xbf16>, vector<16x128xf32> -> vector<16x128xf32>
    %c0_610 = arith.constant 0 : index
    %c0_611 = arith.constant 0 : index
    %1054 = vector.load %arg16[%c0_610, %c0_611] : memref<1x128xf32, #tpu.memory_space<vmem>>, vector<1x128xf32>
    %1055 = vector.broadcast %1054 : vector<1x128xf32> to vector<16x128xf32>
    %1056 = arith.addf %1053, %1055 : vector<16x128xf32>
    %c0_612 = arith.constant 0 : index
    %c0_613 = arith.constant 0 : index
    %1057 = vector.load %arg17[%c0_612, %c0_613] : memref<16x128xf32, #tpu.memory_space<vmem>>, vector<16x128xf32>
    tpu.vector_store %arg17[%c0_612, %c0_613], %1056 {strides = array<i32>} : memref<16x128xf32, #tpu.memory_space<vmem>>, vector<16x128xf32>,
    return
  }
}

</mosaic_0001>

<bundles_post_ra>
// kernel: tpu_custom_call.1
= control target key start
LH: loop header
LB: loop body
LE: loop exit
PB: predicated region body
PF: predicated region fallthrough
CT: control target
= control target key end

     0   :  { %s8829_s0 = inlined_call_operand.vmem [shape: f32[2,8,32], index: 0, kind: input, shape index: {}]   ;;  %s8830_s1 = inlined_call_operand.vmem [shape: f32[8,32], index: 1, kind: input, shape index: {}]   ;;  %s8831_s2 = inlined_call_operand.vmem [shape: f32[16,16], index: 2, kind: input, shape index: {}]   ;;  %s8832_s3 = inlined_call_operand.vmem [shape: bf16[6,32,96], index: 3, kind: input, shape index: {}]   ;;  %s8833_s4 = inlined_call_operand.vmem [shape: f32[6,1,96], index: 4, kind: input, shape index: {}]   ;;  %s8834_s5 = inlined_call_operand.vmem [shape: bf16[6,32,32], index: 5, kind: input, shape index: {}]   ;;  %s8835_s6 = inlined_call_operand.vmem [shape: f32[6,1,32], index: 6, kind: input, shape index: {}]   ;;  %s8836_s7 = inlined_call_operand.vmem [shape: f32[6,1,32], index: 7, kind: input, shape index: {}]   ;;  %s8837_s8 = inlined_call_operand.vmem [shape: f32[6,1,32], index: 8, kind: input, shape index: {}]   ;;  %s8838_s9 = inlined_call_operand.vmem [shape: bf16[6,32,128], index: 9, kind: input, shape index: {}]   ;;  %s8839_s10 = inlined_call_operand.vmem [shape: f32[6,1,128], index: 10, kind: input, shape index: {}]   ;;  %s8840_s11 = inlined_call_operand.vmem [shape: bf16[6,128,32], index: 11, kind: input, shape index: {}]   ;;  %s8841_s12 = inlined_call_operand.vmem [shape: f32[6,1,32], index: 12, kind: input, shape index: {}]   ;;  %s8842_s13 = inlined_call_operand.vmem [shape: f32[6,1,32], index: 13, kind: input, shape index: {}]   ;;  %s8843_s14 = inlined_call_operand.vmem [shape: f32[6,1,32], index: 14, kind: input, shape index: {}]   ;;  %s8844_s15 = inlined_call_operand.vmem [shape: bf16[32,128], index: 15, kind: input, shape index: {}]   ;;  %s8845_s16 = inlined_call_operand.vmem [shape: f32[1,128], index: 16, kind: input, shape index: {}]   ;;  %s8846_s17 = inlined_call_operand.hbm [shape: f32[16,128], index: 17, kind: output, shape index: {}]  }
   0x1   :  { %8888 = sst [smem:[#allocation7_spill]] %s8829_s0 }
   0x2   :  { %8889 = sst [smem:[#allocation8_spill]] %s8830_s1 }
   0x3   :  { %8890 = sst [smem:[#allocation9_spill]] %s8831_s2 }
   0x4   :  { %8891 = sst [smem:[#allocation10_spill]] %s8834_s5 }
   0x5   :  { %8892 = sst [smem:[#allocation11_spill]] %s8835_s6 }
   0x6   :  { %8893 = sst [smem:[#allocation12_spill]] %s8844_s15 }
   0x7   :  { %8894 = sst [smem:[#allocation13_spill]] %s8845_s16 }
   0x8   :  { %8895 = sst [smem:[#allocation14_spill]] %s8846_s17 }
   0x9   :  { %v7056_v0 = vld [vmem:[%s8832_s3 + $0x8] sm:$0xff]   ;;  %v7408_v1 = vmov 0.0   ;;  %v7057_v2 = vld [vmem:[%s8832_s3] sm:$0xff]   ;;  %vm7409_vm0 = vmmov 0   ;;  %s8896_s0 = sld [smem:[#allocation7_spill]]  ;;  %vm89_vm1 = vcmask 261120  }
   0xa   :  { %6478 = vmatprep.subr.bf16.mxu1 %v7408_v1  ;;  %6492 = vmatprep.subr.bf16.mxu0 %v7408_v1  ;;  %s8897_s20 = sld [smem:[#allocation8_spill]] }
   0xb   :  { %6479 = vmatpush3.bf16.msra.mxu1 %v7056_v0  ;;  %6482 = vmatprep.mubr.msk.bf16.mxu1 %vm7409_vm0, %v7408_v1 }
   0xc   :  { %6480 = vmatprep.subr.bf16.mxu1 %v7408_v1  ;;  %6494 = vmatprep.mubr.msk.bf16.mxu0 %vm7409_vm0, %v7408_v1 }
   0xf   :  { %v58_v3 = vld [vmem:[%s8896_s0] sm:$0xff]  ;;  %v59_v4 = vld [vmem:[%s8896_s0 + $0x8] sm:$0xff]  ;;  %6481 = vmatpush3.bf16.msra.mxu1 %v7057_v2 }
  0x10   :  { %v60_v5 = vld [vmem:[%s8897_s20] sm:$0xff]  ;;  %6486 = vmatprep.subr.bf16.mxu1 %v7408_v1 }
  0x11   :  { %v7536_v6 = vadd.f32 %v60_v5, %v58_v3  ;;  %v7538_v7 = vadd.f32 %v60_v5, %v59_v4 }
  0x13   :  { %v65_v8 = vpack.c.bf16 %v7538_v7, %v7536_v6 }
  0x15   :  { %6483 = vmatmul.mubr.msk.bf16.vlgmr.msra.gmra.mxu1 %vm89_vm1, %v65_v8 }
  0x16   :  { %6488 = vmatprep.mubr.msk.bf16.mxu1 %vm7409_vm0, %v7408_v1 }
  0x17   :  { %22 = vsyncpa [#allocation5], 0  ;;  %v5889_v9 = vld [vmem:[%s8833_s4] ss:$0 sm:$0xff]  ;;  %vm134_vm2 = vcmask 785408   ;;  %s8870_s23 = smov 120  }
  0x18   :  { %s8874_s24 = smov 96   ;;  %s8868_s25 = smov 80   ;;  %vm143_vm3 = vcmask 64512   ;;  %v7593_v30 = vld [vmem:[%s8831_s2] sm:$0xff]  ;;  %vm191_vm4 = vcmask 130048   ;;  %v7599_v34 = vld [vmem:[%s8831_s2 + $0x8] sm:$0xff] }
  0x19   :  { %s8862_s26 = smov 88   ;;  %s8860_s27 = smov 72   ;;  %vm397_vm5 = vcmask 130112   ;;  %vm533_vm6 = vcmask 195712   ;;  %vm669_vm7 = vcmask 261312  }
  0x1a   :  { %s8866_s28 = smov 112   ;;  %s8864_s29 = smov 104  }
  0x1b   :  { %s8850_s1 = smov 56   ;;  %s8872_s20 = smov 64  }
  0x1c   :  { %s8858_s21 = smov 48   ;;  %s8848_s22 = smov 40  }
  0x1d   :  { %s8856_s0 = smov 8   ;;  %s8854_s19 = smov 16  }
  0x1e   :  { %s8852_s30 = smov 24   ;;  %s8900_s18 = smov 56  }
  0x1f   :  { %s8911_s16 = smov 88   ;;  %s8913_s17 = smov 24  }
  0xd5   :  { %v127_v10 = vpop.f32.mrf.mxu1 }
  0xd6   :  { %v128_v11 = vadd.f32 %v5889_v9, %v127_v10 }
  0xd7   :  { %v6484_v12 = vpop.f32.mrf.mxu1 }
  0xd8   :  { %135 = vst.msk [vmem:[#allocation2] sm:$0xff] %vm134_vm2, %v128_v11 }
  0xd9   :  { %v130_v13 = vpop.f32.mrf.mxu1 }
  0xda   :  { %v131_v14 = vadd.f32 %v5889_v9, %v130_v13 }
  0xdb   :  { %v6485_v15 = vpop.f32.mrf.mxu1 }
  0xdc   :  { %136 = vst.msk [vmem:[#allocation2 + $0x8] sm:$0xff] %vm134_vm2, %v131_v14 }
  0xdf   :  { %v264_v16 = vld [vmem:[#allocation2] sm:$0xff] }
  0xe3   :  { %v265_v17 = vld [vmem:[#allocation2 + $0x8] sm:$0xff] }
  0xe4   :  { %v7553_v18 = vpack.c.bf16 %v265_v17, %v264_v16 }
  0xe6   :  { %268 = vrot.lane.b32.xlu1 %v7553_v18, %s8870_s23  ;;  %141 = vrot.lane.b32.xlu0 %v7553_v18, %s8874_s24 }
  0xea   :  { %406 = vrot.lane.b32.xlu1 %v7553_v18, %s8868_s25  ;;  %270 = vrot.lane.b32.xlu0 %v7553_v18, %s8862_s26 }
  0xee   :  { %542 = vrot.lane.b32.xlu1 %v7553_v18, %s8860_s27  ;;  %404 = vrot.lane.b32.xlu0 %v7553_v18, %s8866_s28  ;;  %s8908_s27 = smov 80  }
  0xf2   :  { %540 = vrot.lane.b32.xlu0 %v7553_v18, %s8864_s29 }
 0x158   :  { %v142_v19 = vpop.permute.xlu0 %141  ;;  %v269_v22 = vpop.permute.xlu1 %268 }
 0x159   :  { %v148_v20 = vsel %vm143_vm3, %v142_v19, 0 }
 0x15a   :  { %6487 = vmatpush3.bf16.xpose.msra.mxu1 %v148_v20 }
 0x15b   :  { %6498 = vmatprep.subr.bf16.mxu1 %v7408_v1 }
 0x15c   :  { %v271_v21 = vpop.permute.xlu0 %270  ;;  %v407_v24 = vpop.permute.xlu1 %406 }
 0x15d   :  { %v276_v23 = vsel %vm143_vm3, %v271_v21, 0  ;;  %v412_v25 = vsel %vm143_vm3, %v407_v24, 0 }
 0x160   :  { %v543_v26 = vpop.permute.xlu1 %542  ;;  %v405_v27 = vpop.permute.xlu0 %404 }
 0x161   :  { %6489 = vmatmul.mubr.msk.bf16.vlgmr.msra.gmra.mxu1 %vm143_vm3, %v7553_v18  ;;  %v548_v28 = vsel %vm143_vm3, %v543_v26, 0 }
 0x162   :  { %6499 = vmatpush3.bf16.xpose.msra.mxu1 %v276_v23  ;;  %6500 = vmatprep.mubr.msk.bf16.mxu1 %vm7409_vm0, %v7408_v1 }
 0x163   :  { %6510 = vmatprep.subr.bf16.mxu1 %v7408_v1 }
 0x164   :  { %v541_v29 = vpop.permute.xlu0 %540 }
 0x169   :  { %6501 = vmatmul.mubr.msk.bf16.vlgmr.msra.gmra.mxu1 %vm143_vm3, %v269_v22 }
 0x16a   :  { %6511 = vmatpush3.bf16.xpose.msra.mxu1 %v412_v25  ;;  %6512 = vmatprep.mubr.msk.bf16.mxu1 %vm7409_vm0, %v7408_v1 }
 0x16b   :  { %6522 = vmatprep.subr.bf16.mxu1 %v7408_v1 }
 0x171   :  { %6513 = vmatmul.mubr.msk.bf16.vlgmr.msra.gmra.mxu1 %vm143_vm3, %v405_v27 }
 0x172   :  { %6523 = vmatpush3.bf16.xpose.msra.mxu1 %v548_v28  ;;  %6524 = vmatprep.mubr.msk.bf16.mxu1 %vm7409_vm0, %v7408_v1 }
 0x173   :  { %6534 = vmatprep.subr.bf16.mxu1 %v7408_v1 }
 0x179   :  { %6525 = vmatmul.mubr.msk.bf16.vlgmr.msra.gmra.mxu1 %vm143_vm3, %v541_v29 }
 0x17a   :  { %6538 = vmatprep.mubr.msk.bf16.mxu1 %vm7409_vm0, %v7408_v1 }
 0x221   :  { %v184_v31 = vpop.f32.mrf.mxu1 }
 0x222   :  { %v185_v32 = vadd.f32 %v184_v31, %v7593_v30 }
 0x223   :  { %v6490_v33 = vpop.f32.mrf.mxu1 }
 0x224   :  { %v192_v35 = vsel %vm191_vm4, %v185_v32, -inf }
 0x225   :  { %193 = vmax.xlane.f32.xlu1 %v192_v35  ;;  %v187_v36 = vpop.f32.mrf.mxu1 }
 0x226   :  { %v188_v37 = vadd.f32 %v187_v36, %v7599_v34 }
 0x227   :  { %v6491_v38 = vpop.f32.mrf.mxu1 }
 0x228   :  { %v195_v39 = vsel %vm191_vm4, %v188_v37, -inf }
 0x229   :  { %196 = vmax.xlane.f32.xlu0 %v195_v39  ;;  %v312_v40 = vpop.f32.mrf.mxu1 }
 0x22a   :  { %v313_v41 = vadd.f32 %v312_v40, %v7593_v30 }
 0x22b   :  { %v6502_v42 = vpop.f32.mrf.mxu1 }
 0x22c   :  { %v319_v43 = vsel %vm191_vm4, %v313_v41, -inf }
 0x22d   :  { %320 = vmax.xlane.f32.xlu0 %v319_v43  ;;  %v315_v44 = vpop.f32.mrf.mxu1 }
 0x22e   :  { %v316_v45 = vadd.f32 %v315_v44, %v7599_v34 }
 0x22f   :  { %v6503_v46 = vpop.f32.mrf.mxu1 }
 0x230   :  { %v322_v47 = vsel %vm191_vm4, %v316_v45, -inf }
 0x231   :  { %323 = vmax.xlane.f32.xlu1 %v322_v47  ;;  %v448_v48 = vpop.f32.mrf.mxu1 }
 0x232   :  { %v449_v49 = vadd.f32 %v448_v48, %v7593_v30 }
 0x233   :  { %v6514_v50 = vpop.f32.mrf.mxu1 }
 0x234   :  { %v455_v51 = vsel %vm191_vm4, %v449_v49, -inf }
 0x235   :  { %456 = vmax.xlane.f32.xlu0 %v455_v51  ;;  %v451_v52 = vpop.f32.mrf.mxu1 }
 0x236   :  { %v452_v53 = vadd.f32 %v451_v52, %v7599_v34 }
 0x237   :  { %v6515_v54 = vpop.f32.mrf.mxu1 }
 0x238   :  { %v458_v55 = vsel %vm191_vm4, %v452_v53, -inf }
 0x239   :  { %459 = vmax.xlane.f32.xlu1 %v458_v55  ;;  %v584_v56 = vpop.f32.mrf.mxu1 }
 0x23a   :  { %v585_v57 = vadd.f32 %v584_v56, %v7593_v30 }
 0x23b   :  { %v6526_v58 = vpop.f32.mrf.mxu1 }
 0x23c   :  { %v591_v59 = vsel %vm191_vm4, %v585_v57, -inf }
 0x23d   :  { %592 = vmax.xlane.f32.xlu0 %v591_v59  ;;  %v587_v60 = vpop.f32.mrf.mxu1 }
 0x23e   :  { %v588_v61 = vadd.f32 %v587_v60, %v7599_v34 }
 0x23f   :  { %v6527_v62 = vpop.f32.mrf.mxu1 }
 0x240   :  { %v594_v63 = vsel %vm191_vm4, %v588_v61, -inf }
 0x241   :  { %595 = vmax.xlane.f32.xlu1 %v594_v63 }
 0x2ae   :  { %v194_v0 = vpop.xlane.xlu1 %193 }
 0x2af   :  { %v198_v2 = vsub.f32 %v185_v32, %v194_v0 }
 0x2b1   :  { %v200_v3 = vmul.f32 1.442695, %v198_v2 }
 0x2b2   :  { %v197_v4 = vpop.xlane.xlu0 %196 }
 0x2b3   :  { %7142 = vpow2.f32 %v200_v3  ;;  %v199_v5 = vsub.f32 %v188_v37, %v197_v4 }
 0x2b5   :  { %v202_v8 = vmul.f32 1.442695, %v199_v5 }
 0x2b6   :  { %v321_v9 = vpop.xlane.xlu0 %320 }
 0x2b7   :  { %7144 = vpow2.f32 %v202_v8  ;;  %v325_v10 = vsub.f32 %v313_v41, %v321_v9 }
 0x2b9   :  { %v327_v11 = vmul.f32 1.442695, %v325_v10 }
 0x2ba   :  { %v324_v19 = vpop.xlane.xlu1 %323 }
 0x2bb   :  { %7146 = vpow2.f32 %v327_v11  ;;  %v326_v20 = vsub.f32 %v316_v45, %v324_v19 }
 0x2bd   :  { %v329_v24 = vmul.f32 1.442695, %v326_v20 }
 0x2be   :  { %v457_v21 = vpop.xlane.xlu0 %456 }
 0x2bf   :  { %v461_v23 = vsub.f32 %v449_v49, %v457_v21  ;;  %7148 = vpow2.f32 %v329_v24 }
 0x2c0   :  { %v7143_v12 = vpop.eup %7142 }
 0x2c1   :  { %v204_v13 = vsel %vm191_vm4, %v7143_v12, 0.0  ;;  %v463_v28 = vmul.f32 1.442695, %v461_v23 }
 0x2c2   :  { %205 = vadd.xlane.f32.xlu0 %v204_v13  ;;  %v460_v22 = vpop.xlane.xlu1 %459 }
 0x2c3   :  { %v462_v25 = vsub.f32 %v452_v53, %v460_v22  ;;  %7150 = vpow2.f32 %v463_v28  ;;  %v7059_v28 = vld [vmem:[%s8834_s5] sm:$0xff]  }
 0x2c4   :  { %v7145_v14 = vpop.eup %7144 }
 0x2c5   :  { %v207_v15 = vsel %vm191_vm4, %v7145_v14, 0.0  ;;  %v465_v31 = vmul.f32 1.442695, %v462_v25 }
 0x2c6   :  { %208 = vadd.xlane.f32.xlu1 %v207_v15  ;;  %v593_v26 = vpop.xlane.xlu0 %592 }
 0x2c7   :  { %v597_v29 = vsub.f32 %v585_v57, %v593_v26  ;;  %7152 = vpow2.f32 %v465_v31  ;;  %v7058_v26 = vld [vmem:[%s8834_s5 + $0x8] sm:$0xff]  }
 0x2c8   :  { %v7618_v16 = vpop.eup %7146  ;;  %6535 = vmatpush3.bf16.msra.mxu1 %v7058_v26 }
 0x2c9   :  { %v331_v17 = vsel %vm191_vm4, %v7618_v16, 0.0  ;;  %v599_v33 = vmul.f32 1.442695, %v597_v29  ;;  %6536 = vmatprep.subr.bf16.mxu1 %v7408_v1 }
 0x2ca   :  { %332 = vadd.xlane.f32.xlu0 %v331_v17  ;;  %v596_v27 = vpop.xlane.xlu1 %595 }
 0x2cb   :  { %v598_v32 = vsub.f32 %v588_v61, %v596_v27  ;;  %7154 = vpow2.f32 %v599_v33 }
 0x2cc   :  { %v7149_v36 = vpop.eup %7148  ;;  %6537 = vmatpush3.bf16.msra.mxu1 %v7059_v28  ;;  %v7067_v28 = vld [vmem:[%s8840_s11 + $0x10] sm:$0xff]  }
 0x2cd   :  { %v601_v35 = vmul.f32 1.442695, %v598_v32  ;;  %v334_v38 = vsel %vm191_vm4, %v7149_v36, 0.0  ;;  %6550 = vmatprep.subr.bf16.mxu1 %v7408_v1 }
 0x2cf   :  { %7156 = vpow2.f32 %v601_v35 }
 0x2d0   :  { %v7151_v37 = vpop.eup %7150 }
 0x2d1   :  { %v467_v41 = vsel %vm191_vm4, %v7151_v37, 0.0 }
 0x2d4   :  { %v7153_v39 = vpop.eup %7152 }
 0x2d5   :  { %v470_v42 = vsel %vm191_vm4, %v7153_v39, 0.0 }
 0x2d7   :  { %342 = vrot.lane.b32.xlu1 %v7553_v18, %s8850_s1  ;;  %s8902_s1 = smov 8  }
 0x2d8   :  { %v7627_v40 = vpop.eup %7154 }
 0x2d9   :  { %v603_v44 = vsel %vm191_vm4, %v7627_v40, 0.0 }
 0x2dc   :  { %v7157_v43 = vpop.eup %7156 }
 0x2dd   :  { %v606_v45 = vsel %vm191_vm4, %v7157_v43, 0.0 }
 0x2e0   :  { %215 = vrot.lane.b32.xlu0 %v7553_v18, %s8872_s20 }
 0x2fb   :  { %335 = vadd.xlane.f32.xlu1 %v334_v38 }
 0x2ff   :  { %468 = vadd.xlane.f32.xlu0 %v467_v41  ;;  %471 = vadd.xlane.f32.xlu1 %v470_v42 }
 0x303   :  { %604 = vadd.xlane.f32.xlu0 %v603_v44  ;;  %607 = vadd.xlane.f32.xlu1 %v606_v45 }
 0x314   :  { %478 = vrot.lane.b32.xlu1 %v7553_v18, %s8858_s21  ;;  %s8898_s21 = smov 72  }
 0x319   :  { %614 = vrot.lane.b32.xlu0 %v7553_v18, %s8848_s22  ;;  %s8903_s22 = smov 16  }
 0x34b   :  { %v206_v46 = vpop.xlane.xlu0 %205 }
 0x34c   :  { %7158 = vrcp.f32 %v206_v46  ;;  %v5901_v46 = vld [vmem:[%s8835_s6] ss:$0 sm:$0xff] }
 0x34f   :  { %v209_v47 = vpop.xlane.xlu1 %208 }
 0x350   :  { %7160 = vrcp.f32 %v209_v47 }
 0x353   :  { %v333_v48 = vpop.xlane.xlu0 %332  ;;  %v343_v55 = vpop.permute.xlu1 %342 }
 0x354   :  { %7162 = vrcp.f32 %v333_v48 }
 0x357   :  { %v216_v49 = vpop.permute.xlu0 %215 }
 0x358   :  { %6493 = vmatpush3.bf16.msra.mxu0 %v216_v49 }
 0x359   :  { %6504 = vmatprep.subr.bf16.mxu0 %v7408_v1  ;;  %v7159_v50 = vpop.eup %7158 }
 0x35a   :  { %v212_v52 = vmul.f32 %v7159_v50, %v7143_v12 }
 0x35d   :  { %v7161_v51 = vpop.eup %7160 }
 0x35e   :  { %v213_v53 = vmul.f32 %v7161_v51, %v7145_v14 }
 0x360   :  { %v214_v54 = vpack.c.bf16 %v213_v53, %v212_v52 }
 0x361   :  { %v7163_v60 = vpop.eup %7162 }
 0x362   :  { %6495 = vmatmul.mubr.msk.bf16.vlgmr.msra.gmra.mxu0 %vm191_vm4, %v214_v54  ;;  %v339_v62 = vmul.f32 %v7163_v60, %v7618_v16 }
 0x363   :  { %6505 = vmatpush3.bf16.msra.mxu0 %v343_v55  ;;  %6506 = vmatprep.mubr.msk.bf16.mxu0 %vm7409_vm0, %v7408_v1 }
 0x364   :  { %6516 = vmatprep.subr.bf16.mxu0 %v7408_v1 }
 0x384   :  { %v336_v18 = vpop.xlane.xlu1 %335 }
 0x385   :  { %7164 = vrcp.f32 %v336_v18 }
 0x388   :  { %v469_v56 = vpop.xlane.xlu0 %468  ;;  %v472_v57 = vpop.xlane.xlu1 %471 }
 0x389   :  { %7166 = vrcp.f32 %v469_v56 }
 0x38a   :  { %7168 = vrcp.f32 %v472_v57 }
 0x38c   :  { %v605_v58 = vpop.xlane.xlu0 %604  ;;  %v608_v59 = vpop.xlane.xlu1 %607 }
 0x38d   :  { %7170 = vrcp.f32 %v605_v58 }
 0x38e   :  { %7172 = vrcp.f32 %v608_v59 }
 0x390   :  { %v479_v4 = vpop.permute.xlu1 %478  ;;  %v615_v12 = vpop.permute.xlu0 %614 }
 0x392   :  { %v7165_v61 = vpop.eup %7164 }
 0x393   :  { %v340_v63 = vmul.f32 %v7165_v61, %v7149_v36 }
 0x395   :  { %v341_v0 = vpack.c.bf16 %v340_v63, %v339_v62 }
 0x396   :  { %v7167_v2 = vpop.eup %7166 }
 0x397   :  { %v7169_v3 = vpop.eup %7168  ;;  %6507 = vmatmul.mubr.msk.bf16.vlgmr.msra.gmra.mxu0 %vm191_vm4, %v341_v0  ;;  %v475_v5 = vmul.f32 %v7167_v2, %v7151_v37  ;;  %v7061_v2 = vld [vmem:[%s8838_s9] sm:$0xff]  }
 0x398   :  { %6517 = vmatpush3.bf16.msra.mxu0 %v479_v4  ;;  %6518 = vmatprep.mubr.msk.bf16.mxu0 %vm7409_vm0, %v7408_v1  ;;  %v476_v8 = vmul.f32 %v7169_v3, %v7153_v39  ;;  %v7062_v3 = vld [vmem:[%s8840_s11 + $0x38] sm:$0xff]   ;;  %v7063_v4 = vld [vmem:[%s8840_s11 + $0x30] sm:$0xff]  }
 0x399   :  { %6528 = vmatprep.subr.bf16.mxu0 %v7408_v1 }
 0x39a   :  { %v7171_v9 = vpop.eup %7170  ;;  %v477_v10 = vpack.c.bf16 %v476_v8, %v475_v5  ;;  %v7064_v5 = vld [vmem:[%s8840_s11 + $0x28] sm:$0xff]   ;;  %v7065_v8 = vld [vmem:[%s8840_s11 + $0x20] sm:$0xff]  }
 0x39b   :  { %v7173_v11 = vpop.eup %7172  ;;  %v611_v13 = vmul.f32 %v7171_v9, %v7627_v40  ;;  %v7066_v9 = vld [vmem:[%s8840_s11 + $0x18] sm:$0xff]  }
 0x39c   :  { %v612_v14 = vmul.f32 %v7173_v11, %v7157_v43 }
 0x39e   :  { %v613_v15 = vpack.c.bf16 %v612_v14, %v611_v13 }
 0x39f   :  { %6519 = vmatmul.mubr.msk.bf16.vlgmr.msra.gmra.mxu0 %vm191_vm4, %v477_v10 }
 0x3a0   :  { %6529 = vmatpush3.bf16.msra.mxu0 %v615_v12  ;;  %6530 = vmatprep.mubr.msk.bf16.mxu0 %vm7409_vm0, %v7408_v1 }
 0x3a1   :  { %6542 = vmatprep.subr.bf16.mxu0 %v7408_v1 }
 0x3a7   :  { %6531 = vmatmul.mubr.msk.bf16.vlgmr.msra.gmra.mxu0 %vm191_vm4, %v613_v15 }
 0x3a8   :  { %6546 = vmatprep.mubr.msk.bf16.mxu0 %vm7409_vm0, %v7408_v1 }
 0x422   :  { %v255_v16 = vpop.f32.mrf.mxu0 }
 0x423   :  { %262 = vst.msk [vmem:[#allocation3] sm:$0xff] %vm143_vm3, %v255_v16 }
 0x424   :  { %v6496_v17 = vpop.f32.mrf.mxu0 }
 0x426   :  { %v258_v19 = vpop.f32.mrf.mxu0 }
 0x427   :  { %263 = vst.msk [vmem:[#allocation3 + $0x8] sm:$0xff] %vm143_vm3, %v258_v19  ;;  %v5905_v19 = vld [vmem:[%s8836_s7] ss:$0 sm:$0xff] }
 0x428   :  { %v6497_v20 = vpop.f32.mrf.mxu0 }
 0x457   :  { %v382_v21 = vpop.f32.mrf.mxu0 }
 0x458   :  { %391 = vrot.lane.b32.xlu1 %v382_v21, %s8856_s0 }
 0x459   :  { %v6508_v22 = vpop.f32.mrf.mxu0 }
 0x45b   :  { %v385_v23 = vpop.f32.mrf.mxu0 }
 0x45c   :  { %393 = vrot.lane.b32.xlu0 %v385_v23, %s8856_s0  ;;  %v5906_v23 = vld [vmem:[%s8837_s8] ss:$0 sm:$0xff]  ;;  %s8907_s0 = smov 120  }
 0x45d   :  { %v6509_v24 = vpop.f32.mrf.mxu0 }
 0x45f   :  { %v518_v25 = vpop.f32.mrf.mxu0 }
 0x460   :  { %527 = vrot.lane.b32.xlu1 %v518_v25, %s8854_s19 }
 0x461   :  { %v6520_v27 = vpop.f32.mrf.mxu0 }
 0x463   :  { %v521_v29 = vpop.f32.mrf.mxu0 }
 0x464   :  { %529 = vrot.lane.b32.xlu0 %v521_v29, %s8854_s19  ;;  %v7068_v29 = vld [vmem:[%s8840_s11 + $0x8] sm:$0xff]   ;;  %s8899_s19 = smov 48  }
 0x465   :  { %v6521_v31 = vpop.f32.mrf.mxu0 }
 0x466   :  { %v7069_v31 = vld [vmem:[%s8840_s11] sm:$0xff]  }
 0x467   :  { %v654_v32 = vpop.f32.mrf.mxu0 }
 0x468   :  { %663 = vrot.lane.b32.xlu1 %v654_v32, %s8852_s30  ;;  %v5907_v32 = vld [vmem:[%s8839_s10] ss:$0 sm:$0xff] }
 0x469   :  { %v6532_v33 = vpop.f32.mrf.mxu0 }
 0x46b   :  { %v657_v35 = vpop.f32.mrf.mxu0 }
 0x46c   :  { %665 = vrot.lane.b32.xlu0 %v657_v35, %s8852_s30  ;;  %s8901_s30 = smov 40  }
 0x46d   :  { %v6533_v36 = vpop.f32.mrf.mxu0 }
 0x4ca   :  { %v392_v37 = vpop.permute.xlu1 %391 }
 0x4cb   :  { %398 = vst.msk [vmem:[#allocation3] sm:$0xff] %vm397_vm5, %v392_v37 }
 0x4ce   :  { %v394_v38 = vpop.permute.xlu0 %393 }
 0x4cf   :  { %399 = vst.msk [vmem:[#allocation3 + $0x8] sm:$0xff] %vm397_vm5, %v394_v38 }
 0x4d2   :  { %v528_v39 = vpop.permute.xlu1 %527 }
 0x4d3   :  { %534 = vst.msk [vmem:[#allocation3] sm:$0xff] %vm533_vm6, %v528_v39 }
 0x4d6   :  { %v530_v40 = vpop.permute.xlu0 %529 }
 0x4d7   :  { %535 = vst.msk [vmem:[#allocation3 + $0x8] sm:$0xff] %vm533_vm6, %v530_v40 }
 0x4da   :  { %v664_v41 = vpop.permute.xlu1 %663 }
 0x4db   :  { %670 = vst.msk [vmem:[#allocation3] sm:$0xff] %vm669_vm7, %v664_v41 }
 0x4de   :  { %v666_v42 = vpop.permute.xlu0 %665 }
 0x4df   :  { %671 = vst.msk [vmem:[#allocation3 + $0x8] sm:$0xff] %vm669_vm7, %v666_v42 }
 0x4e2   :  { %v672_v43 = vld [vmem:[#allocation3] sm:$0xff] }
 0x4e6   :  { %v673_v44 = vld [vmem:[#allocation3 + $0x8] sm:$0xff] }
 0x4e7   :  { %v674_v45 = vpack.c.bf16 %v673_v44, %v672_v43  ;;  %v5911_v43 = vld [vmem:[%s8841_s12] ss:$0 sm:$0xff] }
 0x4e9   :  { %6539 = vmatmul.mubr.msk.bf16.vlgmr.msra.gmra.mxu1 %vm89_vm1, %v674_v45 }
 0x4ea   :  { %6566 = vmatprep.mubr.msk.bf16.mxu1 %vm7409_vm0, %v7408_v1  ;;  %6551 = vmatpush3.bf16.msra.mxu1 %v7062_v3 }
 0x4eb   :  { %6552 = vmatprep.subr.bf16.mxu1 %v7408_v1 }
 0x4ee   :  { %6553 = vmatpush3.bf16.msra.mxu1 %v7063_v4 }
 0x4ef   :  { %6554 = vmatprep.subr.bf16.mxu1 %v7408_v1 }
 0x4f2   :  { %6555 = vmatpush3.bf16.msra.mxu1 %v7064_v5 }
 0x4f3   :  { %6556 = vmatprep.subr.bf16.mxu1 %v7408_v1 }
 0x4f6   :  { %6557 = vmatpush3.bf16.msra.mxu1 %v7065_v8 }
 0x4f7   :  { %6558 = vmatprep.subr.bf16.mxu1 %v7408_v1 }
 0x4fa   :  { %6559 = vmatpush3.bf16.msra.mxu1 %v7066_v9 }
 0x4fb   :  { %6560 = vmatprep.subr.bf16.mxu1 %v7408_v1 }
 0x4fe   :  { %6561 = vmatpush3.bf16.msra.mxu1 %v7067_v28 }
 0x4ff   :  { %6562 = vmatprep.subr.bf16.mxu1 %v7408_v1 }
 0x502   :  { %6563 = vmatpush3.bf16.msra.mxu1 %v7068_v29 }
 0x503   :  { %6564 = vmatprep.subr.bf16.mxu1 %v7408_v1 }
 0x506   :  { %6565 = vmatpush3.bf16.msra.mxu1 %v7069_v31 }
 0x507   :  { %6596 = vmatprep.subr.bf16.mxu1 %v7408_v1 }
 0x5a9   :  { %v735_v47 = vpop.f32.mrf.mxu1 }
 0x5aa   :  { %v736_v48 = vadd.f32 %v5901_v46, %v735_v47 }
 0x5ab   :  { %v6540_v49 = vpop.f32.mrf.mxu1 }
 0x5ac   :  { %v742_v50 = vadd.f32 %v736_v48, %v7536_v6 }
 0x5ad   :  { %v738_v51 = vpop.f32.mrf.mxu1 }
 0x5ae   :  { %v739_v52 = vadd.f32 %v5901_v46, %v738_v51  ;;  %v746_v53 = vsel %vm89_vm1, %v742_v50, 0.0 }
 0x5af   :  { %747 = vadd.xlane.f32.xlu1 %v746_v53  ;;  %v6541_v54 = vpop.f32.mrf.mxu1 }
 0x5b0   :  { %v743_v55 = vadd.f32 %v739_v52, %v7538_v7  ;;  %v7060_v7 = vld [vmem:[%s8838_s9 + $0x8] sm:$0xff]  }
 0x5b1   :  { %6543 = vmatpush3.bf16.msra.mxu0 %v7060_v7 }
 0x5b2   :  { %v749_v18 = vsel %vm89_vm1, %v743_v55, 0.0  ;;  %6544 = vmatprep.subr.bf16.mxu0 %v7408_v1 }
 0x5b3   :  { %750 = vadd.xlane.f32.xlu0 %v749_v18 }
 0x5b5   :  { %6545 = vmatpush3.bf16.msra.mxu0 %v7061_v2 }
 0x5b6   :  { %6570 = vmatprep.subr.bf16.mxu0 %v7408_v1 }
 0x638   :  { %v748_v56 = vpop.xlane.xlu1 %747 }
 0x639   :  { %v753_v57 = vmul.f32 0.03125, %v748_v56 }
 0x63b   :  { %v755_v58 = vsub.f32 %v742_v50, %v753_v57 }
 0x63c   :  { %v751_v59 = vpop.xlane.xlu0 %750 }
 0x63d   :  { %v754_v60 = vmul.f32 0.03125, %v751_v59  ;;  %v757_v61 = vmul.f32 %v755_v58, %v755_v58 }
 0x63f   :  { %v756_v62 = vsub.f32 %v743_v55, %v754_v60  ;;  %v759_v6 = vsel %vm89_vm1, %v757_v61, 0.0 }
 0x640   :  { %760 = vadd.xlane.f32.xlu0 %v759_v6  ;;  %v7070_v6 = vld [vmem:[%s8832_s3 + $0x18] sm:$0xff]  }
 0x641   :  { %v758_v63 = vmul.f32 %v756_v62, %v756_v62 }
 0x643   :  { %v762_v0 = vsel %vm89_vm1, %v758_v63, 0.0  ;;  %v7071_v63 = vld [vmem:[%s8832_s3 + $0x10] sm:$0xff]  }
 0x644   :  { %763 = vadd.xlane.f32.xlu1 %v762_v0 }
 0x6c9   :  { %v761_v10 = vpop.xlane.xlu0 %760 }
 0x6ca   :  { %v765_v11 = vmul.f32 0.03125, %v761_v10  ;;  %v5920_v10 = vld [vmem:[%s8842_s13] ss:$0 sm:$0xff] }
 0x6cc   :  { %v767_v12 = vadd.f32 1e-05, %v765_v11 }
 0x6cd   :  { %v764_v13 = vpop.xlane.xlu1 %763 }
 0x6ce   :  { %7174 = vrsqrt.f32 %v767_v12  ;;  %v766_v14 = vmul.f32 0.03125, %v764_v13 }
 0x6d0   :  { %v768_v15 = vadd.f32 1e-05, %v766_v14  ;;  %v5921_v14 = vld [vmem:[%s8843_s14] ss:$0 sm:$0xff] }
 0x6d2   :  { %7176 = vrsqrt.f32 %v768_v15 }
 0x6db   :  { %v7175_v16 = vpop.eup %7174 }
 0x6dc   :  { %v771_v17 = vmul.f32 %v7175_v16, %v755_v58 }
 0x6de   :  { %v779_v22 = vmul.f32 %v5905_v19, %v771_v17 }
 0x6df   :  { %v7177_v20 = vpop.eup %7176 }
 0x6e0   :  { %v772_v21 = vmul.f32 %v7177_v20, %v756_v62  ;;  %v787_v25 = vadd.f32 %v5906_v23, %v779_v22  ;;  %v5927_v20 = vld [vmem:[%s8833_s4 + $0x1] ss:$0 sm:$0xff] }
 0x6e2   :  { %v780_v24 = vmul.f32 %v5905_v19, %v772_v21 }
 0x6e4   :  { %v788_v26 = vadd.f32 %v5906_v23, %v780_v24 }
 0x6e6   :  { %v789_v27 = vpack.c.bf16 %v788_v26, %v787_v25 }
 0x6e8   :  { %6547 = vmatmul.mubr.msk.bf16.vlgmr.msra.gmra.mxu0 %vm89_vm1, %v789_v27 }
 0x6e9   :  { %6574 = vmatprep.mubr.msk.bf16.mxu0 %vm7409_vm0, %v7408_v1  ;;  %6571 = vmatpush3.bf16.msra.mxu0 %v7070_v6 }
 0x6ea   :  { %6572 = vmatprep.subr.bf16.mxu0 %v7408_v1 }
 0x6ed   :  { %6573 = vmatpush3.bf16.msra.mxu0 %v7071_v63 }
 0x6ee   :  { %6578 = vmatprep.subr.bf16.mxu0 %v7408_v1 }
 0x7a8   :  { %v850_v33 = vpop.f32.mrf.mxu0 }
 0x7a9   :  { %v851_v36 = vadd.f32 %v5907_v32, %v850_v33 }
 0x7aa   :  { %v6548_v35 = vpop.f32.mrf.mxu0 }
 0x7ab   :  { %v857_v40 = vmax.f32 %v851_v36, 0.0 }
 0x7ac   :  { %v853_v37 = vpop.f32.mrf.mxu0 }
 0x7ad   :  { %v854_v38 = vadd.f32 %v5907_v32, %v853_v37 }
 0x7ae   :  { %v6549_v39 = vpop.f32.mrf.mxu0 }
 0x7af   :  { %v858_v41 = vmax.f32 %v854_v38, 0.0 }
 0x7b1   :  { %v859_v42 = vpack.c.bf16 %v858_v41, %v857_v40 }
 0x7b3   :  { %6567 = vmatmul.mubr.bf16.vlgmr.msra.gmra.mxu1 %v859_v42 }
 0x7b4   :  { %6598 = vmatprep.mubr.msk.bf16.mxu1 %vm7409_vm0, %v7408_v1 }
 0x873   :  { %v965_v44 = vpop.f32.mrf.mxu1 }
 0x874   :  { %v966_v45 = vadd.f32 %v5911_v43, %v965_v44 }
 0x875   :  { %v6568_v46 = vpop.f32.mrf.mxu1 }
 0x876   :  { %v972_v47 = vadd.f32 %v966_v45, %v787_v25 }
 0x877   :  { %v968_v48 = vpop.f32.mrf.mxu1 }
 0x878   :  { %v969_v49 = vadd.f32 %v5911_v43, %v968_v48  ;;  %v976_v50 = vsel %vm89_vm1, %v972_v47, 0.0 }
 0x879   :  { %977 = vadd.xlane.f32.xlu0 %v976_v50  ;;  %v6569_v51 = vpop.f32.mrf.mxu1 }
 0x87a   :  { %v973_v52 = vadd.f32 %v969_v49, %v788_v26 }
 0x87c   :  { %v979_v53 = vsel %vm89_vm1, %v973_v52, 0.0 }
 0x87d   :  { %980 = vadd.xlane.f32.xlu1 %v979_v53 }
 0x902   :  { %v978_v54 = vpop.xlane.xlu0 %977 }
 0x903   :  { %v982_v55 = vmul.f32 0.03125, %v978_v54 }
 0x905   :  { %v984_v18 = vsub.f32 %v972_v47, %v982_v55 }
 0x906   :  { %v981_v56 = vpop.xlane.xlu1 %980 }
 0x907   :  { %v983_v57 = vmul.f32 0.03125, %v981_v56  ;;  %v986_v58 = vmul.f32 %v984_v18, %v984_v18 }
 0x909   :  { %v985_v59 = vsub.f32 %v973_v52, %v983_v57  ;;  %v988_v60 = vsel %vm89_vm1, %v986_v58, 0.0 }
 0x90a   :  { %989 = vadd.xlane.f32.xlu0 %v988_v60 }
 0x90b   :  { %v987_v61 = vmul.f32 %v985_v59, %v985_v59 }
 0x90d   :  { %v991_v62 = vsel %vm89_vm1, %v987_v61, 0.0 }
 0x90e   :  { %992 = vadd.xlane.f32.xlu1 %v991_v62 }
 0x993   :  { %v990_v0 = vpop.xlane.xlu0 %989 }
 0x994   :  { %v994_v7 = vmul.f32 0.03125, %v990_v0 }
 0x996   :  { %v996_v2 = vadd.f32 1e-05, %v994_v7 }
 0x997   :  { %v993_v3 = vpop.xlane.xlu1 %992 }
 0x998   :  { %7178 = vrsqrt.f32 %v996_v2  ;;  %v995_v4 = vmul.f32 0.03125, %v993_v3 }
 0x99a   :  { %v997_v5 = vadd.f32 1e-05, %v995_v4 }
 0x99c   :  { %7180 = vrsqrt.f32 %v997_v5 }
 0x9a5   :  { %v7179_v8 = vpop.eup %7178 }
 0x9a6   :  { %v1000_v9 = vmul.f32 %v7179_v8, %v984_v18 }
 0x9a8   :  { %v1008_v13 = vmul.f32 %v5920_v10, %v1000_v9 }
 0x9a9   :  { %v7181_v11 = vpop.eup %7180 }
 0x9aa   :  { %v1001_v12 = vmul.f32 %v7181_v11, %v985_v59  ;;  %v7765_v16 = vadd.f32 %v5921_v14, %v1008_v13 }
 0x9ac   :  { %v1009_v15 = vmul.f32 %v5920_v10, %v1001_v12 }
 0x9ae   :  { %v7767_v17 = vadd.f32 %v5921_v14, %v1009_v15 }
 0x9b0   :  { %v1018_v19 = vpack.c.bf16 %v7767_v17, %v7765_v16 }
 0x9b2   :  { %6575 = vmatmul.mubr.msk.bf16.vlgmr.msra.gmra.mxu0 %vm89_vm1, %v1018_v19 }
 0x9b3   :  { %6580 = vmatprep.mubr.msk.bf16.mxu0 %vm7409_vm0, %v7408_v1 }
 0xa72   :  { %v1081_v21 = vpop.f32.mrf.mxu0 }
 0xa73   :  { %v1082_v22 = vadd.f32 %v5927_v20, %v1081_v21 }
 0xa74   :  { %v6576_v23 = vpop.f32.mrf.mxu0 }
 0xa75   :  { %1088 = vst.msk [vmem:[#allocation2] sm:$0xff] %vm134_vm2, %v1082_v22 }
 0xa76   :  { %v1084_v24 = vpop.f32.mrf.mxu0 }
 0xa77   :  { %v1085_v25 = vadd.f32 %v5927_v20, %v1084_v24 }
 0xa78   :  { %v6577_v26 = vpop.f32.mrf.mxu0 }
 0xa79   :  { %1089 = vst.msk [vmem:[#allocation2 + $0x8] sm:$0xff] %vm134_vm2, %v1085_v25 }
 0xa7c   :  { %v1090_v27 = vld [vmem:[#allocation2] sm:$0xff] }
 0xa80   :  { %v1091_v28 = vld [vmem:[#allocation2 + $0x8] sm:$0xff] }
 0xa81   :  { %v7779_v29 = vpack.c.bf16 %v1091_v28, %v1090_v27 }
 0xa83   :  { %1094 = vrot.lane.b32.xlu0 %v7779_v29, %s8874_s24 }
 0xa87   :  { %1221 = vrot.lane.b32.xlu0 %v7779_v29, %s8862_s26  ;;  %s8909_s26 = smov 112  }
 0xa8b   :  { %1219 = vrot.lane.b32.xlu0 %v7779_v29, %s8870_s23  ;;  %s8912_s23 = sld [smem:[#allocation10_spill]] }
 0xa8f   :  { %1356 = vrot.lane.b32.xlu0 %v7779_v29, %s8868_s25  ;;  %s8905_s25 = smov 96  }
 0xa93   :  { %1354 = vrot.lane.b32.xlu0 %v7779_v29, %s8866_s28  ;;  %s8904_s28 = smov 24  }
 0xa97   :  { %1489 = vrot.lane.b32.xlu0 %v7779_v29, %s8864_s29  ;;  %s8910_s29 = smov 104  }
 0xaf5   :  { %v1095_v31 = vpop.permute.xlu0 %1094 }
 0xaf6   :  { %v1100_v32 = vsel %vm143_vm3, %v1095_v31, 0 }
 0xaf7   :  { %6579 = vmatpush3.bf16.xpose.msra.mxu0 %v1100_v32 }
 0xaf8   :  { %6584 = vmatprep.subr.bf16.mxu0 %v7408_v1 }
 0xaf9   :  { %v1222_v18 = vpop.permute.xlu0 %1221 }
 0xafa   :  { %v1227_v61 = vsel %vm143_vm3, %v1222_v18, 0 }
 0xafd   :  { %v1220_v60 = vpop.permute.xlu0 %1219 }
 0xafe   :  { %6581 = vmatmul.mubr.msk.bf16.vlgmr.msra.gmra.mxu0 %vm143_vm3, %v7779_v29 }
 0xaff   :  { %6586 = vmatprep.mubr.msk.bf16.mxu0 %vm7409_vm0, %v7408_v1 }
 0xb01   :  { %v1357_v62 = vpop.permute.xlu0 %1356 }
 0xb02   :  { %v1362_v6 = vsel %vm143_vm3, %v1357_v62, 0 }
 0xb05   :  { %v1355_v0 = vpop.permute.xlu0 %1354 }
 0xb09   :  { %v1490_v2 = vpop.permute.xlu0 %1489 }
 0xbbe   :  { %v1136_v33 = vpop.f32.mrf.mxu0 }
 0xbbf   :  { %v1137_v35 = vadd.f32 %v1136_v33, %v7593_v30 }
 0xbc0   :  { %v6582_v36 = vpop.f32.mrf.mxu0 }
 0xbc1   :  { %v1143_v37 = vsel %vm191_vm4, %v1137_v35, -inf }
 0xbc2   :  { %1144 = vmax.xlane.f32.xlu1 %v1143_v37  ;;  %v1139_v38 = vpop.f32.mrf.mxu0 }
 0xbc3   :  { %v1140_v39 = vadd.f32 %v1139_v38, %v7599_v34 }
 0xbc4   :  { %v6583_v40 = vpop.f32.mrf.mxu0 }
 0xbc5   :  { %v1146_v41 = vsel %vm191_vm4, %v1140_v39, -inf }
 0xbc6   :  { %1147 = vmax.xlane.f32.xlu1 %v1146_v41 }
 0xc4b   :  { %v1145_v42 = vpop.xlane.xlu1 %1144 }
 0xc4c   :  { %v1149_v43 = vsub.f32 %v1137_v35, %v1145_v42 }
 0xc4e   :  { %v1151_v44 = vmul.f32 1.442695, %v1149_v43 }
 0xc4f   :  { %v1148_v45 = vpop.xlane.xlu1 %1147 }
 0xc50   :  { %7182 = vpow2.f32 %v1151_v44  ;;  %v1150_v46 = vsub.f32 %v1140_v39, %v1148_v45 }
 0xc52   :  { %v1153_v47 = vmul.f32 1.442695, %v1150_v46 }
 0xc54   :  { %7184 = vpow2.f32 %v1153_v47 }
 0xc5d   :  { %v7183_v48 = vpop.eup %7182 }
 0xc5e   :  { %v1155_v49 = vsel %vm191_vm4, %v7183_v48, 0.0 }
 0xc5f   :  { %1156 = vadd.xlane.f32.xlu1 %v1155_v49 }
 0xc61   :  { %v7185_v50 = vpop.eup %7184 }
 0xc62   :  { %v1158_v51 = vsel %vm191_vm4, %v7185_v50, 0.0 }
 0xc63   :  { %1159 = vadd.xlane.f32.xlu1 %v1158_v51 }
 0xc74   :  { %1166 = vrot.lane.b32.xlu1 %v7779_v29, %s8872_s20  ;;  %s8906_s20 = smov 64  }
 0xc78   :  { %1491 = vrot.lane.b32.xlu1 %v7779_v29, %s8898_s21 }
 0xce8   :  { %v1157_v52 = vpop.xlane.xlu1 %1156 }
 0xce9   :  { %7186 = vrcp.f32 %v1157_v52 }
 0xcec   :  { %v1160_v53 = vpop.xlane.xlu1 %1159 }
 0xced   :  { %7188 = vrcp.f32 %v1160_v53 }
 0xcf0   :  { %v1167_v54 = vpop.permute.xlu1 %1166 }
 0xcf1   :  { %6585 = vmatpush3.bf16.msra.mxu0 %v1167_v54 }
 0xcf2   :  { %6590 = vmatprep.subr.bf16.mxu0 %v7408_v1 }
 0xcf4   :  { %v1492_v63 = vpop.permute.xlu1 %1491 }
 0xcf5   :  { %v1497_v7 = vsel %vm143_vm3, %v1492_v63, 0 }
 0xcf6   :  { %v7187_v55 = vpop.eup %7186 }
 0xcf7   :  { %v1163_v57 = vmul.f32 %v7187_v55, %v7183_v48 }
 0xcfa   :  { %v7189_v56 = vpop.eup %7188 }
 0xcfb   :  { %v1164_v58 = vmul.f32 %v7189_v56, %v7185_v50 }
 0xcfd   :  { %v1165_v59 = vpack.c.bf16 %v1164_v58, %v1163_v57 }
 0xcff   :  { %6587 = vmatmul.mubr.msk.bf16.vlgmr.msra.gmra.mxu0 %vm191_vm4, %v1165_v59 }
 0xd00   :  { %6591 = vmatpush3.bf16.xpose.msra.mxu0 %v1227_v61  ;;  %6592 = vmatprep.mubr.msk.bf16.mxu0 %vm7409_vm0, %v7408_v1 }
 0xd01   :  { %6602 = vmatprep.subr.bf16.mxu0 %v7408_v1 }
 0xd07   :  { %6593 = vmatmul.mubr.msk.bf16.vlgmr.msra.gmra.mxu0 %vm143_vm3, %v1220_v60 }
 0xd08   :  { %6603 = vmatpush3.bf16.xpose.msra.mxu0 %v1362_v6  ;;  %6604 = vmatprep.mubr.msk.bf16.mxu0 %vm7409_vm0, %v7408_v1 }
 0xd09   :  { %6614 = vmatprep.subr.bf16.mxu0 %v7408_v1 }
 0xd0f   :  { %6605 = vmatmul.mubr.msk.bf16.vlgmr.msra.gmra.mxu0 %vm143_vm3, %v1355_v0 }
 0xd10   :  { %6615 = vmatpush3.bf16.xpose.msra.mxu0 %v1497_v7  ;;  %6616 = vmatprep.mubr.msk.bf16.mxu0 %vm7409_vm0, %v7408_v1 }
 0xd11   :  { %6626 = vmatprep.subr.bf16.mxu0 %v7408_v1 }
 0xd17   :  { %6617 = vmatmul.mubr.msk.bf16.vlgmr.msra.gmra.mxu0 %vm143_vm3, %v1490_v2 }
 0xd18   :  { %6630 = vmatprep.mubr.msk.bf16.mxu0 %vm7409_vm0, %v7408_v1 }
 0xdbf   :  { %v1206_v3 = vpop.f32.mrf.mxu0 }
 0xdc0   :  { %1213 = vst.msk [vmem:[#allocation3] sm:$0xff] %vm143_vm3, %v1206_v3 }
 0xdc1   :  { %v6588_v4 = vpop.f32.mrf.mxu0 }
 0xdc3   :  { %v1209_v5 = vpop.f32.mrf.mxu0 }
 0xdc4   :  { %1214 = vst.msk [vmem:[#allocation3 + $0x8] sm:$0xff] %vm143_vm3, %v1209_v5 }
 0xdc5   :  { %v6589_v8 = vpop.f32.mrf.mxu0 }
 0xdc7   :  { %v1263_v9 = vpop.f32.mrf.mxu0 }
 0xdc8   :  { %v1264_v10 = vadd.f32 %v1263_v9, %v7593_v30 }
 0xdc9   :  { %v6594_v11 = vpop.f32.mrf.mxu0 }
 0xdca   :  { %v1270_v12 = vsel %vm191_vm4, %v1264_v10, -inf }
 0xdcb   :  { %1271 = vmax.xlane.f32.xlu1 %v1270_v12  ;;  %v1266_v13 = vpop.f32.mrf.mxu0 }
 0xdcc   :  { %v1267_v14 = vadd.f32 %v1266_v13, %v7599_v34 }
 0xdcd   :  { %v6595_v15 = vpop.f32.mrf.mxu0 }
 0xdce   :  { %v1273_v19 = vsel %vm191_vm4, %v1267_v14, -inf }
 0xdcf   :  { %1274 = vmax.xlane.f32.xlu0 %v1273_v19  ;;  %v1398_v20 = vpop.f32.mrf.mxu0 }
 0xdd0   :  { %v1399_v21 = vadd.f32 %v1398_v20, %v7593_v30 }
 0xdd1   :  { %v6606_v22 = vpop.f32.mrf.mxu0 }
 0xdd2   :  { %v1405_v23 = vsel %vm191_vm4, %v1399_v21, -inf }
 0xdd3   :  { %1406 = vmax.xlane.f32.xlu0 %v1405_v23  ;;  %v1401_v24 = vpop.f32.mrf.mxu0 }
 0xdd4   :  { %v1402_v25 = vadd.f32 %v1401_v24, %v7599_v34 }
 0xdd5   :  { %v6607_v26 = vpop.f32.mrf.mxu0 }
 0xdd6   :  { %v1408_v27 = vsel %vm191_vm4, %v1402_v25, -inf }
 0xdd7   :  { %1409 = vmax.xlane.f32.xlu1 %v1408_v27  ;;  %v1533_v28 = vpop.f32.mrf.mxu0 }
 0xdd8   :  { %v1534_v31 = vadd.f32 %v1533_v28, %v7593_v30 }
 0xdd9   :  { %v6618_v32 = vpop.f32.mrf.mxu0 }
 0xdda   :  { %v1540_v33 = vsel %vm191_vm4, %v1534_v31, -inf }
 0xddb   :  { %1541 = vmax.xlane.f32.xlu0 %v1540_v33  ;;  %v1536_v35 = vpop.f32.mrf.mxu0 }
 0xddc   :  { %v1537_v36 = vadd.f32 %v1536_v35, %v7599_v34 }
 0xddd   :  { %v6619_v37 = vpop.f32.mrf.mxu0 }
 0xdde   :  { %v1543_v38 = vsel %vm191_vm4, %v1537_v36, -inf }
 0xddf   :  { %1544 = vmax.xlane.f32.xlu1 %v1543_v38 }
 0xe54   :  { %v1272_v39 = vpop.xlane.xlu1 %1271 }
 0xe55   :  { %v1276_v40 = vsub.f32 %v1264_v10, %v1272_v39 }
 0xe57   :  { %v1278_v41 = vmul.f32 1.442695, %v1276_v40  ;;  %v7072_v40 = vld [vmem:[%s8834_s5 + $0x18] sm:$0xff]  }
 0xe58   :  { %v1275_v42 = vpop.xlane.xlu0 %1274  ;;  %6627 = vmatpush3.bf16.msra.mxu0 %v7072_v40  ;;  %v5957_v40 = vld [vmem:[%s8839_s10 + $0x1] ss:$0 sm:$0xff] }
 0xe59   :  { %7190 = vpow2.f32 %v1278_v41  ;;  %v1277_v43 = vsub.f32 %v1267_v14, %v1275_v42  ;;  %v7073_v41 = vld [vmem:[%s8834_s5 + $0x10] sm:$0xff]   ;;  %6628 = vmatprep.subr.bf16.mxu0 %v7408_v1 }
 0xe5b   :  { %v1280_v44 = vmul.f32 1.442695, %v1277_v43 }
 0xe5c   :  { %v1407_v45 = vpop.xlane.xlu0 %1406  ;;  %6629 = vmatpush3.bf16.msra.mxu0 %v7073_v41 }
 0xe5d   :  { %7192 = vpow2.f32 %v1280_v44  ;;  %v1411_v30 = vsub.f32 %v1399_v21, %v1407_v45  ;;  %6642 = vmatprep.subr.bf16.mxu0 %v7408_v1 }
 0xe5f   :  { %v1413_v46 = vmul.f32 1.442695, %v1411_v30 }
 0xe60   :  { %v1410_v47 = vpop.xlane.xlu1 %1409 }
 0xe61   :  { %7194 = vpow2.f32 %v1413_v46  ;;  %v1412_v48 = vsub.f32 %v1402_v25, %v1410_v47 }
 0xe63   :  { %v1415_v49 = vmul.f32 1.442695, %v1412_v48 }
 0xe64   :  { %v1542_v34 = vpop.xlane.xlu0 %1541 }
 0xe65   :  { %7196 = vpow2.f32 %v1415_v49  ;;  %v1546_v50 = vsub.f32 %v1534_v31, %v1542_v34 }
 0xe66   :  { %v7191_v51 = vpop.eup %7190 }
 0xe67   :  { %v1548_v52 = vmul.f32 1.442695, %v1546_v50  ;;  %v1282_v53 = vsel %vm191_vm4, %v7191_v51, 0.0 }
 0xe68   :  { %1283 = vadd.xlane.f32.xlu0 %v1282_v53  ;;  %v1545_v61 = vpop.xlane.xlu1 %1544  ;;  %v5944_v53 = vld [vmem:[%s8835_s6 + $0x1] ss:$0 sm:$0xff] }
 0xe69   :  { %7198 = vpow2.f32 %v1548_v52  ;;  %v1547_v62 = vsub.f32 %v1537_v36, %v1545_v61 }
 0xe6a   :  { %v7193_v54 = vpop.eup %7192 }
 0xe6b   :  { %v1285_v55 = vsel %vm191_vm4, %v7193_v54, 0.0  ;;  %v1550_v6 = vmul.f32 1.442695, %v1547_v62 }
 0xe6c   :  { %1286 = vadd.xlane.f32.xlu1 %v1285_v55 }
 0xe6d   :  { %7200 = vpow2.f32 %v1550_v6 }
 0xe6e   :  { %v7195_v18 = vpop.eup %7194 }
 0xe6f   :  { %v1417_v56 = vsel %vm191_vm4, %v7195_v18, 0.0 }
 0xe70   :  { %1418 = vadd.xlane.f32.xlu0 %v1417_v56 }
 0xe72   :  { %v7197_v57 = vpop.eup %7196 }
 0xe73   :  { %v1420_v58 = vsel %vm191_vm4, %v7197_v57, 0.0 }
 0xe74   :  { %1421 = vadd.xlane.f32.xlu1 %v1420_v58 }
 0xe76   :  { %v7199_v59 = vpop.eup %7198 }
 0xe77   :  { %v1552_v60 = vsel %vm191_vm4, %v7199_v59, 0.0 }
 0xe78   :  { %1553 = vadd.xlane.f32.xlu0 %v1552_v60 }
 0xe7a   :  { %v7201_v63 = vpop.eup %7200 }
 0xe7b   :  { %v1555_v0 = vsel %vm191_vm4, %v7201_v63, 0.0 }
 0xe85   :  { %1428 = vrot.lane.b32.xlu1 %v7779_v29, %s8899_s19 }
 0xe8e   :  { %1293 = vrot.lane.b32.xlu0 %v7779_v29, %s8900_s18 }
 0xea9   :  { %1556 = vadd.xlane.f32.xlu1 %v1555_v0 }
 0xeba   :  { %1563 = vrot.lane.b32.xlu1 %v7779_v29, %s8901_s30 }
 0xef1   :  { %v1284_v7 = vpop.xlane.xlu0 %1283 }
 0xef2   :  { %7202 = vrcp.f32 %v1284_v7 }
 0xef5   :  { %v1287_v2 = vpop.xlane.xlu1 %1286 }
 0xef6   :  { %7204 = vrcp.f32 %v1287_v2 }
 0xef9   :  { %v1419_v3 = vpop.xlane.xlu0 %1418 }
 0xefa   :  { %7206 = vrcp.f32 %v1419_v3 }
 0xefd   :  { %v1422_v4 = vpop.xlane.xlu1 %1421 }
 0xefe   :  { %7208 = vrcp.f32 %v1422_v4 }
 0xeff   :  { %v7203_v5 = vpop.eup %7202 }
 0xf00   :  { %v1290_v10 = vmul.f32 %v7203_v5, %v7191_v51 }
 0xf01   :  { %v1554_v8 = vpop.xlane.xlu0 %1553  ;;  %v1429_v29 = vpop.permute.xlu1 %1428 }
 0xf02   :  { %7210 = vrcp.f32 %v1554_v8 }
 0xf03   :  { %v7205_v9 = vpop.eup %7204 }
 0xf04   :  { %v1291_v11 = vmul.f32 %v7205_v9, %v7193_v54  ;;  %v7075_v9 = vld [vmem:[%s8838_s9 + $0x10] sm:$0xff]  }
 0xf05   :  { %v1294_v12 = vpop.permute.xlu0 %1293 }
 0xf06   :  { %6597 = vmatpush3.bf16.msra.mxu1 %v1294_v12  ;;  %v1292_v13 = vpack.c.bf16 %v1291_v11, %v1290_v10  ;;  %v7076_v10 = vld [vmem:[%s8840_s11 + $0x78] sm:$0xff]   ;;  %v7077_v11 = vld [vmem:[%s8840_s11 + $0x70] sm:$0xff]   ;;  %v7078_v12 = vld [vmem:[%s8840_s11 + $0x68] sm:$0xff]  }
 0xf07   :  { %6608 = vmatprep.subr.bf16.mxu1 %v7408_v1  ;;  %v7207_v14 = vpop.eup %7206 }
 0xf08   :  { %v1425_v19 = vmul.f32 %v7207_v14, %v7195_v18  ;;  %v7080_v14 = vld [vmem:[%s8840_s11 + $0x58] sm:$0xff]  }
 0xf09   :  { %6599 = vmatmul.mubr.msk.bf16.vlgmr.msra.gmra.mxu1 %vm191_vm4, %v1292_v13  ;;  %v7079_v13 = vld [vmem:[%s8840_s11 + $0x60] sm:$0xff]  }
 0xf0a   :  { %6609 = vmatpush3.bf16.msra.mxu1 %v1429_v29  ;;  %6610 = vmatprep.mubr.msk.bf16.mxu1 %vm7409_vm0, %v7408_v1 }
 0xf0b   :  { %v7209_v15 = vpop.eup %7208  ;;  %6620 = vmatprep.subr.bf16.mxu1 %v7408_v1 }
 0xf0c   :  { %v1426_v20 = vmul.f32 %v7209_v15, %v7197_v57 }
 0xf0e   :  { %v1427_v21 = vpack.c.bf16 %v1426_v20, %v1425_v19 }
 0xf0f   :  { %v7211_v24 = vpop.eup %7210 }
 0xf10   :  { %v1560_v26 = vmul.f32 %v7211_v24, %v7199_v59 }
 0xf11   :  { %6611 = vmatmul.mubr.msk.bf16.vlgmr.msra.gmra.mxu1 %vm191_vm4, %v1427_v21 }
 0xf12   :  { %6622 = vmatprep.mubr.msk.bf16.mxu1 %vm7409_vm0, %v7408_v1 }
 0xf32   :  { %v1557_v22 = vpop.xlane.xlu1 %1556 }
 0xf33   :  { %7212 = vrcp.f32 %v1557_v22 }
 0xf36   :  { %v1564_v23 = vpop.permute.xlu1 %1563 }
 0xf37   :  { %6621 = vmatpush3.bf16.msra.mxu1 %v1564_v23 }
 0xf38   :  { %6634 = vmatprep.subr.bf16.mxu1 %v7408_v1 }
 0xf40   :  { %v7213_v25 = vpop.eup %7212 }
 0xf41   :  { %v1561_v27 = vmul.f32 %v7213_v25, %v7201_v63  ;;  %v5950_v25 = vld [vmem:[%s8836_s7 + $0x1] ss:$0 sm:$0xff] }
 0xf43   :  { %v1562_v28 = vpack.c.bf16 %v1561_v27, %v1560_v26 }
 0xf45   :  { %6623 = vmatmul.mubr.msk.bf16.vlgmr.msra.gmra.mxu1 %vm191_vm4, %v1562_v28 }
 0xf46   :  { %6638 = vmatprep.mubr.msk.bf16.mxu1 %vm7409_vm0, %v7408_v1 }
 0xfc9   :  { %v1333_v31 = vpop.f32.mrf.mxu1 }
 0xfca   :  { %1342 = vrot.lane.b32.xlu0 %v1333_v31, %s8902_s1  ;;  %v5951_v31 = vld [vmem:[%s8837_s8 + $0x1] ss:$0 sm:$0xff] }
 0xfcb   :  { %v6600_v32 = vpop.f32.mrf.mxu1 }
 0xfcd   :  { %v1336_v33 = vpop.f32.mrf.mxu1 }
 0xfce   :  { %1344 = vrot.lane.b32.xlu1 %v1336_v33, %s8902_s1 }
 0xfcf   :  { %v6601_v35 = vpop.f32.mrf.mxu1 }
 0xfd1   :  { %v1468_v36 = vpop.f32.mrf.mxu1 }
 0xfd2   :  { %1477 = vrot.lane.b32.xlu0 %v1468_v36, %s8903_s22 }
 0xfd3   :  { %v6612_v37 = vpop.f32.mrf.mxu1 }
 0xfd4   :  { %v7081_v37 = vld [vmem:[%s8840_s11 + $0x50] sm:$0xff]  }
 0xfd5   :  { %v1471_v38 = vpop.f32.mrf.mxu1 }
 0xfd6   :  { %1479 = vrot.lane.b32.xlu1 %v1471_v38, %s8903_s22  ;;  %v7082_v38 = vld [vmem:[%s8840_s11 + $0x48] sm:$0xff]  }
 0xfd7   :  { %v6613_v39 = vpop.f32.mrf.mxu1 }
 0xfd8   :  { %v7083_v39 = vld [vmem:[%s8840_s11 + $0x40] sm:$0xff]  }
0x1005   :  { %v1603_v42 = vpop.f32.mrf.mxu1 }
0x1006   :  { %1612 = vrot.lane.b32.xlu0 %v1603_v42, %s8904_s28 }
0x1007   :  { %v6624_v43 = vpop.f32.mrf.mxu1 }
0x1009   :  { %v1606_v44 = vpop.f32.mrf.mxu1 }
0x100a   :  { %1614 = vrot.lane.b32.xlu1 %v1606_v44, %s8904_s28 }
0x100b   :  { %v6625_v45 = vpop.f32.mrf.mxu1 }
0x103c   :  { %v1343_v30 = vpop.permute.xlu0 %1342 }
0x103d   :  { %1348 = vst.msk [vmem:[#allocation3] sm:$0xff] %vm397_vm5, %v1343_v30 }
0x1040   :  { %v1345_v46 = vpop.permute.xlu1 %1344 }
0x1041   :  { %1349 = vst.msk [vmem:[#allocation3 + $0x8] sm:$0xff] %vm397_vm5, %v1345_v46 }
0x1044   :  { %v1478_v47 = vpop.permute.xlu0 %1477 }
0x1045   :  { %1483 = vst.msk [vmem:[#allocation3] sm:$0xff] %vm533_vm6, %v1478_v47 }
0x1048   :  { %v1480_v48 = vpop.permute.xlu1 %1479 }
0x1049   :  { %1484 = vst.msk [vmem:[#allocation3 + $0x8] sm:$0xff] %vm533_vm6, %v1480_v48 }
0x1078   :  { %v1613_v49 = vpop.permute.xlu0 %1612 }
0x1079   :  { %1618 = vst.msk [vmem:[#allocation3] sm:$0xff] %vm669_vm7, %v1613_v49  ;;  %v5978_v49 = vld [vmem:[%s8841_s12 + $0x1] ss:$0 sm:$0xff] }
0x107c   :  { %v1615_v34 = vpop.permute.xlu1 %1614 }
0x107d   :  { %1619 = vst.msk [vmem:[#allocation3 + $0x8] sm:$0xff] %vm669_vm7, %v1615_v34 }
0x1080   :  { %v1620_v50 = vld [vmem:[#allocation3] sm:$0xff] }
0x1084   :  { %v1621_v51 = vld [vmem:[#allocation3 + $0x8] sm:$0xff] }
0x1085   :  { %v1622_v52 = vpack.c.bf16 %v1621_v51, %v1620_v50 }
0x1087   :  { %6631 = vmatmul.mubr.msk.bf16.vlgmr.msra.gmra.mxu0 %vm89_vm1, %v1622_v52 }
0x1088   :  { %6658 = vmatprep.mubr.msk.bf16.mxu0 %vm7409_vm0, %v7408_v1  ;;  %6643 = vmatpush3.bf16.msra.mxu0 %v7076_v10 }
0x1089   :  { %6644 = vmatprep.subr.bf16.mxu0 %v7408_v1 }
0x108c   :  { %6645 = vmatpush3.bf16.msra.mxu0 %v7077_v11 }
0x108d   :  { %6646 = vmatprep.subr.bf16.mxu0 %v7408_v1 }
0x1090   :  { %6647 = vmatpush3.bf16.msra.mxu0 %v7078_v12 }
0x1091   :  { %6648 = vmatprep.subr.bf16.mxu0 %v7408_v1 }
0x1094   :  { %6649 = vmatpush3.bf16.msra.mxu0 %v7079_v13  ;;  %v5989_v13 = vld [vmem:[%s8842_s13 + $0x1] ss:$0 sm:$0xff] }
0x1095   :  { %6650 = vmatprep.subr.bf16.mxu0 %v7408_v1 }
0x1098   :  { %6651 = vmatpush3.bf16.msra.mxu0 %v7080_v14 }
0x1099   :  { %6652 = vmatprep.subr.bf16.mxu0 %v7408_v1 }
0x109c   :  { %6653 = vmatpush3.bf16.msra.mxu0 %v7081_v37 }
0x109d   :  { %6654 = vmatprep.subr.bf16.mxu0 %v7408_v1 }
0x10a0   :  { %6655 = vmatpush3.bf16.msra.mxu0 %v7082_v38 }
0x10a1   :  { %6656 = vmatprep.subr.bf16.mxu0 %v7408_v1 }
0x10a4   :  { %6657 = vmatpush3.bf16.msra.mxu0 %v7083_v39 }
0x10a5   :  { %6688 = vmatprep.subr.bf16.mxu0 %v7408_v1 }
0x1147   :  { %v1685_v54 = vpop.f32.mrf.mxu0 }
0x1148   :  { %v1686_v55 = vadd.f32 %v5944_v53, %v1685_v54 }
0x1149   :  { %v6632_v18 = vpop.f32.mrf.mxu0 }
0x114a   :  { %v1692_v56 = vadd.f32 %v1686_v55, %v7765_v16 }
0x114b   :  { %v1688_v57 = vpop.f32.mrf.mxu0 }
0x114c   :  { %v1689_v58 = vadd.f32 %v5944_v53, %v1688_v57  ;;  %v1698_v59 = vsel %vm89_vm1, %v1692_v56, 0.0 }
0x114d   :  { %1699 = vadd.xlane.f32.xlu0 %v1698_v59  ;;  %v6633_v60 = vpop.f32.mrf.mxu0 }
0x114e   :  { %v1693_v61 = vadd.f32 %v1689_v58, %v7767_v17  ;;  %v7074_v17 = vld [vmem:[%s8838_s9 + $0x18] sm:$0xff]  }
0x114f   :  { %6635 = vmatpush3.bf16.msra.mxu1 %v7074_v17 }
0x1150   :  { %v1701_v62 = vsel %vm89_vm1, %v1693_v61, 0.0  ;;  %6636 = vmatprep.subr.bf16.mxu1 %v7408_v1 }
0x1151   :  { %1702 = vadd.xlane.f32.xlu1 %v1701_v62 }
0x1153   :  { %6637 = vmatpush3.bf16.msra.mxu1 %v7075_v9 }
0x1154   :  { %6662 = vmatprep.subr.bf16.mxu1 %v7408_v1 }
0x11d6   :  { %v1700_v6 = vpop.xlane.xlu0 %1699 }
0x11d7   :  { %v1704_v63 = vmul.f32 0.03125, %v1700_v6 }
0x11d9   :  { %v1706_v0 = vsub.f32 %v1692_v56, %v1704_v63 }
0x11da   :  { %v1703_v7 = vpop.xlane.xlu1 %1702 }
0x11db   :  { %v1705_v2 = vmul.f32 0.03125, %v1703_v7  ;;  %v1708_v3 = vmul.f32 %v1706_v0, %v1706_v0 }
0x11dd   :  { %v1707_v4 = vsub.f32 %v1693_v61, %v1705_v2  ;;  %v1710_v16 = vsel %vm89_vm1, %v1708_v3, 0.0  ;;  %v7084_v3 = vld [vmem:[%s8832_s3 + $0x28] sm:$0xff]  }
0x11de   :  { %1711 = vadd.xlane.f32.xlu0 %v1710_v16 }
0x11df   :  { %v1709_v5 = vmul.f32 %v1707_v4, %v1707_v4 }
0x11e1   :  { %v1713_v8 = vsel %vm89_vm1, %v1709_v5, 0.0 }
0x11e2   :  { %1714 = vadd.xlane.f32.xlu0 %v1713_v8 }
0x1267   :  { %v1712_v29 = vpop.xlane.xlu0 %1711 }
0x1268   :  { %v1716_v15 = vmul.f32 0.03125, %v1712_v29 }
0x126a   :  { %v1718_v19 = vadd.f32 1e-05, %v1716_v15 }
0x126b   :  { %v1715_v20 = vpop.xlane.xlu0 %1714 }
0x126c   :  { %7214 = vrsqrt.f32 %v1718_v19  ;;  %v1717_v21 = vmul.f32 0.03125, %v1715_v20  ;;  %v5990_v19 = vld [vmem:[%s8843_s14 + $0x1] ss:$0 sm:$0xff] }
0x126e   :  { %v1719_v22 = vadd.f32 1e-05, %v1717_v21 }
0x1270   :  { %7216 = vrsqrt.f32 %v1719_v22 }
0x1279   :  { %v7215_v23 = vpop.eup %7214 }
0x127a   :  { %v1722_v24 = vmul.f32 %v7215_v23, %v1706_v0 }
0x127c   :  { %v1730_v28 = vmul.f32 %v5950_v25, %v1722_v24  ;;  %v5996_v24 = vld [vmem:[%s8833_s4 + $0x2] ss:$0 sm:$0xff] }
0x127d   :  { %v7217_v26 = vpop.eup %7216 }
0x127e   :  { %v1723_v27 = vmul.f32 %v7217_v26, %v1707_v4  ;;  %v1738_v33 = vadd.f32 %v5951_v31, %v1730_v28  ;;  %v7085_v4 = vld [vmem:[%s8832_s3 + $0x20] sm:$0xff]  }
0x1280   :  { %v1731_v32 = vmul.f32 %v5950_v25, %v1723_v27 }
0x1282   :  { %v1739_v35 = vadd.f32 %v5951_v31, %v1731_v32 }
0x1284   :  { %v1740_v36 = vpack.c.bf16 %v1739_v35, %v1738_v33 }
0x1286   :  { %6639 = vmatmul.mubr.msk.bf16.vlgmr.msra.gmra.mxu1 %vm89_vm1, %v1740_v36 }
0x1287   :  { %6666 = vmatprep.mubr.msk.bf16.mxu1 %vm7409_vm0, %v7408_v1  ;;  %6663 = vmatpush3.bf16.msra.mxu1 %v7084_v3 }
0x1288   :  { %6664 = vmatprep.subr.bf16.mxu1 %v7408_v1 }
0x128b   :  { %6665 = vmatpush3.bf16.msra.mxu1 %v7085_v4 }
0x128c   :  { %6670 = vmatprep.subr.bf16.mxu1 %v7408_v1 }
0x1346   :  { %v1803_v41 = vpop.f32.mrf.mxu1 }
0x1347   :  { %v1804_v43 = vadd.f32 %v5957_v40, %v1803_v41  ;;  %v8013_v41 = vld [vmem:[%s8831_s2] sm:$0xff] }
0x1348   :  { %v6640_v42 = vpop.f32.mrf.mxu1 }
0x1349   :  { %v1810_v46 = vmax.f32 %v1804_v43, 0.0 }
0x134a   :  { %v1806_v44 = vpop.f32.mrf.mxu1 }
0x134b   :  { %v1807_v45 = vadd.f32 %v5957_v40, %v1806_v44 }
0x134c   :  { %v6641_v30 = vpop.f32.mrf.mxu1 }
0x134d   :  { %v1811_v47 = vmax.f32 %v1807_v45, 0.0  ;;  %v8020_v30 = vld [vmem:[%s8831_s2 + $0x8] sm:$0xff]  ;;  %s8918_s2 = sld [smem:[#allocation11_spill]] }
0x134f   :  { %v1812_v48 = vpack.c.bf16 %v1811_v47, %v1810_v46 }
0x1351   :  { %6659 = vmatmul.mubr.bf16.vlgmr.msra.gmra.mxu0 %v1812_v48 }
0x1352   :  { %6690 = vmatprep.mubr.msk.bf16.mxu0 %vm7409_vm0, %v7408_v1 }
0x1411   :  { %v1920_v34 = vpop.f32.mrf.mxu0 }
0x1412   :  { %v1921_v50 = vadd.f32 %v5978_v49, %v1920_v34 }
0x1413   :  { %v6660_v51 = vpop.f32.mrf.mxu0 }
0x1414   :  { %v1927_v52 = vadd.f32 %v1921_v50, %v1738_v33 }
0x1415   :  { %v1923_v53 = vpop.f32.mrf.mxu0 }
0x1416   :  { %v1924_v54 = vadd.f32 %v5978_v49, %v1923_v53  ;;  %v1933_v55 = vsel %vm89_vm1, %v1927_v52, 0.0 }
0x1417   :  { %1934 = vadd.xlane.f32.xlu1 %v1933_v55  ;;  %v6661_v18 = vpop.f32.mrf.mxu0 }
0x1418   :  { %v1928_v56 = vadd.f32 %v1924_v54, %v1739_v35 }
0x141a   :  { %v1936_v57 = vsel %vm89_vm1, %v1928_v56, 0.0 }
0x141b   :  { %1937 = vadd.xlane.f32.xlu0 %v1936_v57 }
0x14a0   :  { %v1935_v58 = vpop.xlane.xlu1 %1934 }
0x14a1   :  { %v1939_v59 = vmul.f32 0.03125, %v1935_v58 }
0x14a3   :  { %v1941_v60 = vsub.f32 %v1927_v52, %v1939_v59 }
0x14a4   :  { %v1938_v61 = vpop.xlane.xlu0 %1937 }
0x14a5   :  { %v1940_v62 = vmul.f32 0.03125, %v1938_v61  ;;  %v1943_v6 = vmul.f32 %v1941_v60, %v1941_v60 }
0x14a7   :  { %v1942_v63 = vsub.f32 %v1928_v56, %v1940_v62  ;;  %v1945_v0 = vsel %vm89_vm1, %v1943_v6, 0.0 }
0x14a8   :  { %1946 = vadd.xlane.f32.xlu1 %v1945_v0 }
0x14a9   :  { %v1944_v7 = vmul.f32 %v1942_v63, %v1942_v63 }
0x14ab   :  { %v1948_v2 = vsel %vm89_vm1, %v1944_v7, 0.0 }
0x14ac   :  { %1949 = vadd.xlane.f32.xlu0 %v1948_v2 }
0x1531   :  { %v1947_v16 = vpop.xlane.xlu1 %1946 }
0x1532   :  { %v1951_v5 = vmul.f32 0.03125, %v1947_v16 }
0x1534   :  { %v1953_v8 = vadd.f32 1e-05, %v1951_v5 }
0x1535   :  { %v1950_v17 = vpop.xlane.xlu0 %1949 }
0x1536   :  { %7218 = vrsqrt.f32 %v1953_v8  ;;  %v1952_v9 = vmul.f32 0.03125, %v1950_v17 }
0x1538   :  { %v1954_v10 = vadd.f32 1e-05, %v1952_v9 }
0x153a   :  { %7220 = vrsqrt.f32 %v1954_v10 }
0x1543   :  { %v7219_v11 = vpop.eup %7218 }
0x1544   :  { %v1957_v12 = vmul.f32 %v7219_v11, %v1941_v60 }
0x1546   :  { %v1965_v15 = vmul.f32 %v5989_v13, %v1957_v12 }
0x1547   :  { %v7221_v14 = vpop.eup %7220 }
0x1548   :  { %v1958_v29 = vmul.f32 %v7221_v14, %v1942_v63  ;;  %v7973_v21 = vadd.f32 %v5990_v19, %v1965_v15 }
0x154a   :  { %v1966_v20 = vmul.f32 %v5989_v13, %v1958_v29 }
0x154c   :  { %v7975_v22 = vadd.f32 %v5990_v19, %v1966_v20 }
0x154e   :  { %v1975_v23 = vpack.c.bf16 %v7975_v22, %v7973_v21 }
0x1550   :  { %6667 = vmatmul.mubr.msk.bf16.vlgmr.msra.gmra.mxu1 %vm89_vm1, %v1975_v23 }
0x1551   :  { %6672 = vmatprep.mubr.msk.bf16.mxu1 %vm7409_vm0, %v7408_v1 }
0x1610   :  { %v2038_v25 = vpop.f32.mrf.mxu1 }
0x1611   :  { %v2039_v26 = vadd.f32 %v5996_v24, %v2038_v25 }
0x1612   :  { %v6668_v27 = vpop.f32.mrf.mxu1 }
0x1613   :  { %2045 = vst.msk [vmem:[#allocation2] sm:$0xff] %vm134_vm2, %v2039_v26 }
0x1614   :  { %v2041_v28 = vpop.f32.mrf.mxu1 }
0x1615   :  { %v2042_v31 = vadd.f32 %v5996_v24, %v2041_v28 }
0x1616   :  { %v6669_v32 = vpop.f32.mrf.mxu1 }
0x1617   :  { %2046 = vst.msk [vmem:[#allocation2 + $0x8] sm:$0xff] %vm134_vm2, %v2042_v31 }
0x161a   :  { %v2047_v33 = vld [vmem:[#allocation2] sm:$0xff] }
0x161e   :  { %v2048_v35 = vld [vmem:[#allocation2 + $0x8] sm:$0xff] }
0x161f   :  { %v7987_v36 = vpack.c.bf16 %v2048_v35, %v2047_v33 }
0x1621   :  { %2051 = vrot.lane.b32.xlu1 %v7987_v36, %s8905_s25 }
0x1625   :  { %2123 = vrot.lane.b32.xlu1 %v7987_v36, %s8906_s20 }
0x1629   :  { %2176 = vrot.lane.b32.xlu1 %v7987_v36, %s8907_s0 }
0x162d   :  { %2313 = vrot.lane.b32.xlu1 %v7987_v36, %s8908_s27 }
0x1631   :  { %2311 = vrot.lane.b32.xlu1 %v7987_v36, %s8909_s26 }
0x1635   :  { %2448 = vrot.lane.b32.xlu1 %v7987_v36, %s8898_s21 }
0x1639   :  { %2446 = vrot.lane.b32.xlu1 %v7987_v36, %s8910_s29 }
0x1693   :  { %v2052_v37 = vpop.permute.xlu1 %2051 }
0x1694   :  { %v2057_v38 = vsel %vm143_vm3, %v2052_v37, 0 }
0x1695   :  { %6671 = vmatpush3.bf16.xpose.msra.mxu1 %v2057_v38 }
0x1696   :  { %6676 = vmatprep.subr.bf16.mxu1 %v7408_v1 }
0x1697   :  { %v2124_v39 = vpop.permute.xlu1 %2123 }
0x169b   :  { %v2177_v61 = vpop.permute.xlu1 %2176 }
0x169c   :  { %6673 = vmatmul.mubr.msk.bf16.vlgmr.msra.gmra.mxu1 %vm143_vm3, %v7987_v36 }
0x169d   :  { %6677 = vmatpush3.bf16.msra.mxu1 %v2124_v39  ;;  %6678 = vmatprep.mubr.msk.bf16.mxu1 %vm7409_vm0, %v7408_v1 }
0x169e   :  { %6682 = vmatprep.subr.bf16.mxu1 %v7408_v1 }
0x169f   :  { %v2314_v2 = vpop.permute.xlu1 %2313 }
0x16a0   :  { %v2319_v4 = vsel %vm143_vm3, %v2314_v2, 0 }
0x16a3   :  { %v2312_v3 = vpop.permute.xlu1 %2311 }
0x16a7   :  { %v2449_v16 = vpop.permute.xlu1 %2448 }
0x16a8   :  { %v2454_v5 = vsel %vm143_vm3, %v2449_v16, 0 }
0x16ab   :  { %v2447_v8 = vpop.permute.xlu1 %2446 }
0x175c   :  { %v2093_v40 = vpop.f32.mrf.mxu1 }
0x175d   :  { %v2094_v42 = vadd.f32 %v8013_v41, %v2093_v40 }
0x175e   :  { %v6674_v43 = vpop.f32.mrf.mxu1 }
0x175f   :  { %v2100_v44 = vsel %vm191_vm4, %v2094_v42, -inf }
0x1760   :  { %2101 = vmax.xlane.f32.xlu0 %v2100_v44  ;;  %v2096_v45 = vpop.f32.mrf.mxu1 }
0x1761   :  { %v2097_v46 = vadd.f32 %v8020_v30, %v2096_v45 }
0x1762   :  { %v6675_v47 = vpop.f32.mrf.mxu1 }
0x1763   :  { %v2103_v48 = vsel %vm191_vm4, %v2097_v46, -inf }
0x1764   :  { %2104 = vmax.xlane.f32.xlu0 %v2103_v48 }
0x17e9   :  { %v2102_v49 = vpop.xlane.xlu0 %2101 }
0x17ea   :  { %v2106_v34 = vsub.f32 %v2094_v42, %v2102_v49 }
0x17ec   :  { %v2108_v50 = vmul.f32 1.442695, %v2106_v34 }
0x17ed   :  { %v2105_v51 = vpop.xlane.xlu0 %2104 }
0x17ee   :  { %7222 = vpow2.f32 %v2108_v50  ;;  %v2107_v52 = vsub.f32 %v2097_v46, %v2105_v51 }
0x17f0   :  { %v2110_v53 = vmul.f32 1.442695, %v2107_v52 }
0x17f2   :  { %7224 = vpow2.f32 %v2110_v53 }
0x17fb   :  { %v7223_v54 = vpop.eup %7222 }
0x17fc   :  { %v2112_v55 = vsel %vm191_vm4, %v7223_v54, 0.0 }
0x17fd   :  { %2113 = vadd.xlane.f32.xlu0 %v2112_v55 }
0x17ff   :  { %v7225_v18 = vpop.eup %7224 }
0x1800   :  { %v2115_v56 = vsel %vm191_vm4, %v7225_v18, 0.0 }
0x1801   :  { %2116 = vadd.xlane.f32.xlu0 %v2115_v56 }
0x1817   :  { %2178 = vrot.lane.b32.xlu0 %v7987_v36, %s8911_s16 }
0x1886   :  { %v2114_v57 = vpop.xlane.xlu0 %2113 }
0x1887   :  { %7226 = vrcp.f32 %v2114_v57 }
0x188a   :  { %v2117_v58 = vpop.xlane.xlu0 %2116 }
0x188b   :  { %7228 = vrcp.f32 %v2117_v58 }
0x188e   :  { %v2179_v63 = vpop.permute.xlu0 %2178 }
0x188f   :  { %v2184_v7 = vsel %vm143_vm3, %v2179_v63, 0 }
0x1894   :  { %v7227_v59 = vpop.eup %7226 }
0x1895   :  { %v2120_v62 = vmul.f32 %v7227_v59, %v7223_v54 }
0x1898   :  { %v7229_v60 = vpop.eup %7228 }
0x1899   :  { %v2121_v6 = vmul.f32 %v7229_v60, %v7225_v18 }
0x189b   :  { %v2122_v0 = vpack.c.bf16 %v2121_v6, %v2120_v62 }
0x189d   :  { %6679 = vmatmul.mubr.msk.bf16.vlgmr.msra.gmra.mxu1 %vm191_vm4, %v2122_v0 }
0x189e   :  { %6683 = vmatpush3.bf16.xpose.msra.mxu1 %v2184_v7  ;;  %6684 = vmatprep.mubr.msk.bf16.mxu1 %vm7409_vm0, %v7408_v1 }
0x189f   :  { %6694 = vmatprep.subr.bf16.mxu1 %v7408_v1 }
0x18a5   :  { %6685 = vmatmul.mubr.msk.bf16.vlgmr.msra.gmra.mxu1 %vm143_vm3, %v2177_v61 }
0x18a6   :  { %6695 = vmatpush3.bf16.xpose.msra.mxu1 %v2319_v4  ;;  %6696 = vmatprep.mubr.msk.bf16.mxu1 %vm7409_vm0, %v7408_v1 }
0x18a7   :  { %6706 = vmatprep.subr.bf16.mxu1 %v7408_v1 }
0x18ad   :  { %6697 = vmatmul.mubr.msk.bf16.vlgmr.msra.gmra.mxu1 %vm143_vm3, %v2312_v3 }
0x18ae   :  { %6707 = vmatpush3.bf16.xpose.msra.mxu1 %v2454_v5  ;;  %6708 = vmatprep.mubr.msk.bf16.mxu1 %vm7409_vm0, %v7408_v1 }
0x18af   :  { %6718 = vmatprep.subr.bf16.mxu1 %v7408_v1 }
0x18b5   :  { %6709 = vmatmul.mubr.msk.bf16.vlgmr.msra.gmra.mxu1 %vm143_vm3, %v2447_v8 }
0x18b6   :  { %6722 = vmatprep.mubr.msk.bf16.mxu1 %vm7409_vm0, %v7408_v1 }
0x195d   :  { %v2163_v17 = vpop.f32.mrf.mxu1 }
0x195e   :  { %2170 = vst.msk [vmem:[#allocation3] sm:$0xff] %vm143_vm3, %v2163_v17 }
0x195f   :  { %v6680_v9 = vpop.f32.mrf.mxu1 }
0x1961   :  { %v2166_v10 = vpop.f32.mrf.mxu1 }
0x1962   :  { %2171 = vst.msk [vmem:[#allocation3 + $0x8] sm:$0xff] %vm143_vm3, %v2166_v10 }
0x1963   :  { %v6681_v11 = vpop.f32.mrf.mxu1 }
0x1965   :  { %v2220_v12 = vpop.f32.mrf.mxu1 }
0x1966   :  { %v2221_v13 = vadd.f32 %v8013_v41, %v2220_v12 }
0x1967   :  { %v6686_v14 = vpop.f32.mrf.mxu1 }
0x1968   :  { %v2227_v29 = vsel %vm191_vm4, %v2221_v13, -inf }
0x1969   :  { %2228 = vmax.xlane.f32.xlu0 %v2227_v29  ;;  %v2223_v15 = vpop.f32.mrf.mxu1 }
0x196a   :  { %v2224_v19 = vadd.f32 %v8020_v30, %v2223_v15 }
0x196b   :  { %v6687_v20 = vpop.f32.mrf.mxu1 }
0x196c   :  { %v2230_v23 = vsel %vm191_vm4, %v2224_v19, -inf }
0x196d   :  { %2231 = vmax.xlane.f32.xlu1 %v2230_v23  ;;  %v2355_v24 = vpop.f32.mrf.mxu1 }
0x196e   :  { %v2356_v25 = vadd.f32 %v8013_v41, %v2355_v24 }
0x196f   :  { %v6698_v26 = vpop.f32.mrf.mxu1 }
0x1970   :  { %v2362_v27 = vsel %vm191_vm4, %v2356_v25, -inf }
0x1971   :  { %2363 = vmax.xlane.f32.xlu0 %v2362_v27  ;;  %v2358_v28 = vpop.f32.mrf.mxu1 }
0x1972   :  { %v2359_v31 = vadd.f32 %v8020_v30, %v2358_v28 }
0x1973   :  { %v6699_v32 = vpop.f32.mrf.mxu1 }
0x1974   :  { %v2365_v33 = vsel %vm191_vm4, %v2359_v31, -inf }
0x1975   :  { %2366 = vmax.xlane.f32.xlu0 %v2365_v33  ;;  %v2490_v35 = vpop.f32.mrf.mxu1 }
0x1976   :  { %v2491_v37 = vadd.f32 %v8013_v41, %v2490_v35 }
0x1977   :  { %v6710_v38 = vpop.f32.mrf.mxu1 }
0x1978   :  { %v2497_v39 = vsel %vm191_vm4, %v2491_v37, -inf }
0x1979   :  { %2498 = vmax.xlane.f32.xlu1 %v2497_v39  ;;  %v2493_v40 = vpop.f32.mrf.mxu1 }
0x197a   :  { %v2494_v42 = vadd.f32 %v8020_v30, %v2493_v40 }
0x197b   :  { %v6711_v43 = vpop.f32.mrf.mxu1 }
0x197c   :  { %v2500_v44 = vsel %vm191_vm4, %v2494_v42, -inf }
0x197d   :  { %2501 = vmax.xlane.f32.xlu0 %v2500_v44 }
0x198a   :  { %2250 = vrot.lane.b32.xlu1 %v7987_v36, %s8900_s18 }
0x19f2   :  { %v2229_v45 = vpop.xlane.xlu0 %2228 }
0x19f3   :  { %v2233_v46 = vsub.f32 %v2221_v13, %v2229_v45  ;;  %v7086_v45 = vld [vmem:[%s8834_s5 + $0x28] sm:$0xff]  }
0x19f4   :  { %6719 = vmatpush3.bf16.msra.mxu1 %v7086_v45 }
0x19f5   :  { %v2235_v47 = vmul.f32 1.442695, %v2233_v46  ;;  %6720 = vmatprep.subr.bf16.mxu1 %v7408_v1 }
0x19f6   :  { %v2232_v48 = vpop.xlane.xlu1 %2231 }
0x19f7   :  { %7230 = vpow2.f32 %v2235_v47  ;;  %v2234_v49 = vsub.f32 %v2224_v19, %v2232_v48  ;;  %v7087_v47 = vld [vmem:[%s8834_s5 + $0x20] sm:$0xff]   ;;  %s8923_s5 = sld [smem:[#allocation13_spill]] }
0x19f8   :  { %6721 = vmatpush3.bf16.msra.mxu1 %v7087_v47  ;;  %v7095_v47 = vld [vmem:[%s8840_s11 + $0x90] sm:$0xff]  }
0x19f9   :  { %v2237_v34 = vmul.f32 1.442695, %v2234_v49  ;;  %6734 = vmatprep.subr.bf16.mxu1 %v7408_v1 }
0x19fa   :  { %v2364_v50 = vpop.xlane.xlu0 %2363 }
0x19fb   :  { %7232 = vpow2.f32 %v2237_v34  ;;  %v2368_v51 = vsub.f32 %v2356_v25, %v2364_v50 }
0x19fd   :  { %v2370_v52 = vmul.f32 1.442695, %v2368_v51 }
0x19fe   :  { %v2367_v53 = vpop.xlane.xlu0 %2366 }
0x19ff   :  { %7234 = vpow2.f32 %v2370_v52  ;;  %v2369_v54 = vsub.f32 %v2359_v31, %v2367_v53 }
0x1a01   :  { %v2372_v55 = vmul.f32 1.442695, %v2369_v54 }
0x1a02   :  { %v2499_v18 = vpop.xlane.xlu1 %2498 }
0x1a03   :  { %7236 = vpow2.f32 %v2372_v55  ;;  %v2503_v56 = vsub.f32 %v2491_v37, %v2499_v18 }
0x1a04   :  { %v7231_v57 = vpop.eup %7230 }
0x1a05   :  { %v2505_v58 = vmul.f32 1.442695, %v2503_v56  ;;  %v2239_v59 = vsel %vm191_vm4, %v7231_v57, 0.0 }
0x1a06   :  { %2240 = vadd.xlane.f32.xlu1 %v2239_v59  ;;  %v2251_v60 = vpop.permute.xlu1 %2250  ;;  %v2502_v61 = vpop.xlane.xlu0 %2501 }
0x1a07   :  { %7238 = vpow2.f32 %v2505_v58  ;;  %v2504_v62 = vsub.f32 %v2494_v42, %v2502_v61  ;;  %6689 = vmatpush3.bf16.msra.mxu0 %v2251_v60  ;;  %v6013_v61 = vld [vmem:[%s8835_s6 + $0x2] ss:$0 sm:$0xff]  ;;  %s8914_s6 = sld [smem:[#allocation11_spill]] }
0x1a08   :  { %v7233_v6 = vpop.eup %7232  ;;  %6700 = vmatprep.subr.bf16.mxu0 %v7408_v1 }
0x1a09   :  { %v2507_v63 = vmul.f32 1.442695, %v2504_v62  ;;  %v2242_v0 = vsel %vm191_vm4, %v7233_v6, 0.0 }
0x1a0a   :  { %2243 = vadd.xlane.f32.xlu0 %v2242_v0 }
0x1a0b   :  { %7240 = vpow2.f32 %v2507_v63 }
0x1a0c   :  { %v7235_v7 = vpop.eup %7234 }
0x1a0d   :  { %v2374_v2 = vsel %vm191_vm4, %v7235_v7, 0.0 }
0x1a0e   :  { %2375 = vadd.xlane.f32.xlu1 %v2374_v2 }
0x1a10   :  { %v7237_v3 = vpop.eup %7236 }
0x1a11   :  { %v2377_v4 = vsel %vm191_vm4, %v7237_v3, 0.0 }
0x1a12   :  { %2378 = vadd.xlane.f32.xlu0 %v2377_v4 }
0x1a14   :  { %v7239_v16 = vpop.eup %7238 }
0x1a15   :  { %v2509_v5 = vsel %vm191_vm4, %v7239_v16, 0.0 }
0x1a16   :  { %2510 = vadd.xlane.f32.xlu1 %v2509_v5 }
0x1a18   :  { %v7241_v8 = vpop.eup %7240 }
0x1a19   :  { %v2512_v17 = vsel %vm191_vm4, %v7241_v8, 0.0 }
0x1a1a   :  { %2513 = vadd.xlane.f32.xlu0 %v2512_v17 }
0x1a27   :  { %2520 = vrot.lane.b32.xlu1 %v7987_v36, %s8901_s30 }
0x1a30   :  { %2385 = vrot.lane.b32.xlu0 %v7987_v36, %s8899_s19 }
0x1a8f   :  { %v2241_v9 = vpop.xlane.xlu1 %2240 }
0x1a90   :  { %7242 = vrcp.f32 %v2241_v9 }
0x1a93   :  { %v2244_v10 = vpop.xlane.xlu0 %2243 }
0x1a94   :  { %7244 = vrcp.f32 %v2244_v10 }
0x1a97   :  { %v2376_v11 = vpop.xlane.xlu1 %2375 }
0x1a98   :  { %7246 = vrcp.f32 %v2376_v11 }
0x1a9b   :  { %v2379_v12 = vpop.xlane.xlu0 %2378 }
0x1a9c   :  { %7248 = vrcp.f32 %v2379_v12 }
0x1a9d   :  { %v7243_v13 = vpop.eup %7242 }
0x1a9e   :  { %v2247_v15 = vmul.f32 %v7243_v13, %v7231_v57 }
0x1a9f   :  { %v2511_v14 = vpop.xlane.xlu1 %2510 }
0x1aa0   :  { %7250 = vrcp.f32 %v2511_v14 }
0x1aa1   :  { %v7245_v29 = vpop.eup %7244 }
0x1aa2   :  { %v2248_v19 = vmul.f32 %v7245_v29, %v7233_v6 }
0x1aa3   :  { %v2514_v20 = vpop.xlane.xlu0 %2513  ;;  %v2521_v31 = vpop.permute.xlu1 %2520 }
0x1aa4   :  { %7252 = vrcp.f32 %v2514_v20  ;;  %v2249_v23 = vpack.c.bf16 %v2248_v19, %v2247_v15  ;;  %v7089_v15 = vld [vmem:[%s8838_s9 + $0x20] sm:$0xff]   ;;  %v7090_v19 = vld [vmem:[%s8840_s11 + $0xb8] sm:$0xff]   ;;  %v7091_v20 = vld [vmem:[%s8840_s11 + $0xb0] sm:$0xff]  }
0x1aa5   :  { %v7247_v36 = vpop.eup %7246 }
0x1aa6   :  { %6691 = vmatmul.mubr.msk.bf16.vlgmr.msra.gmra.mxu0 %vm191_vm4, %v2249_v23  ;;  %v2382_v26 = vmul.f32 %v7247_v36, %v7235_v7  ;;  %v7092_v23 = vld [vmem:[%s8840_s11 + $0xa8] sm:$0xff]   ;;  %v7093_v36 = vld [vmem:[%s8840_s11 + $0xa0] sm:$0xff]  }
0x1aa7   :  { %v2386_v24 = vpop.permute.xlu0 %2385  ;;  %6702 = vmatprep.mubr.msk.bf16.mxu0 %vm7409_vm0, %v7408_v1 }
0x1aa8   :  { %6701 = vmatpush3.bf16.msra.mxu0 %v2386_v24  ;;  %v7094_v24 = vld [vmem:[%s8840_s11 + $0x98] sm:$0xff]  }
0x1aa9   :  { %v7249_v25 = vpop.eup %7248  ;;  %6712 = vmatprep.subr.bf16.mxu0 %v7408_v1 }
0x1aaa   :  { %v2383_v27 = vmul.f32 %v7249_v25, %v7237_v3 }
0x1aac   :  { %v2384_v28 = vpack.c.bf16 %v2383_v27, %v2382_v26 }
0x1aad   :  { %v7251_v32 = vpop.eup %7250 }
0x1aae   :  { %6703 = vmatmul.mubr.msk.bf16.vlgmr.msra.gmra.mxu0 %vm191_vm4, %v2384_v28  ;;  %v2517_v35 = vmul.f32 %v7251_v32, %v7239_v16 }
0x1aaf   :  { %6713 = vmatpush3.bf16.msra.mxu0 %v2521_v31  ;;  %6714 = vmatprep.mubr.msk.bf16.mxu0 %vm7409_vm0, %v7408_v1 }
0x1ab0   :  { %6726 = vmatprep.subr.bf16.mxu0 %v7408_v1 }
0x1ab1   :  { %v7253_v33 = vpop.eup %7252 }
0x1ab2   :  { %v2518_v37 = vmul.f32 %v7253_v33, %v7241_v8 }
0x1ab4   :  { %v2519_v38 = vpack.c.bf16 %v2518_v37, %v2517_v35  ;;  %v6019_v37 = vld [vmem:[%s8836_s7 + $0x2] ss:$0 sm:$0xff] }
0x1ab6   :  { %6715 = vmatmul.mubr.msk.bf16.vlgmr.msra.gmra.mxu0 %vm191_vm4, %v2519_v38 }
0x1ab7   :  { %6730 = vmatprep.mubr.msk.bf16.mxu0 %vm7409_vm0, %v7408_v1 }
0x1b66   :  { %v2290_v39 = vpop.f32.mrf.mxu0 }
0x1b67   :  { %2299 = vrot.lane.b32.xlu1 %v2290_v39, %s8902_s1 }
0x1b68   :  { %v6692_v40 = vpop.f32.mrf.mxu0 }
0x1b6a   :  { %v2293_v42 = vpop.f32.mrf.mxu0 }
0x1b6b   :  { %2301 = vrot.lane.b32.xlu0 %v2293_v42, %s8902_s1  ;;  %v6020_v42 = vld [vmem:[%s8837_s8 + $0x2] ss:$0 sm:$0xff] }
0x1b6c   :  { %v6693_v43 = vpop.f32.mrf.mxu0 }
0x1b6e   :  { %v2425_v44 = vpop.f32.mrf.mxu0 }
0x1b6f   :  { %2434 = vrot.lane.b32.xlu1 %v2425_v44, %s8903_s22 }
0x1b70   :  { %v6704_v46 = vpop.f32.mrf.mxu0 }
0x1b72   :  { %v2428_v48 = vpop.f32.mrf.mxu0 }
0x1b73   :  { %2436 = vrot.lane.b32.xlu0 %v2428_v48, %s8903_s22  ;;  %v7096_v48 = vld [vmem:[%s8840_s11 + $0x88] sm:$0xff]  }
0x1b74   :  { %v6705_v49 = vpop.f32.mrf.mxu0 }
0x1b75   :  { %v7097_v49 = vld [vmem:[%s8840_s11 + $0x80] sm:$0xff]  }
0x1b76   :  { %v2560_v34 = vpop.f32.mrf.mxu0 }
0x1b77   :  { %2569 = vrot.lane.b32.xlu1 %v2560_v34, %s8904_s28  ;;  %v6026_v34 = vld [vmem:[%s8839_s10 + $0x2] ss:$0 sm:$0xff] }
0x1b78   :  { %v6716_v50 = vpop.f32.mrf.mxu0 }
0x1b7a   :  { %v2563_v51 = vpop.f32.mrf.mxu0 }
0x1b7b   :  { %2571 = vrot.lane.b32.xlu0 %v2563_v51, %s8904_s28  ;;  %s8915_s28 = sld [smem:[#allocation9_spill]] }
0x1b7c   :  { %v6717_v52 = vpop.f32.mrf.mxu0 }
0x1bd9   :  { %v2300_v53 = vpop.permute.xlu1 %2299 }
0x1bda   :  { %2305 = vst.msk [vmem:[#allocation3] sm:$0xff] %vm397_vm5, %v2300_v53 }
0x1bdd   :  { %v2302_v54 = vpop.permute.xlu0 %2301 }
0x1bde   :  { %2306 = vst.msk [vmem:[#allocation3 + $0x8] sm:$0xff] %vm397_vm5, %v2302_v54 }
0x1be1   :  { %v2435_v55 = vpop.permute.xlu1 %2434 }
0x1be2   :  { %2440 = vst.msk [vmem:[#allocation3] sm:$0xff] %vm533_vm6, %v2435_v55 }
0x1be5   :  { %v2437_v18 = vpop.permute.xlu0 %2436 }
0x1be6   :  { %2441 = vst.msk [vmem:[#allocation3 + $0x8] sm:$0xff] %vm533_vm6, %v2437_v18 }
0x1be9   :  { %v2570_v56 = vpop.permute.xlu1 %2569 }
0x1bea   :  { %2575 = vst.msk [vmem:[#allocation3] sm:$0xff] %vm669_vm7, %v2570_v56 }
0x1bed   :  { %v2572_v57 = vpop.permute.xlu0 %2571 }
0x1bee   :  { %2576 = vst.msk [vmem:[#allocation3 + $0x8] sm:$0xff] %vm669_vm7, %v2572_v57 }
0x1bf1   :  { %v2577_v58 = vld [vmem:[#allocation3] sm:$0xff] }
0x1bf5   :  { %v2578_v59 = vld [vmem:[#allocation3 + $0x8] sm:$0xff] }
0x1bf6   :  { %v2579_v60 = vpack.c.bf16 %v2578_v59, %v2577_v58  ;;  %v6047_v58 = vld [vmem:[%s8841_s12 + $0x2] ss:$0 sm:$0xff] }
0x1bf8   :  { %6723 = vmatmul.mubr.msk.bf16.vlgmr.msra.gmra.mxu1 %vm89_vm1, %v2579_v60 }
0x1bf9   :  { %6750 = vmatprep.mubr.msk.bf16.mxu1 %vm7409_vm0, %v7408_v1  ;;  %6735 = vmatpush3.bf16.msra.mxu1 %v7090_v19 }
0x1bfa   :  { %6736 = vmatprep.subr.bf16.mxu1 %v7408_v1 }
0x1bfd   :  { %6737 = vmatpush3.bf16.msra.mxu1 %v7091_v20 }
0x1bfe   :  { %6738 = vmatprep.subr.bf16.mxu1 %v7408_v1 }
0x1c01   :  { %6739 = vmatpush3.bf16.msra.mxu1 %v7092_v23 }
0x1c02   :  { %6740 = vmatprep.subr.bf16.mxu1 %v7408_v1 }
0x1c05   :  { %6741 = vmatpush3.bf16.msra.mxu1 %v7093_v36 }
0x1c06   :  { %6742 = vmatprep.subr.bf16.mxu1 %v7408_v1 }
0x1c09   :  { %6743 = vmatpush3.bf16.msra.mxu1 %v7094_v24 }
0x1c0a   :  { %6744 = vmatprep.subr.bf16.mxu1 %v7408_v1 }
0x1c0d   :  { %6745 = vmatpush3.bf16.msra.mxu1 %v7095_v47 }
0x1c0e   :  { %6746 = vmatprep.subr.bf16.mxu1 %v7408_v1 }
0x1c11   :  { %6747 = vmatpush3.bf16.msra.mxu1 %v7096_v48 }
0x1c12   :  { %6748 = vmatprep.subr.bf16.mxu1 %v7408_v1 }
0x1c15   :  { %6749 = vmatpush3.bf16.msra.mxu1 %v7097_v49 }
0x1c16   :  { %6780 = vmatprep.subr.bf16.mxu1 %v7408_v1 }
0x1cb8   :  { %v2642_v62 = vpop.f32.mrf.mxu1 }
0x1cb9   :  { %v2643_v6 = vadd.f32 %v6013_v61, %v2642_v62 }
0x1cba   :  { %v6724_v63 = vpop.f32.mrf.mxu1 }
0x1cbb   :  { %v2649_v0 = vadd.f32 %v2643_v6, %v7973_v21 }
0x1cbc   :  { %v2645_v7 = vpop.f32.mrf.mxu1 }
0x1cbd   :  { %v2646_v2 = vadd.f32 %v6013_v61, %v2645_v7  ;;  %v2655_v3 = vsel %vm89_vm1, %v2649_v0, 0.0 }
0x1cbe   :  { %2656 = vadd.xlane.f32.xlu1 %v2655_v3  ;;  %v6725_v4 = vpop.f32.mrf.mxu1 }
0x1cbf   :  { %v2650_v16 = vadd.f32 %v2646_v2, %v7975_v22  ;;  %v7088_v22 = vld [vmem:[%s8838_s9 + $0x28] sm:$0xff]  }
0x1cc0   :  { %6727 = vmatpush3.bf16.msra.mxu0 %v7088_v22 }
0x1cc1   :  { %v2658_v5 = vsel %vm89_vm1, %v2650_v16, 0.0  ;;  %6728 = vmatprep.subr.bf16.mxu0 %v7408_v1 }
0x1cc2   :  { %2659 = vadd.xlane.f32.xlu0 %v2658_v5 }
0x1cc4   :  { %6729 = vmatpush3.bf16.msra.mxu0 %v7089_v15 }
0x1cc5   :  { %6754 = vmatprep.subr.bf16.mxu0 %v7408_v1 }
0x1d47   :  { %v2657_v8 = vpop.xlane.xlu1 %2656 }
0x1d48   :  { %v2661_v17 = vmul.f32 0.03125, %v2657_v8 }
0x1d4a   :  { %v2663_v9 = vsub.f32 %v2649_v0, %v2661_v17 }
0x1d4b   :  { %v2660_v10 = vpop.xlane.xlu0 %2659 }
0x1d4c   :  { %v2662_v11 = vmul.f32 0.03125, %v2660_v10  ;;  %v2665_v12 = vmul.f32 %v2663_v9, %v2663_v9 }
0x1d4e   :  { %v2664_v13 = vsub.f32 %v2650_v16, %v2662_v11  ;;  %v2667_v21 = vsel %vm89_vm1, %v2665_v12, 0.0 }
0x1d4f   :  { %2668 = vadd.xlane.f32.xlu0 %v2667_v21  ;;  %v7098_v21 = vld [vmem:[%s8832_s3 + $0x38] sm:$0xff]  }
0x1d50   :  { %v2666_v14 = vmul.f32 %v2664_v13, %v2664_v13 }
0x1d52   :  { %v2670_v29 = vsel %vm89_vm1, %v2666_v14, 0.0  ;;  %v7099_v14 = vld [vmem:[%s8832_s3 + $0x30] sm:$0xff]  }
0x1d53   :  { %2671 = vadd.xlane.f32.xlu1 %v2670_v29 }
0x1dd8   :  { %v2669_v25 = vpop.xlane.xlu0 %2668 }
0x1dd9   :  { %v2673_v26 = vmul.f32 0.03125, %v2669_v25  ;;  %v6058_v25 = vld [vmem:[%s8842_s13 + $0x2] ss:$0 sm:$0xff] }
0x1ddb   :  { %v2675_v27 = vadd.f32 1e-05, %v2673_v26 }
0x1ddc   :  { %v2672_v28 = vpop.xlane.xlu1 %2671 }
0x1ddd   :  { %7254 = vrsqrt.f32 %v2675_v27  ;;  %v2674_v31 = vmul.f32 0.03125, %v2672_v28 }
0x1ddf   :  { %v2676_v32 = vadd.f32 1e-05, %v2674_v31  ;;  %v6059_v31 = vld [vmem:[%s8843_s14 + $0x2] ss:$0 sm:$0xff] }
0x1de1   :  { %7256 = vrsqrt.f32 %v2676_v32 }
0x1dea   :  { %v7255_v33 = vpop.eup %7254 }
0x1deb   :  { %v2679_v35 = vmul.f32 %v7255_v33, %v2663_v9 }
0x1ded   :  { %v2687_v40 = vmul.f32 %v6019_v37, %v2679_v35 }
0x1dee   :  { %v7257_v38 = vpop.eup %7256 }
0x1def   :  { %v2680_v39 = vmul.f32 %v7257_v38, %v2664_v13  ;;  %v2695_v44 = vadd.f32 %v6020_v42, %v2687_v40  ;;  %v6065_v38 = vld [vmem:[%s8833_s4 + $0x3] ss:$0 sm:$0xff] }
0x1df1   :  { %v2688_v43 = vmul.f32 %v6019_v37, %v2680_v39 }
0x1df3   :  { %v2696_v45 = vadd.f32 %v6020_v42, %v2688_v43 }
0x1df5   :  { %v2697_v46 = vpack.c.bf16 %v2696_v45, %v2695_v44 }
0x1df7   :  { %6731 = vmatmul.mubr.msk.bf16.vlgmr.msra.gmra.mxu0 %vm89_vm1, %v2697_v46 }
0x1df8   :  { %6758 = vmatprep.mubr.msk.bf16.mxu0 %vm7409_vm0, %v7408_v1  ;;  %6755 = vmatpush3.bf16.msra.mxu0 %v7098_v21 }
0x1df9   :  { %6756 = vmatprep.subr.bf16.mxu0 %v7408_v1 }
0x1dfc   :  { %6757 = vmatpush3.bf16.msra.mxu0 %v7099_v14 }
0x1dfd   :  { %6762 = vmatprep.subr.bf16.mxu0 %v7408_v1 }
0x1eb7   :  { %v2760_v50 = vpop.f32.mrf.mxu0 }
0x1eb8   :  { %v2761_v52 = vadd.f32 %v6026_v34, %v2760_v50 }
0x1eb9   :  { %v6732_v51 = vpop.f32.mrf.mxu0 }
0x1eba   :  { %v2767_v18 = vmax.f32 %v2761_v52, 0.0 }
0x1ebb   :  { %v2763_v53 = vpop.f32.mrf.mxu0 }
0x1ebc   :  { %v2764_v54 = vadd.f32 %v6026_v34, %v2763_v53 }
0x1ebd   :  { %v6733_v55 = vpop.f32.mrf.mxu0 }
0x1ebe   :  { %v2768_v56 = vmax.f32 %v2764_v54, 0.0 }
0x1ec0   :  { %v2769_v57 = vpack.c.bf16 %v2768_v56, %v2767_v18 }
0x1ec2   :  { %6751 = vmatmul.mubr.bf16.vlgmr.msra.gmra.mxu1 %v2769_v57 }
0x1ec3   :  { %6782 = vmatprep.mubr.msk.bf16.mxu1 %vm7409_vm0, %v7408_v1 }
0x1f82   :  { %v2877_v59 = vpop.f32.mrf.mxu1 }
0x1f83   :  { %v2878_v60 = vadd.f32 %v6047_v58, %v2877_v59 }
0x1f84   :  { %v6752_v61 = vpop.f32.mrf.mxu1 }
0x1f85   :  { %v2884_v62 = vadd.f32 %v2878_v60, %v2695_v44 }
0x1f86   :  { %v2880_v6 = vpop.f32.mrf.mxu1 }
0x1f87   :  { %v2881_v63 = vadd.f32 %v6047_v58, %v2880_v6  ;;  %v2890_v0 = vsel %vm89_vm1, %v2884_v62, 0.0 }
0x1f88   :  { %2891 = vadd.xlane.f32.xlu0 %v2890_v0  ;;  %v6753_v7 = vpop.f32.mrf.mxu1 }
0x1f89   :  { %v2885_v2 = vadd.f32 %v2881_v63, %v2696_v45 }
0x1f8b   :  { %v2893_v3 = vsel %vm89_vm1, %v2885_v2, 0.0 }
0x1f8c   :  { %2894 = vadd.xlane.f32.xlu1 %v2893_v3 }
0x2011   :  { %v2892_v4 = vpop.xlane.xlu0 %2891 }
0x2012   :  { %v2896_v16 = vmul.f32 0.03125, %v2892_v4 }
0x2014   :  { %v2898_v5 = vsub.f32 %v2884_v62, %v2896_v16 }
0x2015   :  { %v2895_v8 = vpop.xlane.xlu1 %2894 }
0x2016   :  { %v2897_v17 = vmul.f32 0.03125, %v2895_v8  ;;  %v2900_v9 = vmul.f32 %v2898_v5, %v2898_v5 }
0x2018   :  { %v2899_v10 = vsub.f32 %v2885_v2, %v2897_v17  ;;  %v2902_v11 = vsel %vm89_vm1, %v2900_v9, 0.0 }
0x2019   :  { %2903 = vadd.xlane.f32.xlu0 %v2902_v11 }
0x201a   :  { %v2901_v12 = vmul.f32 %v2899_v10, %v2899_v10 }
0x201c   :  { %v2905_v13 = vsel %vm89_vm1, %v2901_v12, 0.0 }
0x201d   :  { %2906 = vadd.xlane.f32.xlu1 %v2905_v13 }
0x20a2   :  { %v2904_v29 = vpop.xlane.xlu0 %2903 }
0x20a3   :  { %v2908_v22 = vmul.f32 0.03125, %v2904_v29 }
0x20a5   :  { %v2910_v15 = vadd.f32 1e-05, %v2908_v22 }
0x20a6   :  { %v2907_v19 = vpop.xlane.xlu1 %2906 }
0x20a7   :  { %7258 = vrsqrt.f32 %v2910_v15  ;;  %v2909_v20 = vmul.f32 0.03125, %v2907_v19 }
0x20a9   :  { %v2911_v23 = vadd.f32 1e-05, %v2909_v20 }
0x20ab   :  { %7260 = vrsqrt.f32 %v2911_v23 }
0x20b4   :  { %v7259_v36 = vpop.eup %7258 }
0x20b5   :  { %v2914_v24 = vmul.f32 %v7259_v36, %v2898_v5 }
0x20b7   :  { %v2922_v28 = vmul.f32 %v6058_v25, %v2914_v24 }
0x20b8   :  { %v7261_v26 = vpop.eup %7260 }
0x20b9   :  { %v2915_v27 = vmul.f32 %v7261_v26, %v2899_v10  ;;  %v8191_v33 = vadd.f32 %v6059_v31, %v2922_v28 }
0x20bb   :  { %v2923_v32 = vmul.f32 %v6058_v25, %v2915_v27 }
0x20bd   :  { %v8193_v35 = vadd.f32 %v6059_v31, %v2923_v32 }
0x20bf   :  { %v2932_v37 = vpack.c.bf16 %v8193_v35, %v8191_v33 }
0x20c1   :  { %6759 = vmatmul.mubr.msk.bf16.vlgmr.msra.gmra.mxu0 %vm89_vm1, %v2932_v37 }
0x20c2   :  { %6764 = vmatprep.mubr.msk.bf16.mxu0 %vm7409_vm0, %v7408_v1 }
0x2181   :  { %v2995_v39 = vpop.f32.mrf.mxu0 }
0x2182   :  { %v2996_v40 = vadd.f32 %v6065_v38, %v2995_v39 }
0x2183   :  { %v6760_v42 = vpop.f32.mrf.mxu0 }
0x2184   :  { %3002 = vst.msk [vmem:[#allocation2] sm:$0xff] %vm134_vm2, %v2996_v40 }
0x2185   :  { %v2998_v43 = vpop.f32.mrf.mxu0 }
0x2186   :  { %v2999_v44 = vadd.f32 %v6065_v38, %v2998_v43 }
0x2187   :  { %v6761_v45 = vpop.f32.mrf.mxu0 }
0x2188   :  { %3003 = vst.msk [vmem:[#allocation2 + $0x8] sm:$0xff] %vm134_vm2, %v2999_v44 }
0x218b   :  { %v3004_v46 = vld [vmem:[#allocation2] sm:$0xff] }
0x218f   :  { %v3005_v47 = vld [vmem:[#allocation2 + $0x8] sm:$0xff] }
0x2190   :  { %v8205_v48 = vpack.c.bf16 %v3005_v47, %v3004_v46 }
0x2192   :  { %3008 = vrot.lane.b32.xlu0 %v8205_v48, %s8905_s25 }
0x2196   :  { %3135 = vrot.lane.b32.xlu0 %v8205_v48, %s8911_s16 }
0x219a   :  { %3133 = vrot.lane.b32.xlu0 %v8205_v48, %s8907_s0 }
0x219e   :  { %3270 = vrot.lane.b32.xlu0 %v8205_v48, %s8908_s27 }
0x21a2   :  { %3268 = vrot.lane.b32.xlu0 %v8205_v48, %s8909_s26 }
0x21a6   :  { %3403 = vrot.lane.b32.xlu0 %v8205_v48, %s8910_s29 }
0x2204   :  { %v3009_v49 = vpop.permute.xlu0 %3008 }
0x2205   :  { %v3014_v34 = vsel %vm143_vm3, %v3009_v49, 0 }
0x2206   :  { %6763 = vmatpush3.bf16.xpose.msra.mxu0 %v3014_v34 }
0x2207   :  { %6768 = vmatprep.subr.bf16.mxu0 %v7408_v1 }
0x2208   :  { %v3136_v5 = vpop.permute.xlu0 %3135 }
0x2209   :  { %v3141_v12 = vsel %vm143_vm3, %v3136_v5, 0 }
0x220c   :  { %v3134_v11 = vpop.permute.xlu0 %3133 }
0x220d   :  { %6765 = vmatmul.mubr.msk.bf16.vlgmr.msra.gmra.mxu0 %vm143_vm3, %v8205_v48 }
0x220e   :  { %6770 = vmatprep.mubr.msk.bf16.mxu0 %vm7409_vm0, %v7408_v1 }
0x2210   :  { %v3271_v13 = vpop.permute.xlu0 %3270 }
0x2211   :  { %v3276_v21 = vsel %vm143_vm3, %v3271_v13, 0 }
0x2214   :  { %v3269_v29 = vpop.permute.xlu0 %3268 }
0x2218   :  { %v3404_v15 = vpop.permute.xlu0 %3403 }
0x22cd   :  { %v3050_v50 = vpop.f32.mrf.mxu0 }
0x22ce   :  { %v3051_v51 = vadd.f32 %v8013_v41, %v3050_v50 }
0x22cf   :  { %v6766_v52 = vpop.f32.mrf.mxu0 }
0x22d0   :  { %v3057_v53 = vsel %vm191_vm4, %v3051_v51, -inf }
0x22d1   :  { %3058 = vmax.xlane.f32.xlu1 %v3057_v53  ;;  %v3053_v54 = vpop.f32.mrf.mxu0 }
0x22d2   :  { %v3054_v55 = vadd.f32 %v8020_v30, %v3053_v54 }
0x22d3   :  { %v6767_v18 = vpop.f32.mrf.mxu0 }
0x22d4   :  { %v3060_v56 = vsel %vm191_vm4, %v3054_v55, -inf }
0x22d5   :  { %3061 = vmax.xlane.f32.xlu1 %v3060_v56 }
0x235a   :  { %v3059_v57 = vpop.xlane.xlu1 %3058 }
0x235b   :  { %v3063_v58 = vsub.f32 %v3051_v51, %v3059_v57 }
0x235d   :  { %v3065_v59 = vmul.f32 1.442695, %v3063_v58 }
0x235e   :  { %v3062_v60 = vpop.xlane.xlu1 %3061 }
0x235f   :  { %7262 = vpow2.f32 %v3065_v59  ;;  %v3064_v61 = vsub.f32 %v3054_v55, %v3062_v60 }
0x2361   :  { %v3067_v62 = vmul.f32 1.442695, %v3064_v61 }
0x2363   :  { %7264 = vpow2.f32 %v3067_v62 }
0x236c   :  { %v7263_v6 = vpop.eup %7262 }
0x236d   :  { %v3069_v63 = vsel %vm191_vm4, %v7263_v6, 0.0 }
0x236e   :  { %3070 = vadd.xlane.f32.xlu1 %v3069_v63 }
0x2370   :  { %v7265_v0 = vpop.eup %7264 }
0x2371   :  { %v3072_v7 = vsel %vm191_vm4, %v7265_v0, 0.0 }
0x2372   :  { %3073 = vadd.xlane.f32.xlu1 %v3072_v7 }
0x2383   :  { %3080 = vrot.lane.b32.xlu1 %v8205_v48, %s8906_s20 }
0x2387   :  { %3405 = vrot.lane.b32.xlu1 %v8205_v48, %s8898_s21 }
0x23f7   :  { %v3071_v2 = vpop.xlane.xlu1 %3070 }
0x23f8   :  { %7266 = vrcp.f32 %v3071_v2 }
0x23fb   :  { %v3074_v3 = vpop.xlane.xlu1 %3073 }
0x23fc   :  { %7268 = vrcp.f32 %v3074_v3 }
0x23ff   :  { %v3081_v4 = vpop.permute.xlu1 %3080 }
0x2400   :  { %6769 = vmatpush3.bf16.msra.mxu0 %v3081_v4 }
0x2401   :  { %6774 = vmatprep.subr.bf16.mxu0 %v7408_v1 }
0x2403   :  { %v3406_v14 = vpop.permute.xlu1 %3405 }
0x2404   :  { %v3411_v22 = vsel %vm143_vm3, %v3406_v14, 0 }
0x2405   :  { %v7267_v16 = vpop.eup %7266 }
0x2406   :  { %v3077_v17 = vmul.f32 %v7267_v16, %v7263_v6 }
0x2409   :  { %v7269_v8 = vpop.eup %7268 }
0x240a   :  { %v3078_v9 = vmul.f32 %v7269_v8, %v7265_v0 }
0x240c   :  { %v3079_v10 = vpack.c.bf16 %v3078_v9, %v3077_v17 }
0x240e   :  { %6771 = vmatmul.mubr.msk.bf16.vlgmr.msra.gmra.mxu0 %vm191_vm4, %v3079_v10 }
0x240f   :  { %6775 = vmatpush3.bf16.xpose.msra.mxu0 %v3141_v12  ;;  %6776 = vmatprep.mubr.msk.bf16.mxu0 %vm7409_vm0, %v7408_v1 }
0x2410   :  { %6786 = vmatprep.subr.bf16.mxu0 %v7408_v1 }
0x2416   :  { %6777 = vmatmul.mubr.msk.bf16.vlgmr.msra.gmra.mxu0 %vm143_vm3, %v3134_v11 }
0x2417   :  { %6787 = vmatpush3.bf16.xpose.msra.mxu0 %v3276_v21  ;;  %6788 = vmatprep.mubr.msk.bf16.mxu0 %vm7409_vm0, %v7408_v1 }
0x2418   :  { %6798 = vmatprep.subr.bf16.mxu0 %v7408_v1 }
0x241e   :  { %6789 = vmatmul.mubr.msk.bf16.vlgmr.msra.gmra.mxu0 %vm143_vm3, %v3269_v29 }
0x241f   :  { %6799 = vmatpush3.bf16.xpose.msra.mxu0 %v3411_v22  ;;  %6800 = vmatprep.mubr.msk.bf16.mxu0 %vm7409_vm0, %v7408_v1 }
0x2420   :  { %6810 = vmatprep.subr.bf16.mxu0 %v7408_v1 }
0x2426   :  { %6801 = vmatmul.mubr.msk.bf16.vlgmr.msra.gmra.mxu0 %vm143_vm3, %v3404_v15 }
0x2427   :  { %6814 = vmatprep.mubr.msk.bf16.mxu0 %vm7409_vm0, %v7408_v1 }
0x24ce   :  { %v3120_v19 = vpop.f32.mrf.mxu0 }
0x24cf   :  { %3127 = vst.msk [vmem:[#allocation3] sm:$0xff] %vm143_vm3, %v3120_v19 }
0x24d0   :  { %v6772_v20 = vpop.f32.mrf.mxu0 }
0x24d2   :  { %v3123_v23 = vpop.f32.mrf.mxu0 }
0x24d3   :  { %3128 = vst.msk [vmem:[#allocation3 + $0x8] sm:$0xff] %vm143_vm3, %v3123_v23 }
0x24d4   :  { %v6773_v36 = vpop.f32.mrf.mxu0 }
0x24d6   :  { %v3177_v24 = vpop.f32.mrf.mxu0 }
0x24d7   :  { %v3178_v25 = vadd.f32 %v8013_v41, %v3177_v24 }
0x24d8   :  { %v6778_v26 = vpop.f32.mrf.mxu0 }
0x24d9   :  { %v3184_v27 = vsel %vm191_vm4, %v3178_v25, -inf }
0x24da   :  { %3185 = vmax.xlane.f32.xlu1 %v3184_v27  ;;  %v3180_v28 = vpop.f32.mrf.mxu0 }
0x24db   :  { %v3181_v31 = vadd.f32 %v8020_v30, %v3180_v28 }
0x24dc   :  { %v6779_v32 = vpop.f32.mrf.mxu0 }
0x24dd   :  { %v3187_v37 = vsel %vm191_vm4, %v3181_v31, -inf }
0x24de   :  { %3188 = vmax.xlane.f32.xlu0 %v3187_v37  ;;  %v3312_v38 = vpop.f32.mrf.mxu0 }
0x24df   :  { %v3313_v39 = vadd.f32 %v8013_v41, %v3312_v38 }
0x24e0   :  { %v6790_v40 = vpop.f32.mrf.mxu0 }
0x24e1   :  { %v3319_v42 = vsel %vm191_vm4, %v3313_v39, -inf }
0x24e2   :  { %3320 = vmax.xlane.f32.xlu0 %v3319_v42  ;;  %v3315_v43 = vpop.f32.mrf.mxu0 }
0x24e3   :  { %v3316_v44 = vadd.f32 %v8020_v30, %v3315_v43 }
0x24e4   :  { %v6791_v45 = vpop.f32.mrf.mxu0 }
0x24e5   :  { %v3322_v46 = vsel %vm191_vm4, %v3316_v44, -inf }
0x24e6   :  { %3323 = vmax.xlane.f32.xlu1 %v3322_v46  ;;  %v3447_v47 = vpop.f32.mrf.mxu0 }
0x24e7   :  { %v3448_v49 = vadd.f32 %v8013_v41, %v3447_v47 }
0x24e8   :  { %v6802_v34 = vpop.f32.mrf.mxu0 }
0x24e9   :  { %v3454_v50 = vsel %vm191_vm4, %v3448_v49, -inf }
0x24ea   :  { %3455 = vmax.xlane.f32.xlu0 %v3454_v50  ;;  %v3450_v51 = vpop.f32.mrf.mxu0 }
0x24eb   :  { %v3451_v52 = vadd.f32 %v8020_v30, %v3450_v51 }
0x24ec   :  { %v6803_v53 = vpop.f32.mrf.mxu0 }
0x24ed   :  { %v3457_v54 = vsel %vm191_vm4, %v3451_v52, -inf }
0x24ee   :  { %3458 = vmax.xlane.f32.xlu1 %v3457_v54 }
0x2563   :  { %v3186_v55 = vpop.xlane.xlu1 %3185 }
0x2564   :  { %v3190_v18 = vsub.f32 %v3178_v25, %v3186_v55 }
0x2566   :  { %v3192_v56 = vmul.f32 1.442695, %v3190_v18  ;;  %v7100_v18 = vld [vmem:[%s8912_s23 + $0x38] sm:$0xff]  }
0x2567   :  { %v3189_v57 = vpop.xlane.xlu0 %3188  ;;  %6811 = vmatpush3.bf16.msra.mxu0 %v7100_v18  ;;  %v6095_v18 = vld [vmem:[%s8839_s10 + $0x3] ss:$0 sm:$0xff] }
0x2568   :  { %7270 = vpow2.f32 %v3192_v56  ;;  %v3191_v58 = vsub.f32 %v3181_v31, %v3189_v57  ;;  %v7101_v56 = vld [vmem:[%s8912_s23 + $0x30] sm:$0xff]   ;;  %6812 = vmatprep.subr.bf16.mxu0 %v7408_v1 }
0x256a   :  { %v3194_v59 = vmul.f32 1.442695, %v3191_v58 }
0x256b   :  { %v3321_v60 = vpop.xlane.xlu0 %3320  ;;  %6813 = vmatpush3.bf16.msra.mxu0 %v7101_v56 }
0x256c   :  { %7272 = vpow2.f32 %v3194_v59  ;;  %v3325_v41 = vsub.f32 %v3313_v39, %v3321_v60  ;;  %6826 = vmatprep.subr.bf16.mxu0 %v7408_v1 }
0x256e   :  { %v3327_v61 = vmul.f32 1.442695, %v3325_v41 }
0x256f   :  { %v3324_v62 = vpop.xlane.xlu1 %3323 }
0x2570   :  { %7274 = vpow2.f32 %v3327_v61  ;;  %v3326_v6 = vsub.f32 %v3316_v44, %v3324_v62 }
0x2572   :  { %v3329_v63 = vmul.f32 1.442695, %v3326_v6 }
0x2573   :  { %v3456_v30 = vpop.xlane.xlu0 %3455 }
0x2574   :  { %7276 = vpow2.f32 %v3329_v63  ;;  %v3460_v0 = vsub.f32 %v3448_v49, %v3456_v30 }
0x2575   :  { %v7271_v7 = vpop.eup %7270 }
0x2576   :  { %v3462_v2 = vmul.f32 1.442695, %v3460_v0  ;;  %v3196_v3 = vsel %vm191_vm4, %v7271_v7, 0.0 }
0x2577   :  { %3197 = vadd.xlane.f32.xlu0 %v3196_v3  ;;  %v3459_v12 = vpop.xlane.xlu1 %3458  ;;  %v6082_v3 = vld [vmem:[%s8914_s6 + $0x3] ss:$0 sm:$0xff] }
0x2578   :  { %7278 = vpow2.f32 %v3462_v2  ;;  %v3461_v13 = vsub.f32 %v3451_v52, %v3459_v12 }
0x2579   :  { %v7273_v4 = vpop.eup %7272 }
0x257a   :  { %v3199_v16 = vsel %vm191_vm4, %v7273_v4, 0.0  ;;  %v3464_v21 = vmul.f32 1.442695, %v3461_v13 }
0x257b   :  { %3200 = vadd.xlane.f32.xlu1 %v3199_v16 }
0x257c   :  { %7280 = vpow2.f32 %v3464_v21 }
0x257d   :  { %v7275_v5 = vpop.eup %7274 }
0x257e   :  { %v3331_v8 = vsel %vm191_vm4, %v7275_v5, 0.0 }
0x257f   :  { %3332 = vadd.xlane.f32.xlu0 %v3331_v8 }
0x2581   :  { %v7277_v17 = vpop.eup %7276 }
0x2582   :  { %v3334_v9 = vsel %vm191_vm4, %v7277_v17, 0.0 }
0x2583   :  { %3335 = vadd.xlane.f32.xlu1 %v3334_v9 }
0x2585   :  { %v7279_v10 = vpop.eup %7278 }
0x2586   :  { %v3466_v11 = vsel %vm191_vm4, %v7279_v10, 0.0 }
0x2587   :  { %3467 = vadd.xlane.f32.xlu0 %v3466_v11 }
0x2589   :  { %v7281_v14 = vpop.eup %7280 }
0x258a   :  { %v3469_v29 = vsel %vm191_vm4, %v7281_v14, 0.0 }
0x2594   :  { %3342 = vrot.lane.b32.xlu1 %v8205_v48, %s8899_s19 }
0x259d   :  { %3207 = vrot.lane.b32.xlu0 %v8205_v48, %s8900_s18 }
0x25b8   :  { %3470 = vadd.xlane.f32.xlu1 %v3469_v29 }
0x25c9   :  { %3477 = vrot.lane.b32.xlu1 %v8205_v48, %s8901_s30 }
0x2600   :  { %v3198_v22 = vpop.xlane.xlu0 %3197 }
0x2601   :  { %7282 = vrcp.f32 %v3198_v22 }
0x2604   :  { %v3201_v15 = vpop.xlane.xlu1 %3200 }
0x2605   :  { %7284 = vrcp.f32 %v3201_v15 }
0x2608   :  { %v3333_v19 = vpop.xlane.xlu0 %3332 }
0x2609   :  { %7286 = vrcp.f32 %v3333_v19 }
0x260c   :  { %v3336_v20 = vpop.xlane.xlu1 %3335 }
0x260d   :  { %7288 = vrcp.f32 %v3336_v20 }
0x260e   :  { %v7283_v23 = vpop.eup %7282 }
0x260f   :  { %v3204_v25 = vmul.f32 %v7283_v23, %v7271_v7 }
0x2610   :  { %v3468_v36 = vpop.xlane.xlu0 %3467  ;;  %v3343_v48 = vpop.permute.xlu1 %3342 }
0x2611   :  { %7290 = vrcp.f32 %v3468_v36 }
0x2612   :  { %v7285_v24 = vpop.eup %7284 }
0x2613   :  { %v3205_v26 = vmul.f32 %v7285_v24, %v7273_v4  ;;  %v7103_v24 = vld [vmem:[%s8838_s9 + $0x30] sm:$0xff]  }
0x2614   :  { %v3208_v27 = vpop.permute.xlu0 %3207 }
0x2615   :  { %6781 = vmatpush3.bf16.msra.mxu1 %v3208_v27  ;;  %v3206_v28 = vpack.c.bf16 %v3205_v26, %v3204_v25  ;;  %v7104_v25 = vld [vmem:[%s8840_s11 + $0xf8] sm:$0xff]   ;;  %v7105_v26 = vld [vmem:[%s8840_s11 + $0xf0] sm:$0xff]   ;;  %v7106_v27 = vld [vmem:[%s8840_s11 + $0xe8] sm:$0xff]  }
0x2616   :  { %6792 = vmatprep.subr.bf16.mxu1 %v7408_v1  ;;  %v7287_v31 = vpop.eup %7286 }
0x2617   :  { %v3339_v37 = vmul.f32 %v7287_v31, %v7275_v5  ;;  %v7108_v31 = vld [vmem:[%s8840_s11 + $0xd8] sm:$0xff]  }
0x2618   :  { %6783 = vmatmul.mubr.msk.bf16.vlgmr.msra.gmra.mxu1 %vm191_vm4, %v3206_v28  ;;  %v7107_v28 = vld [vmem:[%s8840_s11 + $0xe0] sm:$0xff]  }
0x2619   :  { %6793 = vmatpush3.bf16.msra.mxu1 %v3343_v48  ;;  %6794 = vmatprep.mubr.msk.bf16.mxu1 %vm7409_vm0, %v7408_v1 }
0x261a   :  { %v7289_v32 = vpop.eup %7288  ;;  %6804 = vmatprep.subr.bf16.mxu1 %v7408_v1 }
0x261b   :  { %v3340_v38 = vmul.f32 %v7289_v32, %v7277_v17 }
0x261d   :  { %v3341_v39 = vpack.c.bf16 %v3340_v38, %v3339_v37 }
0x261e   :  { %v7291_v43 = vpop.eup %7290 }
0x261f   :  { %v3474_v45 = vmul.f32 %v7291_v43, %v7279_v10 }
0x2620   :  { %6795 = vmatmul.mubr.msk.bf16.vlgmr.msra.gmra.mxu1 %vm191_vm4, %v3341_v39 }
0x2621   :  { %6806 = vmatprep.mubr.msk.bf16.mxu1 %vm7409_vm0, %v7408_v1 }
0x2641   :  { %v3471_v40 = vpop.xlane.xlu1 %3470 }
0x2642   :  { %7292 = vrcp.f32 %v3471_v40 }
0x2645   :  { %v3478_v42 = vpop.permute.xlu1 %3477 }
0x2646   :  { %6805 = vmatpush3.bf16.msra.mxu1 %v3478_v42 }
0x2647   :  { %6818 = vmatprep.subr.bf16.mxu1 %v7408_v1 }
0x264f   :  { %v7293_v44 = vpop.eup %7292 }
0x2650   :  { %v3475_v46 = vmul.f32 %v7293_v44, %v7281_v14  ;;  %v6088_v44 = vld [vmem:[%s8836_s7 + $0x3] ss:$0 sm:$0xff] }
0x2652   :  { %v3476_v47 = vpack.c.bf16 %v3475_v46, %v3474_v45 }
0x2654   :  { %6807 = vmatmul.mubr.msk.bf16.vlgmr.msra.gmra.mxu1 %vm191_vm4, %v3476_v47 }
0x2655   :  { %6822 = vmatprep.mubr.msk.bf16.mxu1 %vm7409_vm0, %v7408_v1 }
0x26d8   :  { %v3247_v49 = vpop.f32.mrf.mxu1 }
0x26d9   :  { %3256 = vrot.lane.b32.xlu0 %v3247_v49, %s8902_s1  ;;  %v6089_v49 = vld [vmem:[%s8837_s8 + $0x3] ss:$0 sm:$0xff] }
0x26da   :  { %v6784_v34 = vpop.f32.mrf.mxu1 }
0x26dc   :  { %v3250_v50 = vpop.f32.mrf.mxu1 }
0x26dd   :  { %3258 = vrot.lane.b32.xlu1 %v3250_v50, %s8902_s1 }
0x26de   :  { %v6785_v51 = vpop.f32.mrf.mxu1 }
0x26e0   :  { %v3382_v52 = vpop.f32.mrf.mxu1 }
0x26e1   :  { %3391 = vrot.lane.b32.xlu0 %v3382_v52, %s8903_s22 }
0x26e2   :  { %v6796_v53 = vpop.f32.mrf.mxu1 }
0x26e3   :  { %v7109_v53 = vld [vmem:[%s8840_s11 + $0xd0] sm:$0xff]  }
0x26e4   :  { %v3385_v54 = vpop.f32.mrf.mxu1 }
0x26e5   :  { %3393 = vrot.lane.b32.xlu1 %v3385_v54, %s8903_s22  ;;  %v7110_v54 = vld [vmem:[%s8840_s11 + $0xc8] sm:$0xff]   ;;  %s8916_s22 = smov 16  }
0x26e6   :  { %v6797_v55 = vpop.f32.mrf.mxu1 }
0x26e7   :  { %v7111_v55 = vld [vmem:[%s8840_s11 + $0xc0] sm:$0xff]  }
0x2714   :  { %v3517_v57 = vpop.f32.mrf.mxu1 }
0x2715   :  { %3526 = vrot.lane.b32.xlu0 %v3517_v57, %s8913_s17 }
0x2716   :  { %v6808_v58 = vpop.f32.mrf.mxu1 }
0x2718   :  { %v3520_v59 = vpop.f32.mrf.mxu1 }
0x2719   :  { %3528 = vrot.lane.b32.xlu1 %v3520_v59, %s8913_s17 }
0x271a   :  { %v6809_v60 = vpop.f32.mrf.mxu1 }
0x274b   :  { %v3257_v41 = vpop.permute.xlu0 %3256 }
0x274c   :  { %3262 = vst.msk [vmem:[#allocation3] sm:$0xff] %vm397_vm5, %v3257_v41 }
0x274f   :  { %v3259_v61 = vpop.permute.xlu1 %3258 }
0x2750   :  { %3263 = vst.msk [vmem:[#allocation3 + $0x8] sm:$0xff] %vm397_vm5, %v3259_v61 }
0x2753   :  { %v3392_v62 = vpop.permute.xlu0 %3391 }
0x2754   :  { %3397 = vst.msk [vmem:[#allocation3] sm:$0xff] %vm533_vm6, %v3392_v62 }
0x2757   :  { %v3394_v6 = vpop.permute.xlu1 %3393 }
0x2758   :  { %3398 = vst.msk [vmem:[#allocation3 + $0x8] sm:$0xff] %vm533_vm6, %v3394_v6 }
0x2787   :  { %v3527_v63 = vpop.permute.xlu0 %3526 }
0x2788   :  { %3532 = vst.msk [vmem:[#allocation3] sm:$0xff] %vm669_vm7, %v3527_v63  ;;  %v6116_v63 = vld [vmem:[%s8841_s12 + $0x3] ss:$0 sm:$0xff] }
0x278b   :  { %v3529_v30 = vpop.permute.xlu1 %3528 }
0x278c   :  { %3533 = vst.msk [vmem:[#allocation3 + $0x8] sm:$0xff] %vm669_vm7, %v3529_v30 }
0x278f   :  { %v3534_v0 = vld [vmem:[#allocation3] sm:$0xff] }
0x2793   :  { %v3535_v7 = vld [vmem:[#allocation3 + $0x8] sm:$0xff] }
0x2794   :  { %v3536_v2 = vpack.c.bf16 %v3535_v7, %v3534_v0 }
0x2796   :  { %6815 = vmatmul.mubr.msk.bf16.vlgmr.msra.gmra.mxu0 %vm89_vm1, %v3536_v2 }
0x2797   :  { %6842 = vmatprep.mubr.msk.bf16.mxu0 %vm7409_vm0, %v7408_v1  ;;  %6827 = vmatpush3.bf16.msra.mxu0 %v7104_v25 }
0x2798   :  { %6828 = vmatprep.subr.bf16.mxu0 %v7408_v1 }
0x279b   :  { %6829 = vmatpush3.bf16.msra.mxu0 %v7105_v26 }
0x279c   :  { %6830 = vmatprep.subr.bf16.mxu0 %v7408_v1 }
0x279f   :  { %6831 = vmatpush3.bf16.msra.mxu0 %v7106_v27 }
0x27a0   :  { %6832 = vmatprep.subr.bf16.mxu0 %v7408_v1 }
0x27a3   :  { %6833 = vmatpush3.bf16.msra.mxu0 %v7107_v28  ;;  %v6127_v28 = vld [vmem:[%s8842_s13 + $0x3] ss:$0 sm:$0xff] }
0x27a4   :  { %6834 = vmatprep.subr.bf16.mxu0 %v7408_v1 }
0x27a7   :  { %6835 = vmatpush3.bf16.msra.mxu0 %v7108_v31 }
0x27a8   :  { %6836 = vmatprep.subr.bf16.mxu0 %v7408_v1 }
0x27ab   :  { %6837 = vmatpush3.bf16.msra.mxu0 %v7109_v53 }
0x27ac   :  { %6838 = vmatprep.subr.bf16.mxu0 %v7408_v1 }
0x27af   :  { %6839 = vmatpush3.bf16.msra.mxu0 %v7110_v54 }
0x27b0   :  { %6840 = vmatprep.subr.bf16.mxu0 %v7408_v1 }
0x27b3   :  { %6841 = vmatpush3.bf16.msra.mxu0 %v7111_v55 }
0x27b4   :  { %6872 = vmatprep.subr.bf16.mxu0 %v7408_v1 }
0x2856   :  { %v3599_v4 = vpop.f32.mrf.mxu0 }
0x2857   :  { %v3600_v16 = vadd.f32 %v6082_v3, %v3599_v4 }
0x2858   :  { %v6816_v5 = vpop.f32.mrf.mxu0 }
0x2859   :  { %v3606_v8 = vadd.f32 %v3600_v16, %v8191_v33 }
0x285a   :  { %v3602_v17 = vpop.f32.mrf.mxu0 }
0x285b   :  { %v3603_v9 = vadd.f32 %v6082_v3, %v3602_v17  ;;  %v3612_v10 = vsel %vm89_vm1, %v3606_v8, 0.0 }
0x285c   :  { %3613 = vadd.xlane.f32.xlu0 %v3612_v10  ;;  %v6817_v11 = vpop.f32.mrf.mxu0 }
0x285d   :  { %v3607_v12 = vadd.f32 %v3603_v9, %v8193_v35  ;;  %v7102_v35 = vld [vmem:[%s8838_s9 + $0x38] sm:$0xff]  }
0x285e   :  { %6819 = vmatpush3.bf16.msra.mxu1 %v7102_v35 }
0x285f   :  { %v3615_v13 = vsel %vm89_vm1, %v3607_v12, 0.0  ;;  %6820 = vmatprep.subr.bf16.mxu1 %v7408_v1 }
0x2860   :  { %3616 = vadd.xlane.f32.xlu1 %v3615_v13 }
0x2862   :  { %6821 = vmatpush3.bf16.msra.mxu1 %v7103_v24 }
0x2863   :  { %6846 = vmatprep.subr.bf16.mxu1 %v7408_v1 }
0x28e5   :  { %v3614_v21 = vpop.xlane.xlu0 %3613 }
0x28e6   :  { %v3618_v14 = vmul.f32 0.03125, %v3614_v21 }
0x28e8   :  { %v3620_v29 = vsub.f32 %v3606_v8, %v3618_v14 }
0x28e9   :  { %v3617_v22 = vpop.xlane.xlu1 %3616 }
0x28ea   :  { %v3619_v15 = vmul.f32 0.03125, %v3617_v22  ;;  %v3622_v19 = vmul.f32 %v3620_v29, %v3620_v29 }
0x28ec   :  { %v3621_v20 = vsub.f32 %v3607_v12, %v3619_v15  ;;  %v3624_v33 = vsel %vm89_vm1, %v3622_v19, 0.0  ;;  %v7112_v19 = vld [vmem:[%s8832_s3 + $0x48] sm:$0xff]  }
0x28ed   :  { %3625 = vadd.xlane.f32.xlu0 %v3624_v33 }
0x28ee   :  { %v3623_v23 = vmul.f32 %v3621_v20, %v3621_v20 }
0x28f0   :  { %v3627_v36 = vsel %vm89_vm1, %v3623_v23, 0.0 }
0x28f1   :  { %3628 = vadd.xlane.f32.xlu0 %v3627_v36 }
0x2976   :  { %v3626_v48 = vpop.xlane.xlu0 %3625 }
0x2977   :  { %v3630_v32 = vmul.f32 0.03125, %v3626_v48 }
0x2979   :  { %v3632_v37 = vadd.f32 1e-05, %v3630_v32 }
0x297a   :  { %v3629_v38 = vpop.xlane.xlu0 %3628 }
0x297b   :  { %7294 = vrsqrt.f32 %v3632_v37  ;;  %v3631_v39 = vmul.f32 0.03125, %v3629_v38  ;;  %v6128_v37 = vld [vmem:[%s8843_s14 + $0x3] ss:$0 sm:$0xff] }
0x297d   :  { %v3633_v40 = vadd.f32 1e-05, %v3631_v39 }
0x297f   :  { %7296 = vrsqrt.f32 %v3633_v40 }
0x2988   :  { %v7295_v42 = vpop.eup %7294 }
0x2989   :  { %v3636_v43 = vmul.f32 %v7295_v42, %v3620_v29 }
0x298b   :  { %v3644_v47 = vmul.f32 %v6088_v44, %v3636_v43  ;;  %v6134_v43 = vld [vmem:[%s8833_s4 + $0x4] ss:$0 sm:$0xff] }
0x298c   :  { %v7297_v45 = vpop.eup %7296 }
0x298d   :  { %v3637_v46 = vmul.f32 %v7297_v45, %v3621_v20  ;;  %v3652_v50 = vadd.f32 %v6089_v49, %v3644_v47  ;;  %v7113_v20 = vld [vmem:[%s8832_s3 + $0x40] sm:$0xff]  }
0x298f   :  { %v3645_v34 = vmul.f32 %v6088_v44, %v3637_v46 }
0x2991   :  { %v3653_v51 = vadd.f32 %v6089_v49, %v3645_v34 }
0x2993   :  { %v3654_v52 = vpack.c.bf16 %v3653_v51, %v3652_v50 }
0x2995   :  { %6823 = vmatmul.mubr.msk.bf16.vlgmr.msra.gmra.mxu1 %vm89_vm1, %v3654_v52 }
0x2996   :  { %6850 = vmatprep.mubr.msk.bf16.mxu1 %vm7409_vm0, %v7408_v1  ;;  %6847 = vmatpush3.bf16.msra.mxu1 %v7112_v19 }
0x2997   :  { %6848 = vmatprep.subr.bf16.mxu1 %v7408_v1 }
0x299a   :  { %6849 = vmatpush3.bf16.msra.mxu1 %v7113_v20 }
0x299b   :  { %6854 = vmatprep.subr.bf16.mxu1 %v7408_v1 }
0x2a55   :  { %v3717_v56 = vpop.f32.mrf.mxu1 }
0x2a56   :  { %v3718_v58 = vadd.f32 %v6095_v18, %v3717_v56  ;;  %v8439_v56 = vld [vmem:[%s8915_s28] sm:$0xff] }
0x2a57   :  { %v6824_v57 = vpop.f32.mrf.mxu1 }
0x2a58   :  { %v3724_v61 = vmax.f32 %v3718_v58, 0.0 }
0x2a59   :  { %v3720_v59 = vpop.f32.mrf.mxu1 }
0x2a5a   :  { %v3721_v60 = vadd.f32 %v6095_v18, %v3720_v59 }
0x2a5b   :  { %v6825_v41 = vpop.f32.mrf.mxu1 }
0x2a5c   :  { %v3725_v62 = vmax.f32 %v3721_v60, 0.0  ;;  %v8446_v41 = vld [vmem:[%s8915_s28 + $0x8] sm:$0xff]  ;;  %s8917_s28 = smov 24  }
0x2a5e   :  { %v3726_v6 = vpack.c.bf16 %v3725_v62, %v3724_v61 }
0x2a60   :  { %6843 = vmatmul.mubr.bf16.vlgmr.msra.gmra.mxu0 %v3726_v6 }
0x2a61   :  { %6874 = vmatprep.mubr.msk.bf16.mxu0 %vm7409_vm0, %v7408_v1 }
0x2b20   :  { %v3834_v30 = vpop.f32.mrf.mxu0 }
0x2b21   :  { %v3835_v0 = vadd.f32 %v6116_v63, %v3834_v30 }
0x2b22   :  { %v6844_v7 = vpop.f32.mrf.mxu0 }
0x2b23   :  { %v3841_v2 = vadd.f32 %v3835_v0, %v3652_v50 }
0x2b24   :  { %v3837_v3 = vpop.f32.mrf.mxu0 }
0x2b25   :  { %v3838_v4 = vadd.f32 %v6116_v63, %v3837_v3  ;;  %v3847_v16 = vsel %vm89_vm1, %v3841_v2, 0.0 }
0x2b26   :  { %3848 = vadd.xlane.f32.xlu1 %v3847_v16  ;;  %v6845_v5 = vpop.f32.mrf.mxu0 }
0x2b27   :  { %v3842_v8 = vadd.f32 %v3838_v4, %v3653_v51 }
0x2b29   :  { %v3850_v17 = vsel %vm89_vm1, %v3842_v8, 0.0 }
0x2b2a   :  { %3851 = vadd.xlane.f32.xlu0 %v3850_v17 }
0x2baf   :  { %v3849_v9 = vpop.xlane.xlu1 %3848 }
0x2bb0   :  { %v3853_v10 = vmul.f32 0.03125, %v3849_v9 }
0x2bb2   :  { %v3855_v11 = vsub.f32 %v3841_v2, %v3853_v10 }
0x2bb3   :  { %v3852_v12 = vpop.xlane.xlu0 %3851 }
0x2bb4   :  { %v3854_v13 = vmul.f32 0.03125, %v3852_v12  ;;  %v3857_v21 = vmul.f32 %v3855_v11, %v3855_v11 }
0x2bb6   :  { %v3856_v14 = vsub.f32 %v3842_v8, %v3854_v13  ;;  %v3859_v29 = vsel %vm89_vm1, %v3857_v21, 0.0 }
0x2bb7   :  { %3860 = vadd.xlane.f32.xlu1 %v3859_v29 }
0x2bb8   :  { %v3858_v22 = vmul.f32 %v3856_v14, %v3856_v14 }
0x2bba   :  { %v3862_v15 = vsel %vm89_vm1, %v3858_v22, 0.0 }
0x2bbb   :  { %3863 = vadd.xlane.f32.xlu0 %v3862_v15 }
0x2c40   :  { %v3861_v33 = vpop.xlane.xlu1 %3860 }
0x2c41   :  { %v3865_v23 = vmul.f32 0.03125, %v3861_v33 }
0x2c43   :  { %v3867_v36 = vadd.f32 1e-05, %v3865_v23 }
0x2c44   :  { %v3864_v35 = vpop.xlane.xlu0 %3863 }
0x2c45   :  { %7298 = vrsqrt.f32 %v3867_v36  ;;  %v3866_v24 = vmul.f32 0.03125, %v3864_v35 }
0x2c47   :  { %v3868_v25 = vadd.f32 1e-05, %v3866_v24 }
0x2c49   :  { %7300 = vrsqrt.f32 %v3868_v25 }
0x2c52   :  { %v7299_v26 = vpop.eup %7298 }
0x2c53   :  { %v3871_v27 = vmul.f32 %v7299_v26, %v3855_v11 }
0x2c55   :  { %v3879_v32 = vmul.f32 %v6127_v28, %v3871_v27 }
0x2c56   :  { %v7301_v31 = vpop.eup %7300 }
0x2c57   :  { %v3872_v48 = vmul.f32 %v7301_v31, %v3856_v14  ;;  %v8399_v39 = vadd.f32 %v6128_v37, %v3879_v32 }
0x2c59   :  { %v3880_v38 = vmul.f32 %v6127_v28, %v3872_v48 }
0x2c5b   :  { %v8401_v40 = vadd.f32 %v6128_v37, %v3880_v38 }
0x2c5d   :  { %v3889_v42 = vpack.c.bf16 %v8401_v40, %v8399_v39 }
0x2c5f   :  { %6851 = vmatmul.mubr.msk.bf16.vlgmr.msra.gmra.mxu1 %vm89_vm1, %v3889_v42 }
0x2c60   :  { %6856 = vmatprep.mubr.msk.bf16.mxu1 %vm7409_vm0, %v7408_v1 }
0x2d1f   :  { %v3952_v44 = vpop.f32.mrf.mxu1 }
0x2d20   :  { %v3953_v45 = vadd.f32 %v6134_v43, %v3952_v44 }
0x2d21   :  { %v6852_v46 = vpop.f32.mrf.mxu1 }
0x2d22   :  { %3959 = vst.msk [vmem:[#allocation2] sm:$0xff] %vm134_vm2, %v3953_v45 }
0x2d23   :  { %v3955_v47 = vpop.f32.mrf.mxu1 }
0x2d24   :  { %v3956_v49 = vadd.f32 %v6134_v43, %v3955_v47 }
0x2d25   :  { %v6853_v34 = vpop.f32.mrf.mxu1 }
0x2d26   :  { %3960 = vst.msk [vmem:[#allocation2 + $0x8] sm:$0xff] %vm134_vm2, %v3956_v49 }
0x2d29   :  { %v3961_v50 = vld [vmem:[#allocation2] sm:$0xff] }
0x2d2d   :  { %v3962_v51 = vld [vmem:[#allocation2 + $0x8] sm:$0xff] }
0x2d2e   :  { %v8413_v52 = vpack.c.bf16 %v3962_v51, %v3961_v50 }
0x2d30   :  { %3965 = vrot.lane.b32.xlu1 %v8413_v52, %s8905_s25 }
0x2d34   :  { %4037 = vrot.lane.b32.xlu1 %v8413_v52, %s8906_s20 }
0x2d38   :  { %4090 = vrot.lane.b32.xlu1 %v8413_v52, %s8907_s0 }
0x2d3c   :  { %4227 = vrot.lane.b32.xlu1 %v8413_v52, %s8908_s27 }
0x2d40   :  { %4225 = vrot.lane.b32.xlu1 %v8413_v52, %s8909_s26 }
0x2d44   :  { %4362 = vrot.lane.b32.xlu1 %v8413_v52, %s8898_s21 }
0x2d48   :  { %4360 = vrot.lane.b32.xlu1 %v8413_v52, %s8910_s29 }
0x2da2   :  { %v3966_v53 = vpop.permute.xlu1 %3965 }
0x2da3   :  { %v3971_v54 = vsel %vm143_vm3, %v3966_v53, 0 }
0x2da4   :  { %6855 = vmatpush3.bf16.xpose.msra.mxu1 %v3971_v54 }
0x2da5   :  { %6860 = vmatprep.subr.bf16.mxu1 %v7408_v1 }
0x2da6   :  { %v4038_v55 = vpop.permute.xlu1 %4037 }
0x2daa   :  { %v4091_v12 = vpop.permute.xlu1 %4090 }
0x2dab   :  { %6857 = vmatmul.mubr.msk.bf16.vlgmr.msra.gmra.mxu1 %vm143_vm3, %v8413_v52 }
0x2dac   :  { %6861 = vmatpush3.bf16.msra.mxu1 %v4038_v55  ;;  %6862 = vmatprep.mubr.msk.bf16.mxu1 %vm7409_vm0, %v7408_v1 }
0x2dad   :  { %6866 = vmatprep.subr.bf16.mxu1 %v7408_v1 }
0x2dae   :  { %v4228_v15 = vpop.permute.xlu1 %4227 }
0x2daf   :  { %v4233_v20 = vsel %vm143_vm3, %v4228_v15, 0 }
0x2db2   :  { %v4226_v19 = vpop.permute.xlu1 %4225 }
0x2db6   :  { %v4363_v33 = vpop.permute.xlu1 %4362 }
0x2db7   :  { %v4368_v23 = vsel %vm143_vm3, %v4363_v33, 0 }
0x2dba   :  { %v4361_v36 = vpop.permute.xlu1 %4360 }
0x2e6b   :  { %v4007_v18 = vpop.f32.mrf.mxu1 }
0x2e6c   :  { %v4008_v57 = vadd.f32 %v8439_v56, %v4007_v18 }
0x2e6d   :  { %v6858_v58 = vpop.f32.mrf.mxu1 }
0x2e6e   :  { %v4014_v59 = vsel %vm191_vm4, %v4008_v57, -inf }
0x2e6f   :  { %4015 = vmax.xlane.f32.xlu0 %v4014_v59  ;;  %v4010_v60 = vpop.f32.mrf.mxu1 }
0x2e70   :  { %v4011_v61 = vadd.f32 %v8446_v41, %v4010_v60 }
0x2e71   :  { %v6859_v62 = vpop.f32.mrf.mxu1 }
0x2e72   :  { %v4017_v6 = vsel %vm191_vm4, %v4011_v61, -inf }
0x2e73   :  { %4018 = vmax.xlane.f32.xlu0 %v4017_v6 }
0x2ef8   :  { %v4016_v63 = vpop.xlane.xlu0 %4015 }
0x2ef9   :  { %v4020_v30 = vsub.f32 %v4008_v57, %v4016_v63 }
0x2efb   :  { %v4022_v0 = vmul.f32 1.442695, %v4020_v30 }
0x2efc   :  { %v4019_v7 = vpop.xlane.xlu0 %4018 }
0x2efd   :  { %7302 = vpow2.f32 %v4022_v0  ;;  %v4021_v2 = vsub.f32 %v4011_v61, %v4019_v7 }
0x2eff   :  { %v4024_v3 = vmul.f32 1.442695, %v4021_v2 }
0x2f01   :  { %7304 = vpow2.f32 %v4024_v3 }
0x2f0a   :  { %v7303_v4 = vpop.eup %7302 }
0x2f0b   :  { %v4026_v16 = vsel %vm191_vm4, %v7303_v4, 0.0 }
0x2f0c   :  { %4027 = vadd.xlane.f32.xlu0 %v4026_v16 }
0x2f0e   :  { %v7305_v5 = vpop.eup %7304 }
0x2f0f   :  { %v4029_v8 = vsel %vm191_vm4, %v7305_v5, 0.0 }
0x2f10   :  { %4030 = vadd.xlane.f32.xlu0 %v4029_v8 }
0x2f26   :  { %4092 = vrot.lane.b32.xlu0 %v8413_v52, %s8911_s16 }
0x2f95   :  { %v4028_v17 = vpop.xlane.xlu0 %4027 }
0x2f96   :  { %7306 = vrcp.f32 %v4028_v17 }
0x2f99   :  { %v4031_v9 = vpop.xlane.xlu0 %4030 }
0x2f9a   :  { %7308 = vrcp.f32 %v4031_v9 }
0x2f9d   :  { %v4093_v14 = vpop.permute.xlu0 %4092 }
0x2f9e   :  { %v4098_v22 = vsel %vm143_vm3, %v4093_v14, 0 }
0x2fa3   :  { %v7307_v10 = vpop.eup %7306 }
0x2fa4   :  { %v4034_v13 = vmul.f32 %v7307_v10, %v7303_v4 }
0x2fa7   :  { %v7309_v11 = vpop.eup %7308 }
0x2fa8   :  { %v4035_v21 = vmul.f32 %v7309_v11, %v7305_v5 }
0x2faa   :  { %v4036_v29 = vpack.c.bf16 %v4035_v21, %v4034_v13 }
0x2fac   :  { %6863 = vmatmul.mubr.msk.bf16.vlgmr.msra.gmra.mxu1 %vm191_vm4, %v4036_v29 }
0x2fad   :  { %6867 = vmatpush3.bf16.xpose.msra.mxu1 %v4098_v22  ;;  %6868 = vmatprep.mubr.msk.bf16.mxu1 %vm7409_vm0, %v7408_v1 }
0x2fae   :  { %6878 = vmatprep.subr.bf16.mxu1 %v7408_v1 }
0x2fb4   :  { %6869 = vmatmul.mubr.msk.bf16.vlgmr.msra.gmra.mxu1 %vm143_vm3, %v4091_v12 }
0x2fb5   :  { %6879 = vmatpush3.bf16.xpose.msra.mxu1 %v4233_v20  ;;  %6880 = vmatprep.mubr.msk.bf16.mxu1 %vm7409_vm0, %v7408_v1 }
0x2fb6   :  { %6890 = vmatprep.subr.bf16.mxu1 %v7408_v1 }
0x2fbc   :  { %6881 = vmatmul.mubr.msk.bf16.vlgmr.msra.gmra.mxu1 %vm143_vm3, %v4226_v19 }
0x2fbd   :  { %6891 = vmatpush3.bf16.xpose.msra.mxu1 %v4368_v23  ;;  %6892 = vmatprep.mubr.msk.bf16.mxu1 %vm7409_vm0, %v7408_v1 }
0x2fbe   :  { %6902 = vmatprep.subr.bf16.mxu1 %v7408_v1 }
0x2fc4   :  { %6893 = vmatmul.mubr.msk.bf16.vlgmr.msra.gmra.mxu1 %vm143_vm3, %v4361_v36 }
0x2fc5   :  { %6906 = vmatprep.mubr.msk.bf16.mxu1 %vm7409_vm0, %v7408_v1 }
0x306c   :  { %v4077_v35 = vpop.f32.mrf.mxu1 }
0x306d   :  { %4084 = vst.msk [vmem:[#allocation3] sm:$0xff] %vm143_vm3, %v4077_v35 }
0x306e   :  { %v6864_v24 = vpop.f32.mrf.mxu1 }
0x3070   :  { %v4080_v25 = vpop.f32.mrf.mxu1 }
0x3071   :  { %4085 = vst.msk [vmem:[#allocation3 + $0x8] sm:$0xff] %vm143_vm3, %v4080_v25 }
0x3072   :  { %v6865_v26 = vpop.f32.mrf.mxu1 }
0x3074   :  { %v4134_v27 = vpop.f32.mrf.mxu1 }
0x3075   :  { %v4135_v28 = vadd.f32 %v8439_v56, %v4134_v27 }
0x3076   :  { %v6870_v31 = vpop.f32.mrf.mxu1 }
0x3077   :  { %v4141_v48 = vsel %vm191_vm4, %v4135_v28, -inf }
0x3078   :  { %4142 = vmax.xlane.f32.xlu0 %v4141_v48  ;;  %v4137_v32 = vpop.f32.mrf.mxu1 }
0x3079   :  { %v4138_v37 = vadd.f32 %v8446_v41, %v4137_v32 }
0x307a   :  { %v6871_v38 = vpop.f32.mrf.mxu1 }
0x307b   :  { %v4144_v42 = vsel %vm191_vm4, %v4138_v37, -inf }
0x307c   :  { %4145 = vmax.xlane.f32.xlu1 %v4144_v42  ;;  %v4269_v43 = vpop.f32.mrf.mxu1 }
0x307d   :  { %v4270_v44 = vadd.f32 %v8439_v56, %v4269_v43 }
0x307e   :  { %v6882_v45 = vpop.f32.mrf.mxu1 }
0x307f   :  { %v4276_v46 = vsel %vm191_vm4, %v4270_v44, -inf }
0x3080   :  { %4277 = vmax.xlane.f32.xlu0 %v4276_v46  ;;  %v4272_v47 = vpop.f32.mrf.mxu1 }
0x3081   :  { %v4273_v49 = vadd.f32 %v8446_v41, %v4272_v47 }
0x3082   :  { %v6883_v34 = vpop.f32.mrf.mxu1 }
0x3083   :  { %v4279_v50 = vsel %vm191_vm4, %v4273_v49, -inf }
0x3084   :  { %4280 = vmax.xlane.f32.xlu0 %v4279_v50  ;;  %v4404_v51 = vpop.f32.mrf.mxu1 }
0x3085   :  { %v4405_v53 = vadd.f32 %v8439_v56, %v4404_v51 }
0x3086   :  { %v6894_v54 = vpop.f32.mrf.mxu1 }
0x3087   :  { %v4411_v55 = vsel %vm191_vm4, %v4405_v53, -inf }
0x3088   :  { %4412 = vmax.xlane.f32.xlu1 %v4411_v55  ;;  %v4407_v18 = vpop.f32.mrf.mxu1 }
0x3089   :  { %v4408_v57 = vadd.f32 %v8446_v41, %v4407_v18 }
0x308a   :  { %v6895_v58 = vpop.f32.mrf.mxu1 }
0x308b   :  { %v4414_v59 = vsel %vm191_vm4, %v4408_v57, -inf }
0x308c   :  { %4415 = vmax.xlane.f32.xlu0 %v4414_v59 }
0x3099   :  { %4164 = vrot.lane.b32.xlu1 %v8413_v52, %s8900_s18 }
0x3101   :  { %v4143_v60 = vpop.xlane.xlu0 %4142 }
0x3102   :  { %v4147_v61 = vsub.f32 %v4135_v28, %v4143_v60  ;;  %v7114_v60 = vld [vmem:[%s8912_s23 + $0x48] sm:$0xff]  }
0x3103   :  { %6903 = vmatpush3.bf16.msra.mxu1 %v7114_v60 }
0x3104   :  { %v4149_v62 = vmul.f32 1.442695, %v4147_v61  ;;  %6904 = vmatprep.subr.bf16.mxu1 %v7408_v1 }
0x3105   :  { %v4146_v6 = vpop.xlane.xlu1 %4145 }
0x3106   :  { %7310 = vpow2.f32 %v4149_v62  ;;  %v4148_v63 = vsub.f32 %v4138_v37, %v4146_v6  ;;  %v7115_v62 = vld [vmem:[%s8912_s23 + $0x40] sm:$0xff]  }
0x3107   :  { %6905 = vmatpush3.bf16.msra.mxu1 %v7115_v62  ;;  %v7123_v62 = vld [vmem:[%s8840_s11 + $0x110] sm:$0xff]  }
0x3108   :  { %v4151_v30 = vmul.f32 1.442695, %v4148_v63  ;;  %6918 = vmatprep.subr.bf16.mxu1 %v7408_v1 }
0x3109   :  { %v4278_v0 = vpop.xlane.xlu0 %4277 }
0x310a   :  { %7312 = vpow2.f32 %v4151_v30  ;;  %v4282_v7 = vsub.f32 %v4270_v44, %v4278_v0 }
0x310c   :  { %v4284_v2 = vmul.f32 1.442695, %v4282_v7 }
0x310d   :  { %v4281_v3 = vpop.xlane.xlu0 %4280 }
0x310e   :  { %7314 = vpow2.f32 %v4284_v2  ;;  %v4283_v4 = vsub.f32 %v4273_v49, %v4281_v3 }
0x3110   :  { %v4286_v16 = vmul.f32 1.442695, %v4283_v4 }
0x3111   :  { %v4413_v5 = vpop.xlane.xlu1 %4412 }
0x3112   :  { %7316 = vpow2.f32 %v4286_v16  ;;  %v4417_v8 = vsub.f32 %v4405_v53, %v4413_v5 }
0x3113   :  { %v7311_v17 = vpop.eup %7310 }
0x3114   :  { %v4419_v9 = vmul.f32 1.442695, %v4417_v8  ;;  %v4153_v10 = vsel %vm191_vm4, %v7311_v17, 0.0 }
0x3115   :  { %4154 = vadd.xlane.f32.xlu1 %v4153_v10  ;;  %v4165_v11 = vpop.permute.xlu1 %4164  ;;  %v4416_v12 = vpop.xlane.xlu0 %4415 }
0x3116   :  { %7318 = vpow2.f32 %v4419_v9  ;;  %v4418_v13 = vsub.f32 %v4408_v57, %v4416_v12  ;;  %6873 = vmatpush3.bf16.msra.mxu0 %v4165_v11  ;;  %v6151_v12 = vld [vmem:[%s8918_s2 + $0x4] ss:$0 sm:$0xff] }
0x3117   :  { %v7313_v21 = vpop.eup %7312  ;;  %6884 = vmatprep.subr.bf16.mxu0 %v7408_v1 }
0x3118   :  { %v4421_v14 = vmul.f32 1.442695, %v4418_v13  ;;  %v4156_v29 = vsel %vm191_vm4, %v7313_v21, 0.0 }
0x3119   :  { %4157 = vadd.xlane.f32.xlu0 %v4156_v29 }
0x311a   :  { %7320 = vpow2.f32 %v4421_v14 }
0x311b   :  { %v7315_v22 = vpop.eup %7314 }
0x311c   :  { %v4288_v15 = vsel %vm191_vm4, %v7315_v22, 0.0 }
0x311d   :  { %4289 = vadd.xlane.f32.xlu1 %v4288_v15 }
0x311f   :  { %v7317_v19 = vpop.eup %7316 }
0x3120   :  { %v4291_v20 = vsel %vm191_vm4, %v7317_v19, 0.0 }
0x3121   :  { %4292 = vadd.xlane.f32.xlu0 %v4291_v20 }
0x3123   :  { %v7319_v33 = vpop.eup %7318 }
0x3124   :  { %v4423_v23 = vsel %vm191_vm4, %v7319_v33, 0.0 }
0x3125   :  { %4424 = vadd.xlane.f32.xlu1 %v4423_v23 }
0x3127   :  { %v7321_v36 = vpop.eup %7320 }
0x3128   :  { %v4426_v35 = vsel %vm191_vm4, %v7321_v36, 0.0 }
0x3129   :  { %4427 = vadd.xlane.f32.xlu0 %v4426_v35 }
0x3136   :  { %4434 = vrot.lane.b32.xlu1 %v8413_v52, %s8901_s30 }
0x313f   :  { %4299 = vrot.lane.b32.xlu0 %v8413_v52, %s8899_s19 }
0x319e   :  { %v4155_v24 = vpop.xlane.xlu1 %4154 }
0x319f   :  { %7322 = vrcp.f32 %v4155_v24 }
0x31a2   :  { %v4158_v25 = vpop.xlane.xlu0 %4157 }
0x31a3   :  { %7324 = vrcp.f32 %v4158_v25 }
0x31a6   :  { %v4290_v26 = vpop.xlane.xlu1 %4289 }
0x31a7   :  { %7326 = vrcp.f32 %v4290_v26 }
0x31aa   :  { %v4293_v27 = vpop.xlane.xlu0 %4292 }
0x31ab   :  { %7328 = vrcp.f32 %v4293_v27 }
0x31ac   :  { %v7323_v28 = vpop.eup %7322 }
0x31ad   :  { %v4161_v32 = vmul.f32 %v7323_v28, %v7311_v17 }
0x31ae   :  { %v4425_v31 = vpop.xlane.xlu1 %4424 }
0x31af   :  { %7330 = vrcp.f32 %v4425_v31 }
0x31b0   :  { %v7325_v48 = vpop.eup %7324 }
0x31b1   :  { %v4162_v37 = vmul.f32 %v7325_v48, %v7313_v21 }
0x31b2   :  { %v4428_v38 = vpop.xlane.xlu0 %4427  ;;  %v4435_v49 = vpop.permute.xlu1 %4434 }
0x31b3   :  { %7332 = vrcp.f32 %v4428_v38  ;;  %v4163_v42 = vpack.c.bf16 %v4162_v37, %v4161_v32  ;;  %v7117_v32 = vld [vmem:[%s8838_s9 + $0x40] sm:$0xff]   ;;  %v7118_v37 = vld [vmem:[%s8840_s11 + $0x138] sm:$0xff]   ;;  %v7119_v38 = vld [vmem:[%s8840_s11 + $0x130] sm:$0xff]  }
0x31b4   :  { %v7327_v52 = vpop.eup %7326 }
0x31b5   :  { %6875 = vmatmul.mubr.msk.bf16.vlgmr.msra.gmra.mxu0 %vm191_vm4, %v4163_v42  ;;  %v4296_v45 = vmul.f32 %v7327_v52, %v7315_v22  ;;  %v7120_v42 = vld [vmem:[%s8840_s11 + $0x128] sm:$0xff]   ;;  %v7121_v52 = vld [vmem:[%s8840_s11 + $0x120] sm:$0xff]  }
0x31b6   :  { %v4300_v43 = vpop.permute.xlu0 %4299  ;;  %6886 = vmatprep.mubr.msk.bf16.mxu0 %vm7409_vm0, %v7408_v1 }
0x31b7   :  { %6885 = vmatpush3.bf16.msra.mxu0 %v4300_v43  ;;  %v7122_v43 = vld [vmem:[%s8840_s11 + $0x118] sm:$0xff]  }
0x31b8   :  { %v7329_v44 = vpop.eup %7328  ;;  %6896 = vmatprep.subr.bf16.mxu0 %v7408_v1 }
0x31b9   :  { %v4297_v46 = vmul.f32 %v7329_v44, %v7317_v19 }
0x31bb   :  { %v4298_v47 = vpack.c.bf16 %v4297_v46, %v4296_v45 }
0x31bc   :  { %v7331_v34 = vpop.eup %7330 }
0x31bd   :  { %6887 = vmatmul.mubr.msk.bf16.vlgmr.msra.gmra.mxu0 %vm191_vm4, %v4298_v47  ;;  %v4431_v51 = vmul.f32 %v7331_v34, %v7319_v33 }
0x31be   :  { %6897 = vmatpush3.bf16.msra.mxu0 %v4435_v49  ;;  %6898 = vmatprep.mubr.msk.bf16.mxu0 %vm7409_vm0, %v7408_v1 }
0x31bf   :  { %6910 = vmatprep.subr.bf16.mxu0 %v7408_v1 }
0x31c0   :  { %v7333_v50 = vpop.eup %7332 }
0x31c1   :  { %v4432_v53 = vmul.f32 %v7333_v50, %v7321_v36 }
0x31c3   :  { %v4433_v54 = vpack.c.bf16 %v4432_v53, %v4431_v51  ;;  %v6157_v53 = vld [vmem:[%s8836_s7 + $0x4] ss:$0 sm:$0xff] }
0x31c5   :  { %6899 = vmatmul.mubr.msk.bf16.vlgmr.msra.gmra.mxu0 %vm191_vm4, %v4433_v54 }
0x31c6   :  { %6914 = vmatprep.mubr.msk.bf16.mxu0 %vm7409_vm0, %v7408_v1 }
0x3275   :  { %v4204_v55 = vpop.f32.mrf.mxu0 }
0x3276   :  { %4213 = vrot.lane.b32.xlu1 %v4204_v55, %s8902_s1 }
0x3277   :  { %v6876_v18 = vpop.f32.mrf.mxu0 }
0x3279   :  { %v4207_v57 = vpop.f32.mrf.mxu0 }
0x327a   :  { %4215 = vrot.lane.b32.xlu0 %v4207_v57, %s8902_s1  ;;  %v6158_v57 = vld [vmem:[%s8837_s8 + $0x4] ss:$0 sm:$0xff] }
0x327b   :  { %v6877_v58 = vpop.f32.mrf.mxu0 }
0x327d   :  { %v4339_v59 = vpop.f32.mrf.mxu0 }
0x327e   :  { %4348 = vrot.lane.b32.xlu1 %v4339_v59, %s8916_s22 }
0x327f   :  { %v6888_v61 = vpop.f32.mrf.mxu0 }
0x3281   :  { %v4342_v6 = vpop.f32.mrf.mxu0 }
0x3282   :  { %4350 = vrot.lane.b32.xlu0 %v4342_v6, %s8916_s22  ;;  %v7124_v6 = vld [vmem:[%s8840_s11 + $0x108] sm:$0xff]  }
0x3283   :  { %v6889_v63 = vpop.f32.mrf.mxu0 }
0x3284   :  { %v7125_v63 = vld [vmem:[%s8840_s11 + $0x100] sm:$0xff]  }
0x3285   :  { %v4474_v30 = vpop.f32.mrf.mxu0 }
0x3286   :  { %4483 = vrot.lane.b32.xlu1 %v4474_v30, %s8917_s28  ;;  %v6164_v30 = vld [vmem:[%s8839_s10 + $0x4] ss:$0 sm:$0xff] }
0x3287   :  { %v6900_v0 = vpop.f32.mrf.mxu0 }
0x3289   :  { %v4477_v7 = vpop.f32.mrf.mxu0 }
0x328a   :  { %4485 = vrot.lane.b32.xlu0 %v4477_v7, %s8917_s28 }
0x328b   :  { %v6901_v2 = vpop.f32.mrf.mxu0 }
0x32e8   :  { %v4214_v3 = vpop.permute.xlu1 %4213 }
0x32e9   :  { %4219 = vst.msk [vmem:[#allocation3] sm:$0xff] %vm397_vm5, %v4214_v3 }
0x32ec   :  { %v4216_v4 = vpop.permute.xlu0 %4215 }
0x32ed   :  { %4220 = vst.msk [vmem:[#allocation3 + $0x8] sm:$0xff] %vm397_vm5, %v4216_v4 }
0x32f0   :  { %v4349_v16 = vpop.permute.xlu1 %4348 }
0x32f1   :  { %4354 = vst.msk [vmem:[#allocation3] sm:$0xff] %vm533_vm6, %v4349_v16 }
0x32f4   :  { %v4351_v5 = vpop.permute.xlu0 %4350 }
0x32f5   :  { %4355 = vst.msk [vmem:[#allocation3 + $0x8] sm:$0xff] %vm533_vm6, %v4351_v5 }
0x32f8   :  { %v4484_v8 = vpop.permute.xlu1 %4483 }
0x32f9   :  { %4489 = vst.msk [vmem:[#allocation3] sm:$0xff] %vm669_vm7, %v4484_v8 }
0x32fc   :  { %v4486_v17 = vpop.permute.xlu0 %4485 }
0x32fd   :  { %4490 = vst.msk [vmem:[#allocation3 + $0x8] sm:$0xff] %vm669_vm7, %v4486_v17 }
0x3300   :  { %v4491_v9 = vld [vmem:[#allocation3] sm:$0xff] }
0x3304   :  { %v4492_v10 = vld [vmem:[#allocation3 + $0x8] sm:$0xff] }
0x3305   :  { %v4493_v11 = vpack.c.bf16 %v4492_v10, %v4491_v9  ;;  %v6185_v9 = vld [vmem:[%s8841_s12 + $0x4] ss:$0 sm:$0xff] }
0x3307   :  { %6907 = vmatmul.mubr.msk.bf16.vlgmr.msra.gmra.mxu1 %vm89_vm1, %v4493_v11 }
0x3308   :  { %6934 = vmatprep.mubr.msk.bf16.mxu1 %vm7409_vm0, %v7408_v1  ;;  %6919 = vmatpush3.bf16.msra.mxu1 %v7118_v37 }
0x3309   :  { %6920 = vmatprep.subr.bf16.mxu1 %v7408_v1 }
0x330c   :  { %6921 = vmatpush3.bf16.msra.mxu1 %v7119_v38 }
0x330d   :  { %6922 = vmatprep.subr.bf16.mxu1 %v7408_v1 }
0x3310   :  { %6923 = vmatpush3.bf16.msra.mxu1 %v7120_v42 }
0x3311   :  { %6924 = vmatprep.subr.bf16.mxu1 %v7408_v1 }
0x3314   :  { %6925 = vmatpush3.bf16.msra.mxu1 %v7121_v52 }
0x3315   :  { %6926 = vmatprep.subr.bf16.mxu1 %v7408_v1 }
0x3318   :  { %6927 = vmatpush3.bf16.msra.mxu1 %v7122_v43 }
0x3319   :  { %6928 = vmatprep.subr.bf16.mxu1 %v7408_v1 }
0x331c   :  { %6929 = vmatpush3.bf16.msra.mxu1 %v7123_v62 }
0x331d   :  { %6930 = vmatprep.subr.bf16.mxu1 %v7408_v1 }
0x3320   :  { %6931 = vmatpush3.bf16.msra.mxu1 %v7124_v6 }
0x3321   :  { %6932 = vmatprep.subr.bf16.mxu1 %v7408_v1 }
0x3324   :  { %6933 = vmatpush3.bf16.msra.mxu1 %v7125_v63 }
0x3325   :  { %6964 = vmatprep.subr.bf16.mxu1 %v7408_v1 }
0x33c7   :  { %v4556_v13 = vpop.f32.mrf.mxu1 }
0x33c8   :  { %v4557_v21 = vadd.f32 %v6151_v12, %v4556_v13 }
0x33c9   :  { %v6908_v14 = vpop.f32.mrf.mxu1 }
0x33ca   :  { %v4563_v29 = vadd.f32 %v4557_v21, %v8399_v39 }
0x33cb   :  { %v4559_v22 = vpop.f32.mrf.mxu1 }
0x33cc   :  { %v4560_v15 = vadd.f32 %v6151_v12, %v4559_v22  ;;  %v4569_v19 = vsel %vm89_vm1, %v4563_v29, 0.0 }
0x33cd   :  { %4570 = vadd.xlane.f32.xlu1 %v4569_v19  ;;  %v6909_v20 = vpop.f32.mrf.mxu1 }
0x33ce   :  { %v4564_v33 = vadd.f32 %v4560_v15, %v8401_v40  ;;  %v7116_v40 = vld [vmem:[%s8838_s9 + $0x48] sm:$0xff]  }
0x33cf   :  { %6911 = vmatpush3.bf16.msra.mxu0 %v7116_v40 }
0x33d0   :  { %v4572_v23 = vsel %vm89_vm1, %v4564_v33, 0.0  ;;  %6912 = vmatprep.subr.bf16.mxu0 %v7408_v1 }
0x33d1   :  { %4573 = vadd.xlane.f32.xlu0 %v4572_v23 }
0x33d3   :  { %6913 = vmatpush3.bf16.msra.mxu0 %v7117_v32 }
0x33d4   :  { %6938 = vmatprep.subr.bf16.mxu0 %v7408_v1 }
0x3456   :  { %v4571_v36 = vpop.xlane.xlu1 %4570 }
0x3457   :  { %v4575_v35 = vmul.f32 0.03125, %v4571_v36 }
0x3459   :  { %v4577_v24 = vsub.f32 %v4563_v29, %v4575_v35 }
0x345a   :  { %v4574_v25 = vpop.xlane.xlu0 %4573 }
0x345b   :  { %v4576_v26 = vmul.f32 0.03125, %v4574_v25  ;;  %v4579_v27 = vmul.f32 %v4577_v24, %v4577_v24 }
0x345d   :  { %v4578_v28 = vsub.f32 %v4564_v33, %v4576_v26  ;;  %v4581_v39 = vsel %vm89_vm1, %v4579_v27, 0.0 }
0x345e   :  { %4582 = vadd.xlane.f32.xlu0 %v4581_v39  ;;  %v7126_v39 = vld [vmem:[%s8832_s3 + $0x58] sm:$0xff]  }
0x345f   :  { %v4580_v31 = vmul.f32 %v4578_v28, %v4578_v28 }
0x3461   :  { %v4584_v48 = vsel %vm89_vm1, %v4580_v31, 0.0  ;;  %v7127_v31 = vld [vmem:[%s8832_s3 + $0x50] sm:$0xff]  }
0x3462   :  { %4585 = vadd.xlane.f32.xlu1 %v4584_v48 }
0x34e7   :  { %v4583_v44 = vpop.xlane.xlu0 %4582 }
0x34e8   :  { %v4587_v45 = vmul.f32 0.03125, %v4583_v44  ;;  %v6196_v44 = vld [vmem:[%s8842_s13 + $0x4] ss:$0 sm:$0xff] }
0x34ea   :  { %v4589_v46 = vadd.f32 1e-05, %v4587_v45 }
0x34eb   :  { %v4586_v47 = vpop.xlane.xlu1 %4585 }
0x34ec   :  { %7334 = vrsqrt.f32 %v4589_v46  ;;  %v4588_v49 = vmul.f32 0.03125, %v4586_v47 }
0x34ee   :  { %v4590_v34 = vadd.f32 1e-05, %v4588_v49  ;;  %v6197_v49 = vld [vmem:[%s8843_s14 + $0x4] ss:$0 sm:$0xff] }
0x34f0   :  { %7336 = vrsqrt.f32 %v4590_v34 }
0x34f9   :  { %v7335_v50 = vpop.eup %7334 }
0x34fa   :  { %v4593_v51 = vmul.f32 %v7335_v50, %v4577_v24 }
0x34fc   :  { %v4601_v55 = vmul.f32 %v6157_v53, %v4593_v51 }
0x34fd   :  { %v7337_v54 = vpop.eup %7336 }
0x34fe   :  { %v4594_v18 = vmul.f32 %v7337_v54, %v4578_v28  ;;  %v4609_v59 = vadd.f32 %v6158_v57, %v4601_v55  ;;  %v6203_v54 = vld [vmem:[%s8833_s4 + $0x5] ss:$0 sm:$0xff] }
0x3500   :  { %v4602_v58 = vmul.f32 %v6157_v53, %v4594_v18 }
0x3502   :  { %v4610_v60 = vadd.f32 %v6158_v57, %v4602_v58 }
0x3504   :  { %v4611_v61 = vpack.c.bf16 %v4610_v60, %v4609_v59 }
0x3506   :  { %6915 = vmatmul.mubr.msk.bf16.vlgmr.msra.gmra.mxu0 %vm89_vm1, %v4611_v61 }
0x3507   :  { %6942 = vmatprep.mubr.msk.bf16.mxu0 %vm7409_vm0, %v7408_v1  ;;  %6939 = vmatpush3.bf16.msra.mxu0 %v7126_v39 }
0x3508   :  { %6940 = vmatprep.subr.bf16.mxu0 %v7408_v1 }
0x350b   :  { %6941 = vmatpush3.bf16.msra.mxu0 %v7127_v31 }
0x350c   :  { %6946 = vmatprep.subr.bf16.mxu0 %v7408_v1 }
0x35c6   :  { %v4674_v0 = vpop.f32.mrf.mxu0 }
0x35c7   :  { %v4675_v2 = vadd.f32 %v6164_v30, %v4674_v0 }
0x35c8   :  { %v6916_v7 = vpop.f32.mrf.mxu0 }
0x35c9   :  { %v4681_v5 = vmax.f32 %v4675_v2, 0.0 }
0x35ca   :  { %v4677_v3 = vpop.f32.mrf.mxu0 }
0x35cb   :  { %v4678_v4 = vadd.f32 %v6164_v30, %v4677_v3 }
0x35cc   :  { %v6917_v16 = vpop.f32.mrf.mxu0 }
0x35cd   :  { %v4682_v8 = vmax.f32 %v4678_v4, 0.0 }
0x35cf   :  { %v4683_v17 = vpack.c.bf16 %v4682_v8, %v4681_v5 }
0x35d1   :  { %6935 = vmatmul.mubr.bf16.vlgmr.msra.gmra.mxu1 %v4683_v17 }
0x35d2   :  { %6966 = vmatprep.mubr.msk.bf16.mxu1 %vm7409_vm0, %v7408_v1 }
0x3691   :  { %v4791_v10 = vpop.f32.mrf.mxu1 }
0x3692   :  { %v4792_v11 = vadd.f32 %v6185_v9, %v4791_v10 }
0x3693   :  { %v6936_v12 = vpop.f32.mrf.mxu1 }
0x3694   :  { %v4798_v13 = vadd.f32 %v4792_v11, %v4609_v59 }
0x3695   :  { %v4794_v21 = vpop.f32.mrf.mxu1 }
0x3696   :  { %v4795_v14 = vadd.f32 %v6185_v9, %v4794_v21  ;;  %v4804_v29 = vsel %vm89_vm1, %v4798_v13, 0.0 }
0x3697   :  { %4805 = vadd.xlane.f32.xlu0 %v4804_v29  ;;  %v6937_v22 = vpop.f32.mrf.mxu1 }
0x3698   :  { %v4799_v15 = vadd.f32 %v4795_v14, %v4610_v60 }
0x369a   :  { %v4807_v19 = vsel %vm89_vm1, %v4799_v15, 0.0 }
0x369b   :  { %4808 = vadd.xlane.f32.xlu1 %v4807_v19 }
0x3720   :  { %v4806_v20 = vpop.xlane.xlu0 %4805 }
0x3721   :  { %v4810_v33 = vmul.f32 0.03125, %v4806_v20 }
0x3723   :  { %v4812_v23 = vsub.f32 %v4798_v13, %v4810_v33 }
0x3724   :  { %v4809_v36 = vpop.xlane.xlu1 %4808 }
0x3725   :  { %v4811_v35 = vmul.f32 0.03125, %v4809_v36  ;;  %v4814_v24 = vmul.f32 %v4812_v23, %v4812_v23 }
0x3727   :  { %v4813_v25 = vsub.f32 %v4799_v15, %v4811_v35  ;;  %v4816_v26 = vsel %vm89_vm1, %v4814_v24, 0.0 }
0x3728   :  { %4817 = vadd.xlane.f32.xlu0 %v4816_v26 }
0x3729   :  { %v4815_v27 = vmul.f32 %v4813_v25, %v4813_v25 }
0x372b   :  { %v4819_v28 = vsel %vm89_vm1, %v4815_v27, 0.0 }
0x372c   :  { %4820 = vadd.xlane.f32.xlu1 %v4819_v28 }
0x37b1   :  { %v4818_v48 = vpop.xlane.xlu0 %4817 }
0x37b2   :  { %v4822_v40 = vmul.f32 0.03125, %v4818_v48 }
0x37b4   :  { %v4824_v32 = vadd.f32 1e-05, %v4822_v40 }
0x37b5   :  { %v4821_v37 = vpop.xlane.xlu1 %4820 }
0x37b6   :  { %7338 = vrsqrt.f32 %v4824_v32  ;;  %v4823_v38 = vmul.f32 0.03125, %v4821_v37 }
0x37b8   :  { %v4825_v42 = vadd.f32 1e-05, %v4823_v38 }
0x37ba   :  { %7340 = vrsqrt.f32 %v4825_v42 }
0x37c3   :  { %v7339_v52 = vpop.eup %7338 }
0x37c4   :  { %v4828_v43 = vmul.f32 %v7339_v52, %v4812_v23 }
0x37c6   :  { %v4836_v46 = vmul.f32 %v6196_v44, %v4828_v43 }
0x37c7   :  { %v7341_v45 = vpop.eup %7340 }
0x37c8   :  { %v4829_v47 = vmul.f32 %v7341_v45, %v4813_v25  ;;  %v8617_v50 = vadd.f32 %v6197_v49, %v4836_v46 }
0x37ca   :  { %v4837_v34 = vmul.f32 %v6196_v44, %v4829_v47 }
0x37cc   :  { %v8619_v51 = vadd.f32 %v6197_v49, %v4837_v34 }
0x37ce   :  { %v4846_v53 = vpack.c.bf16 %v8619_v51, %v8617_v50 }
0x37d0   :  { %6943 = vmatmul.mubr.msk.bf16.vlgmr.msra.gmra.mxu0 %vm89_vm1, %v4846_v53 }
0x37d1   :  { %6948 = vmatprep.mubr.msk.bf16.mxu0 %vm7409_vm0, %v7408_v1 }
0x3890   :  { %v4909_v55 = vpop.f32.mrf.mxu0 }
0x3891   :  { %v4910_v18 = vadd.f32 %v6203_v54, %v4909_v55 }
0x3892   :  { %v6944_v57 = vpop.f32.mrf.mxu0 }
0x3893   :  { %4916 = vst.msk [vmem:[#allocation2] sm:$0xff] %vm134_vm2, %v4910_v18 }
0x3894   :  { %v4912_v58 = vpop.f32.mrf.mxu0 }
0x3895   :  { %v4913_v59 = vadd.f32 %v6203_v54, %v4912_v58 }
0x3896   :  { %v6945_v60 = vpop.f32.mrf.mxu0 }
0x3897   :  { %4917 = vst.msk [vmem:[#allocation2 + $0x8] sm:$0xff] %vm134_vm2, %v4913_v59 }
0x389a   :  { %v4918_v61 = vld [vmem:[#allocation2] sm:$0xff] }
0x389e   :  { %v4919_v62 = vld [vmem:[#allocation2 + $0x8] sm:$0xff] }
0x389f   :  { %v8631_v6 = vpack.c.bf16 %v4919_v62, %v4918_v61 }
0x38a1   :  { %4922 = vrot.lane.b32.xlu0 %v8631_v6, %s8905_s25  ;;  %s8920_s25 = smov 24  }
0x38a5   :  { %5049 = vrot.lane.b32.xlu0 %v8631_v6, %s8911_s16 }
0x38a9   :  { %5047 = vrot.lane.b32.xlu0 %v8631_v6, %s8907_s0 }
0x38ad   :  { %5184 = vrot.lane.b32.xlu0 %v8631_v6, %s8908_s27  ;;  %s8921_s27 = sld [smem:[#allocation11_spill]] }
0x38b1   :  { %5182 = vrot.lane.b32.xlu0 %v8631_v6, %s8909_s26 }
0x38b5   :  { %5317 = vrot.lane.b32.xlu0 %v8631_v6, %s8910_s29 }
0x3913   :  { %v4923_v63 = vpop.permute.xlu0 %4922 }
0x3914   :  { %v4928_v30 = vsel %vm143_vm3, %v4923_v63, 0 }
0x3915   :  { %6947 = vmatpush3.bf16.xpose.msra.mxu0 %v4928_v30 }
0x3916   :  { %6952 = vmatprep.subr.bf16.mxu0 %v7408_v1 }
0x3917   :  { %v5050_v23 = vpop.permute.xlu0 %5049 }
0x3918   :  { %v5055_v27 = vsel %vm143_vm3, %v5050_v23, 0 }
0x391b   :  { %v5048_v26 = vpop.permute.xlu0 %5047 }
0x391c   :  { %6949 = vmatmul.mubr.msk.bf16.vlgmr.msra.gmra.mxu0 %vm143_vm3, %v8631_v6 }
0x391d   :  { %6954 = vmatprep.mubr.msk.bf16.mxu0 %vm7409_vm0, %v7408_v1 }
0x391f   :  { %v5185_v28 = vpop.permute.xlu0 %5184 }
0x3920   :  { %v5190_v39 = vsel %vm143_vm3, %v5185_v28, 0 }
0x3923   :  { %v5183_v48 = vpop.permute.xlu0 %5182 }
0x3927   :  { %v5318_v32 = vpop.permute.xlu0 %5317 }
0x39dc   :  { %v4964_v0 = vpop.f32.mrf.mxu0 }
0x39dd   :  { %v4965_v7 = vadd.f32 %v8439_v56, %v4964_v0 }
0x39de   :  { %v6950_v2 = vpop.f32.mrf.mxu0 }
0x39df   :  { %v4971_v3 = vsel %vm191_vm4, %v4965_v7, -inf }
0x39e0   :  { %4972 = vmax.xlane.f32.xlu1 %v4971_v3  ;;  %v4967_v4 = vpop.f32.mrf.mxu0 }
0x39e1   :  { %v4968_v16 = vadd.f32 %v8446_v41, %v4967_v4 }
0x39e2   :  { %v6951_v5 = vpop.f32.mrf.mxu0 }
0x39e3   :  { %v4974_v8 = vsel %vm191_vm4, %v4968_v16, -inf }
0x39e4   :  { %4975 = vmax.xlane.f32.xlu1 %v4974_v8 }
0x3a69   :  { %v4973_v17 = vpop.xlane.xlu1 %4972 }
0x3a6a   :  { %v4977_v9 = vsub.f32 %v4965_v7, %v4973_v17 }
0x3a6c   :  { %v4979_v10 = vmul.f32 1.442695, %v4977_v9 }
0x3a6d   :  { %v4976_v11 = vpop.xlane.xlu1 %4975 }
0x3a6e   :  { %7342 = vpow2.f32 %v4979_v10  ;;  %v4978_v12 = vsub.f32 %v4968_v16, %v4976_v11 }
0x3a70   :  { %v4981_v13 = vmul.f32 1.442695, %v4978_v12 }
0x3a72   :  { %7344 = vpow2.f32 %v4981_v13 }
0x3a7b   :  { %v7343_v21 = vpop.eup %7342 }
0x3a7c   :  { %v4983_v14 = vsel %vm191_vm4, %v7343_v21, 0.0 }
0x3a7d   :  { %4984 = vadd.xlane.f32.xlu1 %v4983_v14 }
0x3a7f   :  { %v7345_v29 = vpop.eup %7344 }
0x3a80   :  { %v4986_v22 = vsel %vm191_vm4, %v7345_v29, 0.0 }
0x3a81   :  { %4987 = vadd.xlane.f32.xlu1 %v4986_v22 }
0x3a92   :  { %4994 = vrot.lane.b32.xlu1 %v8631_v6, %s8906_s20 }
0x3a96   :  { %5319 = vrot.lane.b32.xlu1 %v8631_v6, %s8898_s21 }
0x3b06   :  { %v4985_v15 = vpop.xlane.xlu1 %4984 }
0x3b07   :  { %7346 = vrcp.f32 %v4985_v15 }
0x3b0a   :  { %v4988_v19 = vpop.xlane.xlu1 %4987 }
0x3b0b   :  { %7348 = vrcp.f32 %v4988_v19 }
0x3b0e   :  { %v4995_v20 = vpop.permute.xlu1 %4994 }
0x3b0f   :  { %6953 = vmatpush3.bf16.msra.mxu0 %v4995_v20 }
0x3b10   :  { %6958 = vmatprep.subr.bf16.mxu0 %v7408_v1 }
0x3b12   :  { %v5320_v31 = vpop.permute.xlu1 %5319 }
0x3b13   :  { %v5325_v40 = vsel %vm143_vm3, %v5320_v31, 0 }
0x3b14   :  { %v7347_v33 = vpop.eup %7346 }
0x3b15   :  { %v4991_v35 = vmul.f32 %v7347_v33, %v7343_v21 }
0x3b18   :  { %v7349_v36 = vpop.eup %7348 }
0x3b19   :  { %v4992_v24 = vmul.f32 %v7349_v36, %v7345_v29 }
0x3b1b   :  { %v4993_v25 = vpack.c.bf16 %v4992_v24, %v4991_v35 }
0x3b1d   :  { %6955 = vmatmul.mubr.msk.bf16.vlgmr.msra.gmra.mxu0 %vm191_vm4, %v4993_v25 }
0x3b1e   :  { %6959 = vmatpush3.bf16.xpose.msra.mxu0 %v5055_v27  ;;  %6960 = vmatprep.mubr.msk.bf16.mxu0 %vm7409_vm0, %v7408_v1 }
0x3b1f   :  { %6970 = vmatprep.subr.bf16.mxu0 %v7408_v1 }
0x3b25   :  { %6961 = vmatmul.mubr.msk.bf16.vlgmr.msra.gmra.mxu0 %vm143_vm3, %v5048_v26 }
0x3b26   :  { %6971 = vmatpush3.bf16.xpose.msra.mxu0 %v5190_v39  ;;  %6972 = vmatprep.mubr.msk.bf16.mxu0 %vm7409_vm0, %v7408_v1 }
0x3b27   :  { %6982 = vmatprep.subr.bf16.mxu0 %v7408_v1 }
0x3b2d   :  { %6973 = vmatmul.mubr.msk.bf16.vlgmr.msra.gmra.mxu0 %vm143_vm3, %v5183_v48 }
0x3b2e   :  { %6983 = vmatpush3.bf16.xpose.msra.mxu0 %v5325_v40  ;;  %6984 = vmatprep.mubr.msk.bf16.mxu0 %vm7409_vm0, %v7408_v1 }
0x3b2f   :  { %6994 = vmatprep.subr.bf16.mxu0 %v7408_v1 }
0x3b35   :  { %6985 = vmatmul.mubr.msk.bf16.vlgmr.msra.gmra.mxu0 %vm143_vm3, %v5318_v32 }
0x3b36   :  { %6998 = vmatprep.mubr.msk.bf16.mxu0 %vm7409_vm0, %v7408_v1 }
0x3bdd   :  { %v5034_v37 = vpop.f32.mrf.mxu0 }
0x3bde   :  { %5041 = vst.msk [vmem:[#allocation3] sm:$0xff] %vm143_vm3, %v5034_v37 }
0x3bdf   :  { %v6956_v38 = vpop.f32.mrf.mxu0 }
0x3be1   :  { %v5037_v42 = vpop.f32.mrf.mxu0 }
0x3be2   :  { %5042 = vst.msk [vmem:[#allocation3 + $0x8] sm:$0xff] %vm143_vm3, %v5037_v42 }
0x3be3   :  { %v6957_v52 = vpop.f32.mrf.mxu0 }
0x3be5   :  { %v5091_v43 = vpop.f32.mrf.mxu0 }
0x3be6   :  { %v5092_v44 = vadd.f32 %v8439_v56, %v5091_v43 }
0x3be7   :  { %v6962_v45 = vpop.f32.mrf.mxu0 }
0x3be8   :  { %v5098_v46 = vsel %vm191_vm4, %v5092_v44, -inf }
0x3be9   :  { %5099 = vmax.xlane.f32.xlu1 %v5098_v46  ;;  %v5094_v47 = vpop.f32.mrf.mxu0 }
0x3bea   :  { %v5095_v49 = vadd.f32 %v8446_v41, %v5094_v47 }
0x3beb   :  { %v6963_v34 = vpop.f32.mrf.mxu0 }
0x3bec   :  { %v5101_v53 = vsel %vm191_vm4, %v5095_v49, -inf }
0x3bed   :  { %5102 = vmax.xlane.f32.xlu0 %v5101_v53  ;;  %v5226_v54 = vpop.f32.mrf.mxu0 }
0x3bee   :  { %v5227_v55 = vadd.f32 %v8439_v56, %v5226_v54 }
0x3bef   :  { %v6974_v18 = vpop.f32.mrf.mxu0 }
0x3bf0   :  { %v5233_v57 = vsel %vm191_vm4, %v5227_v55, -inf }
0x3bf1   :  { %5234 = vmax.xlane.f32.xlu0 %v5233_v57  ;;  %v5229_v58 = vpop.f32.mrf.mxu0 }
0x3bf2   :  { %v5230_v59 = vadd.f32 %v8446_v41, %v5229_v58 }
0x3bf3   :  { %v6975_v60 = vpop.f32.mrf.mxu0 }
0x3bf4   :  { %v5236_v61 = vsel %vm191_vm4, %v5230_v59, -inf }
0x3bf5   :  { %5237 = vmax.xlane.f32.xlu1 %v5236_v61  ;;  %v5361_v62 = vpop.f32.mrf.mxu0 }
0x3bf6   :  { %v5362_v63 = vadd.f32 %v8439_v56, %v5361_v62 }
0x3bf7   :  { %v6986_v30 = vpop.f32.mrf.mxu0 }
0x3bf8   :  { %v5368_v0 = vsel %vm191_vm4, %v5362_v63, -inf }
0x3bf9   :  { %5369 = vmax.xlane.f32.xlu0 %v5368_v0  ;;  %v5364_v7 = vpop.f32.mrf.mxu0 }
0x3bfa   :  { %v5365_v2 = vadd.f32 %v8446_v41, %v5364_v7 }
0x3bfb   :  { %v6987_v3 = vpop.f32.mrf.mxu0 }
0x3bfc   :  { %v5371_v4 = vsel %vm191_vm4, %v5365_v2, -inf }
0x3bfd   :  { %5372 = vmax.xlane.f32.xlu1 %v5371_v4 }
0x3c72   :  { %v5100_v16 = vpop.xlane.xlu1 %5099 }
0x3c73   :  { %v5104_v5 = vsub.f32 %v5092_v44, %v5100_v16 }
0x3c75   :  { %v5106_v8 = vmul.f32 1.442695, %v5104_v5 }
0x3c76   :  { %v5103_v17 = vpop.xlane.xlu0 %5102 }
0x3c77   :  { %7350 = vpow2.f32 %v5106_v8  ;;  %v5105_v9 = vsub.f32 %v5095_v49, %v5103_v17 }
0x3c79   :  { %v5108_v10 = vmul.f32 1.442695, %v5105_v9 }
0x3c7a   :  { %v5235_v11 = vpop.xlane.xlu0 %5234 }
0x3c7b   :  { %7352 = vpow2.f32 %v5108_v10  ;;  %v5239_v56 = vsub.f32 %v5227_v55, %v5235_v11 }
0x3c7d   :  { %v5241_v12 = vmul.f32 1.442695, %v5239_v56 }
0x3c7e   :  { %v5238_v13 = vpop.xlane.xlu1 %5237 }
0x3c7f   :  { %7354 = vpow2.f32 %v5241_v12  ;;  %v5240_v21 = vsub.f32 %v5230_v59, %v5238_v13 }
0x3c81   :  { %v5243_v14 = vmul.f32 1.442695, %v5240_v21 }
0x3c82   :  { %v5370_v41 = vpop.xlane.xlu0 %5369 }
0x3c83   :  { %7356 = vpow2.f32 %v5243_v14  ;;  %v5374_v29 = vsub.f32 %v5362_v63, %v5370_v41 }
0x3c84   :  { %v7351_v22 = vpop.eup %7350 }
0x3c85   :  { %v5376_v15 = vmul.f32 1.442695, %v5374_v29  ;;  %v5110_v19 = vsel %vm191_vm4, %v7351_v22, 0.0 }
0x3c86   :  { %5111 = vadd.xlane.f32.xlu0 %v5110_v19  ;;  %v5373_v27 = vpop.xlane.xlu1 %5372  ;;  %v6220_v19 = vld [vmem:[%s8921_s27 + $0x5] ss:$0 sm:$0xff] }
0x3c87   :  { %7358 = vpow2.f32 %v5376_v15  ;;  %v5375_v28 = vsub.f32 %v5365_v2, %v5373_v27 }
0x3c88   :  { %v7353_v20 = vpop.eup %7352 }
0x3c89   :  { %v5113_v33 = vsel %vm191_vm4, %v7353_v20, 0.0  ;;  %v5378_v39 = vmul.f32 1.442695, %v5375_v28 }
0x3c8a   :  { %5114 = vadd.xlane.f32.xlu1 %v5113_v33 }
0x3c8b   :  { %7360 = vpow2.f32 %v5378_v39 }
0x3c8c   :  { %v7355_v23 = vpop.eup %7354 }
0x3c8d   :  { %v5245_v36 = vsel %vm191_vm4, %v7355_v23, 0.0 }
0x3c8e   :  { %5246 = vadd.xlane.f32.xlu0 %v5245_v36 }
0x3c90   :  { %v7357_v35 = vpop.eup %7356 }
0x3c91   :  { %v5248_v24 = vsel %vm191_vm4, %v7357_v35, 0.0 }
0x3c92   :  { %5249 = vadd.xlane.f32.xlu1 %v5248_v24 }
0x3c94   :  { %v7359_v25 = vpop.eup %7358 }
0x3c95   :  { %v5380_v26 = vsel %vm191_vm4, %v7359_v25, 0.0 }
0x3c96   :  { %5381 = vadd.xlane.f32.xlu0 %v5380_v26 }
0x3c98   :  { %v7361_v31 = vpop.eup %7360 }
0x3c99   :  { %v5383_v48 = vsel %vm191_vm4, %v7361_v31, 0.0 }
0x3ca3   :  { %5256 = vrot.lane.b32.xlu1 %v8631_v6, %s8899_s19  ;;  %s8919_s19 = sld [smem:[#allocation10_spill]] }
0x3ca9   :  { %v7128_v5 = vld [vmem:[%s8919_s19 + $0x58] sm:$0xff]   ;;  %v7129_v8 = vld [vmem:[%s8919_s19 + $0x50] sm:$0xff]  }
0x3caa   :  { %6995 = vmatpush3.bf16.msra.mxu0 %v7128_v5  ;;  %v6233_v5 = vld [vmem:[%s8839_s10 + $0x5] ss:$0 sm:$0xff] }
0x3cab   :  { %6996 = vmatprep.subr.bf16.mxu0 %v7408_v1 }
0x3cac   :  { %5121 = vrot.lane.b32.xlu0 %v8631_v6, %s8900_s18 }
0x3cae   :  { %6997 = vmatpush3.bf16.msra.mxu0 %v7129_v8 }
0x3caf   :  { %7010 = vmatprep.subr.bf16.mxu0 %v7408_v1 }
0x3cc7   :  { %5384 = vadd.xlane.f32.xlu1 %v5383_v48 }
0x3cd8   :  { %5391 = vrot.lane.b32.xlu1 %v8631_v6, %s8901_s30 }
0x3d0f   :  { %v5112_v40 = vpop.xlane.xlu0 %5111 }
0x3d10   :  { %7362 = vrcp.f32 %v5112_v40 }
0x3d13   :  { %v5115_v32 = vpop.xlane.xlu1 %5114 }
0x3d14   :  { %7364 = vrcp.f32 %v5115_v32 }
0x3d17   :  { %v5247_v37 = vpop.xlane.xlu0 %5246 }
0x3d18   :  { %7366 = vrcp.f32 %v5247_v37 }
0x3d1b   :  { %v5250_v38 = vpop.xlane.xlu1 %5249 }
0x3d1c   :  { %7368 = vrcp.f32 %v5250_v38 }
0x3d1d   :  { %v7363_v42 = vpop.eup %7362 }
0x3d1e   :  { %v5118_v44 = vmul.f32 %v7363_v42, %v7351_v22 }
0x3d1f   :  { %v5382_v52 = vpop.xlane.xlu0 %5381  ;;  %v5257_v6 = vpop.permute.xlu1 %5256 }
0x3d20   :  { %7370 = vrcp.f32 %v5382_v52 }
0x3d21   :  { %v7365_v43 = vpop.eup %7364 }
0x3d22   :  { %v5119_v45 = vmul.f32 %v7365_v43, %v7353_v20  ;;  %v7131_v43 = vld [vmem:[%s8838_s9 + $0x50] sm:$0xff]  }
0x3d23   :  { %v5122_v46 = vpop.permute.xlu0 %5121 }
0x3d24   :  { %v5120_v47 = vpack.c.bf16 %v5119_v45, %v5118_v44  ;;  %6965 = vmatpush3.bf16.msra.mxu1 %v5122_v46  ;;  %v7132_v44 = vld [vmem:[%s8840_s11 + $0x178] sm:$0xff]   ;;  %v7133_v45 = vld [vmem:[%s8840_s11 + $0x170] sm:$0xff]   ;;  %v7134_v46 = vld [vmem:[%s8840_s11 + $0x168] sm:$0xff]  }
0x3d25   :  { %6976 = vmatprep.subr.bf16.mxu1 %v7408_v1  ;;  %v7367_v49 = vpop.eup %7366 }
0x3d26   :  { %v5253_v53 = vmul.f32 %v7367_v49, %v7355_v23  ;;  %v7136_v49 = vld [vmem:[%s8840_s11 + $0x158] sm:$0xff]  }
0x3d27   :  { %6967 = vmatmul.mubr.msk.bf16.vlgmr.msra.gmra.mxu1 %vm191_vm4, %v5120_v47  ;;  %v7135_v47 = vld [vmem:[%s8840_s11 + $0x160] sm:$0xff]  }
0x3d28   :  { %6977 = vmatpush3.bf16.msra.mxu1 %v5257_v6  ;;  %6978 = vmatprep.mubr.msk.bf16.mxu1 %vm7409_vm0, %v7408_v1 }
0x3d29   :  { %v7369_v34 = vpop.eup %7368  ;;  %6988 = vmatprep.subr.bf16.mxu1 %v7408_v1 }
0x3d2a   :  { %v5254_v54 = vmul.f32 %v7369_v34, %v7357_v35 }
0x3d2c   :  { %v5255_v55 = vpack.c.bf16 %v5254_v54, %v5253_v53 }
0x3d2d   :  { %v7371_v58 = vpop.eup %7370 }
0x3d2e   :  { %v5388_v60 = vmul.f32 %v7371_v58, %v7359_v25 }
0x3d2f   :  { %6979 = vmatmul.mubr.msk.bf16.vlgmr.msra.gmra.mxu1 %vm191_vm4, %v5255_v55 }
0x3d30   :  { %6990 = vmatprep.mubr.msk.bf16.mxu1 %vm7409_vm0, %v7408_v1 }
0x3d50   :  { %v5385_v18 = vpop.xlane.xlu1 %5384 }
0x3d51   :  { %7372 = vrcp.f32 %v5385_v18 }
0x3d54   :  { %v5392_v57 = vpop.permute.xlu1 %5391 }
0x3d55   :  { %6989 = vmatpush3.bf16.msra.mxu1 %v5392_v57 }
0x3d56   :  { %7002 = vmatprep.subr.bf16.mxu1 %v7408_v1 }
0x3d5e   :  { %v7373_v59 = vpop.eup %7372 }
0x3d5f   :  { %v5389_v61 = vmul.f32 %v7373_v59, %v7361_v31  ;;  %v6226_v59 = vld [vmem:[%s8836_s7 + $0x5] ss:$0 sm:$0xff] }
0x3d61   :  { %v5390_v62 = vpack.c.bf16 %v5389_v61, %v5388_v60 }
0x3d63   :  { %6991 = vmatmul.mubr.msk.bf16.vlgmr.msra.gmra.mxu1 %vm191_vm4, %v5390_v62 }
0x3d64   :  { %7006 = vmatprep.mubr.msk.bf16.mxu1 %vm7409_vm0, %v7408_v1 }
0x3de7   :  { %v5161_v63 = vpop.f32.mrf.mxu1 }
0x3de8   :  { %5170 = vrot.lane.b32.xlu0 %v5161_v63, %s8902_s1  ;;  %v6227_v63 = vld [vmem:[%s8837_s8 + $0x5] ss:$0 sm:$0xff] }
0x3de9   :  { %v6968_v30 = vpop.f32.mrf.mxu1 }
0x3deb   :  { %v5164_v0 = vpop.f32.mrf.mxu1 }
0x3dec   :  { %5172 = vrot.lane.b32.xlu1 %v5164_v0, %s8902_s1 }
0x3ded   :  { %v6969_v7 = vpop.f32.mrf.mxu1 }
0x3def   :  { %v5296_v2 = vpop.f32.mrf.mxu1 }
0x3df0   :  { %5305 = vrot.lane.b32.xlu0 %v5296_v2, %s8916_s22 }
0x3df1   :  { %v6980_v3 = vpop.f32.mrf.mxu1 }
0x3df2   :  { %v7137_v3 = vld [vmem:[%s8840_s11 + $0x150] sm:$0xff]  }
0x3df3   :  { %v5299_v4 = vpop.f32.mrf.mxu1 }
0x3df4   :  { %5307 = vrot.lane.b32.xlu1 %v5299_v4, %s8916_s22  ;;  %v7138_v4 = vld [vmem:[%s8840_s11 + $0x148] sm:$0xff]  }
0x3df5   :  { %v6981_v16 = vpop.f32.mrf.mxu1 }
0x3df6   :  { %v7139_v16 = vld [vmem:[%s8840_s11 + $0x140] sm:$0xff]  }
0x3e23   :  { %v5431_v17 = vpop.f32.mrf.mxu1 }
0x3e24   :  { %5440 = vrot.lane.b32.xlu0 %v5431_v17, %s8920_s25 }
0x3e25   :  { %v6992_v9 = vpop.f32.mrf.mxu1 }
0x3e27   :  { %v5434_v10 = vpop.f32.mrf.mxu1 }
0x3e28   :  { %5442 = vrot.lane.b32.xlu1 %v5434_v10, %s8920_s25 }
0x3e29   :  { %v6993_v11 = vpop.f32.mrf.mxu1 }
0x3e5a   :  { %v5171_v56 = vpop.permute.xlu0 %5170 }
0x3e5b   :  { %5176 = vst.msk [vmem:[#allocation3] sm:$0xff] %vm397_vm5, %v5171_v56 }
0x3e5e   :  { %v5173_v12 = vpop.permute.xlu1 %5172 }
0x3e5f   :  { %5177 = vst.msk [vmem:[#allocation3 + $0x8] sm:$0xff] %vm397_vm5, %v5173_v12 }
0x3e62   :  { %v5306_v13 = vpop.permute.xlu0 %5305 }
0x3e63   :  { %5311 = vst.msk [vmem:[#allocation3] sm:$0xff] %vm533_vm6, %v5306_v13 }
0x3e66   :  { %v5308_v21 = vpop.permute.xlu1 %5307 }
0x3e67   :  { %5312 = vst.msk [vmem:[#allocation3 + $0x8] sm:$0xff] %vm533_vm6, %v5308_v21 }
0x3e96   :  { %v5441_v14 = vpop.permute.xlu0 %5440 }
0x3e97   :  { %5446 = vst.msk [vmem:[#allocation3] sm:$0xff] %vm669_vm7, %v5441_v14  ;;  %v6254_v14 = vld [vmem:[%s8841_s12 + $0x5] ss:$0 sm:$0xff]  ;;  %s8922_s12 = sld [smem:[#allocation12_spill]] }
0x3e9a   :  { %v5443_v41 = vpop.permute.xlu1 %5442 }
0x3e9b   :  { %5447 = vst.msk [vmem:[#allocation3 + $0x8] sm:$0xff] %vm669_vm7, %v5443_v41 }
0x3e9e   :  { %v5448_v29 = vld [vmem:[#allocation3] sm:$0xff] }
0x3ea2   :  { %v5449_v22 = vld [vmem:[#allocation3 + $0x8] sm:$0xff] }
0x3ea3   :  { %v5450_v15 = vpack.c.bf16 %v5449_v22, %v5448_v29 }
0x3ea5   :  { %6999 = vmatmul.mubr.msk.bf16.vlgmr.msra.gmra.mxu0 %vm89_vm1, %v5450_v15 }
0x3ea6   :  { %7026 = vmatprep.mubr.msk.bf16.mxu0 %vm7409_vm0, %v7408_v1  ;;  %7011 = vmatpush3.bf16.msra.mxu0 %v7132_v44 }
0x3ea7   :  { %7012 = vmatprep.subr.bf16.mxu0 %v7408_v1 }
0x3eaa   :  { %7013 = vmatpush3.bf16.msra.mxu0 %v7133_v45 }
0x3eab   :  { %7014 = vmatprep.subr.bf16.mxu0 %v7408_v1 }
0x3eae   :  { %7015 = vmatpush3.bf16.msra.mxu0 %v7134_v46 }
0x3eaf   :  { %7016 = vmatprep.subr.bf16.mxu0 %v7408_v1 }
0x3eb2   :  { %7017 = vmatpush3.bf16.msra.mxu0 %v7135_v47  ;;  %v6265_v47 = vld [vmem:[%s8842_s13 + $0x5] ss:$0 sm:$0xff]  ;;  %s7424_s13 = smov [#allocation4]  }
0x3eb3   :  { %7018 = vmatprep.subr.bf16.mxu0 %v7408_v1  ;;  %s5878_s24 = sshll.u32 %s7424_s13, 4  ;;  %s5879_s24 = int_to_ptr.vmem [resolvable:$true] %s5878_s24 }
0x3eb4   :  { %p7391_p1 = scmp.lt.s32.totalorder %s5879_s24, %s5879_s24 }
0x3eb6   :  { %7019 = vmatpush3.bf16.msra.mxu0 %v7136_v49 }
0x3eb7   :  { %7020 = vmatprep.subr.bf16.mxu0 %v7408_v1 }
0x3eba   :  { %7021 = vmatpush3.bf16.msra.mxu0 %v7137_v3 }
0x3ebb   :  { %7022 = vmatprep.subr.bf16.mxu0 %v7408_v1 }
0x3ebe   :  { %7023 = vmatpush3.bf16.msra.mxu0 %v7138_v4 }
0x3ebf   :  { %7024 = vmatprep.subr.bf16.mxu0 %v7408_v1 }
0x3ec2   :  { %7025 = vmatpush3.bf16.msra.mxu0 %v7139_v16 }
0x3f65   :  { %v5513_v20 = vpop.f32.mrf.mxu0 }
0x3f66   :  { %v5514_v33 = vadd.f32 %v6220_v19, %v5513_v20 }
0x3f67   :  { %v7000_v23 = vpop.f32.mrf.mxu0 }
0x3f68   :  { %v5520_v36 = vadd.f32 %v5514_v33, %v8617_v50 }
0x3f69   :  { %v5516_v35 = vpop.f32.mrf.mxu0 }
0x3f6a   :  { %v5517_v24 = vadd.f32 %v6220_v19, %v5516_v35  ;;  %v5526_v25 = vsel %vm89_vm1, %v5520_v36, 0.0 }
0x3f6b   :  { %5527 = vadd.xlane.f32.xlu0 %v5526_v25  ;;  %v7001_v26 = vpop.f32.mrf.mxu0 }
0x3f6c   :  { %v5521_v27 = vadd.f32 %v5517_v24, %v8619_v51  ;;  %v7130_v51 = vld [vmem:[%s8838_s9 + $0x58] sm:$0xff]  }
0x3f6d   :  { %7003 = vmatpush3.bf16.msra.mxu1 %v7130_v51 }
0x3f6e   :  { %v5529_v28 = vsel %vm89_vm1, %v5521_v27, 0.0  ;;  %7004 = vmatprep.subr.bf16.mxu1 %v7408_v1 }
0x3f6f   :  { %5530 = vadd.xlane.f32.xlu1 %v5529_v28 }
0x3f71   :  { %7005 = vmatpush3.bf16.msra.mxu1 %v7131_v43 }
0x3f72   :  { %7030 = vmatprep.subr.bf16.mxu1 %v7408_v1 }
0x3ff4   :  { %v5528_v39 = vpop.xlane.xlu0 %5527 }
0x3ff5   :  { %v5532_v31 = vmul.f32 0.03125, %v5528_v39 }
0x3ff7   :  { %v5534_v48 = vsub.f32 %v5520_v36, %v5532_v31 }
0x3ff8   :  { %v5531_v40 = vpop.xlane.xlu1 %5530 }
0x3ff9   :  { %v5533_v32 = vmul.f32 0.03125, %v5531_v40  ;;  %v5536_v37 = vmul.f32 %v5534_v48, %v5534_v48 }
0x3ffb   :  { %v5535_v38 = vsub.f32 %v5521_v27, %v5533_v32  ;;  %v5538_v50 = vsel %vm89_vm1, %v5536_v37, 0.0  ;;  %v7140_v37 = vld [vmem:[%s8922_s12 + $0x8] sm:$0xff]  }
0x3ffc   :  { %5539 = vadd.xlane.f32.xlu0 %v5538_v50 }
0x3ffd   :  { %v5537_v42 = vmul.f32 %v5535_v38, %v5535_v38 }
0x3fff   :  { %v5541_v52 = vsel %vm89_vm1, %v5537_v42, 0.0 }
0x4000   :  { %5542 = vadd.xlane.f32.xlu0 %v5541_v52 }
0x4085   :  { %v5540_v6 = vpop.xlane.xlu0 %5539 }
0x4086   :  { %v5544_v34 = vmul.f32 0.03125, %v5540_v6 }
0x4088   :  { %v5546_v53 = vadd.f32 1e-05, %v5544_v34  ;;  %v6266_v34 = vld [vmem:[%s8843_s14 + $0x5] ss:$0 sm:$0xff]  ;;  %s7386_s14 = scalar_lea.vmem %s5879_s24, 256 }
0x4089   :  { %v5543_v54 = vpop.xlane.xlu0 %5542  ;;  %p7387_p0 = scmp.ne.s32.totalorder %s5879_s24, %s7386_s14  ;;  %p7392_p2 = scmp.lt.s32.totalorder %s7386_s14, %s7386_s14 }
0x408a   :  { %7374 = vrsqrt.f32 %v5546_v53  ;;  %v5545_v55 = vmul.f32 0.03125, %v5543_v54 }
0x408b   :  { %p7393_p3 = por %p7392_p2, %p7391_p1 }
0x408c   :  { %v5547_v18 = vadd.f32 1e-05, %v5545_v55 }
0x408d   :  { %p7394_p4 = pnand %p7393_p3, %p7387_p0 }
0x408e   :  { %7376 = vrsqrt.f32 %v5547_v18 }
0x4097   :  { %v7375_v57 = vpop.eup %7374 }
0x4098   :  { %v5550_v58 = vmul.f32 %v7375_v57, %v5534_v48  ;;  %v6267_v57 = vld [vmem:[%s8923_s5] ss:$0 sm:$0xff] }
0x409a   :  { %v5558_v61 = vmul.f32 %v6226_v59, %v5550_v58 }
0x409b   :  { %v7377_v60 = vpop.eup %7376 }
0x409c   :  { %v5551_v62 = vmul.f32 %v7377_v60, %v5535_v38  ;;  %v5566_v0 = vadd.f32 %v6227_v63, %v5558_v61  ;;  %v7141_v38 = vld [vmem:[%s8922_s12] sm:$0xff]  }
0x409e   :  { %v5559_v30 = vmul.f32 %v6226_v59, %v5551_v62 }
0x40a0   :  { %v5567_v7 = vadd.f32 %v6227_v63, %v5559_v30 }
0x40a2   :  { %v5568_v2 = vpack.c.bf16 %v5567_v7, %v5566_v0 }
0x40a4   :  { %7007 = vmatmul.mubr.msk.bf16.vlgmr.msra.gmra.mxu1 %vm89_vm1, %v5568_v2 }
0x40a5   :  { %7034 = vmatprep.mubr.msk.bf16.mxu1 %vm7409_vm0, %v7408_v1  ;;  %7031 = vmatpush3.bf16.msra.mxu1 %v7140_v37 }
0x40a6   :  { %7032 = vmatprep.subr.bf16.mxu1 %v7408_v1 }
0x40a9   :  { %7033 = vmatpush3.bf16.msra.mxu1 %v7141_v38 }
0x4164   :  { %v5631_v8 = vpop.f32.mrf.mxu1 }
0x4165   :  { %v5632_v9 = vadd.f32 %v6233_v5, %v5631_v8 }
0x4166   :  { %v7008_v17 = vpop.f32.mrf.mxu1 }
0x4167   :  { %v5638_v12 = vmax.f32 %v5632_v9, 0.0 }
0x4168   :  { %v5634_v10 = vpop.f32.mrf.mxu1 }
0x4169   :  { %v5635_v11 = vadd.f32 %v6233_v5, %v5634_v10 }
0x416a   :  { %v7009_v56 = vpop.f32.mrf.mxu1 }
0x416b   :  { %v5639_v13 = vmax.f32 %v5635_v11, 0.0 }
0x416d   :  { %v5640_v21 = vpack.c.bf16 %v5639_v13, %v5638_v12 }
0x416f   :  { %7027 = vmatmul.mubr.bf16.vlgmr.msra.gmra.mxu0 %v5640_v21 }
0x422f   :  { %v5748_v41 = vpop.f32.mrf.mxu0 }
0x4230   :  { %v5749_v29 = vadd.f32 %v6254_v14, %v5748_v41 }
0x4231   :  { %v7028_v22 = vpop.f32.mrf.mxu0 }
0x4232   :  { %v5755_v15 = vadd.f32 %v5749_v29, %v5566_v0 }
0x4233   :  { %v5751_v19 = vpop.f32.mrf.mxu0 }
0x4234   :  { %v5752_v20 = vadd.f32 %v6254_v14, %v5751_v19  ;;  %v5761_v33 = vsel %vm89_vm1, %v5755_v15, 0.0 }
0x4235   :  { %5762 = vadd.xlane.f32.xlu1 %v5761_v33  ;;  %v7029_v23 = vpop.f32.mrf.mxu0 }
0x4236   :  { %v5756_v36 = vadd.f32 %v5752_v20, %v5567_v7 }
0x4238   :  { %v5764_v35 = vsel %vm89_vm1, %v5756_v36, 0.0 }
0x4239   :  { %5765 = vadd.xlane.f32.xlu0 %v5764_v35 }
0x42be   :  { %v5763_v24 = vpop.xlane.xlu1 %5762 }
0x42bf   :  { %v5767_v25 = vmul.f32 0.03125, %v5763_v24 }
0x42c1   :  { %v5769_v26 = vsub.f32 %v5755_v15, %v5767_v25 }
0x42c2   :  { %v5766_v27 = vpop.xlane.xlu0 %5765 }
0x42c3   :  { %v5768_v28 = vmul.f32 0.03125, %v5766_v27  ;;  %v5771_v39 = vmul.f32 %v5769_v26, %v5769_v26 }
0x42c5   :  { %v5770_v31 = vsub.f32 %v5756_v36, %v5768_v28  ;;  %v5773_v48 = vsel %vm89_vm1, %v5771_v39, 0.0 }
0x42c6   :  { %5774 = vadd.xlane.f32.xlu1 %v5773_v48 }
0x42c7   :  { %v5772_v40 = vmul.f32 %v5770_v31, %v5770_v31 }
0x42c9   :  { %v5776_v32 = vsel %vm89_vm1, %v5772_v40, 0.0 }
0x42ca   :  { %5777 = vadd.xlane.f32.xlu0 %v5776_v32 }
0x434f   :  { %v5775_v50 = vpop.xlane.xlu1 %5774 }
0x4350   :  { %v5779_v42 = vmul.f32 0.03125, %v5775_v50 }
0x4352   :  { %v5781_v52 = vadd.f32 1e-05, %v5779_v42 }
0x4353   :  { %v5778_v51 = vpop.xlane.xlu0 %5777 }
0x4354   :  { %7378 = vrsqrt.f32 %v5781_v52  ;;  %v5780_v43 = vmul.f32 0.03125, %v5778_v51 }
0x4356   :  { %v5782_v44 = vadd.f32 1e-05, %v5780_v43 }
0x4358   :  { %7380 = vrsqrt.f32 %v5782_v44 }
0x4361   :  { %v7379_v45 = vpop.eup %7378 }
0x4362   :  { %v5785_v46 = vmul.f32 %v7379_v45, %v5769_v26 }
0x4364   :  { %v5793_v49 = vmul.f32 %v6265_v47, %v5785_v46 }
0x4365   :  { %v7381_v1 = vpop.eup %7380 }
0x4366   :  { %v5786_v6 = vmul.f32 %v7381_v1, %v5770_v31  ;;  %v5801_v54 = vadd.f32 %v6266_v34, %v5793_v49 }
0x4368   :  { %v5794_v53 = vmul.f32 %v6265_v47, %v5786_v6 }
0x436a   :  { %v5802_v55 = vadd.f32 %v6266_v34, %v5794_v53 }
0x436c   :  { %v5803_v18 = vpack.c.bf16 %v5802_v55, %v5801_v54 }
0x436e   :  { %7035 = vmatmul.mubr.msk.bf16.vlgmr.msra.gmra.mxu1 %vm89_vm1, %v5803_v18 }
0x442e   :  { %v5864_v58 = vpop.f32.mrf.mxu1 }
0x442f   :  { %v5865_v59 = vadd.f32 %v6267_v57, %v5864_v58 }
0x4430   :  { %v7036_v60 = vpop.f32.mrf.mxu1 }
0x4431   :  { %5871 = vst [vmem:[#allocation4] sm:$0xff] %v5865_v59 }
0x4432   :  { %v5867_v61 = vpop.f32.mrf.mxu1 }
0x4433   :  { %v5868_v62 = vadd.f32 %v6267_v57, %v5867_v61 }
0x4434   :  { %v7037_v63 = vpop.f32.mrf.mxu1 }
0x4435   :  { %5872 = vst [vmem:[#allocation4 + $0x8] sm:$0xff] %v5868_v62 }
0x4436   :  { %7397 = shalt.err (!%p7394_p4)
}
0x4437   :  { %s7425_s2 = smov 128   ;;  %s8924_s19 = sld [smem:[#allocation14_spill]] }
0x443d   :  { %5884 = dma.vmem_to_hbm [thread:$0]  %s5879_s24, 256, %s8924_s19, [#allocation5], %s7425_s2, %s7425_s2, %s8902_s1  }
0x443e   :  { %7406 = dma.done.wait [#allocation5], 256  }
0x443f   :  { %7407 = vsyncadd [#allocation5], 4294967040 }
0x4440   :  { %5888 = vsyncpa [#allocation5], 1 }

</bundles_post_ra>
